<compile_context>
chip_gen: v5e
topology: v5e:2x2
jax: 0.10.0
libtpu: 0.0.40
codegen_flags: <defaults>
</compile_context>

<pallas_src>
import math
import functools

import jax
import jax.numpy as jnp
from jax import lax
from jax.experimental import pallas as pl
from jax.experimental.pallas import tpu as pltpu


def _encoder_kernel(x_ref, wqkv_ref, bqkv_ref, wo_ref, bo_ref, o_ref, *,
                    num_layers, num_heads, set_size, dim_v, matmul_dtype,
                    head_batched, pack):
    """All L SAB layers for one (Bb*N, D) block of rows; X stays resident in VMEM.

    Per layer (PyTorch MAB with Q = K = X, ln=False):
      QKV = X Wqkv + bqkv
      per head h: A = softmax(Qh Kh^T / sqrt(dim_V)); Oh = Qh + A Vh
      O = concat_heads(Oh); X <- O + relu(O Wo + bo)
    """
    N, D, H, L = set_size, dim_v, num_heads, num_layers
    dh = D // H
    scale = 1.0 / math.sqrt(D)          # PyTorch MAB scales by sqrt(dim_V), NOT sqrt(dh).
    rows = x_ref.shape[0]               # Bb * N
    Bb = rows // N
    BH = Bb * H
    mm_dt = matmul_dtype

    x2 = x_ref[...].astype(jnp.float32)                                    # (rows, D)

    for l in range(L):                                                     # static unroll, L small
        wqkv = wqkv_ref[l].astype(mm_dt)                                   # (D, 3D)
        bqkv = bqkv_ref[l]                                                 # (1, 3D) f32
        wo = wo_ref[l].astype(mm_dt)                                       # (D, D)
        bo = bo_ref[l]                                                     # (1, D)  f32

        # Fused Q/K/V projection: one (rows, D) x (D, 3D) MXU matmul, f32 accumulation.
        qkv = jnp.dot(x2.astype(mm_dt), wqkv,
                      preferred_element_type=jnp.float32) + bqkv           # (rows, 3D)

        if head_batched:
            # Head-batched attention: ONE relayout in / ONE relayout out per layer instead of
            # ~3H lane slices + an H-way lane concat; heads fold into the dot_general batch dim.
            qkv_h = jnp.transpose(qkv.reshape(Bb, N, 3 * H, dh), (0, 2, 1, 3))   # (Bb,3H,N,dh)
            q_h = qkv_h[:, 0 * H:1 * H].reshape(BH, N, dh)
            k_h = qkv_h[:, 1 * H:2 * H].reshape(BH, N, dh)
            v_h = qkv_h[:, 2 * H:3 * H].reshape(BH, N, dh)

            s = lax.dot_general(                                           # (BH, N, N)
                q_h.astype(mm_dt), k_h.astype(mm_dt),
                dimension_numbers=(((2,), (2,)), ((0,), (0,))),
                preferred_element_type=jnp.float32) * scale
            m = jnp.max(s, axis=-1, keepdims=True)
            p = jnp.exp(s - m)
            denom = jnp.sum(p, axis=-1, keepdims=True)
            p = p * pl.reciprocal(denom, approx=True)                      # EUP slot, not a divide
            av = lax.dot_general(                                          # (BH, N, dh)
                p.astype(mm_dt), v_h.astype(mm_dt),
                dimension_numbers=(((2,), (1,)), ((0,), (0,))),
                preferred_element_type=jnp.float32)

            # Back to (rows, D); Q-residual added once as a full-width (D-lane) VPU add.
            av2 = jnp.transpose(av.reshape(Bb, H, N, dh), (0, 2, 1, 3)).reshape(rows, D)
            o2 = qkv[:, :D] + av2
        else:
            # Fallback: per-head loop (lane slices), residual hoisted to ONE full-width add.
            qkv3 = qkv.reshape(Bb, N, 3 * D)
            q3 = qkv3[:, :, 0 * D:1 * D]                                   # (Bb, N, D)
            k3 = qkv3[:, :, 1 * D:2 * D]
            v3 = qkv3[:, :, 2 * D:3 * D]
            av_list = []
            for h in range(H):
                sl = slice(h * dh, (h + 1) * dh)
                qh, kh, vh = q3[:, :, sl], k3[:, :, sl], v3[:, :, sl]      # (Bb, N, dh)
                s = lax.dot_general(
                    qh.astype(mm_dt), kh.astype(mm_dt),
                    dimension_numbers=(((2,), (2,)), ((0,), (0,))),
                    preferred_element_type=jnp.float32) * scale
                m = jnp.max(s, axis=-1, keepdims=True)
                p = jnp.exp(s - m)
                denom = jnp.sum(p, axis=-1, keepdims=True)
                p = p * pl.reciprocal(denom, approx=True)
                av_list.append(lax.dot_general(
                    p.astype(mm_dt), vh.astype(mm_dt),
                    dimension_numbers=(((2,), (1,)), ((0,), (0,))),
                    preferred_element_type=jnp.float32))
            o3 = q3 + jnp.concatenate(av_list, axis=-1)                    # one 32-lane add
            o2 = o3.reshape(rows, D)

        # Feed-forward residual: O = O + relu(O Wo + bo)
        ff = jnp.dot(o2.astype(mm_dt), wo, preferred_element_type=jnp.float32) + bo
        x2 = o2 + jnp.maximum(ff, 0.0)

    if pack > 1:
        # Lane-dense writeback: present the tile as (rows/pack, pack*D) (pack*D == 128) so the
        # final store is an unmasked vst instead of D-of-128 masked partial stores.
        o_ref[...] = x2.reshape(rows // pack, pack * D).astype(o_ref.dtype)
    else:
        o_ref[...] = x2.astype(o_ref.dtype)


def _pick_block_batch(B, N, *, max_rows, min_blocks, row_align):
    """Largest Bb dividing B such that the grid keeps >= min_blocks steps (>= 2 per v7x
    TensorCore when min_blocks >= 4), the (Bb*N, D) block stays within the VMEM budget, and
    the block's row count satisfies the sublane / lane-pack alignment."""
    candidates = [bb for bb in range(1, B)
                  if B % bb == 0
                  and (bb * N) % row_align == 0
                  and bb * N <= max_rows
                  and B // bb >= min_blocks]
    return max(candidates) if candidates else B     # full-array block (grid of 1) always legal


def set_transformer_encoder(x, layer_params, num_heads, *,
                            matmul_dtype=jnp.bfloat16,
                            max_rows=2048, min_blocks=4,
                            interpret=False):
    """Fused SAB-stack forward. x: (B, N, D); layer_params: list of
    (wq, bq, wk, bk, wv, bv, wo, bo) tuples with dim_in == dim_out == D."""
    B, N, D = x.shape
    L = len(layer_params)
    assert D % num_heads == 0

    # Pack per-layer weights: fused QKV (D, 3D) + output projection, stacked over layers.
    wqkv = jnp.stack([jnp.concatenate([p[0], p[2], p[4]], axis=1) for p in layer_params])
    bqkv = jnp.stack([jnp.concatenate([p[1], p[3], p[5]], axis=1) for p in layer_params])
    wo = jnp.stack([p[6] for p in layer_params])
    bo = jnp.stack([p[7] for p in layer_params])
    if matmul_dtype != jnp.float32:
        # Pre-cast the (resident) weight matrices once; biases stay f32 (added post-accum).
        wqkv = wqkv.astype(matmul_dtype)
        wo = wo.astype(matmul_dtype)

    # Lane-dense output packing: pack rows so the stored minor dim is a full 128 lanes.
    pack = 128 // D if (D < 128 and 128 % D == 0) else 1
    row_align = 8 * pack     # 8-sublane alignment for the x block AND for the packed out block

    Bb = _pick_block_batch(B, N, max_rows=max_rows, min_blocks=min_blocks, row_align=row_align)
    rows_per_block = Bb * N
    total_rows = B * N
    if pack > 1 and (rows_per_block % pack != 0 or total_rows % pack != 0):
        pack = 1

    x_rows = x.reshape(total_rows, D)     # fold the set axis into rows (free reshape in HBM)
    grid = (B // Bb,)

    def _run(head_batched, pk):
        kernel = functools.partial(
            _encoder_kernel, num_layers=L, num_heads=num_heads,
            set_size=N, dim_v=D, matmul_dtype=matmul_dtype,
            head_batched=head_batched, pack=pk)

        x_spec = pl.BlockSpec((rows_per_block, D), lambda b: (b, 0))
        if pk > 1:
            out_shape = jax.ShapeDtypeStruct((total_rows // pk, pk * D), x.dtype)
            out_spec = pl.BlockSpec((rows_per_block // pk, pk * D), lambda b: (b, 0))
        else:
            out_shape = jax.ShapeDtypeStruct((total_rows, D), x.dtype)
            out_spec = x_spec

        def const_spec(a):                # whole array, DMA'd once, resident across the grid
            return pl.BlockSpec(a.shape, lambda b, nd=a.ndim: (0,) * nd)

        out = pl.pallas_call(
            kernel,
            out_shape=out_shape,
            grid_spec=pltpu.PrefetchScalarGridSpec(
                num_scalar_prefetch=0,
                grid=grid,
                in_specs=[x_spec,
                          const_spec(wqkv), const_spec(bqkv),
                          const_spec(wo), const_spec(bo)],
                out_specs=out_spec,
            ),
            compiler_params=pltpu.CompilerParams(
                dimension_semantics=("parallel",),       # v7x: shard blocks across its 2 TCs
                # Re-derived for the larger blocks: in/out blocks (x2 buffers), resident weight
                # stack, plus the lane-padded qkv / per-head score temporaries; <= ~48 MiB of
                # v7x's 64 MiB physical VMEM, well within v5e/v6e's 128 MiB.
                vmem_limit_bytes=48 * 1024 * 1024,
            ),
            interpret=interpret,
        )(x_rows, wqkv, bqkv, wo, bo)
        return out.reshape(B, N, D)       # free: packed row-major layout matches (B, N, D)

    # Fastest config first; fall back if this Mosaic build rejects the interior-dim transpose
    # (head-batched path) or the minor-dim packing reshape (lane-dense store).
    configs = []
    for cfg in ((True, pack), (True, 1), (False, pack), (False, 1)):
        if cfg not in configs:
            configs.append(cfg)
    last_err = None
    for head_batched, pk in configs:
        try:
            return _run(head_batched, pk)
        except Exception as e:            # pragma: no cover - Mosaic lowering-gap fallback
            last_err = e
    raise last_err


def init_mab_params(key, dim_in, dim_v):
    """Deterministic init mimicking nn.Linear default (uniform +/- 1/sqrt(fan_in))."""
    ks = jax.random.split(key, 8)

    def lin(kw, kb, fan_in, fan_out):
        bound = 1.0 / math.sqrt(fan_in)
        w = jax.random.uniform(kw, (fan_in, fan_out), jnp.float32, -bound, bound)
        b = jax.random.uniform(kb, (1, fan_out), jnp.float32, -bound, bound)
        return w, b

    wq, bq = lin(ks[0], ks[1], dim_in, dim_v)
    wk, bk = lin(ks[2], ks[3], dim_in, dim_v)
    wv, bv = lin(ks[4], ks[5], dim_in, dim_v)
    wo, bo = lin(ks[6], ks[7], dim_v, dim_v)
    return (wq, bq, wk, bk, wv, bv, wo, bo)


# --- pure-JAX reference for the correctness check ---
def mab_ref(x, params, num_heads):
    wq, bq, wk, bk, wv, bv, wo, bo = params
    D = wq.shape[1]
    q = x @ wq + bq
    k = x @ wk + bk
    v = x @ wv + bv
    dh = D // num_heads
    outs = []
    for h in range(num_heads):
        qh = q[..., h * dh:(h + 1) * dh]
        kh = k[..., h * dh:(h + 1) * dh]
        vh = v[..., h * dh:(h + 1) * dh]
        s = jnp.einsum("bnd,bmd->bnm", qh, kh) / math.sqrt(D)
        a = jax.nn.softmax(s, axis=-1)
        outs.append(qh + jnp.einsum("bnm,bmd->bnd", a, vh))
    o = jnp.concatenate(outs, axis=-1)
    return o + jax.nn.relu(o @ wo + bo)


if __name__ == "__main__":
    # SetTransformerEncoder(dim_in=32, dim_out=32, layers=2, num_heads=4,
    #                       use_isab=False, ln=False, dropout=0.0)
    B, N, D, H, L = 16, 8, 32, 4, 2

    key = jax.random.PRNGKey(0)
    kx, kp = jax.random.split(key)
    x = jax.random.normal(kx, (B, N, D), jnp.float32)

    layer_keys = jax.random.split(kp, L)
    layer_params = [init_mab_params(layer_keys[l], D, D) for l in range(L)]

    ref = x
    for params in layer_params:
        ref = mab_ref(ref, params, H)

    # Default path: bf16 MXU operands (v6e/v7x-native, fine on v5e), f32 accumulation.
    out = jax.block_until_ready(set_transformer_encoder(x, layer_params, H))
    assert out.shape == (B, N, D)
    rel_err = float(jnp.max(jnp.abs(out - ref)) / (jnp.max(jnp.abs(ref)) + 1e-6))
    assert rel_err < 5e-2, rel_err

    # Tight check with f32 matmul operands (tolerance covers the approx EUP reciprocal,
    # which compounds ~1e-3-level relative error per layer -- fine for 2 layers).
    out_f32 = jax.block_until_ready(
        set_transformer_encoder(x, layer_params, H, matmul_dtype=jnp.float32))
    assert jnp.allclose(out_f32, ref, atol=5e-3, rtol=5e-3), \
        float(jnp.max(jnp.abs(out_f32 - ref)))

    print("KERNEL_OK")
</pallas_src>

<mosaic_0001>
module attributes {stable_mosaic.version = 11 : i64} {
  func.func @_encoder_kernel(%arg0: i32, %arg1: memref<32x32xf32, #tpu.memory_space<vmem>>, %arg2: memref<2x32x96xbf16, #tpu.memory_space<vmem>>, %arg3: memref<2x1x96xf32, #tpu.memory_space<vmem>>, %arg4: memref<2x32x32xbf16, #tpu.memory_space<vmem>>, %arg5: memref<2x1x32xf32, #tpu.memory_space<vmem>>, %arg6: memref<8x128xf32, #tpu.memory_space<vmem>>) attributes {dimension_semantics = [#tpu.dimension_semantics<parallel>], iteration_bounds = array<i64: 4>, scalar_prefetch = 0 : i64, scratch_operands = 0 : i64, tpu.core_type = #tpu.core_type<tc>, window_params = [{transform_indices = @transform_0, window_bounds = array<i64: 32, 32>}, {pipeline_mode = #tpu.pipeline_mode<synchronous>, transform_indices = @transform_1, window_bounds = array<i64: 2, 32, 96>}, {pipeline_mode = #tpu.pipeline_mode<synchronous>, transform_indices = @transform_2, window_bounds = array<i64: 2, 1, 96>}, {pipeline_mode = #tpu.pipeline_mode<synchronous>, transform_indices = @transform_3, window_bounds = array<i64: 2, 32, 32>}, {pipeline_mode = #tpu.pipeline_mode<synchronous>, transform_indices = @transform_4, window_bounds = array<i64: 2, 1, 32>}, {transform_indices = @transform_5, window_bounds = array<i64: 8, 128>}]} {
    %c0 = arith.constant 0 : index
    %c0_0 = arith.constant 0 : index
    %0 = vector.load %arg1[%c0, %c0_0] : memref<32x32xf32, #tpu.memory_space<vmem>>, vector<32x32xf32>
    %c0_1 = arith.constant 0 : index
    %c0_2 = arith.constant 0 : index
    %c0_3 = arith.constant 0 : index
    %1 = vector.load %arg2[%c0_1, %c0_2, %c0_3] : memref<2x32x96xbf16, #tpu.memory_space<vmem>>, vector<1x32x96xbf16>
    %2 = vector.shape_cast %1 : vector<1x32x96xbf16> to vector<32x96xbf16>
    %c0_4 = arith.constant 0 : index
    %c0_5 = arith.constant 0 : index
    %c0_6 = arith.constant 0 : index
    %3 = vector.load %arg3[%c0_4, %c0_5, %c0_6] : memref<2x1x96xf32, #tpu.memory_space<vmem>>, vector<1x1x96xf32>
    %4 = vector.shape_cast %3 : vector<1x1x96xf32> to vector<1x96xf32>
    %c0_7 = arith.constant 0 : index
    %c0_8 = arith.constant 0 : index
    %c0_9 = arith.constant 0 : index
    %5 = vector.load %arg4[%c0_7, %c0_8, %c0_9] : memref<2x32x32xbf16, #tpu.memory_space<vmem>>, vector<1x32x32xbf16>
    %6 = vector.shape_cast %5 : vector<1x32x32xbf16> to vector<32x32xbf16>
    %c0_10 = arith.constant 0 : index
    %c0_11 = arith.constant 0 : index
    %c0_12 = arith.constant 0 : index
    %7 = vector.load %arg5[%c0_10, %c0_11, %c0_12] : memref<2x1x32xf32, #tpu.memory_space<vmem>>, vector<1x1x32xf32>
    %8 = vector.shape_cast %7 : vector<1x1x32xf32> to vector<1x32xf32>
    %9 = arith.truncf %0 : vector<32x32xf32> to vector<32x32xbf16>
    %cst = arith.constant dense<0.000000e+00> : vector<32x96xf32>
    %10 = tpu.matmul %9, %2, %cst {dimension_numbers = #tpu.dot_dimension_numbers<[1], [0], [0], [1], [0, 0, 1, 1], [], []>} : vector<32x32xbf16>, vector<32x96xbf16>, vector<32x96xf32> -> vector<32x96xf32>
    %11 = vector.broadcast %4 : vector<1x96xf32> to vector<32x96xf32>
    %12 = arith.addf %10, %11 : vector<32x96xf32>
    %13 = vector.shape_cast %12 : vector<32x96xf32> to vector<4x8x12x8xf32>
    %14 = tpu.transpose %13, [0, 2, 1, 3] : vector<4x8x12x8xf32> -> vector<4x12x8x8xf32>
    %15 = vector.extract_strided_slice %14 {offsets = [0, 0, 0, 0], sizes = [4, 4, 8, 8], strides = [1, 1, 1, 1]} : vector<4x12x8x8xf32> to vector<4x4x8x8xf32>
    %16 = vector.shape_cast %15 : vector<4x4x8x8xf32> to vector<16x8x8xf32>
    %17 = vector.extract_strided_slice %14 {offsets = [0, 4, 0, 0], sizes = [4, 4, 8, 8], strides = [1, 1, 1, 1]} : vector<4x12x8x8xf32> to vector<4x4x8x8xf32>
    %18 = vector.shape_cast %17 : vector<4x4x8x8xf32> to vector<16x8x8xf32>
    %19 = vector.extract_strided_slice %14 {offsets = [0, 8, 0, 0], sizes = [4, 4, 8, 8], strides = [1, 1, 1, 1]} : vector<4x12x8x8xf32> to vector<4x4x8x8xf32>
    %20 = vector.shape_cast %19 : vector<4x4x8x8xf32> to vector<16x8x8xf32>
    %21 = arith.truncf %16 : vector<16x8x8xf32> to vector<16x8x8xbf16>
    %22 = arith.truncf %18 : vector<16x8x8xf32> to vector<16x8x8xbf16>
    %cst_13 = arith.constant dense<0.000000e+00> : vector<16x8x8xf32>
    %23 = tpu.matmul %21, %22, %cst_13 {dimension_numbers = #tpu.dot_dimension_numbers<[2], [2], [1], [1], [0, 0, 0, 1, 1, 1], [0], [0]>} : vector<16x8x8xbf16>, vector<16x8x8xbf16>, vector<16x8x8xf32> -> vector<16x8x8xf32>
    %cst_14 = arith.constant 0.176776692 : f32
    %24 = vector.broadcast %cst_14 : f32 to vector<16x8x8xf32>
    %25 = arith.mulf %23, %24 : vector<16x8x8xf32>
    %cst_15 = arith.constant dense<0xFF800000> : vector<16x8xf32>
    %26 = vector.multi_reduction <maximumf>, %25, %cst_15 [2] : vector<16x8x8xf32> to vector<16x8xf32>
    %27 = vector.shape_cast %26 : vector<16x8xf32> to vector<16x8x1xf32>
    %28 = vector.broadcast %27 : vector<16x8x1xf32> to vector<16x8x8xf32>
    %29 = arith.subf %25, %28 : vector<16x8x8xf32>
    %30 = math.exp %29 : vector<16x8x8xf32>
    %cst_16 = arith.constant dense<0.000000e+00> : vector<16x8xf32>
    %31 = vector.multi_reduction <add>, %30, %cst_16 [2] : vector<16x8x8xf32> to vector<16x8xf32>
    %32 = vector.shape_cast %31 : vector<16x8xf32> to vector<16x8x1xf32>
    %33 = tpu.reciprocal %32 {approx = true} : vector<16x8x1xf32> -> vector<16x8x1xf32>
    %34 = vector.broadcast %33 : vector<16x8x1xf32> to vector<16x8x8xf32>
    %35 = arith.mulf %30, %34 : vector<16x8x8xf32>
    %36 = arith.truncf %35 : vector<16x8x8xf32> to vector<16x8x8xbf16>
    %37 = arith.truncf %20 : vector<16x8x8xf32> to vector<16x8x8xbf16>
    %cst_17 = arith.constant dense<0.000000e+00> : vector<16x8x8xf32>
    %38 = tpu.matmul %36, %37, %cst_17 {dimension_numbers = #tpu.dot_dimension_numbers<[2], [1], [1], [2], [0, 0, 0, 1, 1, 2], [0], [0]>} : vector<16x8x8xbf16>, vector<16x8x8xbf16>, vector<16x8x8xf32> -> vector<16x8x8xf32>
    %39 = vector.shape_cast %38 : vector<16x8x8xf32> to vector<4x4x8x8xf32>
    %40 = tpu.transpose %39, [0, 2, 1, 3] : vector<4x4x8x8xf32> -> vector<4x8x4x8xf32>
    %41 = vector.shape_cast %40 : vector<4x8x4x8xf32> to vector<32x32xf32>
    %42 = vector.extract_strided_slice %12 {offsets = [0, 0], sizes = [32, 32], strides = [1, 1]} : vector<32x96xf32> to vector<32x32xf32>
    %43 = arith.addf %42, %41 : vector<32x32xf32>
    %44 = arith.truncf %43 : vector<32x32xf32> to vector<32x32xbf16>
    %cst_18 = arith.constant dense<0.000000e+00> : vector<32x32xf32>
    %45 = tpu.matmul %44, %6, %cst_18 {dimension_numbers = #tpu.dot_dimension_numbers<[1], [0], [0], [1], [0, 0, 1, 1], [], []>} : vector<32x32xbf16>, vector<32x32xbf16>, vector<32x32xf32> -> vector<32x32xf32>
    %46 = vector.broadcast %8 : vector<1x32xf32> to vector<32x32xf32>
    %47 = arith.addf %45, %46 : vector<32x32xf32>
    %cst_19 = arith.constant 0.000000e+00 : f32
    %48 = vector.broadcast %cst_19 : f32 to vector<32x32xf32>
    %49 = arith.maximumf %47, %48 : vector<32x32xf32>
    %50 = arith.addf %43, %49 : vector<32x32xf32>
    %c1 = arith.constant 1 : index
    %c0_20 = arith.constant 0 : index
    %c0_21 = arith.constant 0 : index
    %51 = vector.load %arg2[%c1, %c0_20, %c0_21] : memref<2x32x96xbf16, #tpu.memory_space<vmem>>, vector<1x32x96xbf16>
    %52 = vector.shape_cast %51 : vector<1x32x96xbf16> to vector<32x96xbf16>
    %c1_22 = arith.constant 1 : index
    %c0_23 = arith.constant 0 : index
    %c0_24 = arith.constant 0 : index
    %53 = vector.load %arg3[%c1_22, %c0_23, %c0_24] : memref<2x1x96xf32, #tpu.memory_space<vmem>>, vector<1x1x96xf32>
    %54 = vector.shape_cast %53 : vector<1x1x96xf32> to vector<1x96xf32>
    %c1_25 = arith.constant 1 : index
    %c0_26 = arith.constant 0 : index
    %c0_27 = arith.constant 0 : index
    %55 = vector.load %arg4[%c1_25, %c0_26, %c0_27] : memref<2x32x32xbf16, #tpu.memory_space<vmem>>, vector<1x32x32xbf16>
    %56 = vector.shape_cast %55 : vector<1x32x32xbf16> to vector<32x32xbf16>
    %c1_28 = arith.constant 1 : index
    %c0_29 = arith.constant 0 : index
    %c0_30 = arith.constant 0 : index
    %57 = vector.load %arg5[%c1_28, %c0_29, %c0_30] : memref<2x1x32xf32, #tpu.memory_space<vmem>>, vector<1x1x32xf32>
    %58 = vector.shape_cast %57 : vector<1x1x32xf32> to vector<1x32xf32>
    %59 = arith.truncf %50 : vector<32x32xf32> to vector<32x32xbf16>
    %cst_31 = arith.constant dense<0.000000e+00> : vector<32x96xf32>
    %60 = tpu.matmul %59, %52, %cst_31 {dimension_numbers = #tpu.dot_dimension_numbers<[1], [0], [0], [1], [0, 0, 1, 1], [], []>} : vector<32x32xbf16>, vector<32x96xbf16>, vector<32x96xf32> -> vector<32x96xf32>
    %61 = vector.broadcast %54 : vector<1x96xf32> to vector<32x96xf32>
    %62 = arith.addf %60, %61 : vector<32x96xf32>
    %63 = vector.shape_cast %62 : vector<32x96xf32> to vector<4x8x12x8xf32>
    %64 = tpu.transpose %63, [0, 2, 1, 3] : vector<4x8x12x8xf32> -> vector<4x12x8x8xf32>
    %65 = vector.extract_strided_slice %64 {offsets = [0, 0, 0, 0], sizes = [4, 4, 8, 8], strides = [1, 1, 1, 1]} : vector<4x12x8x8xf32> to vector<4x4x8x8xf32>
    %66 = vector.shape_cast %65 : vector<4x4x8x8xf32> to vector<16x8x8xf32>
    %67 = vector.extract_strided_slice %64 {offsets = [0, 4, 0, 0], sizes = [4, 4, 8, 8], strides = [1, 1, 1, 1]} : vector<4x12x8x8xf32> to vector<4x4x8x8xf32>
    %68 = vector.shape_cast %67 : vector<4x4x8x8xf32> to vector<16x8x8xf32>
    %69 = vector.extract_strided_slice %64 {offsets = [0, 8, 0, 0], sizes = [4, 4, 8, 8], strides = [1, 1, 1, 1]} : vector<4x12x8x8xf32> to vector<4x4x8x8xf32>
    %70 = vector.shape_cast %69 : vector<4x4x8x8xf32> to vector<16x8x8xf32>
    %71 = arith.truncf %66 : vector<16x8x8xf32> to vector<16x8x8xbf16>
    %72 = arith.truncf %68 : vector<16x8x8xf32> to vector<16x8x8xbf16>
    %cst_32 = arith.constant dense<0.000000e+00> : vector<16x8x8xf32>
    %73 = tpu.matmul %71, %72, %cst_32 {dimension_numbers = #tpu.dot_dimension_numbers<[2], [2], [1], [1], [0, 0, 0, 1, 1, 1], [0], [0]>} : vector<16x8x8xbf16>, vector<16x8x8xbf16>, vector<16x8x8xf32> -> vector<16x8x8xf32>
    %cst_33 = arith.constant 0.176776692 : f32
    %74 = vector.broadcast %cst_33 : f32 to vector<16x8x8xf32>
    %75 = arith.mulf %73, %74 : vector<16x8x8xf32>
    %cst_34 = arith.constant dense<0xFF800000> : vector<16x8xf32>
    %76 = vector.multi_reduction <maximumf>, %75, %cst_34 [2] : vector<16x8x8xf32> to vector<16x8xf32>
    %77 = vector.shape_cast %76 : vector<16x8xf32> to vector<16x8x1xf32>
    %78 = vector.broadcast %77 : vector<16x8x1xf32> to vector<16x8x8xf32>
    %79 = arith.subf %75, %78 : vector<16x8x8xf32>
    %80 = math.exp %79 : vector<16x8x8xf32>
    %cst_35 = arith.constant dense<0.000000e+00> : vector<16x8xf32>
    %81 = vector.multi_reduction <add>, %80, %cst_35 [2] : vector<16x8x8xf32> to vector<16x8xf32>
    %82 = vector.shape_cast %81 : vector<16x8xf32> to vector<16x8x1xf32>
    %83 = tpu.reciprocal %82 {approx = true} : vector<16x8x1xf32> -> vector<16x8x1xf32>
    %84 = vector.broadcast %83 : vector<16x8x1xf32> to vector<16x8x8xf32>
    %85 = arith.mulf %80, %84 : vector<16x8x8xf32>
    %86 = arith.truncf %85 : vector<16x8x8xf32> to vector<16x8x8xbf16>
    %87 = arith.truncf %70 : vector<16x8x8xf32> to vector<16x8x8xbf16>
    %cst_36 = arith.constant dense<0.000000e+00> : vector<16x8x8xf32>
    %88 = tpu.matmul %86, %87, %cst_36 {dimension_numbers = #tpu.dot_dimension_numbers<[2], [1], [1], [2], [0, 0, 0, 1, 1, 2], [0], [0]>} : vector<16x8x8xbf16>, vector<16x8x8xbf16>, vector<16x8x8xf32> -> vector<16x8x8xf32>
    %89 = vector.shape_cast %88 : vector<16x8x8xf32> to vector<4x4x8x8xf32>
    %90 = tpu.transpose %89, [0, 2, 1, 3] : vector<4x4x8x8xf32> -> vector<4x8x4x8xf32>
    %91 = vector.shape_cast %90 : vector<4x8x4x8xf32> to vector<32x32xf32>
    %92 = vector.extract_strided_slice %62 {offsets = [0, 0], sizes = [32, 32], strides = [1, 1]} : vector<32x96xf32> to vector<32x32xf32>
    %93 = arith.addf %92, %91 : vector<32x32xf32>
    %94 = arith.truncf %93 : vector<32x32xf32> to vector<32x32xbf16>
    %cst_37 = arith.constant dense<0.000000e+00> : vector<32x32xf32>
    %95 = tpu.matmul %94, %56, %cst_37 {dimension_numbers = #tpu.dot_dimension_numbers<[1], [0], [0], [1], [0, 0, 1, 1], [], []>} : vector<32x32xbf16>, vector<32x32xbf16>, vector<32x32xf32> -> vector<32x32xf32>
    %96 = vector.broadcast %58 : vector<1x32xf32> to vector<32x32xf32>
    %97 = arith.addf %95, %96 : vector<32x32xf32>
    %cst_38 = arith.constant 0.000000e+00 : f32
    %98 = vector.broadcast %cst_38 : f32 to vector<32x32xf32>
    %99 = arith.maximumf %97, %98 : vector<32x32xf32>
    %100 = arith.addf %93, %99 : vector<32x32xf32>
    %101 = vector.shape_cast %100 : vector<32x32xf32> to vector<8x128xf32>
    %c0_39 = arith.constant 0 : index
    %c0_40 = arith.constant 0 : index
    %102 = vector.load %arg6[%c0_39, %c0_40] : memref<8x128xf32, #tpu.memory_space<vmem>>, vector<8x128xf32>
    tpu.vector_store %arg6[%c0_39, %c0_40], %101 {strides = array<i32>} : memref<8x128xf32, #tpu.memory_space<vmem>>, vector<8x128xf32>,
    return
  }
  func.func @transform_0(%arg0: i32) -> (i32, i32) {
    %c0_i32 = arith.constant 0 : i32
    %c0_i32_0 = arith.constant 0 : i32
    return %arg0, %c0_i32 : i32, i32
  }
  func.func @transform_1(%arg0: i32) -> (i32, i32, i32) {
    %c0_i32 = arith.constant 0 : i32
    %c0_i32_0 = arith.constant 0 : i32
    %c0_i32_1 = arith.constant 0 : i32
    %c0_i32_2 = arith.constant 0 : i32
    return %c0_i32, %c0_i32_0, %c0_i32_1 : i32, i32, i32
  }
  func.func @transform_2(%arg0: i32) -> (i32, i32, i32) {
    %c0_i32 = arith.constant 0 : i32
    %c0_i32_0 = arith.constant 0 : i32
    %c0_i32_1 = arith.constant 0 : i32
    %c0_i32_2 = arith.constant 0 : i32
    return %c0_i32, %c0_i32_0, %c0_i32_1 : i32, i32, i32
  }
  func.func @transform_3(%arg0: i32) -> (i32, i32, i32) {
    %c0_i32 = arith.constant 0 : i32
    %c0_i32_0 = arith.constant 0 : i32
    %c0_i32_1 = arith.constant 0 : i32
    %c0_i32_2 = arith.constant 0 : i32
    return %c0_i32, %c0_i32_0, %c0_i32_1 : i32, i32, i32
  }
  func.func @transform_4(%arg0: i32) -> (i32, i32, i32) {
    %c0_i32 = arith.constant 0 : i32
    %c0_i32_0 = arith.constant 0 : i32
    %c0_i32_1 = arith.constant 0 : i32
    %c0_i32_2 = arith.constant 0 : i32
    return %c0_i32, %c0_i32_0, %c0_i32_1 : i32, i32, i32
  }
  func.func @transform_5(%arg0: i32) -> (i32, i32) {
    %c0_i32 = arith.constant 0 : i32
    %c0_i32_0 = arith.constant 0 : i32
    return %arg0, %c0_i32 : i32, i32
  }
}

module attributes {stable_mosaic.version = 11 : i64} {
  func.func @_encoder_kernel(%arg0: i32, %arg1: memref<32x32xf32, #tpu.memory_space<vmem>>, %arg2: memref<2x32x96xbf16, #tpu.memory_space<vmem>>, %arg3: memref<2x1x96xf32, #tpu.memory_space<vmem>>, %arg4: memref<2x32x32xbf16, #tpu.memory_space<vmem>>, %arg5: memref<2x1x32xf32, #tpu.memory_space<vmem>>, %arg6: memref<32x32xf32, #tpu.memory_space<vmem>>) attributes {dimension_semantics = [#tpu.dimension_semantics<parallel>], iteration_bounds = array<i64: 4>, scalar_prefetch = 0 : i64, scratch_operands = 0 : i64, tpu.core_type = #tpu.core_type<tc>, window_params = [{transform_indices = @transform_0, window_bounds = array<i64: 32, 32>}, {pipeline_mode = #tpu.pipeline_mode<synchronous>, transform_indices = @transform_1, window_bounds = array<i64: 2, 32, 96>}, {pipeline_mode = #tpu.pipeline_mode<synchronous>, transform_indices = @transform_2, window_bounds = array<i64: 2, 1, 96>}, {pipeline_mode = #tpu.pipeline_mode<synchronous>, transform_indices = @transform_3, window_bounds = array<i64: 2, 32, 32>}, {pipeline_mode = #tpu.pipeline_mode<synchronous>, transform_indices = @transform_4, window_bounds = array<i64: 2, 1, 32>}, {transform_indices = @transform_5, window_bounds = array<i64: 32, 32>}]} {
    %c0 = arith.constant 0 : index
    %c0_0 = arith.constant 0 : index
    %0 = vector.load %arg1[%c0, %c0_0] : memref<32x32xf32, #tpu.memory_space<vmem>>, vector<32x32xf32>
    %c0_1 = arith.constant 0 : index
    %c0_2 = arith.constant 0 : index
    %c0_3 = arith.constant 0 : index
    %1 = vector.load %arg2[%c0_1, %c0_2, %c0_3] : memref<2x32x96xbf16, #tpu.memory_space<vmem>>, vector<1x32x96xbf16>
    %2 = vector.shape_cast %1 : vector<1x32x96xbf16> to vector<32x96xbf16>
    %c0_4 = arith.constant 0 : index
    %c0_5 = arith.constant 0 : index
    %c0_6 = arith.constant 0 : index
    %3 = vector.load %arg3[%c0_4, %c0_5, %c0_6] : memref<2x1x96xf32, #tpu.memory_space<vmem>>, vector<1x1x96xf32>
    %4 = vector.shape_cast %3 : vector<1x1x96xf32> to vector<1x96xf32>
    %c0_7 = arith.constant 0 : index
    %c0_8 = arith.constant 0 : index
    %c0_9 = arith.constant 0 : index
    %5 = vector.load %arg4[%c0_7, %c0_8, %c0_9] : memref<2x32x32xbf16, #tpu.memory_space<vmem>>, vector<1x32x32xbf16>
    %6 = vector.shape_cast %5 : vector<1x32x32xbf16> to vector<32x32xbf16>
    %c0_10 = arith.constant 0 : index
    %c0_11 = arith.constant 0 : index
    %c0_12 = arith.constant 0 : index
    %7 = vector.load %arg5[%c0_10, %c0_11, %c0_12] : memref<2x1x32xf32, #tpu.memory_space<vmem>>, vector<1x1x32xf32>
    %8 = vector.shape_cast %7 : vector<1x1x32xf32> to vector<1x32xf32>
    %9 = arith.truncf %0 : vector<32x32xf32> to vector<32x32xbf16>
    %cst = arith.constant dense<0.000000e+00> : vector<32x96xf32>
    %10 = tpu.matmul %9, %2, %cst {dimension_numbers = #tpu.dot_dimension_numbers<[1], [0], [0], [1], [0, 0, 1, 1], [], []>} : vector<32x32xbf16>, vector<32x96xbf16>, vector<32x96xf32> -> vector<32x96xf32>
    %11 = vector.broadcast %4 : vector<1x96xf32> to vector<32x96xf32>
    %12 = arith.addf %10, %11 : vector<32x96xf32>
    %13 = vector.shape_cast %12 : vector<32x96xf32> to vector<4x8x12x8xf32>
    %14 = tpu.transpose %13, [0, 2, 1, 3] : vector<4x8x12x8xf32> -> vector<4x12x8x8xf32>
    %15 = vector.extract_strided_slice %14 {offsets = [0, 0, 0, 0], sizes = [4, 4, 8, 8], strides = [1, 1, 1, 1]} : vector<4x12x8x8xf32> to vector<4x4x8x8xf32>
    %16 = vector.shape_cast %15 : vector<4x4x8x8xf32> to vector<16x8x8xf32>
    %17 = vector.extract_strided_slice %14 {offsets = [0, 4, 0, 0], sizes = [4, 4, 8, 8], strides = [1, 1, 1, 1]} : vector<4x12x8x8xf32> to vector<4x4x8x8xf32>
    %18 = vector.shape_cast %17 : vector<4x4x8x8xf32> to vector<16x8x8xf32>
    %19 = vector.extract_strided_slice %14 {offsets = [0, 8, 0, 0], sizes = [4, 4, 8, 8], strides = [1, 1, 1, 1]} : vector<4x12x8x8xf32> to vector<4x4x8x8xf32>
    %20 = vector.shape_cast %19 : vector<4x4x8x8xf32> to vector<16x8x8xf32>
    %21 = arith.truncf %16 : vector<16x8x8xf32> to vector<16x8x8xbf16>
    %22 = arith.truncf %18 : vector<16x8x8xf32> to vector<16x8x8xbf16>
    %cst_13 = arith.constant dense<0.000000e+00> : vector<16x8x8xf32>
    %23 = tpu.matmul %21, %22, %cst_13 {dimension_numbers = #tpu.dot_dimension_numbers<[2], [2], [1], [1], [0, 0, 0, 1, 1, 1], [0], [0]>} : vector<16x8x8xbf16>, vector<16x8x8xbf16>, vector<16x8x8xf32> -> vector<16x8x8xf32>
    %cst_14 = arith.constant 0.176776692 : f32
    %24 = vector.broadcast %cst_14 : f32 to vector<16x8x8xf32>
    %25 = arith.mulf %23, %24 : vector<16x8x8xf32>
    %cst_15 = arith.constant dense<0xFF800000> : vector<16x8xf32>
    %26 = vector.multi_reduction <maximumf>, %25, %cst_15 [2] : vector<16x8x8xf32> to vector<16x8xf32>
    %27 = vector.shape_cast %26 : vector<16x8xf32> to vector<16x8x1xf32>
    %28 = vector.broadcast %27 : vector<16x8x1xf32> to vector<16x8x8xf32>
    %29 = arith.subf %25, %28 : vector<16x8x8xf32>
    %30 = math.exp %29 : vector<16x8x8xf32>
    %cst_16 = arith.constant dense<0.000000e+00> : vector<16x8xf32>
    %31 = vector.multi_reduction <add>, %30, %cst_16 [2] : vector<16x8x8xf32> to vector<16x8xf32>
    %32 = vector.shape_cast %31 : vector<16x8xf32> to vector<16x8x1xf32>
    %33 = tpu.reciprocal %32 {approx = true} : vector<16x8x1xf32> -> vector<16x8x1xf32>
    %34 = vector.broadcast %33 : vector<16x8x1xf32> to vector<16x8x8xf32>
    %35 = arith.mulf %30, %34 : vector<16x8x8xf32>
    %36 = arith.truncf %35 : vector<16x8x8xf32> to vector<16x8x8xbf16>
    %37 = arith.truncf %20 : vector<16x8x8xf32> to vector<16x8x8xbf16>
    %cst_17 = arith.constant dense<0.000000e+00> : vector<16x8x8xf32>
    %38 = tpu.matmul %36, %37, %cst_17 {dimension_numbers = #tpu.dot_dimension_numbers<[2], [1], [1], [2], [0, 0, 0, 1, 1, 2], [0], [0]>} : vector<16x8x8xbf16>, vector<16x8x8xbf16>, vector<16x8x8xf32> -> vector<16x8x8xf32>
    %39 = vector.shape_cast %38 : vector<16x8x8xf32> to vector<4x4x8x8xf32>
    %40 = tpu.transpose %39, [0, 2, 1, 3] : vector<4x4x8x8xf32> -> vector<4x8x4x8xf32>
    %41 = vector.shape_cast %40 : vector<4x8x4x8xf32> to vector<32x32xf32>
    %42 = vector.extract_strided_slice %12 {offsets = [0, 0], sizes = [32, 32], strides = [1, 1]} : vector<32x96xf32> to vector<32x32xf32>
    %43 = arith.addf %42, %41 : vector<32x32xf32>
    %44 = arith.truncf %43 : vector<32x32xf32> to vector<32x32xbf16>
    %cst_18 = arith.constant dense<0.000000e+00> : vector<32x32xf32>
    %45 = tpu.matmul %44, %6, %cst_18 {dimension_numbers = #tpu.dot_dimension_numbers<[1], [0], [0], [1], [0, 0, 1, 1], [], []>} : vector<32x32xbf16>, vector<32x32xbf16>, vector<32x32xf32> -> vector<32x32xf32>
    %46 = vector.broadcast %8 : vector<1x32xf32> to vector<32x32xf32>
    %47 = arith.addf %45, %46 : vector<32x32xf32>
    %cst_19 = arith.constant 0.000000e+00 : f32
    %48 = vector.broadcast %cst_19 : f32 to vector<32x32xf32>
    %49 = arith.maximumf %47, %48 : vector<32x32xf32>
    %50 = arith.addf %43, %49 : vector<32x32xf32>
    %c1 = arith.constant 1 : index
    %c0_20 = arith.constant 0 : index
    %c0_21 = arith.constant 0 : index
    %51 = vector.load %arg2[%c1, %c0_20, %c0_21] : memref<2x32x96xbf16, #tpu.memory_space<vmem>>, vector<1x32x96xbf16>
    %52 = vector.shape_cast %51 : vector<1x32x96xbf16> to vector<32x96xbf16>
    %c1_22 = arith.constant 1 : index
    %c0_23 = arith.constant 0 : index
    %c0_24 = arith.constant 0 : index
    %53 = vector.load %arg3[%c1_22, %c0_23, %c0_24] : memref<2x1x96xf32, #tpu.memory_space<vmem>>, vector<1x1x96xf32>
    %54 = vector.shape_cast %53 : vector<1x1x96xf32> to vector<1x96xf32>
    %c1_25 = arith.constant 1 : index
    %c0_26 = arith.constant 0 : index
    %c0_27 = arith.constant 0 : index
    %55 = vector.load %arg4[%c1_25, %c0_26, %c0_27] : memref<2x32x32xbf16, #tpu.memory_space<vmem>>, vector<1x32x32xbf16>
    %56 = vector.shape_cast %55 : vector<1x32x32xbf16> to vector<32x32xbf16>
    %c1_28 = arith.constant 1 : index
    %c0_29 = arith.constant 0 : index
    %c0_30 = arith.constant 0 : index
    %57 = vector.load %arg5[%c1_28, %c0_29, %c0_30] : memref<2x1x32xf32, #tpu.memory_space<vmem>>, vector<1x1x32xf32>
    %58 = vector.shape_cast %57 : vector<1x1x32xf32> to vector<1x32xf32>
    %59 = arith.truncf %50 : vector<32x32xf32> to vector<32x32xbf16>
    %cst_31 = arith.constant dense<0.000000e+00> : vector<32x96xf32>
    %60 = tpu.matmul %59, %52, %cst_31 {dimension_numbers = #tpu.dot_dimension_numbers<[1], [0], [0], [1], [0, 0, 1, 1], [], []>} : vector<32x32xbf16>, vector<32x96xbf16>, vector<32x96xf32> -> vector<32x96xf32>
    %61 = vector.broadcast %54 : vector<1x96xf32> to vector<32x96xf32>
    %62 = arith.addf %60, %61 : vector<32x96xf32>
    %63 = vector.shape_cast %62 : vector<32x96xf32> to vector<4x8x12x8xf32>
    %64 = tpu.transpose %63, [0, 2, 1, 3] : vector<4x8x12x8xf32> -> vector<4x12x8x8xf32>
    %65 = vector.extract_strided_slice %64 {offsets = [0, 0, 0, 0], sizes = [4, 4, 8, 8], strides = [1, 1, 1, 1]} : vector<4x12x8x8xf32> to vector<4x4x8x8xf32>
    %66 = vector.shape_cast %65 : vector<4x4x8x8xf32> to vector<16x8x8xf32>
    %67 = vector.extract_strided_slice %64 {offsets = [0, 4, 0, 0], sizes = [4, 4, 8, 8], strides = [1, 1, 1, 1]} : vector<4x12x8x8xf32> to vector<4x4x8x8xf32>
    %68 = vector.shape_cast %67 : vector<4x4x8x8xf32> to vector<16x8x8xf32>
    %69 = vector.extract_strided_slice %64 {offsets = [0, 8, 0, 0], sizes = [4, 4, 8, 8], strides = [1, 1, 1, 1]} : vector<4x12x8x8xf32> to vector<4x4x8x8xf32>
    %70 = vector.shape_cast %69 : vector<4x4x8x8xf32> to vector<16x8x8xf32>
    %71 = arith.truncf %66 : vector<16x8x8xf32> to vector<16x8x8xbf16>
    %72 = arith.truncf %68 : vector<16x8x8xf32> to vector<16x8x8xbf16>
    %cst_32 = arith.constant dense<0.000000e+00> : vector<16x8x8xf32>
    %73 = tpu.matmul %71, %72, %cst_32 {dimension_numbers = #tpu.dot_dimension_numbers<[2], [2], [1], [1], [0, 0, 0, 1, 1, 1], [0], [0]>} : vector<16x8x8xbf16>, vector<16x8x8xbf16>, vector<16x8x8xf32> -> vector<16x8x8xf32>
    %cst_33 = arith.constant 0.176776692 : f32
    %74 = vector.broadcast %cst_33 : f32 to vector<16x8x8xf32>
    %75 = arith.mulf %73, %74 : vector<16x8x8xf32>
    %cst_34 = arith.constant dense<0xFF800000> : vector<16x8xf32>
    %76 = vector.multi_reduction <maximumf>, %75, %cst_34 [2] : vector<16x8x8xf32> to vector<16x8xf32>
    %77 = vector.shape_cast %76 : vector<16x8xf32> to vector<16x8x1xf32>
    %78 = vector.broadcast %77 : vector<16x8x1xf32> to vector<16x8x8xf32>
    %79 = arith.subf %75, %78 : vector<16x8x8xf32>
    %80 = math.exp %79 : vector<16x8x8xf32>
    %cst_35 = arith.constant dense<0.000000e+00> : vector<16x8xf32>
    %81 = vector.multi_reduction <add>, %80, %cst_35 [2] : vector<16x8x8xf32> to vector<16x8xf32>
    %82 = vector.shape_cast %81 : vector<16x8xf32> to vector<16x8x1xf32>
    %83 = tpu.reciprocal %82 {approx = true} : vector<16x8x1xf32> -> vector<16x8x1xf32>
    %84 = vector.broadcast %83 : vector<16x8x1xf32> to vector<16x8x8xf32>
    %85 = arith.mulf %80, %84 : vector<16x8x8xf32>
    %86 = arith.truncf %85 : vector<16x8x8xf32> to vector<16x8x8xbf16>
    %87 = arith.truncf %70 : vector<16x8x8xf32> to vector<16x8x8xbf16>
    %cst_36 = arith.constant dense<0.000000e+00> : vector<16x8x8xf32>
    %88 = tpu.matmul %86, %87, %cst_36 {dimension_numbers = #tpu.dot_dimension_numbers<[2], [1], [1], [2], [0, 0, 0, 1, 1, 2], [0], [0]>} : vector<16x8x8xbf16>, vector<16x8x8xbf16>, vector<16x8x8xf32> -> vector<16x8x8xf32>
    %89 = vector.shape_cast %88 : vector<16x8x8xf32> to vector<4x4x8x8xf32>
    %90 = tpu.transpose %89, [0, 2, 1, 3] : vector<4x4x8x8xf32> -> vector<4x8x4x8xf32>
    %91 = vector.shape_cast %90 : vector<4x8x4x8xf32> to vector<32x32xf32>
    %92 = vector.extract_strided_slice %62 {offsets = [0, 0], sizes = [32, 32], strides = [1, 1]} : vector<32x96xf32> to vector<32x32xf32>
    %93 = arith.addf %92, %91 : vector<32x32xf32>
    %94 = arith.truncf %93 : vector<32x32xf32> to vector<32x32xbf16>
    %cst_37 = arith.constant dense<0.000000e+00> : vector<32x32xf32>
    %95 = tpu.matmul %94, %56, %cst_37 {dimension_numbers = #tpu.dot_dimension_numbers<[1], [0], [0], [1], [0, 0, 1, 1], [], []>} : vector<32x32xbf16>, vector<32x32xbf16>, vector<32x32xf32> -> vector<32x32xf32>
    %96 = vector.broadcast %58 : vector<1x32xf32> to vector<32x32xf32>
    %97 = arith.addf %95, %96 : vector<32x32xf32>
    %cst_38 = arith.constant 0.000000e+00 : f32
    %98 = vector.broadcast %cst_38 : f32 to vector<32x32xf32>
    %99 = arith.maximumf %97, %98 : vector<32x32xf32>
    %100 = arith.addf %93, %99 : vector<32x32xf32>
    %c0_39 = arith.constant 0 : index
    %c0_40 = arith.constant 0 : index
    %101 = vector.load %arg6[%c0_39, %c0_40] : memref<32x32xf32, #tpu.memory_space<vmem>>, vector<32x32xf32>
    tpu.vector_store %arg6[%c0_39, %c0_40], %100 {strides = array<i32>} : memref<32x32xf32, #tpu.memory_space<vmem>>, vector<32x32xf32>,
    return
  }
  func.func @transform_0(%arg0: i32) -> (i32, i32) {
    %c0_i32 = arith.constant 0 : i32
    %c0_i32_0 = arith.constant 0 : i32
    return %arg0, %c0_i32 : i32, i32
  }
  func.func @transform_1(%arg0: i32) -> (i32, i32, i32) {
    %c0_i32 = arith.constant 0 : i32
    %c0_i32_0 = arith.constant 0 : i32
    %c0_i32_1 = arith.constant 0 : i32
    %c0_i32_2 = arith.constant 0 : i32
    return %c0_i32, %c0_i32_0, %c0_i32_1 : i32, i32, i32
  }
  func.func @transform_2(%arg0: i32) -> (i32, i32, i32) {
    %c0_i32 = arith.constant 0 : i32
    %c0_i32_0 = arith.constant 0 : i32
    %c0_i32_1 = arith.constant 0 : i32
    %c0_i32_2 = arith.constant 0 : i32
    return %c0_i32, %c0_i32_0, %c0_i32_1 : i32, i32, i32
  }
  func.func @transform_3(%arg0: i32) -> (i32, i32, i32) {
    %c0_i32 = arith.constant 0 : i32
    %c0_i32_0 = arith.constant 0 : i32
    %c0_i32_1 = arith.constant 0 : i32
    %c0_i32_2 = arith.constant 0 : i32
    return %c0_i32, %c0_i32_0, %c0_i32_1 : i32, i32, i32
  }
  func.func @transform_4(%arg0: i32) -> (i32, i32, i32) {
    %c0_i32 = arith.constant 0 : i32
    %c0_i32_0 = arith.constant 0 : i32
    %c0_i32_1 = arith.constant 0 : i32
    %c0_i32_2 = arith.constant 0 : i32
    return %c0_i32, %c0_i32_0, %c0_i32_1 : i32, i32, i32
  }
  func.func @transform_5(%arg0: i32) -> (i32, i32) {
    %c0_i32 = arith.constant 0 : i32
    %c0_i32_0 = arith.constant 0 : i32
    return %arg0, %c0_i32 : i32, i32
  }
}

module attributes {stable_mosaic.version = 11 : i64} {
  func.func @_encoder_kernel(%arg0: i32, %arg1: memref<32x32xf32, #tpu.memory_space<vmem>>, %arg2: memref<2x32x96xbf16, #tpu.memory_space<vmem>>, %arg3: memref<2x1x96xf32, #tpu.memory_space<vmem>>, %arg4: memref<2x32x32xbf16, #tpu.memory_space<vmem>>, %arg5: memref<2x1x32xf32, #tpu.memory_space<vmem>>, %arg6: memref<8x128xf32, #tpu.memory_space<vmem>>) attributes {dimension_semantics = [#tpu.dimension_semantics<parallel>], iteration_bounds = array<i64: 4>, scalar_prefetch = 0 : i64, scratch_operands = 0 : i64, tpu.core_type = #tpu.core_type<tc>, window_params = [{transform_indices = @transform_0, window_bounds = array<i64: 32, 32>}, {pipeline_mode = #tpu.pipeline_mode<synchronous>, transform_indices = @transform_1, window_bounds = array<i64: 2, 32, 96>}, {pipeline_mode = #tpu.pipeline_mode<synchronous>, transform_indices = @transform_2, window_bounds = array<i64: 2, 1, 96>}, {pipeline_mode = #tpu.pipeline_mode<synchronous>, transform_indices = @transform_3, window_bounds = array<i64: 2, 32, 32>}, {pipeline_mode = #tpu.pipeline_mode<synchronous>, transform_indices = @transform_4, window_bounds = array<i64: 2, 1, 32>}, {transform_indices = @transform_5, window_bounds = array<i64: 8, 128>}]} {
    %c0 = arith.constant 0 : index
    %c0_0 = arith.constant 0 : index
    %0 = vector.load %arg1[%c0, %c0_0] : memref<32x32xf32, #tpu.memory_space<vmem>>, vector<32x32xf32>
    %c0_1 = arith.constant 0 : index
    %c0_2 = arith.constant 0 : index
    %c0_3 = arith.constant 0 : index
    %1 = vector.load %arg2[%c0_1, %c0_2, %c0_3] : memref<2x32x96xbf16, #tpu.memory_space<vmem>>, vector<1x32x96xbf16>
    %2 = vector.shape_cast %1 : vector<1x32x96xbf16> to vector<32x96xbf16>
    %c0_4 = arith.constant 0 : index
    %c0_5 = arith.constant 0 : index
    %c0_6 = arith.constant 0 : index
    %3 = vector.load %arg3[%c0_4, %c0_5, %c0_6] : memref<2x1x96xf32, #tpu.memory_space<vmem>>, vector<1x1x96xf32>
    %4 = vector.shape_cast %3 : vector<1x1x96xf32> to vector<1x96xf32>
    %c0_7 = arith.constant 0 : index
    %c0_8 = arith.constant 0 : index
    %c0_9 = arith.constant 0 : index
    %5 = vector.load %arg4[%c0_7, %c0_8, %c0_9] : memref<2x32x32xbf16, #tpu.memory_space<vmem>>, vector<1x32x32xbf16>
    %6 = vector.shape_cast %5 : vector<1x32x32xbf16> to vector<32x32xbf16>
    %c0_10 = arith.constant 0 : index
    %c0_11 = arith.constant 0 : index
    %c0_12 = arith.constant 0 : index
    %7 = vector.load %arg5[%c0_10, %c0_11, %c0_12] : memref<2x1x32xf32, #tpu.memory_space<vmem>>, vector<1x1x32xf32>
    %8 = vector.shape_cast %7 : vector<1x1x32xf32> to vector<1x32xf32>
    %9 = arith.truncf %0 : vector<32x32xf32> to vector<32x32xbf16>
    %cst = arith.constant dense<0.000000e+00> : vector<32x96xf32>
    %10 = tpu.matmul %9, %2, %cst {dimension_numbers = #tpu.dot_dimension_numbers<[1], [0], [0], [1], [0, 0, 1, 1], [], []>} : vector<32x32xbf16>, vector<32x96xbf16>, vector<32x96xf32> -> vector<32x96xf32>
    %11 = vector.broadcast %4 : vector<1x96xf32> to vector<32x96xf32>
    %12 = arith.addf %10, %11 : vector<32x96xf32>
    %13 = vector.shape_cast %12 : vector<32x96xf32> to vector<4x8x96xf32>
    %14 = vector.extract_strided_slice %13 {offsets = [0, 0, 0], sizes = [4, 8, 32], strides = [1, 1, 1]} : vector<4x8x96xf32> to vector<4x8x32xf32>
    %15 = vector.extract_strided_slice %13 {offsets = [0, 0, 32], sizes = [4, 8, 32], strides = [1, 1, 1]} : vector<4x8x96xf32> to vector<4x8x32xf32>
    %16 = vector.extract_strided_slice %13 {offsets = [0, 0, 64], sizes = [4, 8, 32], strides = [1, 1, 1]} : vector<4x8x96xf32> to vector<4x8x32xf32>
    %17 = vector.extract_strided_slice %14 {offsets = [0, 0, 0], sizes = [4, 8, 8], strides = [1, 1, 1]} : vector<4x8x32xf32> to vector<4x8x8xf32>
    %18 = vector.extract_strided_slice %15 {offsets = [0, 0, 0], sizes = [4, 8, 8], strides = [1, 1, 1]} : vector<4x8x32xf32> to vector<4x8x8xf32>
    %19 = vector.extract_strided_slice %16 {offsets = [0, 0, 0], sizes = [4, 8, 8], strides = [1, 1, 1]} : vector<4x8x32xf32> to vector<4x8x8xf32>
    %20 = arith.truncf %17 : vector<4x8x8xf32> to vector<4x8x8xbf16>
    %21 = arith.truncf %18 : vector<4x8x8xf32> to vector<4x8x8xbf16>
    %cst_13 = arith.constant dense<0.000000e+00> : vector<4x8x8xf32>
    %22 = tpu.matmul %20, %21, %cst_13 {dimension_numbers = #tpu.dot_dimension_numbers<[2], [2], [1], [1], [0, 0, 0, 1, 1, 1], [0], [0]>} : vector<4x8x8xbf16>, vector<4x8x8xbf16>, vector<4x8x8xf32> -> vector<4x8x8xf32>
    %cst_14 = arith.constant 0.176776692 : f32
    %23 = vector.broadcast %cst_14 : f32 to vector<4x8x8xf32>
    %24 = arith.mulf %22, %23 : vector<4x8x8xf32>
    %cst_15 = arith.constant dense<0xFF800000> : vector<4x8xf32>
    %25 = vector.multi_reduction <maximumf>, %24, %cst_15 [2] : vector<4x8x8xf32> to vector<4x8xf32>
    %26 = vector.shape_cast %25 : vector<4x8xf32> to vector<4x8x1xf32>
    %27 = vector.broadcast %26 : vector<4x8x1xf32> to vector<4x8x8xf32>
    %28 = arith.subf %24, %27 : vector<4x8x8xf32>
    %29 = math.exp %28 : vector<4x8x8xf32>
    %cst_16 = arith.constant dense<0.000000e+00> : vector<4x8xf32>
    %30 = vector.multi_reduction <add>, %29, %cst_16 [2] : vector<4x8x8xf32> to vector<4x8xf32>
    %31 = vector.shape_cast %30 : vector<4x8xf32> to vector<4x8x1xf32>
    %32 = tpu.reciprocal %31 {approx = true} : vector<4x8x1xf32> -> vector<4x8x1xf32>
    %33 = vector.broadcast %32 : vector<4x8x1xf32> to vector<4x8x8xf32>
    %34 = arith.mulf %29, %33 : vector<4x8x8xf32>
    %35 = arith.truncf %34 : vector<4x8x8xf32> to vector<4x8x8xbf16>
    %36 = arith.truncf %19 : vector<4x8x8xf32> to vector<4x8x8xbf16>
    %cst_17 = arith.constant dense<0.000000e+00> : vector<4x8x8xf32>
    %37 = tpu.matmul %35, %36, %cst_17 {dimension_numbers = #tpu.dot_dimension_numbers<[2], [1], [1], [2], [0, 0, 0, 1, 1, 2], [0], [0]>} : vector<4x8x8xbf16>, vector<4x8x8xbf16>, vector<4x8x8xf32> -> vector<4x8x8xf32>
    %38 = vector.extract_strided_slice %14 {offsets = [0, 0, 8], sizes = [4, 8, 8], strides = [1, 1, 1]} : vector<4x8x32xf32> to vector<4x8x8xf32>
    %39 = vector.extract_strided_slice %15 {offsets = [0, 0, 8], sizes = [4, 8, 8], strides = [1, 1, 1]} : vector<4x8x32xf32> to vector<4x8x8xf32>
    %40 = vector.extract_strided_slice %16 {offsets = [0, 0, 8], sizes = [4, 8, 8], strides = [1, 1, 1]} : vector<4x8x32xf32> to vector<4x8x8xf32>
    %41 = arith.truncf %38 : vector<4x8x8xf32> to vector<4x8x8xbf16>
    %42 = arith.truncf %39 : vector<4x8x8xf32> to vector<4x8x8xbf16>
    %cst_18 = arith.constant dense<0.000000e+00> : vector<4x8x8xf32>
    %43 = tpu.matmul %41, %42, %cst_18 {dimension_numbers = #tpu.dot_dimension_numbers<[2], [2], [1], [1], [0, 0, 0, 1, 1, 1], [0], [0]>} : vector<4x8x8xbf16>, vector<4x8x8xbf16>, vector<4x8x8xf32> -> vector<4x8x8xf32>
    %cst_19 = arith.constant 0.176776692 : f32
    %44 = vector.broadcast %cst_19 : f32 to vector<4x8x8xf32>
    %45 = arith.mulf %43, %44 : vector<4x8x8xf32>
    %cst_20 = arith.constant dense<0xFF800000> : vector<4x8xf32>
    %46 = vector.multi_reduction <maximumf>, %45, %cst_20 [2] : vector<4x8x8xf32> to vector<4x8xf32>
    %47 = vector.shape_cast %46 : vector<4x8xf32> to vector<4x8x1xf32>
    %48 = vector.broadcast %47 : vector<4x8x1xf32> to vector<4x8x8xf32>
    %49 = arith.subf %45, %48 : vector<4x8x8xf32>
    %50 = math.exp %49 : vector<4x8x8xf32>
    %cst_21 = arith.constant dense<0.000000e+00> : vector<4x8xf32>
    %51 = vector.multi_reduction <add>, %50, %cst_21 [2] : vector<4x8x8xf32> to vector<4x8xf32>
    %52 = vector.shape_cast %51 : vector<4x8xf32> to vector<4x8x1xf32>
    %53 = tpu.reciprocal %52 {approx = true} : vector<4x8x1xf32> -> vector<4x8x1xf32>
    %54 = vector.broadcast %53 : vector<4x8x1xf32> to vector<4x8x8xf32>
    %55 = arith.mulf %50, %54 : vector<4x8x8xf32>
    %56 = arith.truncf %55 : vector<4x8x8xf32> to vector<4x8x8xbf16>
    %57 = arith.truncf %40 : vector<4x8x8xf32> to vector<4x8x8xbf16>
    %cst_22 = arith.constant dense<0.000000e+00> : vector<4x8x8xf32>
    %58 = tpu.matmul %56, %57, %cst_22 {dimension_numbers = #tpu.dot_dimension_numbers<[2], [1], [1], [2], [0, 0, 0, 1, 1, 2], [0], [0]>} : vector<4x8x8xbf16>, vector<4x8x8xbf16>, vector<4x8x8xf32> -> vector<4x8x8xf32>
    %59 = vector.extract_strided_slice %14 {offsets = [0, 0, 16], sizes = [4, 8, 8], strides = [1, 1, 1]} : vector<4x8x32xf32> to vector<4x8x8xf32>
    %60 = vector.extract_strided_slice %15 {offsets = [0, 0, 16], sizes = [4, 8, 8], strides = [1, 1, 1]} : vector<4x8x32xf32> to vector<4x8x8xf32>
    %61 = vector.extract_strided_slice %16 {offsets = [0, 0, 16], sizes = [4, 8, 8], strides = [1, 1, 1]} : vector<4x8x32xf32> to vector<4x8x8xf32>
    %62 = arith.truncf %59 : vector<4x8x8xf32> to vector<4x8x8xbf16>
    %63 = arith.truncf %60 : vector<4x8x8xf32> to vector<4x8x8xbf16>
    %cst_23 = arith.constant dense<0.000000e+00> : vector<4x8x8xf32>
    %64 = tpu.matmul %62, %63, %cst_23 {dimension_numbers = #tpu.dot_dimension_numbers<[2], [2], [1], [1], [0, 0, 0, 1, 1, 1], [0], [0]>} : vector<4x8x8xbf16>, vector<4x8x8xbf16>, vector<4x8x8xf32> -> vector<4x8x8xf32>
    %cst_24 = arith.constant 0.176776692 : f32
    %65 = vector.broadcast %cst_24 : f32 to vector<4x8x8xf32>
    %66 = arith.mulf %64, %65 : vector<4x8x8xf32>
    %cst_25 = arith.constant dense<0xFF800000> : vector<4x8xf32>
    %67 = vector.multi_reduction <maximumf>, %66, %cst_25 [2] : vector<4x8x8xf32> to vector<4x8xf32>
    %68 = vector.shape_cast %67 : vector<4x8xf32> to vector<4x8x1xf32>
    %69 = vector.broadcast %68 : vector<4x8x1xf32> to vector<4x8x8xf32>
    %70 = arith.subf %66, %69 : vector<4x8x8xf32>
    %71 = math.exp %70 : vector<4x8x8xf32>
    %cst_26 = arith.constant dense<0.000000e+00> : vector<4x8xf32>
    %72 = vector.multi_reduction <add>, %71, %cst_26 [2] : vector<4x8x8xf32> to vector<4x8xf32>
    %73 = vector.shape_cast %72 : vector<4x8xf32> to vector<4x8x1xf32>
    %74 = tpu.reciprocal %73 {approx = true} : vector<4x8x1xf32> -> vector<4x8x1xf32>
    %75 = vector.broadcast %74 : vector<4x8x1xf32> to vector<4x8x8xf32>
    %76 = arith.mulf %71, %75 : vector<4x8x8xf32>
    %77 = arith.truncf %76 : vector<4x8x8xf32> to vector<4x8x8xbf16>
    %78 = arith.truncf %61 : vector<4x8x8xf32> to vector<4x8x8xbf16>
    %cst_27 = arith.constant dense<0.000000e+00> : vector<4x8x8xf32>
    %79 = tpu.matmul %77, %78, %cst_27 {dimension_numbers = #tpu.dot_dimension_numbers<[2], [1], [1], [2], [0, 0, 0, 1, 1, 2], [0], [0]>} : vector<4x8x8xbf16>, vector<4x8x8xbf16>, vector<4x8x8xf32> -> vector<4x8x8xf32>
    %80 = vector.extract_strided_slice %14 {offsets = [0, 0, 24], sizes = [4, 8, 8], strides = [1, 1, 1]} : vector<4x8x32xf32> to vector<4x8x8xf32>
    %81 = vector.extract_strided_slice %15 {offsets = [0, 0, 24], sizes = [4, 8, 8], strides = [1, 1, 1]} : vector<4x8x32xf32> to vector<4x8x8xf32>
    %82 = vector.extract_strided_slice %16 {offsets = [0, 0, 24], sizes = [4, 8, 8], strides = [1, 1, 1]} : vector<4x8x32xf32> to vector<4x8x8xf32>
    %83 = arith.truncf %80 : vector<4x8x8xf32> to vector<4x8x8xbf16>
    %84 = arith.truncf %81 : vector<4x8x8xf32> to vector<4x8x8xbf16>
    %cst_28 = arith.constant dense<0.000000e+00> : vector<4x8x8xf32>
    %85 = tpu.matmul %83, %84, %cst_28 {dimension_numbers = #tpu.dot_dimension_numbers<[2], [2], [1], [1], [0, 0, 0, 1, 1, 1], [0], [0]>} : vector<4x8x8xbf16>, vector<4x8x8xbf16>, vector<4x8x8xf32> -> vector<4x8x8xf32>
    %cst_29 = arith.constant 0.176776692 : f32
    %86 = vector.broadcast %cst_29 : f32 to vector<4x8x8xf32>
    %87 = arith.mulf %85, %86 : vector<4x8x8xf32>
    %cst_30 = arith.constant dense<0xFF800000> : vector<4x8xf32>
    %88 = vector.multi_reduction <maximumf>, %87, %cst_30 [2] : vector<4x8x8xf32> to vector<4x8xf32>
    %89 = vector.shape_cast %88 : vector<4x8xf32> to vector<4x8x1xf32>
    %90 = vector.broadcast %89 : vector<4x8x1xf32> to vector<4x8x8xf32>
    %91 = arith.subf %87, %90 : vector<4x8x8xf32>
    %92 = math.exp %91 : vector<4x8x8xf32>
    %cst_31 = arith.constant dense<0.000000e+00> : vector<4x8xf32>
    %93 = vector.multi_reduction <add>, %92, %cst_31 [2] : vector<4x8x8xf32> to vector<4x8xf32>
    %94 = vector.shape_cast %93 : vector<4x8xf32> to vector<4x8x1xf32>
    %95 = tpu.reciprocal %94 {approx = true} : vector<4x8x1xf32> -> vector<4x8x1xf32>
    %96 = vector.broadcast %95 : vector<4x8x1xf32> to vector<4x8x8xf32>
    %97 = arith.mulf %92, %96 : vector<4x8x8xf32>
    %98 = arith.truncf %97 : vector<4x8x8xf32> to vector<4x8x8xbf16>
    %99 = arith.truncf %82 : vector<4x8x8xf32> to vector<4x8x8xbf16>
    %cst_32 = arith.constant dense<0.000000e+00> : vector<4x8x8xf32>
    %100 = tpu.matmul %98, %99, %cst_32 {dimension_numbers = #tpu.dot_dimension_numbers<[2], [1], [1], [2], [0, 0, 0, 1, 1, 2], [0], [0]>} : vector<4x8x8xbf16>, vector<4x8x8xbf16>, vector<4x8x8xf32> -> vector<4x8x8xf32>
    %101 = tpu.concatenate %37, %58, %79, %100 in 2 : vector<4x8x8xf32>, vector<4x8x8xf32>, vector<4x8x8xf32>, vector<4x8x8xf32> -> vector<4x8x32xf32>
    %102 = arith.addf %14, %101 : vector<4x8x32xf32>
    %103 = vector.shape_cast %102 : vector<4x8x32xf32> to vector<32x32xf32>
    %104 = arith.truncf %103 : vector<32x32xf32> to vector<32x32xbf16>
    %cst_33 = arith.constant dense<0.000000e+00> : vector<32x32xf32>
    %105 = tpu.matmul %104, %6, %cst_33 {dimension_numbers = #tpu.dot_dimension_numbers<[1], [0], [0], [1], [0, 0, 1, 1], [], []>} : vector<32x32xbf16>, vector<32x32xbf16>, vector<32x32xf32> -> vector<32x32xf32>
    %106 = vector.broadcast %8 : vector<1x32xf32> to vector<32x32xf32>
    %107 = arith.addf %105, %106 : vector<32x32xf32>
    %cst_34 = arith.constant 0.000000e+00 : f32
    %108 = vector.broadcast %cst_34 : f32 to vector<32x32xf32>
    %109 = arith.maximumf %107, %108 : vector<32x32xf32>
    %110 = arith.addf %103, %109 : vector<32x32xf32>
    %c1 = arith.constant 1 : index
    %c0_35 = arith.constant 0 : index
    %c0_36 = arith.constant 0 : index
    %111 = vector.load %arg2[%c1, %c0_35, %c0_36] : memref<2x32x96xbf16, #tpu.memory_space<vmem>>, vector<1x32x96xbf16>
    %112 = vector.shape_cast %111 : vector<1x32x96xbf16> to vector<32x96xbf16>
    %c1_37 = arith.constant 1 : index
    %c0_38 = arith.constant 0 : index
    %c0_39 = arith.constant 0 : index
    %113 = vector.load %arg3[%c1_37, %c0_38, %c0_39] : memref<2x1x96xf32, #tpu.memory_space<vmem>>, vector<1x1x96xf32>
    %114 = vector.shape_cast %113 : vector<1x1x96xf32> to vector<1x96xf32>
    %c1_40 = arith.constant 1 : index
    %c0_41 = arith.constant 0 : index
    %c0_42 = arith.constant 0 : index
    %115 = vector.load %arg4[%c1_40, %c0_41, %c0_42] : memref<2x32x32xbf16, #tpu.memory_space<vmem>>, vector<1x32x32xbf16>
    %116 = vector.shape_cast %115 : vector<1x32x32xbf16> to vector<32x32xbf16>
    %c1_43 = arith.constant 1 : index
    %c0_44 = arith.constant 0 : index
    %c0_45 = arith.constant 0 : index
    %117 = vector.load %arg5[%c1_43, %c0_44, %c0_45] : memref<2x1x32xf32, #tpu.memory_space<vmem>>, vector<1x1x32xf32>
    %118 = vector.shape_cast %117 : vector<1x1x32xf32> to vector<1x32xf32>
    %119 = arith.truncf %110 : vector<32x32xf32> to vector<32x32xbf16>
    %cst_46 = arith.constant dense<0.000000e+00> : vector<32x96xf32>
    %120 = tpu.matmul %119, %112, %cst_46 {dimension_numbers = #tpu.dot_dimension_numbers<[1], [0], [0], [1], [0, 0, 1, 1], [], []>} : vector<32x32xbf16>, vector<32x96xbf16>, vector<32x96xf32> -> vector<32x96xf32>
    %121 = vector.broadcast %114 : vector<1x96xf32> to vector<32x96xf32>
    %122 = arith.addf %120, %121 : vector<32x96xf32>
    %123 = vector.shape_cast %122 : vector<32x96xf32> to vector<4x8x96xf32>
    %124 = vector.extract_strided_slice %123 {offsets = [0, 0, 0], sizes = [4, 8, 32], strides = [1, 1, 1]} : vector<4x8x96xf32> to vector<4x8x32xf32>
    %125 = vector.extract_strided_slice %123 {offsets = [0, 0, 32], sizes = [4, 8, 32], strides = [1, 1, 1]} : vector<4x8x96xf32> to vector<4x8x32xf32>
    %126 = vector.extract_strided_slice %123 {offsets = [0, 0, 64], sizes = [4, 8, 32], strides = [1, 1, 1]} : vector<4x8x96xf32> to vector<4x8x32xf32>
    %127 = vector.extract_strided_slice %124 {offsets = [0, 0, 0], sizes = [4, 8, 8], strides = [1, 1, 1]} : vector<4x8x32xf32> to vector<4x8x8xf32>
    %128 = vector.extract_strided_slice %125 {offsets = [0, 0, 0], sizes = [4, 8, 8], strides = [1, 1, 1]} : vector<4x8x32xf32> to vector<4x8x8xf32>
    %129 = vector.extract_strided_slice %126 {offsets = [0, 0, 0], sizes = [4, 8, 8], strides = [1, 1, 1]} : vector<4x8x32xf32> to vector<4x8x8xf32>
    %130 = arith.truncf %127 : vector<4x8x8xf32> to vector<4x8x8xbf16>
    %131 = arith.truncf %128 : vector<4x8x8xf32> to vector<4x8x8xbf16>
    %cst_47 = arith.constant dense<0.000000e+00> : vector<4x8x8xf32>
    %132 = tpu.matmul %130, %131, %cst_47 {dimension_numbers = #tpu.dot_dimension_numbers<[2], [2], [1], [1], [0, 0, 0, 1, 1, 1], [0], [0]>} : vector<4x8x8xbf16>, vector<4x8x8xbf16>, vector<4x8x8xf32> -> vector<4x8x8xf32>
    %cst_48 = arith.constant 0.176776692 : f32
    %133 = vector.broadcast %cst_48 : f32 to vector<4x8x8xf32>
    %134 = arith.mulf %132, %133 : vector<4x8x8xf32>
    %cst_49 = arith.constant dense<0xFF800000> : vector<4x8xf32>
    %135 = vector.multi_reduction <maximumf>, %134, %cst_49 [2] : vector<4x8x8xf32> to vector<4x8xf32>
    %136 = vector.shape_cast %135 : vector<4x8xf32> to vector<4x8x1xf32>
    %137 = vector.broadcast %136 : vector<4x8x1xf32> to vector<4x8x8xf32>
    %138 = arith.subf %134, %137 : vector<4x8x8xf32>
    %139 = math.exp %138 : vector<4x8x8xf32>
    %cst_50 = arith.constant dense<0.000000e+00> : vector<4x8xf32>
    %140 = vector.multi_reduction <add>, %139, %cst_50 [2] : vector<4x8x8xf32> to vector<4x8xf32>
    %141 = vector.shape_cast %140 : vector<4x8xf32> to vector<4x8x1xf32>
    %142 = tpu.reciprocal %141 {approx = true} : vector<4x8x1xf32> -> vector<4x8x1xf32>
    %143 = vector.broadcast %142 : vector<4x8x1xf32> to vector<4x8x8xf32>
    %144 = arith.mulf %139, %143 : vector<4x8x8xf32>
    %145 = arith.truncf %144 : vector<4x8x8xf32> to vector<4x8x8xbf16>
    %146 = arith.truncf %129 : vector<4x8x8xf32> to vector<4x8x8xbf16>
    %cst_51 = arith.constant dense<0.000000e+00> : vector<4x8x8xf32>
    %147 = tpu.matmul %145, %146, %cst_51 {dimension_numbers = #tpu.dot_dimension_numbers<[2], [1], [1], [2], [0, 0, 0, 1, 1, 2], [0], [0]>} : vector<4x8x8xbf16>, vector<4x8x8xbf16>, vector<4x8x8xf32> -> vector<4x8x8xf32>
    %148 = vector.extract_strided_slice %124 {offsets = [0, 0, 8], sizes = [4, 8, 8], strides = [1, 1, 1]} : vector<4x8x32xf32> to vector<4x8x8xf32>
    %149 = vector.extract_strided_slice %125 {offsets = [0, 0, 8], sizes = [4, 8, 8], strides = [1, 1, 1]} : vector<4x8x32xf32> to vector<4x8x8xf32>
    %150 = vector.extract_strided_slice %126 {offsets = [0, 0, 8], sizes = [4, 8, 8], strides = [1, 1, 1]} : vector<4x8x32xf32> to vector<4x8x8xf32>
    %151 = arith.truncf %148 : vector<4x8x8xf32> to vector<4x8x8xbf16>
    %152 = arith.truncf %149 : vector<4x8x8xf32> to vector<4x8x8xbf16>
    %cst_52 = arith.constant dense<0.000000e+00> : vector<4x8x8xf32>
    %153 = tpu.matmul %151, %152, %cst_52 {dimension_numbers = #tpu.dot_dimension_numbers<[2], [2], [1], [1], [0, 0, 0, 1, 1, 1], [0], [0]>} : vector<4x8x8xbf16>, vector<4x8x8xbf16>, vector<4x8x8xf32> -> vector<4x8x8xf32>
    %cst_53 = arith.constant 0.176776692 : f32
    %154 = vector.broadcast %cst_53 : f32 to vector<4x8x8xf32>
    %155 = arith.mulf %153, %154 : vector<4x8x8xf32>
    %cst_54 = arith.constant dense<0xFF800000> : vector<4x8xf32>
    %156 = vector.multi_reduction <maximumf>, %155, %cst_54 [2] : vector<4x8x8xf32> to vector<4x8xf32>
    %157 = vector.shape_cast %156 : vector<4x8xf32> to vector<4x8x1xf32>
    %158 = vector.broadcast %157 : vector<4x8x1xf32> to vector<4x8x8xf32>
    %159 = arith.subf %155, %158 : vector<4x8x8xf32>
    %160 = math.exp %159 : vector<4x8x8xf32>
    %cst_55 = arith.constant dense<0.000000e+00> : vector<4x8xf32>
    %161 = vector.multi_reduction <add>, %160, %cst_55 [2] : vector<4x8x8xf32> to vector<4x8xf32>
    %162 = vector.shape_cast %161 : vector<4x8xf32> to vector<4x8x1xf32>
    %163 = tpu.reciprocal %162 {approx = true} : vector<4x8x1xf32> -> vector<4x8x1xf32>
    %164 = vector.broadcast %163 : vector<4x8x1xf32> to vector<4x8x8xf32>
    %165 = arith.mulf %160, %164 : vector<4x8x8xf32>
    %166 = arith.truncf %165 : vector<4x8x8xf32> to vector<4x8x8xbf16>
    %167 = arith.truncf %150 : vector<4x8x8xf32> to vector<4x8x8xbf16>
    %cst_56 = arith.constant dense<0.000000e+00> : vector<4x8x8xf32>
    %168 = tpu.matmul %166, %167, %cst_56 {dimension_numbers = #tpu.dot_dimension_numbers<[2], [1], [1], [2], [0, 0, 0, 1, 1, 2], [0], [0]>} : vector<4x8x8xbf16>, vector<4x8x8xbf16>, vector<4x8x8xf32> -> vector<4x8x8xf32>
    %169 = vector.extract_strided_slice %124 {offsets = [0, 0, 16], sizes = [4, 8, 8], strides = [1, 1, 1]} : vector<4x8x32xf32> to vector<4x8x8xf32>
    %170 = vector.extract_strided_slice %125 {offsets = [0, 0, 16], sizes = [4, 8, 8], strides = [1, 1, 1]} : vector<4x8x32xf32> to vector<4x8x8xf32>
    %171 = vector.extract_strided_slice %126 {offsets = [0, 0, 16], sizes = [4, 8, 8], strides = [1, 1, 1]} : vector<4x8x32xf32> to vector<4x8x8xf32>
    %172 = arith.truncf %169 : vector<4x8x8xf32> to vector<4x8x8xbf16>
    %173 = arith.truncf %170 : vector<4x8x8xf32> to vector<4x8x8xbf16>
    %cst_57 = arith.constant dense<0.000000e+00> : vector<4x8x8xf32>
    %174 = tpu.matmul %172, %173, %cst_57 {dimension_numbers = #tpu.dot_dimension_numbers<[2], [2], [1], [1], [0, 0, 0, 1, 1, 1], [0], [0]>} : vector<4x8x8xbf16>, vector<4x8x8xbf16>, vector<4x8x8xf32> -> vector<4x8x8xf32>
    %cst_58 = arith.constant 0.176776692 : f32
    %175 = vector.broadcast %cst_58 : f32 to vector<4x8x8xf32>
    %176 = arith.mulf %174, %175 : vector<4x8x8xf32>
    %cst_59 = arith.constant dense<0xFF800000> : vector<4x8xf32>
    %177 = vector.multi_reduction <maximumf>, %176, %cst_59 [2] : vector<4x8x8xf32> to vector<4x8xf32>
    %178 = vector.shape_cast %177 : vector<4x8xf32> to vector<4x8x1xf32>
    %179 = vector.broadcast %178 : vector<4x8x1xf32> to vector<4x8x8xf32>
    %180 = arith.subf %176, %179 : vector<4x8x8xf32>
    %181 = math.exp %180 : vector<4x8x8xf32>
    %cst_60 = arith.constant dense<0.000000e+00> : vector<4x8xf32>
    %182 = vector.multi_reduction <add>, %181, %cst_60 [2] : vector<4x8x8xf32> to vector<4x8xf32>
    %183 = vector.shape_cast %182 : vector<4x8xf32> to vector<4x8x1xf32>
    %184 = tpu.reciprocal %183 {approx = true} : vector<4x8x1xf32> -> vector<4x8x1xf32>
    %185 = vector.broadcast %184 : vector<4x8x1xf32> to vector<4x8x8xf32>
    %186 = arith.mulf %181, %185 : vector<4x8x8xf32>
    %187 = arith.truncf %186 : vector<4x8x8xf32> to vector<4x8x8xbf16>
    %188 = arith.truncf %171 : vector<4x8x8xf32> to vector<4x8x8xbf16>
    %cst_61 = arith.constant dense<0.000000e+00> : vector<4x8x8xf32>
    %189 = tpu.matmul %187, %188, %cst_61 {dimension_numbers = #tpu.dot_dimension_numbers<[2], [1], [1], [2], [0, 0, 0, 1, 1, 2], [0], [0]>} : vector<4x8x8xbf16>, vector<4x8x8xbf16>, vector<4x8x8xf32> -> vector<4x8x8xf32>
    %190 = vector.extract_strided_slice %124 {offsets = [0, 0, 24], sizes = [4, 8, 8], strides = [1, 1, 1]} : vector<4x8x32xf32> to vector<4x8x8xf32>
    %191 = vector.extract_strided_slice %125 {offsets = [0, 0, 24], sizes = [4, 8, 8], strides = [1, 1, 1]} : vector<4x8x32xf32> to vector<4x8x8xf32>
    %192 = vector.extract_strided_slice %126 {offsets = [0, 0, 24], sizes = [4, 8, 8], strides = [1, 1, 1]} : vector<4x8x32xf32> to vector<4x8x8xf32>
    %193 = arith.truncf %190 : vector<4x8x8xf32> to vector<4x8x8xbf16>
    %194 = arith.truncf %191 : vector<4x8x8xf32> to vector<4x8x8xbf16>
    %cst_62 = arith.constant dense<0.000000e+00> : vector<4x8x8xf32>
    %195 = tpu.matmul %193, %194, %cst_62 {dimension_numbers = #tpu.dot_dimension_numbers<[2], [2], [1], [1], [0, 0, 0, 1, 1, 1], [0], [0]>} : vector<4x8x8xbf16>, vector<4x8x8xbf16>, vector<4x8x8xf32> -> vector<4x8x8xf32>
    %cst_63 = arith.constant 0.176776692 : f32
    %196 = vector.broadcast %cst_63 : f32 to vector<4x8x8xf32>
    %197 = arith.mulf %195, %196 : vector<4x8x8xf32>
    %cst_64 = arith.constant dense<0xFF800000> : vector<4x8xf32>
    %198 = vector.multi_reduction <maximumf>, %197, %cst_64 [2] : vector<4x8x8xf32> to vector<4x8xf32>
    %199 = vector.shape_cast %198 : vector<4x8xf32> to vector<4x8x1xf32>
    %200 = vector.broadcast %199 : vector<4x8x1xf32> to vector<4x8x8xf32>
    %201 = arith.subf %197, %200 : vector<4x8x8xf32>
    %202 = math.exp %201 : vector<4x8x8xf32>
    %cst_65 = arith.constant dense<0.000000e+00> : vector<4x8xf32>
    %203 = vector.multi_reduction <add>, %202, %cst_65 [2] : vector<4x8x8xf32> to vector<4x8xf32>
    %204 = vector.shape_cast %203 : vector<4x8xf32> to vector<4x8x1xf32>
    %205 = tpu.reciprocal %204 {approx = true} : vector<4x8x1xf32> -> vector<4x8x1xf32>
    %206 = vector.broadcast %205 : vector<4x8x1xf32> to vector<4x8x8xf32>
    %207 = arith.mulf %202, %206 : vector<4x8x8xf32>
    %208 = arith.truncf %207 : vector<4x8x8xf32> to vector<4x8x8xbf16>
    %209 = arith.truncf %192 : vector<4x8x8xf32> to vector<4x8x8xbf16>
    %cst_66 = arith.constant dense<0.000000e+00> : vector<4x8x8xf32>
    %210 = tpu.matmul %208, %209, %cst_66 {dimension_numbers = #tpu.dot_dimension_numbers<[2], [1], [1], [2], [0, 0, 0, 1, 1, 2], [0], [0]>} : vector<4x8x8xbf16>, vector<4x8x8xbf16>, vector<4x8x8xf32> -> vector<4x8x8xf32>
    %211 = tpu.concatenate %147, %168, %189, %210 in 2 : vector<4x8x8xf32>, vector<4x8x8xf32>, vector<4x8x8xf32>, vector<4x8x8xf32> -> vector<4x8x32xf32>
    %212 = arith.addf %124, %211 : vector<4x8x32xf32>
    %213 = vector.shape_cast %212 : vector<4x8x32xf32> to vector<32x32xf32>
    %214 = arith.truncf %213 : vector<32x32xf32> to vector<32x32xbf16>
    %cst_67 = arith.constant dense<0.000000e+00> : vector<32x32xf32>
    %215 = tpu.matmul %214, %116, %cst_67 {dimension_numbers = #tpu.dot_dimension_numbers<[1], [0], [0], [1], [0, 0, 1, 1], [], []>} : vector<32x32xbf16>, vector<32x32xbf16>, vector<32x32xf32> -> vector<32x32xf32>
    %216 = vector.broadcast %118 : vector<1x32xf32> to vector<32x32xf32>
    %217 = arith.addf %215, %216 : vector<32x32xf32>
    %cst_68 = arith.constant 0.000000e+00 : f32
    %218 = vector.broadcast %cst_68 : f32 to vector<32x32xf32>
    %219 = arith.maximumf %217, %218 : vector<32x32xf32>
    %220 = arith.addf %213, %219 : vector<32x32xf32>
    %221 = vector.shape_cast %220 : vector<32x32xf32> to vector<8x128xf32>
    %c0_69 = arith.constant 0 : index
    %c0_70 = arith.constant 0 : index
    %222 = vector.load %arg6[%c0_69, %c0_70] : memref<8x128xf32, #tpu.memory_space<vmem>>, vector<8x128xf32>
    tpu.vector_store %arg6[%c0_69, %c0_70], %221 {strides = array<i32>} : memref<8x128xf32, #tpu.memory_space<vmem>>, vector<8x128xf32>,
    return
  }
  func.func @transform_0(%arg0: i32) -> (i32, i32) {
    %c0_i32 = arith.constant 0 : i32
    %c0_i32_0 = arith.constant 0 : i32
    return %arg0, %c0_i32 : i32, i32
  }
  func.func @transform_1(%arg0: i32) -> (i32, i32, i32) {
    %c0_i32 = arith.constant 0 : i32
    %c0_i32_0 = arith.constant 0 : i32
    %c0_i32_1 = arith.constant 0 : i32
    %c0_i32_2 = arith.constant 0 : i32
    return %c0_i32, %c0_i32_0, %c0_i32_1 : i32, i32, i32
  }
  func.func @transform_2(%arg0: i32) -> (i32, i32, i32) {
    %c0_i32 = arith.constant 0 : i32
    %c0_i32_0 = arith.constant 0 : i32
    %c0_i32_1 = arith.constant 0 : i32
    %c0_i32_2 = arith.constant 0 : i32
    return %c0_i32, %c0_i32_0, %c0_i32_1 : i32, i32, i32
  }
  func.func @transform_3(%arg0: i32) -> (i32, i32, i32) {
    %c0_i32 = arith.constant 0 : i32
    %c0_i32_0 = arith.constant 0 : i32
    %c0_i32_1 = arith.constant 0 : i32
    %c0_i32_2 = arith.constant 0 : i32
    return %c0_i32, %c0_i32_0, %c0_i32_1 : i32, i32, i32
  }
  func.func @transform_4(%arg0: i32) -> (i32, i32, i32) {
    %c0_i32 = arith.constant 0 : i32
    %c0_i32_0 = arith.constant 0 : i32
    %c0_i32_1 = arith.constant 0 : i32
    %c0_i32_2 = arith.constant 0 : i32
    return %c0_i32, %c0_i32_0, %c0_i32_1 : i32, i32, i32
  }
  func.func @transform_5(%arg0: i32) -> (i32, i32) {
    %c0_i32 = arith.constant 0 : i32
    %c0_i32_0 = arith.constant 0 : i32
    return %arg0, %c0_i32 : i32, i32
  }
}

module attributes {stable_mosaic.version = 11 : i64} {
  func.func @_encoder_kernel(%arg0: i32, %arg1: memref<32x32xf32, #tpu.memory_space<vmem>>, %arg2: memref<2x32x96xbf16, #tpu.memory_space<vmem>>, %arg3: memref<2x1x96xf32, #tpu.memory_space<vmem>>, %arg4: memref<2x32x32xbf16, #tpu.memory_space<vmem>>, %arg5: memref<2x1x32xf32, #tpu.memory_space<vmem>>, %arg6: memref<32x32xf32, #tpu.memory_space<vmem>>) attributes {dimension_semantics = [#tpu.dimension_semantics<parallel>], iteration_bounds = array<i64: 4>, scalar_prefetch = 0 : i64, scratch_operands = 0 : i64, tpu.core_type = #tpu.core_type<tc>, window_params = [{transform_indices = @transform_0, window_bounds = array<i64: 32, 32>}, {pipeline_mode = #tpu.pipeline_mode<synchronous>, transform_indices = @transform_1, window_bounds = array<i64: 2, 32, 96>}, {pipeline_mode = #tpu.pipeline_mode<synchronous>, transform_indices = @transform_2, window_bounds = array<i64: 2, 1, 96>}, {pipeline_mode = #tpu.pipeline_mode<synchronous>, transform_indices = @transform_3, window_bounds = array<i64: 2, 32, 32>}, {pipeline_mode = #tpu.pipeline_mode<synchronous>, transform_indices = @transform_4, window_bounds = array<i64: 2, 1, 32>}, {transform_indices = @transform_5, window_bounds = array<i64: 32, 32>}]} {
    %c0 = arith.constant 0 : index
    %c0_0 = arith.constant 0 : index
    %0 = vector.load %arg1[%c0, %c0_0] : memref<32x32xf32, #tpu.memory_space<vmem>>, vector<32x32xf32>
    %c0_1 = arith.constant 0 : index
    %c0_2 = arith.constant 0 : index
    %c0_3 = arith.constant 0 : index
    %1 = vector.load %arg2[%c0_1, %c0_2, %c0_3] : memref<2x32x96xbf16, #tpu.memory_space<vmem>>, vector<1x32x96xbf16>
    %2 = vector.shape_cast %1 : vector<1x32x96xbf16> to vector<32x96xbf16>
    %c0_4 = arith.constant 0 : index
    %c0_5 = arith.constant 0 : index
    %c0_6 = arith.constant 0 : index
    %3 = vector.load %arg3[%c0_4, %c0_5, %c0_6] : memref<2x1x96xf32, #tpu.memory_space<vmem>>, vector<1x1x96xf32>
    %4 = vector.shape_cast %3 : vector<1x1x96xf32> to vector<1x96xf32>
    %c0_7 = arith.constant 0 : index
    %c0_8 = arith.constant 0 : index
    %c0_9 = arith.constant 0 : index
    %5 = vector.load %arg4[%c0_7, %c0_8, %c0_9] : memref<2x32x32xbf16, #tpu.memory_space<vmem>>, vector<1x32x32xbf16>
    %6 = vector.shape_cast %5 : vector<1x32x32xbf16> to vector<32x32xbf16>
    %c0_10 = arith.constant 0 : index
    %c0_11 = arith.constant 0 : index
    %c0_12 = arith.constant 0 : index
    %7 = vector.load %arg5[%c0_10, %c0_11, %c0_12] : memref<2x1x32xf32, #tpu.memory_space<vmem>>, vector<1x1x32xf32>
    %8 = vector.shape_cast %7 : vector<1x1x32xf32> to vector<1x32xf32>
    %9 = arith.truncf %0 : vector<32x32xf32> to vector<32x32xbf16>
    %cst = arith.constant dense<0.000000e+00> : vector<32x96xf32>
    %10 = tpu.matmul %9, %2, %cst {dimension_numbers = #tpu.dot_dimension_numbers<[1], [0], [0], [1], [0, 0, 1, 1], [], []>} : vector<32x32xbf16>, vector<32x96xbf16>, vector<32x96xf32> -> vector<32x96xf32>
    %11 = vector.broadcast %4 : vector<1x96xf32> to vector<32x96xf32>
    %12 = arith.addf %10, %11 : vector<32x96xf32>
    %13 = vector.shape_cast %12 : vector<32x96xf32> to vector<4x8x96xf32>
    %14 = vector.extract_strided_slice %13 {offsets = [0, 0, 0], sizes = [4, 8, 32], strides = [1, 1, 1]} : vector<4x8x96xf32> to vector<4x8x32xf32>
    %15 = vector.extract_strided_slice %13 {offsets = [0, 0, 32], sizes = [4, 8, 32], strides = [1, 1, 1]} : vector<4x8x96xf32> to vector<4x8x32xf32>
    %16 = vector.extract_strided_slice %13 {offsets = [0, 0, 64], sizes = [4, 8, 32], strides = [1, 1, 1]} : vector<4x8x96xf32> to vector<4x8x32xf32>
    %17 = vector.extract_strided_slice %14 {offsets = [0, 0, 0], sizes = [4, 8, 8], strides = [1, 1, 1]} : vector<4x8x32xf32> to vector<4x8x8xf32>
    %18 = vector.extract_strided_slice %15 {offsets = [0, 0, 0], sizes = [4, 8, 8], strides = [1, 1, 1]} : vector<4x8x32xf32> to vector<4x8x8xf32>
    %19 = vector.extract_strided_slice %16 {offsets = [0, 0, 0], sizes = [4, 8, 8], strides = [1, 1, 1]} : vector<4x8x32xf32> to vector<4x8x8xf32>
    %20 = arith.truncf %17 : vector<4x8x8xf32> to vector<4x8x8xbf16>
    %21 = arith.truncf %18 : vector<4x8x8xf32> to vector<4x8x8xbf16>
    %cst_13 = arith.constant dense<0.000000e+00> : vector<4x8x8xf32>
    %22 = tpu.matmul %20, %21, %cst_13 {dimension_numbers = #tpu.dot_dimension_numbers<[2], [2], [1], [1], [0, 0, 0, 1, 1, 1], [0], [0]>} : vector<4x8x8xbf16>, vector<4x8x8xbf16>, vector<4x8x8xf32> -> vector<4x8x8xf32>
    %cst_14 = arith.constant 0.176776692 : f32
    %23 = vector.broadcast %cst_14 : f32 to vector<4x8x8xf32>
    %24 = arith.mulf %22, %23 : vector<4x8x8xf32>
    %cst_15 = arith.constant dense<0xFF800000> : vector<4x8xf32>
    %25 = vector.multi_reduction <maximumf>, %24, %cst_15 [2] : vector<4x8x8xf32> to vector<4x8xf32>
    %26 = vector.shape_cast %25 : vector<4x8xf32> to vector<4x8x1xf32>
    %27 = vector.broadcast %26 : vector<4x8x1xf32> to vector<4x8x8xf32>
    %28 = arith.subf %24, %27 : vector<4x8x8xf32>
    %29 = math.exp %28 : vector<4x8x8xf32>
    %cst_16 = arith.constant dense<0.000000e+00> : vector<4x8xf32>
    %30 = vector.multi_reduction <add>, %29, %cst_16 [2] : vector<4x8x8xf32> to vector<4x8xf32>
    %31 = vector.shape_cast %30 : vector<4x8xf32> to vector<4x8x1xf32>
    %32 = tpu.reciprocal %31 {approx = true} : vector<4x8x1xf32> -> vector<4x8x1xf32>
    %33 = vector.broadcast %32 : vector<4x8x1xf32> to vector<4x8x8xf32>
    %34 = arith.mulf %29, %33 : vector<4x8x8xf32>
    %35 = arith.truncf %34 : vector<4x8x8xf32> to vector<4x8x8xbf16>
    %36 = arith.truncf %19 : vector<4x8x8xf32> to vector<4x8x8xbf16>
    %cst_17 = arith.constant dense<0.000000e+00> : vector<4x8x8xf32>
    %37 = tpu.matmul %35, %36, %cst_17 {dimension_numbers = #tpu.dot_dimension_numbers<[2], [1], [1], [2], [0, 0, 0, 1, 1, 2], [0], [0]>} : vector<4x8x8xbf16>, vector<4x8x8xbf16>, vector<4x8x8xf32> -> vector<4x8x8xf32>
    %38 = vector.extract_strided_slice %14 {offsets = [0, 0, 8], sizes = [4, 8, 8], strides = [1, 1, 1]} : vector<4x8x32xf32> to vector<4x8x8xf32>
    %39 = vector.extract_strided_slice %15 {offsets = [0, 0, 8], sizes = [4, 8, 8], strides = [1, 1, 1]} : vector<4x8x32xf32> to vector<4x8x8xf32>
    %40 = vector.extract_strided_slice %16 {offsets = [0, 0, 8], sizes = [4, 8, 8], strides = [1, 1, 1]} : vector<4x8x32xf32> to vector<4x8x8xf32>
    %41 = arith.truncf %38 : vector<4x8x8xf32> to vector<4x8x8xbf16>
    %42 = arith.truncf %39 : vector<4x8x8xf32> to vector<4x8x8xbf16>
    %cst_18 = arith.constant dense<0.000000e+00> : vector<4x8x8xf32>
    %43 = tpu.matmul %41, %42, %cst_18 {dimension_numbers = #tpu.dot_dimension_numbers<[2], [2], [1], [1], [0, 0, 0, 1, 1, 1], [0], [0]>} : vector<4x8x8xbf16>, vector<4x8x8xbf16>, vector<4x8x8xf32> -> vector<4x8x8xf32>
    %cst_19 = arith.constant 0.176776692 : f32
    %44 = vector.broadcast %cst_19 : f32 to vector<4x8x8xf32>
    %45 = arith.mulf %43, %44 : vector<4x8x8xf32>
    %cst_20 = arith.constant dense<0xFF800000> : vector<4x8xf32>
    %46 = vector.multi_reduction <maximumf>, %45, %cst_20 [2] : vector<4x8x8xf32> to vector<4x8xf32>
    %47 = vector.shape_cast %46 : vector<4x8xf32> to vector<4x8x1xf32>
    %48 = vector.broadcast %47 : vector<4x8x1xf32> to vector<4x8x8xf32>
    %49 = arith.subf %45, %48 : vector<4x8x8xf32>
    %50 = math.exp %49 : vector<4x8x8xf32>
    %cst_21 = arith.constant dense<0.000000e+00> : vector<4x8xf32>
    %51 = vector.multi_reduction <add>, %50, %cst_21 [2] : vector<4x8x8xf32> to vector<4x8xf32>
    %52 = vector.shape_cast %51 : vector<4x8xf32> to vector<4x8x1xf32>
    %53 = tpu.reciprocal %52 {approx = true} : vector<4x8x1xf32> -> vector<4x8x1xf32>
    %54 = vector.broadcast %53 : vector<4x8x1xf32> to vector<4x8x8xf32>
    %55 = arith.mulf %50, %54 : vector<4x8x8xf32>
    %56 = arith.truncf %55 : vector<4x8x8xf32> to vector<4x8x8xbf16>
    %57 = arith.truncf %40 : vector<4x8x8xf32> to vector<4x8x8xbf16>
    %cst_22 = arith.constant dense<0.000000e+00> : vector<4x8x8xf32>
    %58 = tpu.matmul %56, %57, %cst_22 {dimension_numbers = #tpu.dot_dimension_numbers<[2], [1], [1], [2], [0, 0, 0, 1, 1, 2], [0], [0]>} : vector<4x8x8xbf16>, vector<4x8x8xbf16>, vector<4x8x8xf32> -> vector<4x8x8xf32>
    %59 = vector.extract_strided_slice %14 {offsets = [0, 0, 16], sizes = [4, 8, 8], strides = [1, 1, 1]} : vector<4x8x32xf32> to vector<4x8x8xf32>
    %60 = vector.extract_strided_slice %15 {offsets = [0, 0, 16], sizes = [4, 8, 8], strides = [1, 1, 1]} : vector<4x8x32xf32> to vector<4x8x8xf32>
    %61 = vector.extract_strided_slice %16 {offsets = [0, 0, 16], sizes = [4, 8, 8], strides = [1, 1, 1]} : vector<4x8x32xf32> to vector<4x8x8xf32>
    %62 = arith.truncf %59 : vector<4x8x8xf32> to vector<4x8x8xbf16>
    %63 = arith.truncf %60 : vector<4x8x8xf32> to vector<4x8x8xbf16>
    %cst_23 = arith.constant dense<0.000000e+00> : vector<4x8x8xf32>
    %64 = tpu.matmul %62, %63, %cst_23 {dimension_numbers = #tpu.dot_dimension_numbers<[2], [2], [1], [1], [0, 0, 0, 1, 1, 1], [0], [0]>} : vector<4x8x8xbf16>, vector<4x8x8xbf16>, vector<4x8x8xf32> -> vector<4x8x8xf32>
    %cst_24 = arith.constant 0.176776692 : f32
    %65 = vector.broadcast %cst_24 : f32 to vector<4x8x8xf32>
    %66 = arith.mulf %64, %65 : vector<4x8x8xf32>
    %cst_25 = arith.constant dense<0xFF800000> : vector<4x8xf32>
    %67 = vector.multi_reduction <maximumf>, %66, %cst_25 [2] : vector<4x8x8xf32> to vector<4x8xf32>
    %68 = vector.shape_cast %67 : vector<4x8xf32> to vector<4x8x1xf32>
    %69 = vector.broadcast %68 : vector<4x8x1xf32> to vector<4x8x8xf32>
    %70 = arith.subf %66, %69 : vector<4x8x8xf32>
    %71 = math.exp %70 : vector<4x8x8xf32>
    %cst_26 = arith.constant dense<0.000000e+00> : vector<4x8xf32>
    %72 = vector.multi_reduction <add>, %71, %cst_26 [2] : vector<4x8x8xf32> to vector<4x8xf32>
    %73 = vector.shape_cast %72 : vector<4x8xf32> to vector<4x8x1xf32>
    %74 = tpu.reciprocal %73 {approx = true} : vector<4x8x1xf32> -> vector<4x8x1xf32>
    %75 = vector.broadcast %74 : vector<4x8x1xf32> to vector<4x8x8xf32>
    %76 = arith.mulf %71, %75 : vector<4x8x8xf32>
    %77 = arith.truncf %76 : vector<4x8x8xf32> to vector<4x8x8xbf16>
    %78 = arith.truncf %61 : vector<4x8x8xf32> to vector<4x8x8xbf16>
    %cst_27 = arith.constant dense<0.000000e+00> : vector<4x8x8xf32>
    %79 = tpu.matmul %77, %78, %cst_27 {dimension_numbers = #tpu.dot_dimension_numbers<[2], [1], [1], [2], [0, 0, 0, 1, 1, 2], [0], [0]>} : vector<4x8x8xbf16>, vector<4x8x8xbf16>, vector<4x8x8xf32> -> vector<4x8x8xf32>
    %80 = vector.extract_strided_slice %14 {offsets = [0, 0, 24], sizes = [4, 8, 8], strides = [1, 1, 1]} : vector<4x8x32xf32> to vector<4x8x8xf32>
    %81 = vector.extract_strided_slice %15 {offsets = [0, 0, 24], sizes = [4, 8, 8], strides = [1, 1, 1]} : vector<4x8x32xf32> to vector<4x8x8xf32>
    %82 = vector.extract_strided_slice %16 {offsets = [0, 0, 24], sizes = [4, 8, 8], strides = [1, 1, 1]} : vector<4x8x32xf32> to vector<4x8x8xf32>
    %83 = arith.truncf %80 : vector<4x8x8xf32> to vector<4x8x8xbf16>
    %84 = arith.truncf %81 : vector<4x8x8xf32> to vector<4x8x8xbf16>
    %cst_28 = arith.constant dense<0.000000e+00> : vector<4x8x8xf32>
    %85 = tpu.matmul %83, %84, %cst_28 {dimension_numbers = #tpu.dot_dimension_numbers<[2], [2], [1], [1], [0, 0, 0, 1, 1, 1], [0], [0]>} : vector<4x8x8xbf16>, vector<4x8x8xbf16>, vector<4x8x8xf32> -> vector<4x8x8xf32>
    %cst_29 = arith.constant 0.176776692 : f32
    %86 = vector.broadcast %cst_29 : f32 to vector<4x8x8xf32>
    %87 = arith.mulf %85, %86 : vector<4x8x8xf32>
    %cst_30 = arith.constant dense<0xFF800000> : vector<4x8xf32>
    %88 = vector.multi_reduction <maximumf>, %87, %cst_30 [2] : vector<4x8x8xf32> to vector<4x8xf32>
    %89 = vector.shape_cast %88 : vector<4x8xf32> to vector<4x8x1xf32>
    %90 = vector.broadcast %89 : vector<4x8x1xf32> to vector<4x8x8xf32>
    %91 = arith.subf %87, %90 : vector<4x8x8xf32>
    %92 = math.exp %91 : vector<4x8x8xf32>
    %cst_31 = arith.constant dense<0.000000e+00> : vector<4x8xf32>
    %93 = vector.multi_reduction <add>, %92, %cst_31 [2] : vector<4x8x8xf32> to vector<4x8xf32>
    %94 = vector.shape_cast %93 : vector<4x8xf32> to vector<4x8x1xf32>
    %95 = tpu.reciprocal %94 {approx = true} : vector<4x8x1xf32> -> vector<4x8x1xf32>
    %96 = vector.broadcast %95 : vector<4x8x1xf32> to vector<4x8x8xf32>
    %97 = arith.mulf %92, %96 : vector<4x8x8xf32>
    %98 = arith.truncf %97 : vector<4x8x8xf32> to vector<4x8x8xbf16>
    %99 = arith.truncf %82 : vector<4x8x8xf32> to vector<4x8x8xbf16>
    %cst_32 = arith.constant dense<0.000000e+00> : vector<4x8x8xf32>
    %100 = tpu.matmul %98, %99, %cst_32 {dimension_numbers = #tpu.dot_dimension_numbers<[2], [1], [1], [2], [0, 0, 0, 1, 1, 2], [0], [0]>} : vector<4x8x8xbf16>, vector<4x8x8xbf16>, vector<4x8x8xf32> -> vector<4x8x8xf32>
    %101 = tpu.concatenate %37, %58, %79, %100 in 2 : vector<4x8x8xf32>, vector<4x8x8xf32>, vector<4x8x8xf32>, vector<4x8x8xf32> -> vector<4x8x32xf32>
    %102 = arith.addf %14, %101 : vector<4x8x32xf32>
    %103 = vector.shape_cast %102 : vector<4x8x32xf32> to vector<32x32xf32>
    %104 = arith.truncf %103 : vector<32x32xf32> to vector<32x32xbf16>
    %cst_33 = arith.constant dense<0.000000e+00> : vector<32x32xf32>
    %105 = tpu.matmul %104, %6, %cst_33 {dimension_numbers = #tpu.dot_dimension_numbers<[1], [0], [0], [1], [0, 0, 1, 1], [], []>} : vector<32x32xbf16>, vector<32x32xbf16>, vector<32x32xf32> -> vector<32x32xf32>
    %106 = vector.broadcast %8 : vector<1x32xf32> to vector<32x32xf32>
    %107 = arith.addf %105, %106 : vector<32x32xf32>
    %cst_34 = arith.constant 0.000000e+00 : f32
    %108 = vector.broadcast %cst_34 : f32 to vector<32x32xf32>
    %109 = arith.maximumf %107, %108 : vector<32x32xf32>
    %110 = arith.addf %103, %109 : vector<32x32xf32>
    %c1 = arith.constant 1 : index
    %c0_35 = arith.constant 0 : index
    %c0_36 = arith.constant 0 : index
    %111 = vector.load %arg2[%c1, %c0_35, %c0_36] : memref<2x32x96xbf16, #tpu.memory_space<vmem>>, vector<1x32x96xbf16>
    %112 = vector.shape_cast %111 : vector<1x32x96xbf16> to vector<32x96xbf16>
    %c1_37 = arith.constant 1 : index
    %c0_38 = arith.constant 0 : index
    %c0_39 = arith.constant 0 : index
    %113 = vector.load %arg3[%c1_37, %c0_38, %c0_39] : memref<2x1x96xf32, #tpu.memory_space<vmem>>, vector<1x1x96xf32>
    %114 = vector.shape_cast %113 : vector<1x1x96xf32> to vector<1x96xf32>
    %c1_40 = arith.constant 1 : index
    %c0_41 = arith.constant 0 : index
    %c0_42 = arith.constant 0 : index
    %115 = vector.load %arg4[%c1_40, %c0_41, %c0_42] : memref<2x32x32xbf16, #tpu.memory_space<vmem>>, vector<1x32x32xbf16>
    %116 = vector.shape_cast %115 : vector<1x32x32xbf16> to vector<32x32xbf16>
    %c1_43 = arith.constant 1 : index
    %c0_44 = arith.constant 0 : index
    %c0_45 = arith.constant 0 : index
    %117 = vector.load %arg5[%c1_43, %c0_44, %c0_45] : memref<2x1x32xf32, #tpu.memory_space<vmem>>, vector<1x1x32xf32>
    %118 = vector.shape_cast %117 : vector<1x1x32xf32> to vector<1x32xf32>
    %119 = arith.truncf %110 : vector<32x32xf32> to vector<32x32xbf16>
    %cst_46 = arith.constant dense<0.000000e+00> : vector<32x96xf32>
    %120 = tpu.matmul %119, %112, %cst_46 {dimension_numbers = #tpu.dot_dimension_numbers<[1], [0], [0], [1], [0, 0, 1, 1], [], []>} : vector<32x32xbf16>, vector<32x96xbf16>, vector<32x96xf32> -> vector<32x96xf32>
    %121 = vector.broadcast %114 : vector<1x96xf32> to vector<32x96xf32>
    %122 = arith.addf %120, %121 : vector<32x96xf32>
    %123 = vector.shape_cast %122 : vector<32x96xf32> to vector<4x8x96xf32>
    %124 = vector.extract_strided_slice %123 {offsets = [0, 0, 0], sizes = [4, 8, 32], strides = [1, 1, 1]} : vector<4x8x96xf32> to vector<4x8x32xf32>
    %125 = vector.extract_strided_slice %123 {offsets = [0, 0, 32], sizes = [4, 8, 32], strides = [1, 1, 1]} : vector<4x8x96xf32> to vector<4x8x32xf32>
    %126 = vector.extract_strided_slice %123 {offsets = [0, 0, 64], sizes = [4, 8, 32], strides = [1, 1, 1]} : vector<4x8x96xf32> to vector<4x8x32xf32>
    %127 = vector.extract_strided_slice %124 {offsets = [0, 0, 0], sizes = [4, 8, 8], strides = [1, 1, 1]} : vector<4x8x32xf32> to vector<4x8x8xf32>
    %128 = vector.extract_strided_slice %125 {offsets = [0, 0, 0], sizes = [4, 8, 8], strides = [1, 1, 1]} : vector<4x8x32xf32> to vector<4x8x8xf32>
    %129 = vector.extract_strided_slice %126 {offsets = [0, 0, 0], sizes = [4, 8, 8], strides = [1, 1, 1]} : vector<4x8x32xf32> to vector<4x8x8xf32>
    %130 = arith.truncf %127 : vector<4x8x8xf32> to vector<4x8x8xbf16>
    %131 = arith.truncf %128 : vector<4x8x8xf32> to vector<4x8x8xbf16>
    %cst_47 = arith.constant dense<0.000000e+00> : vector<4x8x8xf32>
    %132 = tpu.matmul %130, %131, %cst_47 {dimension_numbers = #tpu.dot_dimension_numbers<[2], [2], [1], [1], [0, 0, 0, 1, 1, 1], [0], [0]>} : vector<4x8x8xbf16>, vector<4x8x8xbf16>, vector<4x8x8xf32> -> vector<4x8x8xf32>
    %cst_48 = arith.constant 0.176776692 : f32
    %133 = vector.broadcast %cst_48 : f32 to vector<4x8x8xf32>
    %134 = arith.mulf %132, %133 : vector<4x8x8xf32>
    %cst_49 = arith.constant dense<0xFF800000> : vector<4x8xf32>
    %135 = vector.multi_reduction <maximumf>, %134, %cst_49 [2] : vector<4x8x8xf32> to vector<4x8xf32>
    %136 = vector.shape_cast %135 : vector<4x8xf32> to vector<4x8x1xf32>
    %137 = vector.broadcast %136 : vector<4x8x1xf32> to vector<4x8x8xf32>
    %138 = arith.subf %134, %137 : vector<4x8x8xf32>
    %139 = math.exp %138 : vector<4x8x8xf32>
    %cst_50 = arith.constant dense<0.000000e+00> : vector<4x8xf32>
    %140 = vector.multi_reduction <add>, %139, %cst_50 [2] : vector<4x8x8xf32> to vector<4x8xf32>
    %141 = vector.shape_cast %140 : vector<4x8xf32> to vector<4x8x1xf32>
    %142 = tpu.reciprocal %141 {approx = true} : vector<4x8x1xf32> -> vector<4x8x1xf32>
    %143 = vector.broadcast %142 : vector<4x8x1xf32> to vector<4x8x8xf32>
    %144 = arith.mulf %139, %143 : vector<4x8x8xf32>
    %145 = arith.truncf %144 : vector<4x8x8xf32> to vector<4x8x8xbf16>
    %146 = arith.truncf %129 : vector<4x8x8xf32> to vector<4x8x8xbf16>
    %cst_51 = arith.constant dense<0.000000e+00> : vector<4x8x8xf32>
    %147 = tpu.matmul %145, %146, %cst_51 {dimension_numbers = #tpu.dot_dimension_numbers<[2], [1], [1], [2], [0, 0, 0, 1, 1, 2], [0], [0]>} : vector<4x8x8xbf16>, vector<4x8x8xbf16>, vector<4x8x8xf32> -> vector<4x8x8xf32>
    %148 = vector.extract_strided_slice %124 {offsets = [0, 0, 8], sizes = [4, 8, 8], strides = [1, 1, 1]} : vector<4x8x32xf32> to vector<4x8x8xf32>
    %149 = vector.extract_strided_slice %125 {offsets = [0, 0, 8], sizes = [4, 8, 8], strides = [1, 1, 1]} : vector<4x8x32xf32> to vector<4x8x8xf32>
    %150 = vector.extract_strided_slice %126 {offsets = [0, 0, 8], sizes = [4, 8, 8], strides = [1, 1, 1]} : vector<4x8x32xf32> to vector<4x8x8xf32>
    %151 = arith.truncf %148 : vector<4x8x8xf32> to vector<4x8x8xbf16>
    %152 = arith.truncf %149 : vector<4x8x8xf32> to vector<4x8x8xbf16>
    %cst_52 = arith.constant dense<0.000000e+00> : vector<4x8x8xf32>
    %153 = tpu.matmul %151, %152, %cst_52 {dimension_numbers = #tpu.dot_dimension_numbers<[2], [2], [1], [1], [0, 0, 0, 1, 1, 1], [0], [0]>} : vector<4x8x8xbf16>, vector<4x8x8xbf16>, vector<4x8x8xf32> -> vector<4x8x8xf32>
    %cst_53 = arith.constant 0.176776692 : f32
    %154 = vector.broadcast %cst_53 : f32 to vector<4x8x8xf32>
    %155 = arith.mulf %153, %154 : vector<4x8x8xf32>
    %cst_54 = arith.constant dense<0xFF800000> : vector<4x8xf32>
    %156 = vector.multi_reduction <maximumf>, %155, %cst_54 [2] : vector<4x8x8xf32> to vector<4x8xf32>
    %157 = vector.shape_cast %156 : vector<4x8xf32> to vector<4x8x1xf32>
    %158 = vector.broadcast %157 : vector<4x8x1xf32> to vector<4x8x8xf32>
    %159 = arith.subf %155, %158 : vector<4x8x8xf32>
    %160 = math.exp %159 : vector<4x8x8xf32>
    %cst_55 = arith.constant dense<0.000000e+00> : vector<4x8xf32>
    %161 = vector.multi_reduction <add>, %160, %cst_55 [2] : vector<4x8x8xf32> to vector<4x8xf32>
    %162 = vector.shape_cast %161 : vector<4x8xf32> to vector<4x8x1xf32>
    %163 = tpu.reciprocal %162 {approx = true} : vector<4x8x1xf32> -> vector<4x8x1xf32>
    %164 = vector.broadcast %163 : vector<4x8x1xf32> to vector<4x8x8xf32>
    %165 = arith.mulf %160, %164 : vector<4x8x8xf32>
    %166 = arith.truncf %165 : vector<4x8x8xf32> to vector<4x8x8xbf16>
    %167 = arith.truncf %150 : vector<4x8x8xf32> to vector<4x8x8xbf16>
    %cst_56 = arith.constant dense<0.000000e+00> : vector<4x8x8xf32>
    %168 = tpu.matmul %166, %167, %cst_56 {dimension_numbers = #tpu.dot_dimension_numbers<[2], [1], [1], [2], [0, 0, 0, 1, 1, 2], [0], [0]>} : vector<4x8x8xbf16>, vector<4x8x8xbf16>, vector<4x8x8xf32> -> vector<4x8x8xf32>
    %169 = vector.extract_strided_slice %124 {offsets = [0, 0, 16], sizes = [4, 8, 8], strides = [1, 1, 1]} : vector<4x8x32xf32> to vector<4x8x8xf32>
    %170 = vector.extract_strided_slice %125 {offsets = [0, 0, 16], sizes = [4, 8, 8], strides = [1, 1, 1]} : vector<4x8x32xf32> to vector<4x8x8xf32>
    %171 = vector.extract_strided_slice %126 {offsets = [0, 0, 16], sizes = [4, 8, 8], strides = [1, 1, 1]} : vector<4x8x32xf32> to vector<4x8x8xf32>
    %172 = arith.truncf %169 : vector<4x8x8xf32> to vector<4x8x8xbf16>
    %173 = arith.truncf %170 : vector<4x8x8xf32> to vector<4x8x8xbf16>
    %cst_57 = arith.constant dense<0.000000e+00> : vector<4x8x8xf32>
    %174 = tpu.matmul %172, %173, %cst_57 {dimension_numbers = #tpu.dot_dimension_numbers<[2], [2], [1], [1], [0, 0, 0, 1, 1, 1], [0], [0]>} : vector<4x8x8xbf16>, vector<4x8x8xbf16>, vector<4x8x8xf32> -> vector<4x8x8xf32>
    %cst_58 = arith.constant 0.176776692 : f32
    %175 = vector.broadcast %cst_58 : f32 to vector<4x8x8xf32>
    %176 = arith.mulf %174, %175 : vector<4x8x8xf32>
    %cst_59 = arith.constant dense<0xFF800000> : vector<4x8xf32>
    %177 = vector.multi_reduction <maximumf>, %176, %cst_59 [2] : vector<4x8x8xf32> to vector<4x8xf32>
    %178 = vector.shape_cast %177 : vector<4x8xf32> to vector<4x8x1xf32>
    %179 = vector.broadcast %178 : vector<4x8x1xf32> to vector<4x8x8xf32>
    %180 = arith.subf %176, %179 : vector<4x8x8xf32>
    %181 = math.exp %180 : vector<4x8x8xf32>
    %cst_60 = arith.constant dense<0.000000e+00> : vector<4x8xf32>
    %182 = vector.multi_reduction <add>, %181, %cst_60 [2] : vector<4x8x8xf32> to vector<4x8xf32>
    %183 = vector.shape_cast %182 : vector<4x8xf32> to vector<4x8x1xf32>
    %184 = tpu.reciprocal %183 {approx = true} : vector<4x8x1xf32> -> vector<4x8x1xf32>
    %185 = vector.broadcast %184 : vector<4x8x1xf32> to vector<4x8x8xf32>
    %186 = arith.mulf %181, %185 : vector<4x8x8xf32>
    %187 = arith.truncf %186 : vector<4x8x8xf32> to vector<4x8x8xbf16>
    %188 = arith.truncf %171 : vector<4x8x8xf32> to vector<4x8x8xbf16>
    %cst_61 = arith.constant dense<0.000000e+00> : vector<4x8x8xf32>
    %189 = tpu.matmul %187, %188, %cst_61 {dimension_numbers = #tpu.dot_dimension_numbers<[2], [1], [1], [2], [0, 0, 0, 1, 1, 2], [0], [0]>} : vector<4x8x8xbf16>, vector<4x8x8xbf16>, vector<4x8x8xf32> -> vector<4x8x8xf32>
    %190 = vector.extract_strided_slice %124 {offsets = [0, 0, 24], sizes = [4, 8, 8], strides = [1, 1, 1]} : vector<4x8x32xf32> to vector<4x8x8xf32>
    %191 = vector.extract_strided_slice %125 {offsets = [0, 0, 24], sizes = [4, 8, 8], strides = [1, 1, 1]} : vector<4x8x32xf32> to vector<4x8x8xf32>
    %192 = vector.extract_strided_slice %126 {offsets = [0, 0, 24], sizes = [4, 8, 8], strides = [1, 1, 1]} : vector<4x8x32xf32> to vector<4x8x8xf32>
    %193 = arith.truncf %190 : vector<4x8x8xf32> to vector<4x8x8xbf16>
    %194 = arith.truncf %191 : vector<4x8x8xf32> to vector<4x8x8xbf16>
    %cst_62 = arith.constant dense<0.000000e+00> : vector<4x8x8xf32>
    %195 = tpu.matmul %193, %194, %cst_62 {dimension_numbers = #tpu.dot_dimension_numbers<[2], [2], [1], [1], [0, 0, 0, 1, 1, 1], [0], [0]>} : vector<4x8x8xbf16>, vector<4x8x8xbf16>, vector<4x8x8xf32> -> vector<4x8x8xf32>
    %cst_63 = arith.constant 0.176776692 : f32
    %196 = vector.broadcast %cst_63 : f32 to vector<4x8x8xf32>
    %197 = arith.mulf %195, %196 : vector<4x8x8xf32>
    %cst_64 = arith.constant dense<0xFF800000> : vector<4x8xf32>
    %198 = vector.multi_reduction <maximumf>, %197, %cst_64 [2] : vector<4x8x8xf32> to vector<4x8xf32>
    %199 = vector.shape_cast %198 : vector<4x8xf32> to vector<4x8x1xf32>
    %200 = vector.broadcast %199 : vector<4x8x1xf32> to vector<4x8x8xf32>
    %201 = arith.subf %197, %200 : vector<4x8x8xf32>
    %202 = math.exp %201 : vector<4x8x8xf32>
    %cst_65 = arith.constant dense<0.000000e+00> : vector<4x8xf32>
    %203 = vector.multi_reduction <add>, %202, %cst_65 [2] : vector<4x8x8xf32> to vector<4x8xf32>
    %204 = vector.shape_cast %203 : vector<4x8xf32> to vector<4x8x1xf32>
    %205 = tpu.reciprocal %204 {approx = true} : vector<4x8x1xf32> -> vector<4x8x1xf32>
    %206 = vector.broadcast %205 : vector<4x8x1xf32> to vector<4x8x8xf32>
    %207 = arith.mulf %202, %206 : vector<4x8x8xf32>
    %208 = arith.truncf %207 : vector<4x8x8xf32> to vector<4x8x8xbf16>
    %209 = arith.truncf %192 : vector<4x8x8xf32> to vector<4x8x8xbf16>
    %cst_66 = arith.constant dense<0.000000e+00> : vector<4x8x8xf32>
    %210 = tpu.matmul %208, %209, %cst_66 {dimension_numbers = #tpu.dot_dimension_numbers<[2], [1], [1], [2], [0, 0, 0, 1, 1, 2], [0], [0]>} : vector<4x8x8xbf16>, vector<4x8x8xbf16>, vector<4x8x8xf32> -> vector<4x8x8xf32>
    %211 = tpu.concatenate %147, %168, %189, %210 in 2 : vector<4x8x8xf32>, vector<4x8x8xf32>, vector<4x8x8xf32>, vector<4x8x8xf32> -> vector<4x8x32xf32>
    %212 = arith.addf %124, %211 : vector<4x8x32xf32>
    %213 = vector.shape_cast %212 : vector<4x8x32xf32> to vector<32x32xf32>
    %214 = arith.truncf %213 : vector<32x32xf32> to vector<32x32xbf16>
    %cst_67 = arith.constant dense<0.000000e+00> : vector<32x32xf32>
    %215 = tpu.matmul %214, %116, %cst_67 {dimension_numbers = #tpu.dot_dimension_numbers<[1], [0], [0], [1], [0, 0, 1, 1], [], []>} : vector<32x32xbf16>, vector<32x32xbf16>, vector<32x32xf32> -> vector<32x32xf32>
    %216 = vector.broadcast %118 : vector<1x32xf32> to vector<32x32xf32>
    %217 = arith.addf %215, %216 : vector<32x32xf32>
    %cst_68 = arith.constant 0.000000e+00 : f32
    %218 = vector.broadcast %cst_68 : f32 to vector<32x32xf32>
    %219 = arith.maximumf %217, %218 : vector<32x32xf32>
    %220 = arith.addf %213, %219 : vector<32x32xf32>
    %c0_69 = arith.constant 0 : index
    %c0_70 = arith.constant 0 : index
    %221 = vector.load %arg6[%c0_69, %c0_70] : memref<32x32xf32, #tpu.memory_space<vmem>>, vector<32x32xf32>
    tpu.vector_store %arg6[%c0_69, %c0_70], %220 {strides = array<i32>} : memref<32x32xf32, #tpu.memory_space<vmem>>, vector<32x32xf32>,
    return
  }
  func.func @transform_0(%arg0: i32) -> (i32, i32) {
    %c0_i32 = arith.constant 0 : i32
    %c0_i32_0 = arith.constant 0 : i32
    return %arg0, %c0_i32 : i32, i32
  }
  func.func @transform_1(%arg0: i32) -> (i32, i32, i32) {
    %c0_i32 = arith.constant 0 : i32
    %c0_i32_0 = arith.constant 0 : i32
    %c0_i32_1 = arith.constant 0 : i32
    %c0_i32_2 = arith.constant 0 : i32
    return %c0_i32, %c0_i32_0, %c0_i32_1 : i32, i32, i32
  }
  func.func @transform_2(%arg0: i32) -> (i32, i32, i32) {
    %c0_i32 = arith.constant 0 : i32
    %c0_i32_0 = arith.constant 0 : i32
    %c0_i32_1 = arith.constant 0 : i32
    %c0_i32_2 = arith.constant 0 : i32
    return %c0_i32, %c0_i32_0, %c0_i32_1 : i32, i32, i32
  }
  func.func @transform_3(%arg0: i32) -> (i32, i32, i32) {
    %c0_i32 = arith.constant 0 : i32
    %c0_i32_0 = arith.constant 0 : i32
    %c0_i32_1 = arith.constant 0 : i32
    %c0_i32_2 = arith.constant 0 : i32
    return %c0_i32, %c0_i32_0, %c0_i32_1 : i32, i32, i32
  }
  func.func @transform_4(%arg0: i32) -> (i32, i32, i32) {
    %c0_i32 = arith.constant 0 : i32
    %c0_i32_0 = arith.constant 0 : i32
    %c0_i32_1 = arith.constant 0 : i32
    %c0_i32_2 = arith.constant 0 : i32
    return %c0_i32, %c0_i32_0, %c0_i32_1 : i32, i32, i32
  }
  func.func @transform_5(%arg0: i32) -> (i32, i32) {
    %c0_i32 = arith.constant 0 : i32
    %c0_i32_0 = arith.constant 0 : i32
    return %arg0, %c0_i32 : i32, i32
  }
}

</mosaic_0001>

<bundles_post_ra>
// kernel: tpu_custom_call.1
= control target key start
LH: loop header
LB: loop body
LE: loop exit
PB: predicated region body
PF: predicated region fallthrough
CT: control target
= control target key end

     0   :  { %s6680_s18 = smov 0   ;;  %s9790_s0 = inlined_call_operand.vmem [shape: f32[128,32], index: 0, kind: input, shape index: {}]   ;;  %s9791_s1 = inlined_call_operand.vmem [shape: bf16[2,32,96], index: 1, kind: input, shape index: {}]   ;;  %s9792_s2 = inlined_call_operand.vmem [shape: f32[2,1,96], index: 2, kind: input, shape index: {}]   ;;  %s9793_s3 = inlined_call_operand.vmem [shape: bf16[2,32,32], index: 3, kind: input, shape index: {}]   ;;  %s9794_s4 = inlined_call_operand.vmem [shape: f32[2,1,32], index: 4, kind: input, shape index: {}]   ;;  %s9795_s5 = inlined_call_operand.vmem [shape: f32[128,32], index: 5, kind: output, shape index: {}]  }
   0x1 LB: > { %s6187_s19 = sadd.s32 4294967295, %s6632_s18   ;;  %p6191_p0 = scmp.ge.s32.totalorder %s6632_s18, 1  ;;  %s6632_s18 = sphi %s6680_s18, %s15_s18  }
   0x2   : > { %p188_p1 = scmp.lt.s32.totalorder %s6632_s18, 5 }
   0x4   : > { %p189_p2 = pnand %p6191_p0, %p188_p1 }
   0x5   : > { %s6192_s22 = sshll.u32 (!%p189_p2), %s6187_s19, 2  ;;  %s6634_s6 = smov (!%p189_p2), 88  }
   0x6   : > { %192 = sbr.rel (%p189_p2) target bundleno = 2564 (0xa04), region = 40  ;;  %p217_p3 = scmp.lt.s32.totalorder (!%p189_p2), %s6192_s22, 15 }
   0x7   : > { %s6635_s7 = smov (!%p189_p2), 112   ;;  %s6636_s8 = smov (!%p189_p2), 104  }
   0x8   : > { %s6637_s9 = smov (!%p189_p2), 80   ;;  %s6638_s10 = smov (!%p189_p2), 72  }
   0x9   : > { %s6639_s11 = smov (!%p189_p2), 120   ;;  %s6640_s12 = smov (!%p189_p2), 96  }
   0xa   : > { %s6641_s13 = smov (!%p189_p2), 64   ;;  %s6642_s14 = smov (!%p189_p2), 48  }
   0xb   : > { %v6313_v0 = vld [vmem:[%s9791_s1 + $0x8] sm:$0xff]  ;;  %v6312_v1 = vld [vmem:[%s9791_s1] sm:$0xff]  ;;  %s9841_s22 = smov (!%p217_p3, %s6192_s22), 15  ;;  %vm260_vm0 = vcmask 261120   ;;  %s6643_s15 = smov 56   ;;  %vm423_vm1 = vcmask 1047556  }
   0xc   : > { %273 = vmatpush.bf16.msra.mxu0 %v6313_v0  ;;  %s6193_s25 = sshll.u32 %s9841_s22, 3  ;;  %v6494_v8 = vld [vmem:[%s9792_s2] ss:$0 sm:$0xff]  ;;  %s6644_s16 = smov 40   ;;  %v6645_v22 = vmov 1983009808  }
   0xd   : > { %s220_s28 = scalar_lea.vmem %s9790_s0, %s6193_s25  ;;  %v428_v23 = vunpack.c.l.s4 %v6645_v22  ;;  %v6646_v36 = vmov 1934713408   ;;  %vm1791_vm2 = vcmask 64512   ;;  %vm2323_vm3 = vcmask 1043456   ;;  %s6647_s17 = smov 16  }
   0xe   : > { %v229_v2 = vld [vmem:[%s220_s28] sm:$0xff]  ;;  %v230_v3 = vld [vmem:[%s220_s28 + $0x8] sm:$0xff]  ;;  %v231_v5 = vld [vmem:[%s220_s28 + $0x10] sm:$0xff]  ;;  %v476_v37 = vunpack.c.l.s4 %v6646_v36  ;;  %s6648_s19 = smov 8   ;;  %s6649_s20 = smov 24   ;;  %vm3122_vm4 = vcmask 195584  }
   0xf   : > { %v243_v4 = vpack.c.bf16 %v230_v3, %v229_v2  ;;  %v232_v6 = vld [vmem:[%s220_s28 + $0x18] sm:$0xff]  ;;  %v6784_v28 = vunpack.c.0.s8 %v428_v23  ;;  %vm3117_vm5 = vcmask 130048  }
  0x10   : > { %274 = vmatpush.bf16.msra.mxu0 %v6312_v1  ;;  %v244_v7 = vpack.c.bf16 %v232_v6, %v231_v5  ;;  %v6796_v47 = vunpack.c.0.s8 %v476_v37 }
  0x13   : > { %6204 = vmatmul.msk.bf16.vlgmr.msra.gmra.mxu0 %vm260_vm0, %v243_v4 }
  0x23   : > { %6205 = vmatmul.msk.bf16.gmra.mxu0 %vm260_vm0, %v244_v7 }
  0x90   : > { %v276_v9 = vpop.f32.mrf.mxu0 }
  0x91   : > { %v6707_v10 = vadd.f32 %v6494_v8, %v276_v9 }
  0x93   : > { %338 = vrot.lane.b32.xlu2 %v6707_v10, %s6634_s6  ;;  %302 = vrot.lane.b32.xlu1 %v6707_v10, %s6635_s7  ;;  %v425_v27 = vrot.slane %v6707_v10, 4 }
  0x94   : > { %314 = vrot.lane.b32.xlu0 %v6707_v10, %s6636_s8 }
  0x98   : > { %v278_v11 = vpop.f32.mrf.mxu0 }
  0x99   : > { %v6721_v12 = vadd.f32 %v6494_v8, %v278_v11 }
  0x9b   : > { %350 = vrot.lane.b32.xlu2 %v6707_v10, %s6637_s9  ;;  %362 = vrot.lane.b32.xlu1 %v6707_v10, %s6638_s10  ;;  %v6344_v17 = vpack.i.bf16 %v6721_v12, %v6707_v10  ;;  %v593_v49 = vrot.slane %v6721_v12, 4 }
  0x9c   : > { %290 = vrot.lane.b32.xlu0 %v6707_v10, %s6639_s11 }
  0xa0   : > { %v281_v13 = vpop.f32.mrf.mxu0 }
  0xa1   : > { %v6735_v14 = vadd.f32 %v6494_v8, %v281_v13 }
  0xa3   : > { %316 = vrot.lane.b32.xlu2 %v6721_v12, %s6636_s8  ;;  %292 = vrot.lane.b32.xlu1 %v6721_v12, %s6639_s11  ;;  %v761_v56 = vrot.slane %v6735_v14, 4 }
  0xa4   : > { %326 = vrot.lane.b32.xlu0 %v6707_v10, %s6640_s12 }
  0xa8   : > { %v283_v15 = vpop.f32.mrf.mxu0 }
  0xa9   : > { %v6755_v16 = vadd.f32 %v6494_v8, %v283_v15 }
  0xab   : > { %328 = vrot.lane.b32.xlu2 %v6721_v12, %s6640_s12  ;;  %304 = vrot.lane.b32.xlu1 %v6721_v12, %s6635_s7  ;;  %v929_v57 = vrot.slane %v6755_v16, 4 }
  0xac   : > { %340 = vrot.lane.b32.xlu0 %v6721_v12, %s6634_s6 }
  0xb3   : > { %294 = vrot.lane.b32.xlu2 %v6735_v14, %s6639_s11  ;;  %352 = vrot.lane.b32.xlu1 %v6721_v12, %s6637_s9 }
  0xb4   : > { %364 = vrot.lane.b32.xlu0 %v6721_v12, %s6638_s10 }
  0xbb   : > { %306 = vrot.lane.b32.xlu2 %v6735_v14, %s6635_s7  ;;  %342 = vrot.lane.b32.xlu1 %v6735_v14, %s6634_s6 }
  0xbc   : > { %318 = vrot.lane.b32.xlu0 %v6735_v14, %s6636_s8 }
  0xc3   : > { %354 = vrot.lane.b32.xlu2 %v6735_v14, %s6637_s9  ;;  %366 = vrot.lane.b32.xlu1 %v6735_v14, %s6638_s10 }
  0xc4   : > { %330 = vrot.lane.b32.xlu0 %v6735_v14, %s6640_s12 }
  0xcb   : > { %344 = vrot.lane.b32.xlu2 %v6755_v16, %s6634_s6  ;;  %320 = vrot.lane.b32.xlu1 %v6755_v16, %s6636_s8 }
  0xcc   : > { %296 = vrot.lane.b32.xlu0 %v6755_v16, %s6639_s11 }
  0xd3   : > { %368 = vrot.lane.b32.xlu2 %v6755_v16, %s6638_s10  ;;  %332 = vrot.lane.b32.xlu1 %v6755_v16, %s6640_s12 }
  0xd4   : > { %308 = vrot.lane.b32.xlu0 %v6755_v16, %s6635_s7 }
  0xdb   : > { %6345 = vrot.lane.b32.xlu2 %v6344_v17, %s6641_s13  ;;  %6355 = vrot.lane.b32.xlu1 %v6344_v17, %s6642_s14 }
  0xdc   : > { %356 = vrot.lane.b32.xlu0 %v6755_v16, %s6637_s9 }
  0xe4   : > { %6350 = vrot.lane.b32.xlu0 %v6344_v17, %s6643_s15 }
  0xec   : > { %6360 = vrot.lane.b32.xlu0 %v6344_v17, %s6644_s16 }
  0xed   : > { %v339_v18 = vpop.permute.xlu2 %338 }
  0xee   : > { %v461_v38 = vrot.slane %v339_v18, 4 }
  0xf5   : > { %v6777_v19 = vpop.permute.xlu2 %350 }
  0xf6   : > { %v447_v54 = vrot.slane %v6777_v19, 4 }
  0xfd   : > { %v6779_v20 = vpop.permute.xlu2 %316 }
  0xfe   : > { %v603_v58 = vrot.slane %v6779_v20, 4 }
 0x105   : > { %v6781_v21 = vpop.permute.xlu2 %328  ;;  %v303_v24 = vpop.permute.xlu1 %302 }
 0x106   : > { %v422_v25 = vrot.slane %v303_v24, 4  ;;  %v315_v26 = vpop.permute.xlu0 %314  ;;  %v426_v30 = vsel %vm423_vm1, %v303_v24, %v425_v27  ;;  %v617_v62 = vrot.slane %v6781_v21, 4 }
 0x107   : > { %v434_v32 = vperm.slane %v426_v30, %v6784_v28  ;;  %v435_v33 = vrot.slane %v315_v26, 4 }
 0x108   : > { %v424_v29 = vsel %vm423_vm1, %v422_v25, %v6707_v10 }
 0x109   : > { %v430_v31 = vperm.slane %v424_v29, %v6784_v28  ;;  %v485_v46 = vrot.slane %v434_v32, 4 }
 0x10b   : > { %v473_v43 = vrot.slane %v430_v31, 4 }
 0x10d   : > { %v6791_v34 = vpop.permute.xlu2 %294  ;;  %v363_v35 = vpop.permute.xlu1 %362 }
 0x10e   : > { %v459_v39 = vrot.slane %v363_v35, 4  ;;  %v291_v40 = vpop.permute.xlu0 %290  ;;  %v462_v44 = vsel %vm423_vm1, %v363_v35, %v461_v38  ;;  %v773_v9 = vrot.slane %v6791_v34, 4 }
 0x10f   : > { %v436_v41 = vsel %vm423_vm1, %v435_v33, %v291_v40  ;;  %v437_v42 = vrot.slane %v291_v40, 4  ;;  %v470_v55 = vperm.slane %v462_v44, %v6784_v28 }
 0x110   : > { %v442_v45 = vperm.slane %v436_v41, %v6784_v28  ;;  %v460_v50 = vsel %vm423_vm1, %v459_v39, %v339_v18 }
 0x111   : > { %v438_v48 = vsel %vm423_vm1, %v315_v26, %v437_v42  ;;  %v466_v63 = vperm.slane %v460_v50, %v6784_v28  ;;  %v507_v11 = vrot.slane %v470_v55, 4 }
 0x112   : > { %v446_v51 = vperm.slane %v438_v48, %v6784_v28  ;;  %v471_v52 = vrot.slane %v442_v45, 4  ;;  %v474_v53 = vsel %vm423_vm1, %v442_v45, %v473_v43 }
 0x113   : > { %v482_v1 = vperm.slane %v474_v53, %v6796_v47  ;;  %v495_v24 = vrot.slane %v466_v63, 4 }
 0x114   : > { %v472_v59 = vsel %vm423_vm1, %v471_v52, %v430_v31  ;;  %v483_v60 = vrot.slane %v446_v51, 4  ;;  %v486_v61 = vsel %vm423_vm1, %v446_v51, %v485_v46 }
 0x115   : > { %v478_v0 = vperm.slane %v472_v59, %v6796_v47  ;;  %v307_v2 = vpop.permute.xlu2 %306  ;;  %v293_v3 = vpop.permute.xlu1 %292  ;;  %v6820_v15 = vperm.slane %v486_v61, %v6796_v47  ;;  %v525_v30 = vrot.slane %v482_v1, 4 }
 0x116   : > { %v484_v4 = vsel %vm423_vm1, %v483_v60, %v434_v32  ;;  %v759_v5 = vrot.slane %v307_v2, 4  ;;  %v762_v6 = vsel %vm423_vm1, %v307_v2, %v761_v56  ;;  %v604_v7 = vsel %vm423_vm1, %v603_v58, %v293_v3  ;;  %v327_v8 = vpop.permute.xlu0 %326 }
 0x117   : > { %v490_v13 = vperm.slane %v484_v4, %v6796_v47  ;;  %v6825_v18 = vperm.slane %v762_v6, %v6784_v28  ;;  %v605_v22 = vrot.slane %v293_v3, 4  ;;  %v448_v23 = vsel %vm423_vm1, %v447_v54, %v327_v8 }
 0x118   : > { %v760_v17 = vsel %vm423_vm1, %v759_v5, %v6735_v14  ;;  %v6832_v26 = vperm.slane %v604_v7, %v6784_v28  ;;  %v449_v27 = vrot.slane %v327_v8, 4  ;;  %v521_v29 = vrot.slane %v478_v0, 4 }
 0x119   : > { %v6829_v25 = vperm.slane %v760_v17, %v6784_v28  ;;  %v606_v31 = vsel %vm423_vm1, %v6779_v20, %v605_v22  ;;  %v454_v32 = vperm.slane %v448_v23, %v6784_v28  ;;  %v529_v33 = vrot.slane %v490_v13, 4 }
 0x11a   : > { %v533_v35 = vrot.slane %v6820_v15, 4  ;;  %v614_v36 = vperm.slane %v606_v31, %v6784_v28  ;;  %v450_v37 = vsel %vm423_vm1, %v6777_v19, %v449_v27  ;;  %v821_v38 = vrot.slane %v6825_v18, 4 }
 0x11b   : > { %v458_v39 = vperm.slane %v450_v37, %v6784_v28  ;;  %v496_v40 = vsel %vm423_vm1, %v495_v24, %v454_v32  ;;  %v497_v41 = vrot.slane %v454_v32, 4  ;;  %v809_v42 = vrot.slane %v6829_v25, 4 }
 0x11c   : > { %v639_v20 = vrot.slane %v6832_v26, 4  ;;  %v651_v43 = vrot.slane %v614_v36, 4  ;;  %v502_v44 = vperm.slane %v496_v40, %v6796_v47 }
 0x11d   : > { %v6847_v45 = vpop.permute.xlu2 %354  ;;  %v305_v46 = vpop.permute.xlu1 %304  ;;  %v498_v48 = vsel %vm423_vm1, %v466_v63, %v497_v41  ;;  %v508_v19 = vsel %vm423_vm1, %v507_v11, %v458_v39  ;;  %v509_v50 = vrot.slane %v458_v39, 4 }
 0x11e   : > { %v783_v51 = vrot.slane %v6847_v45, 4  ;;  %v341_v52 = vpop.permute.xlu0 %340  ;;  %v506_v53 = vperm.slane %v498_v48, %v6796_v47  ;;  %v514_v54 = vperm.slane %v508_v19, %v6796_v47  ;;  %v519_v56 = vrot.slane %v502_v44, 4 }
 0x11f   : > { %v522_v58 = vsel %vm423_vm1, %v502_v44, %v521_v29  ;;  %v510_v59 = vsel %vm423_vm1, %v470_v55, %v509_v50  ;;  %v591_v61 = vrot.slane %v305_v46, 4  ;;  %v594_v63 = vsel %vm423_vm1, %v305_v46, %v593_v49 }
 0x120   : > { %v1109_v60 = vrot.slane %v522_v58, 4  ;;  %v518_v2 = vperm.slane %v510_v59, %v6796_v47  ;;  %v520_v3 = vsel %vm423_vm1, %v519_v56, %v478_v0  ;;  %v523_v4 = vrot.slane %v506_v53, 4 }
 0x121   : > { %v526_v5 = vsel %vm423_vm1, %v506_v53, %v525_v30  ;;  %v527_v6 = vrot.slane %v514_v54, 4  ;;  %v6863_v7 = vsel %vm423_vm1, %v514_v54, %v529_v33  ;;  %v1097_v8 = vrot.slane %v520_v3, 4 }
 0x122   : > { %v1107_v11 = vrot.slane %v526_v5, 4  ;;  %v524_v55 = vsel %vm423_vm1, %v523_v4, %v482_v1  ;;  %v531_v17 = vrot.slane %v518_v2, 4  ;;  %v1133_v22 = vrot.slane %v6863_v7, 4 }
 0x123   : > { %v592_v49 = vsel %vm423_vm1, %v591_v61, %v6721_v12  ;;  %v1095_v23 = vrot.slane %v524_v55, 4  ;;  %v602_v27 = vperm.slane %v594_v63, %v6784_v28  ;;  %v629_v30 = vrot.slane %v341_v52, 4 }
 0x124   : > { %v1108_v0 = vsel %vm423_vm1, %v1107_v11, %v522_v58  ;;  %v598_v24 = vperm.slane %v592_v49, %v6784_v28  ;;  %v6876_v1 = vsel %vm423_vm1, %v527_v6, %v490_v13  ;;  %v6880_v33 = vsel %vm423_vm1, %v531_v17, %v6820_v15 }
 0x125   : > { %v6873_v29 = vperm.slane %v1108_v0, %v6784_v28  ;;  %v345_v31 = vpop.permute.xlu2 %344  ;;  %v353_v32 = vpop.permute.xlu1 %352  ;;  %v6883_v37 = vsel %vm423_vm1, %v1095_v23, %v520_v3  ;;  %v652_v41 = vsel %vm423_vm1, %v651_v43, %v602_v27  ;;  %v653_v48 = vrot.slane %v602_v27, 4 }
 0x126   : > { %v640_v39 = vsel %vm423_vm1, %v639_v20, %v598_v24  ;;  %v641_v40 = vrot.slane %v598_v24, 4  ;;  %v365_v44 = vpop.permute.xlu0 %364  ;;  %v658_v13 = vperm.slane %v652_v41, %v6796_v47  ;;  %v965_v19 = vrot.slane %v345_v31, 4 }
 0x127   : > { %v6888_v46 = vperm.slane %v640_v39, %v6796_v47  ;;  %v615_v53 = vrot.slane %v353_v32, 4  ;;  %v618_v54 = vsel %vm423_vm1, %v353_v32, %v617_v62  ;;  %v627_v20 = vrot.slane %v365_v44, 4 }
 0x128   : > { %v642_v50 = vsel %vm423_vm1, %v6832_v26, %v641_v40  ;;  %v654_v43 = vsel %vm423_vm1, %v614_v36, %v653_v48  ;;  %v697_v59 = vrot.slane %v658_v13, 4  ;;  %v626_v26 = vperm.slane %v618_v54, %v6784_v28 }
 0x129   : > { %v6897_v56 = vperm.slane %v642_v50, %v6796_v47  ;;  %v689_v58 = vrot.slane %v6888_v46, 4  ;;  %v662_v61 = vperm.slane %v654_v43, %v6796_v47  ;;  %v616_v63 = vsel %vm423_vm1, %v615_v53, %v6781_v21 }
 0x12a   : > { %v628_v3 = vsel %vm423_vm1, %v627_v20, %v341_v52  ;;  %v622_v4 = vperm.slane %v616_v63, %v6784_v28  ;;  %v630_v6 = vsel %vm423_vm1, %v365_v44, %v629_v30  ;;  %v677_v17 = vrot.slane %v626_v26, 4 }
 0x12b   : > { %v693_v62 = vrot.slane %v6897_v56, 4  ;;  %v634_v36 = vperm.slane %v628_v3, %v6784_v28  ;;  %v701_v11 = vrot.slane %v662_v61, 4  ;;  %v638_v49 = vperm.slane %v630_v6, %v6784_v28 }
 0x12c   : > { %v6914_v21 = vsel %vm423_vm1, %v518_v2, %v533_v35  ;;  %v665_v23 = vrot.slane %v622_v4, 4  ;;  %v1098_v24 = vsel %vm423_vm1, %v524_v55, %v1097_v8  ;;  %v1110_v27 = vsel %vm423_vm1, %v526_v5, %v1109_v60 }
 0x12d   : > { %v663_v0 = vrot.slane %v634_v36, 4  ;;  %v369_v52 = vpop.permute.xlu2 %368  ;;  %v675_v32 = vrot.slane %v638_v49, 4  ;;  %v678_v30 = vsel %vm423_vm1, %v638_v49, %v677_v17  ;;  %v6953_v17 = vpop.permute.xlu1 %342 }
 0x12e   : > { %v963_v39 = vrot.slane %v369_v52, 4  ;;  %v966_v40 = vsel %vm423_vm1, %v369_v52, %v965_v19  ;;  %v666_v15 = vsel %vm423_vm1, %v634_v36, %v665_v23  ;;  %v686_v35 = vperm.slane %v678_v30, %v6796_v47  ;;  %v319_v63 = vpop.permute.xlu0 %318 }
 0x12f   : > { %v664_v41 = vsel %vm423_vm1, %v663_v0, %v622_v4  ;;  %v6924_v2 = vperm.slane %v966_v40, %v6784_v28  ;;  %v6930_v60 = vperm.slane %v666_v15, %v6796_v47  ;;  %v676_v5 = vsel %vm423_vm1, %v675_v32, %v626_v26 }
 0x130   : > { %v6927_v44 = vperm.slane %v664_v41, %v6796_v47  ;;  %v964_v8 = vsel %vm423_vm1, %v963_v39, %v345_v31  ;;  %v682_v55 = vperm.slane %v676_v5, %v6796_v47  ;;  %v699_v48 = vrot.slane %v686_v35, 4 }
 0x131   : > { %v702_v19 = vsel %vm423_vm1, %v686_v35, %v701_v11  ;;  %v6937_v50 = vperm.slane %v964_v8, %v6784_v28  ;;  %v691_v20 = vrot.slane %v6930_v60, 4  ;;  %v774_v32 = vsel %vm423_vm1, %v319_v63, %v773_v9 }
 0x132   : > { %v687_v53 = vrot.slane %v6927_v44, 4  ;;  %v6942_v54 = vsel %vm423_vm1, %v6927_v44, %v689_v58  ;;  %v1297_v43 = vrot.slane %v702_v19, 4  ;;  %v695_v26 = vrot.slane %v682_v55, 4 }
 0x133   : > { %v698_v31 = vsel %vm423_vm1, %v682_v55, %v697_v59  ;;  %v6947_v3 = vsel %vm423_vm1, %v699_v48, %v662_v61  ;;  %v797_v59 = vrot.slane %v6953_v17, 4  ;;  %v771_v61 = vrot.slane %v319_v63, 4 }
 0x134   : > { %v1285_v6 = vrot.slane %v6947_v3, 4  ;;  %v1298_v36 = vsel %vm423_vm1, %v1297_v43, %v698_v31  ;;  %v1299_v11 = vrot.slane %v698_v31, 4  ;;  %v6956_v49 = vsel %vm423_vm1, %v695_v26, %v658_v13 }
 0x135   : > { %v6959_v23 = vperm.slane %v1298_v36, %v6784_v28  ;;  %v1287_v0 = vrot.slane %v6956_v49, 4  ;;  %v1106_v30 = vperm.slane %v1098_v24, %v6784_v28  ;;  %v772_v13 = vsel %vm423_vm1, %v771_v61, %v6791_v34 }
 0x136   : > { %v6964_v52 = vsel %vm423_vm1, %v702_v19, %v1299_v11  ;;  %v782_v39 = vperm.slane %v774_v32, %v6784_v28  ;;  %v1118_v40 = vperm.slane %v1110_v27, %v6784_v28  ;;  %v1119_v41 = vrot.slane %v6880_v33, 4 }
 0x137   : > { %v778_v15 = vperm.slane %v772_v13, %v6784_v28  ;;  %v1121_v35 = vrot.slane %v6876_v1, 4  ;;  %v1131_v5 = vrot.slane %v6914_v21, 4  ;;  %v1134_v9 = vsel %vm423_vm1, %v6914_v21, %v1133_v22 }
 0x138   : > { %v819_v24 = vrot.slane %v782_v39, 4  ;;  %v822_v34 = vsel %vm423_vm1, %v782_v39, %v821_v38  ;;  %v1142_v27 = vperm.slane %v1134_v9, %v6784_v28  ;;  %v1155_v8 = vrot.slane %v1118_v40, 4 }
 0x139   : > { %v807_v55 = vrot.slane %v778_v15, 4  ;;  %v810_v48 = vsel %vm423_vm1, %v778_v15, %v809_v42  ;;  %v6990_v19 = vperm.slane %v822_v34, %v6796_v47  ;;  %v1122_v43 = vsel %vm423_vm1, %v6880_v33, %v1121_v35 }
 0x13a   : > { %v6995_v22 = vperm.slane %v810_v48, %v6796_v47  ;;  %v820_v38 = vsel %vm423_vm1, %v819_v24, %v6825_v18  ;;  %v1130_v21 = vperm.slane %v1122_v43, %v6784_v28  ;;  %v1156_v63 = vsel %vm423_vm1, %v1155_v8, %v1106_v30 }
 0x13b   : > { %v808_v26 = vsel %vm423_vm1, %v807_v55, %v6829_v25  ;;  %v7004_v42 = vperm.slane %v820_v38, %v6796_v47  ;;  %v869_v31 = vrot.slane %v6990_v19, 4  ;;  %v1162_v33 = vperm.slane %v1156_v63, %v6796_v47  ;;  %v367_v55 = vpop.permute.xlu1 %366 }
 0x13c   : > { %v7009_v36 = vperm.slane %v808_v26, %v6796_v47  ;;  %v861_v11 = vrot.slane %v6995_v22, 4  ;;  %v1179_v18 = vrot.slane %v1142_v27, 4  ;;  %v1157_v13 = vrot.slane %v1106_v30, 4 }
 0x13d   : > { %v865_v61 = vrot.slane %v7004_v42, 4  ;;  %v1201_v32 = vrot.slane %v1162_v33, 4  ;;  %v1181_v39 = vrot.slane %v1130_v21, 4  ;;  %v7017_v35 = vperm.slane %v6883_v37, %v6784_v28 }
 0x13e   : > { %v857_v25 = vrot.slane %v7009_v36, 4  ;;  %v1180_v15 = vsel %vm423_vm1, %v1179_v18, %v1130_v21  ;;  %v1120_v9 = vsel %vm423_vm1, %v1119_v41, %v6876_v1  ;;  %v1158_v34 = vsel %vm423_vm1, %v1118_v40, %v1157_v13  ;;  %v7032_v1 = vpop.permute.xlu2 %6345  ;;  %v331_v41 = vpop.permute.xlu0 %330 }
 0x13f   : > { %v1186_v24 = vperm.slane %v1180_v15, %v6796_v47  ;;  %v1182_v8 = vsel %vm423_vm1, %v1142_v27, %v1181_v39  ;;  %v7025_v30 = vperm.slane %v1120_v9, %v6784_v28  ;;  %v1166_v48 = vperm.slane %v1158_v34, %v6796_v47 }
 0x140   : > { %v1190_v43 = vperm.slane %v1182_v8, %v6796_v47  ;;  %v1132_v37 = vsel %vm423_vm1, %v1131_v5, %v6863_v7  ;;  %v1143_v38 = vrot.slane %v6873_v29, 4 }
 0x141   : > { %v1202_v40 = vsel %vm423_vm1, %v1186_v24, %v1201_v32  ;;  %v1199_v21 = vrot.slane %v1186_v24, 4  ;;  %v7036_v27 = vperm.slane %v1132_v37, %v6784_v28  ;;  %v1169_v63 = vrot.slane %v7025_v30, 4 }
 0x142   : > { %v1776_v26 = vpack.c.bf16 %v1202_v40, %v1202_v40  ;;  %v1205_v18 = vrot.slane %v1166_v48, 4  ;;  %v1203_v13 = vrot.slane %v1190_v43, 4  ;;  %v1144_v39 = vsel %vm423_vm1, %v1143_v38, %v7017_v35 }
 0x143   : > { %v1200_v7 = vsel %vm423_vm1, %v1199_v21, %v1162_v33  ;;  %v1150_v5 = vperm.slane %v1144_v39, %v6796_v47  ;;  %v1167_v15 = vrot.slane %v7036_v27, 4  ;;  %v6348_v32 = vunpack.i.h.bf16 %v7032_v1 }
 0x144   : > { %v1815_v9 = vsel %vm1791_vm2, %v1776_v26, 0  ;;  %v1775_v24 = vpack.c.bf16 %v1200_v7, %v1200_v7  ;;  %v1206_v34 = vsel %vm423_vm1, %v1190_v43, %v1205_v18  ;;  %v1204_v8 = vsel %vm423_vm1, %v1203_v13, %v1166_v48 }
 0x145   : > { %1824 = vmatpush.bf16.xpose.msra.mxu3 %v1815_v9  ;;  %v1778_v37 = vpack.c.bf16 %v1206_v34, %v1206_v34  ;;  %v1777_v40 = vpack.c.bf16 %v1204_v8, %v1204_v8  ;;  %v1168_v38 = vsel %vm423_vm1, %v1167_v15, %v7025_v30  ;;  %v1193_v33 = vrot.slane %v1150_v5, 4 }
 0x146   : > { %v1796_v21 = vsel %vm1791_vm2, %v1775_v24, 0  ;;  %v1174_v39 = vperm.slane %v1168_v38, %v6796_v47  ;;  %v7054_v58 = vrot.slane %v6348_v32, 4  ;;  %v6347_v26 = vunpack.i.l.bf16 %v7032_v1 }
 0x147   : > { %1805 = vmatpush.bf16.xpose.msra.mxu1 %v1796_v21  ;;  %v1853_v48 = vsel %vm1791_vm2, %v1778_v37, 0  ;;  %v1834_v43 = vsel %vm1791_vm2, %v1777_v40, 0  ;;  %v795_v18 = vrot.slane %v367_v55, 4  ;;  %v798_v13 = vsel %vm423_vm1, %v367_v55, %v797_v59  ;;  %v321_v55 = vpop.permute.xlu1 %320 }
 0x148   : > { %v1194_v7 = vsel %vm423_vm1, %v1174_v39, %v1193_v33  ;;  %v7065_v15 = vrot.slane %v6347_v26, 4  ;;  %v806_v9 = vperm.slane %v798_v13, %v6784_v28  ;;  %v784_v24 = vsel %vm423_vm1, %v783_v51, %v331_v41 }
 0x149   : > { %v1760_v34 = vpack.c.bf16 %v1194_v7, %v1194_v7  ;;  %v796_v8 = vsel %vm423_vm1, %v795_v18, %v6953_v17  ;;  %v785_v37 = vrot.slane %v331_v41, 4  ;;  %v790_v59 = vperm.slane %v784_v24, %v6784_v28 }
 0x14a   : > { %v802_v40 = vperm.slane %v796_v8, %v6784_v28  ;;  %v843_v38 = vrot.slane %v806_v9, 4  ;;  %v1191_v33 = vrot.slane %v1174_v39, 4  ;;  %v939_v21 = vrot.slane %v321_v55, 4 }
 0x14b   : > { %v833_v13 = vrot.slane %v790_v59, 4  ;;  %v7081_v51 = vsel %vm423_vm1, %v687_v53, %v6888_v46 }
 0x14c   : > { %6207 = vmatmul.msk.bf16.vlgmr.msra.gmra.mxu3 %vm1791_vm2, %v1760_v34  ;;  %v831_v17 = vrot.slane %v802_v40, 4  ;;  %v1192_v39 = vsel %vm423_vm1, %v1191_v33, %v1150_v5  ;;  %v7116_v33 = vsel %vm423_vm1, %v691_v20, %v6897_v56  ;;  %v1288_v56 = vsel %vm423_vm1, %v6947_v3, %v1287_v0 }
 0x14d   : > { %1843 = vmatpush.bf16.xpose.msrb.mxu3 %v1834_v43  ;;  %v786_v43 = vsel %vm423_vm1, %v6847_v45, %v785_v37  ;;  %v834_v7 = vsel %vm423_vm1, %v802_v40, %v833_v13  ;;  %v1759_v45 = vpack.c.bf16 %v1192_v39, %v1192_v39  ;;  %v1170_v0 = vsel %vm423_vm1, %v7036_v27, %v1169_v63 }
 0x14e   : > { %v794_v41 = vperm.slane %v786_v43, %v6784_v28  ;;  %v832_v46 = vsel %vm423_vm1, %v831_v17, %v790_v59  ;;  %v7094_v44 = vperm.slane %v834_v7, %v6796_v47 }
 0x14f   : > { %1862 = vmatpush.bf16.xpose.msrb.mxu1 %v1853_v48  ;;  %v297_v48 = vpop.permute.xlu0 %296  ;;  %v838_v5 = vperm.slane %v832_v46, %v6796_v47  ;;  %v1263_v46 = vrot.slane %v7081_v51, 4 }
 0x150   : > { %v941_v4 = vrot.slane %v297_v48, 4  ;;  %v940_v18 = vsel %vm423_vm1, %v939_v21, %v297_v48  ;;  %v844_v53 = vsel %vm423_vm1, %v843_v38, %v794_v41  ;;  %v845_v34 = vrot.slane %v794_v41, 4  ;;  %6206 = vmatmul.msk.bf16.vlgmr.msra.gmra.mxu1 %vm1791_vm2, %v1759_v45 }
 0x151   : > { %v7090_v8 = vperm.slane %v940_v18, %v6784_v28  ;;  %v850_v37 = vperm.slane %v844_v53, %v6796_v47  ;;  %v7110_v38 = vsel %vm423_vm1, %v7094_v44, %v861_v11  ;;  %v855_v48 = vrot.slane %v838_v5, 4 }
 0x152   : > { %v942_v24 = vsel %vm423_vm1, %v321_v55, %v941_v4  ;;  %v846_v55 = vsel %vm423_vm1, %v806_v9, %v845_v34  ;;  %v7124_v9 = vsel %vm423_vm1, %v838_v5, %v857_v25  ;;  %v1439_v13 = vrot.slane %v7110_v38, 4 }
 0x153   : > { %v7101_v40 = vperm.slane %v942_v24, %v6784_v28  ;;  %v975_v4 = vrot.slane %v7090_v8, 4  ;;  %v7119_v21 = vperm.slane %v846_v55, %v6796_v47  ;;  %v863_v43 = vrot.slane %v850_v37, 4 }
 0x154   : > { %v7129_v11 = vsel %vm423_vm1, %v850_v37, %v865_v61  ;;  %v7136_v41 = vsel %vm423_vm1, %v855_v48, %v7009_v36  ;;  %v1440_v7 = vsel %vm423_vm1, %v1439_v13, %v7124_v9  ;;  %v7161_v24 = vsel %vm423_vm1, %v6930_v60, %v693_v62 }
 0x155   : > { %v987_v17 = vrot.slane %v7101_v40, 4  ;;  %v7140_v25 = vsel %vm423_vm1, %v863_v43, %v7004_v42  ;;  %v7147_v61 = vsel %vm423_vm1, %v7119_v21, %v869_v31  ;;  %v7155_v42 = vperm.slane %v1440_v7, %v6784_v28 }
 0x156   : > { %v1463_v36 = vrot.slane %v7147_v61, 4  ;;  %v1261_v31 = vrot.slane %v7116_v33, 4  ;;  %v1273_v34 = vrot.slane %v7161_v24, 4  ;;  %v1275_v5 = vrot.slane %v6942_v54, 4 }
 0x157   : > { %v1264_v62 = vsel %vm423_vm1, %v7116_v33, %v1263_v46  ;;  %v1296_v60 = vperm.slane %v1288_v56, %v6784_v28  ;;  %v1308_v55 = vperm.slane %v6964_v52, %v6784_v28  ;;  %v309_v48 = vpop.permute.xlu0 %308  ;;  %v1145_v7 = vrot.slane %v7017_v35, 4  ;;  %v7191_v52 = vpop.permute.xlu1 %332 }
 0x158   : > { %v1464_v53 = vsel %vm423_vm1, %v1463_v36, %v7129_v11  ;;  %v1272_v43 = vperm.slane %v1264_v62, %v6784_v28  ;;  %v1276_v13 = vsel %vm423_vm1, %v7161_v24, %v1275_v5  ;;  %v1178_v56 = vperm.slane %v1170_v0, %v6796_v47 }
 0x159   : > { %v7174_v37 = vperm.slane %v1464_v53, %v6784_v28  ;;  %v1284_v36 = vperm.slane %v1276_v13, %v6784_v28  ;;  %v1345_v46 = vrot.slane %v1308_v55, 4  ;;  %v1347_v53 = vrot.slane %v1296_v60, 4 }
 0x15a   : > { %v1323_v45 = vrot.slane %v1272_v43, 4  ;;  %v1146_v62 = vsel %vm423_vm1, %v6873_v29, %v1145_v7  ;;  %v927_v35 = vrot.slane %v309_v48, 4  ;;  %v1195_v39 = vrot.slane %v1178_v56, 4 }
 0x15b   : > { %v1321_v20 = vrot.slane %v1284_v36, 4  ;;  %v1346_v30 = vsel %vm423_vm1, %v1345_v46, %v1296_v60  ;;  %v1348_v27 = vsel %vm423_vm1, %v1308_v55, %v1347_v53  ;;  %v1154_v63 = vperm.slane %v1146_v62, %v6796_v47 }
 0x15c   : > { %v1352_v13 = vperm.slane %v1346_v30, %v6796_v47  ;;  %v1324_v0 = vsel %vm423_vm1, %v1284_v36, %v1323_v45  ;;  %v1356_v18 = vperm.slane %v1348_v27, %v6796_v47  ;;  %v928_v7 = vsel %vm423_vm1, %v927_v35, %v6755_v16 }
 0x15d   : > { %v1322_v59 = vsel %vm423_vm1, %v1321_v20, %v1272_v43  ;;  %v1332_v29 = vperm.slane %v1324_v0, %v6796_v47  ;;  %v930_v60 = vsel %vm423_vm1, %v309_v48, %v929_v57  ;;  %v1196_v45 = vsel %vm423_vm1, %v1195_v39, %v1154_v63 }
 0x15e   : > { %v1328_v55 = vperm.slane %v1322_v59, %v6796_v47  ;;  %v1365_v46 = vrot.slane %v1352_v13, 4  ;;  %v1369_v53 = vrot.slane %v1356_v18, 4  ;;  %v1761_v62 = vpack.c.bf16 %v1196_v45, %v1196_v45 }
 0x15f   : > { %v1371_v36 = vrot.slane %v1332_v29, 4  ;;  %v934_v30 = vperm.slane %v928_v7, %v6784_v28  ;;  %v938_v20 = vperm.slane %v930_v60, %v6784_v28  ;;  %v1197_v0 = vrot.slane %v1154_v63, 4 }
 0x160   : > { %v1366_v43 = vsel %vm423_vm1, %v1365_v46, %v1328_v55  ;;  %v1367_v27 = vrot.slane %v1328_v55, 4  ;;  %v1370_v35 = vsel %vm423_vm1, %v1369_v53, %v1332_v29  ;;  %6208 = vmatmul.msk.bf16.vlgmr.msrb.gmra.mxu3 %vm1791_vm2, %v1761_v62  ;;  %v1333_v33 = vrot.slane %v6959_v23, 4 }
 0x161   : > { %v1779_v5 = vpack.c.bf16 %v1366_v43, %v1366_v43  ;;  %v1781_v57 = vpack.c.bf16 %v1370_v35, %v1370_v35  ;;  %v1372_v59 = vsel %vm423_vm1, %v1356_v18, %v1371_v36  ;;  %v976_v39 = vsel %vm423_vm1, %v975_v4, %v934_v30 }
 0x162   : > { %v1368_v48 = vsel %vm423_vm1, %v1352_v13, %v1367_v27  ;;  %v1782_v7 = vpack.c.bf16 %v1372_v59, %v1372_v59  ;;  %v977_v60 = vrot.slane %v934_v30, 4  ;;  %v7222_v46 = vperm.slane %v976_v39, %v6796_v47  ;;  %v6356_v30 = vpop.permute.xlu1 %6355 }
 0x163   : > { %v1872_v29 = vsel %vm1791_vm2, %v1779_v5, 0  ;;  %v1780_v63 = vpack.c.bf16 %v1368_v48, %v1368_v48  ;;  %v1910_v55 = vsel %vm1791_vm2, %v1781_v57, 0  ;;  %v988_v18 = vsel %vm423_vm1, %v987_v17, %v938_v20 }
 0x164   : > { %1881 = vmatpush.bf16.xpose.msra.mxu2 %v1872_v29  ;;  %1919 = vmatpush.bf16.xpose.msrb.mxu0 %v1910_v55  ;;  %v1929_v4 = vsel %vm1791_vm2, %v1782_v7, 0  ;;  %v978_v13 = vsel %vm423_vm1, %v7090_v8, %v977_v60  ;;  %v989_v53 = vrot.slane %v938_v20, 4  ;;  %v7233_v45 = vperm.slane %v988_v18, %v6796_v47 }
 0x165   : > { %v1891_v5 = vsel %vm1791_vm2, %v1780_v63, 0  ;;  %1938 = vmatpush.bf16.xpose.msra.mxu1 %v1929_v4  ;;  %v7237_v36 = vperm.slane %v978_v13, %v6796_v47  ;;  %v1025_v62 = vrot.slane %v7222_v46, 4  ;;  %v1198_v17 = vsel %vm423_vm1, %v1178_v56, %v1197_v0  ;;  %v357_v0 = vpop.permute.xlu0 %356 }
 0x166   : > { %1900 = vmatpush.bf16.xpose.msra.mxu3 %v1891_v5  ;;  %v990_v43 = vsel %vm423_vm1, %v7101_v40, %v989_v53  ;;  %v1033_v8 = vrot.slane %v7233_v45, 4  ;;  %v1762_v20 = vpack.c.bf16 %v1198_v17, %v1198_v17  ;;  %v1262_v27 = vsel %vm423_vm1, %v1261_v31, %v7081_v51 }
 0x167   : > { %v7249_v35 = vperm.slane %v990_v43, %v6796_v47  ;;  %v1029_v57 = vrot.slane %v7237_v36, 4  ;;  %v1268_v56 = vperm.slane %v1262_v27, %v6784_v28  ;;  %v1274_v40 = vsel %vm423_vm1, %v1273_v34, %v6942_v54 }
 0x168   : > { %6209 = vmatmul.msk.bf16.vlgmr.msrb.gmra.mxu1 %vm1791_vm2, %v1762_v20  ;;  %v1280_v59 = vperm.slane %v1274_v40, %v6784_v28  ;;  %v1286_v51 = vsel %vm423_vm1, %v1285_v6, %v6956_v49  ;;  %v6358_v31 = vunpack.i.h.bf16 %v6356_v30  ;;  %v6357_v7 = vunpack.i.l.bf16 %v6356_v30 }
 0x169   : > { %v1037_v39 = vrot.slane %v7249_v35, 4  ;;  %v1292_v48 = vperm.slane %v1286_v51, %v6784_v28  ;;  %v1311_v24 = vrot.slane %v1268_v56, 4  ;;  %v951_v29 = vrot.slane %v357_v0, 4 }
 0x16a   : > { %v1309_v54 = vrot.slane %v1280_v59, 4  ;;  %v703_v34 = vrot.slane %v6358_v31, 4  ;;  %v706_v60 = vsel %vm423_vm1, %v6358_v31, %v7054_v58  ;;  %v535_v27 = vrot.slane %v6357_v7, 4 }
 0x16b   : > { %v1334_v63 = vsel %vm423_vm1, %v1333_v33, %v1292_v48  ;;  %v1335_v3 = vrot.slane %v1292_v48, 4  ;;  %v1312_v6 = vsel %vm423_vm1, %v1280_v59, %v1311_v24  ;;  %v7271_v49 = vperm.slane %v706_v60, %v6784_v28 }
 0x16c   : > { %v1310_v55 = vsel %vm423_vm1, %v1309_v54, %v1268_v56  ;;  %v7275_v18 = vperm.slane %v1334_v63, %v6796_v47  ;;  %v7278_v4 = vperm.slane %v1312_v6, %v6796_v47  ;;  %v704_v58 = vsel %vm423_vm1, %v703_v34, %v6348_v32 }
 0x16d   : > { %v7284_v13 = vperm.slane %v1310_v55, %v6796_v47  ;;  %v1336_v53 = vsel %vm423_vm1, %v6959_v23, %v1335_v3  ;;  %v7289_v5 = vperm.slane %v704_v58, %v6784_v28  ;;  %v741_v17 = vrot.slane %v7271_v49, 4 }
 0x16e   : > { %v1357_v30 = vrot.slane %v7275_v18, 4  ;;  %v7294_v43 = vperm.slane %v1336_v53, %v6796_v47  ;;  %v1363_v20 = vrot.slane %v7278_v4, 4  ;;  %v538_v23 = vsel %vm423_vm1, %v6357_v7, %v7065_v15 }
 0x16f   : > { %v1359_v32 = vrot.slane %v7284_v13, 4  ;;  %v729_v56 = vrot.slane %v7289_v5, 4  ;;  %v952_v40 = vsel %vm423_vm1, %v951_v29, %v7191_v52  ;;  %v536_v33 = vsel %vm423_vm1, %v535_v27, %v6347_v26 }
 0x170   : > { %v1358_v59 = vsel %vm423_vm1, %v1357_v30, %v7284_v13  ;;  %v1361_v51 = vrot.slane %v7294_v43, 4  ;;  %v7310_v31 = vperm.slane %v538_v23, %v6784_v28  ;;  %v7313_v24 = vperm.slane %v536_v33, %v6784_v28 }
 0x171   : > { %v1763_v48 = vpack.c.bf16 %v1358_v59, %v1358_v59  ;;  %v9797_v15 = vrot.slane %v7191_v52, 4  ;;  %v958_v54 = vperm.slane %v952_v40, %v6784_v28  ;;  %v9798_v60 = vrot.slane %v7094_v44, 4 }
 0x172   : > { %v1362_v34 = vsel %vm423_vm1, %v1361_v51, %v7278_v4  ;;  %v573_v1 = vrot.slane %v7310_v31, 4  ;;  %v9799_v63 = vrot.slane %v6937_v50, 4  ;;  %v9800_v58 = vrot.slane %v6924_v2, 4 }
 0x173   : > { %v954_v7 = vsel %vm423_vm1, %v357_v0, %v9797_v15  ;;  %v7327_v29 = vsel %vm423_vm1, %v9798_v60, %v6995_v22  ;;  %6210 = vmatmul.msk.bf16.vlgmr.msra.gmra.mxu2 %vm1791_vm2, %v1763_v48  ;;  %v1765_v52 = vpack.c.bf16 %v1362_v34, %v1362_v34  ;;  %v561_v0 = vrot.slane %v7313_v24, 4 }
 0x174   : > { %v962_v26 = vperm.slane %v954_v7, %v6784_v28  ;;  %v1000_v3 = vsel %vm423_vm1, %v9799_v63, %v958_v54  ;;  %v1001_v6 = vrot.slane %v958_v54, 4  ;;  %v9801_v22 = vrot.slane %v7119_v21, 4 }
 0x175   : > { %v1006_v55 = vperm.slane %v1000_v3, %v6796_v47  ;;  %6212 = vmatmul.msk.bf16.vlgmr.msrb.gmra.mxu0 %vm1791_vm2, %v1765_v52  ;;  %v1427_v40 = vrot.slane %v7327_v29, 4  ;;  %v9802_v59 = vrot.slane %v7136_v41, 4 }
 0x176   : > { %v1012_v53 = vsel %vm423_vm1, %v9800_v58, %v962_v26  ;;  %v1013_v44 = vrot.slane %v962_v26, 4  ;;  %v7342_v30 = vsel %vm423_vm1, %v9801_v22, %v6990_v19  ;;  %v1002_v27 = vsel %vm423_vm1, %v6937_v50, %v1001_v6 }
 0x177   : > { %v1018_v23 = vperm.slane %v1012_v53, %v6796_v47  ;;  %v1430_v51 = vsel %vm423_vm1, %v7327_v29, %v9802_v59  ;;  %v7354_v33 = vperm.slane %v1002_v27, %v6796_v47  ;;  %v1023_v21 = vrot.slane %v1006_v55, 4 }
 0x178   : > { %v1014_v19 = vsel %vm423_vm1, %v6924_v2, %v1013_v44  ;;  %v7361_v50 = vsel %vm423_vm1, %v1006_v55, %v1025_v62  ;;  %v1438_v58 = vperm.slane %v1430_v51, %v6784_v28  ;;  %v1453_v51 = vrot.slane %v7140_v25, 4 }
 0x179   : > { %v1022_v48 = vperm.slane %v1014_v19, %v6796_v47  ;;  %v1031_v15 = vrot.slane %v1018_v23, 4  ;;  %v1034_v7 = vsel %vm423_vm1, %v1018_v23, %v1033_v8  ;;  %v1607_v54 = vrot.slane %v7361_v50, 4 }
 0x17a   : > { %v7370_v34 = vsel %vm423_vm1, %v1023_v21, %v7222_v46  ;;  %v1027_v2 = vrot.slane %v7354_v33, 4  ;;  %v7377_v62 = vsel %vm423_vm1, %v7354_v33, %v1029_v57  ;;  %v1631_v26 = vrot.slane %v1034_v7, 4 }
 0x17b   : > { %v7381_v60 = vsel %vm423_vm1, %v1031_v15, %v7233_v45  ;;  %v1035_v8 = vrot.slane %v1022_v48, 4  ;;  %v1038_v52 = vsel %vm423_vm1, %v1022_v48, %v1037_v39  ;;  %v1595_v46 = vrot.slane %v7370_v34, 4 }
 0x17c   : > { %v1605_v63 = vrot.slane %v7377_v62, 4  ;;  %v1619_v3 = vrot.slane %v7381_v60, 4  ;;  %v1629_v6 = vrot.slane %v1038_v52, 4  ;;  %v1632_v57 = vsel %vm423_vm1, %v1038_v52, %v1631_v26 }
 0x17d   : > { %v7392_v55 = vsel %vm423_vm1, %v1035_v8, %v7249_v35  ;;  %v7395_v45 = vperm.slane %v1632_v57, %v6784_v28  ;;  %v9803_v39 = vrot.slane %v7124_v9, 4  ;;  %v1451_v9 = vrot.slane %v7342_v30, 4 }
 0x17e   : > { %v1606_v44 = vsel %vm423_vm1, %v1605_v63, %v7361_v50  ;;  %v1617_v22 = vrot.slane %v7392_v55, 4  ;;  %v1630_v27 = vsel %vm423_vm1, %v1629_v6, %v1034_v7  ;;  %v9804_v19 = vrot.slane %v7129_v11, 4  ;;  %v7428_v63 = vpop.permute.xlu0 %6350 }
 0x17f   : > { %v1442_v53 = vsel %vm423_vm1, %v7110_v38, %v9803_v39  ;;  %v7408_v23 = vperm.slane %v1606_v44, %v6784_v28  ;;  %v7411_v59 = vperm.slane %v1630_v27, %v6784_v28  ;;  %v1489_v15 = vrot.slane %v1438_v58, 4 }
 0x180   : > { %v1450_v35 = vperm.slane %v1442_v53, %v6784_v28  ;;  %v1618_v38 = vsel %vm423_vm1, %v1617_v22, %v7381_v60  ;;  %v1466_v21 = vsel %vm423_vm1, %v7147_v61, %v9804_v19  ;;  %v1454_v8 = vsel %vm423_vm1, %v7342_v30, %v1453_v51 }
 0x181   : > { %v7422_v7 = vperm.slane %v1618_v38, %v6784_v28  ;;  %v1665_v26 = vrot.slane %v7411_v59, 4  ;;  %v1474_v52 = vperm.slane %v1466_v21, %v6784_v28  ;;  %v1462_v6 = vperm.slane %v1454_v8, %v6784_v28 }
 0x182   : > { %v1487_v48 = vrot.slane %v1450_v35, 4  ;;  %v1490_v61 = vsel %vm423_vm1, %v1450_v35, %v1489_v15  ;;  %v1360_v57 = vsel %vm423_vm1, %v7275_v18, %v1359_v32  ;;  %v6353_v51 = vunpack.i.h.bf16 %v7428_v63 }
 0x183   : > { %v1667_v39 = vrot.slane %v7422_v7, 4  ;;  %v1511_v30 = vrot.slane %v1474_v52, 4  ;;  %v1498_v44 = vperm.slane %v1490_v61, %v6796_v47  ;;  %v1513_v22 = vrot.slane %v1462_v6, 4 }
 0x184   : > { %v1488_v11 = vsel %vm423_vm1, %v1487_v48, %v1438_v58  ;;  %v1764_v27 = vpack.c.bf16 %v1360_v57, %v1360_v57  ;;  %v6352_v58 = vunpack.i.l.bf16 %v7428_v63  ;;  %v1364_v18 = vsel %vm423_vm1, %v7294_v43, %v1363_v20 }
 0x185   : > { %v1494_v53 = vperm.slane %v1488_v11, %v6796_v47  ;;  %v1512_v35 = vsel %vm423_vm1, %v1511_v30, %v1462_v6  ;;  %v1537_v13 = vrot.slane %v1498_v44, 4  ;;  %v1514_v19 = vsel %vm423_vm1, %v1474_v52, %v1513_v22 }
 0x186   : > { %v1518_v32 = vperm.slane %v1512_v35, %v6796_v47  ;;  %6211 = vmatmul.msk.bf16.vlgmr.msra.gmra.mxu3 %vm1791_vm2, %v1764_v27  ;;  %v717_v21 = vrot.slane %v6353_v51, 4  ;;  %v549_v48 = vrot.slane %v6352_v58, 4  ;;  %v1522_v15 = vperm.slane %v1514_v19, %v6796_v47 }
 0x187   : > { %v1533_v38 = vrot.slane %v1494_v53, 4  ;;  %v1766_v8 = vpack.c.bf16 %v1364_v18, %v1364_v18  ;;  %v1428_v4 = vsel %vm423_vm1, %v1427_v40, %v7136_v41  ;;  %v1452_v43 = vsel %vm423_vm1, %v1451_v9, %v7140_v25  ;;  %v6361_v18 = vpop.permute.xlu0 %6360 }
 0x188   : > { %v1531_v20 = vrot.slane %v1518_v32, 4  ;;  %v1434_v6 = vperm.slane %v1428_v4, %v6784_v28  ;;  %v1458_v11 = vperm.slane %v1452_v43, %v6784_v28  ;;  %v1535_v57 = vrot.slane %v1522_v15, 4 }
 0x189   : > { %v1534_v52 = vsel %vm423_vm1, %v1518_v32, %v1533_v38  ;;  %v1538_v30 = vsel %vm423_vm1, %v1522_v15, %v1537_v13  ;;  %6213 = vmatmul.msk.bf16.vlgmr.msra.gmra.mxu1 %vm1791_vm2, %v1766_v8  ;;  %v1475_v29 = vrot.slane %v7155_v42, 4  ;;  %v1499_v25 = vrot.slane %v7174_v37, 4 }
 0x18a   : > { %v1784_v61 = vpack.c.bf16 %v1534_v52, %v1534_v52  ;;  %v1532_v41 = vsel %vm423_vm1, %v1531_v20, %v1494_v53  ;;  %v1786_v40 = vpack.c.bf16 %v1538_v30, %v1538_v30  ;;  %v1477_v22 = vrot.slane %v1434_v6, 4 }
 0x18b   : > { %v1783_v9 = vpack.c.bf16 %v1532_v41, %v1532_v41  ;;  %v1536_v35 = vsel %vm423_vm1, %v1535_v57, %v1498_v44  ;;  %v1476_v38 = vsel %vm423_vm1, %v1475_v29, %v1434_v6  ;;  %v1500_v53 = vsel %vm423_vm1, %v1499_v25, %v1458_v11 }
 0x18c   : > { %v1967_v27 = vsel %vm1791_vm2, %v1784_v61, 0  ;;  %v1785_v13 = vpack.c.bf16 %v1536_v35, %v1536_v35  ;;  %v2005_v32 = vsel %vm1791_vm2, %v1786_v40, 0  ;;  %v1482_v19 = vperm.slane %v1476_v38, %v6796_v47 }
 0x18d   : > { %1976 = vmatpush.bf16.xpose.msrb.mxu3 %v1967_v27  ;;  %v1948_v15 = vsel %vm1791_vm2, %v1783_v9, 0  ;;  %2014 = vmatpush.bf16.xpose.msrb.mxu1 %v2005_v32  ;;  %v1501_v8 = vrot.slane %v1458_v11, 4  ;;  %v1506_v4 = vperm.slane %v1500_v53, %v6796_v47  ;;  %v1478_v44 = vsel %vm423_vm1, %v7155_v42, %v1477_v22 }
 0x18e   : > { %1957 = vmatpush.bf16.xpose.msrb.mxu2 %v1948_v15  ;;  %v1986_v43 = vsel %vm1791_vm2, %v1785_v13, 0  ;;  %v1525_v20 = vrot.slane %v1482_v19, 4  ;;  %v7481_v52 = vperm.slane %v1478_v44, %v6796_v47  ;;  %v6363_v6 = vunpack.i.h.bf16 %v6361_v18 }
 0x18f   : > { %1995 = vmatpush.bf16.xpose.msra.mxu0 %v1986_v43  ;;  %v1523_v61 = vrot.slane %v1506_v4, 4  ;;  %v1502_v57 = vsel %vm423_vm1, %v7174_v37, %v1501_v8  ;;  %v6362_v30 = vunpack.i.l.bf16 %v6361_v18  ;;  %v7489_v11 = vsel %vm423_vm1, %v1027_v2, %v7237_v36 }
 0x190   : > { %v7492_v42 = vperm.slane %v1502_v57, %v6796_v47  ;;  %v715_v29 = vrot.slane %v6363_v6, 4  ;;  %v718_v41 = vsel %vm423_vm1, %v6363_v6, %v717_v21  ;;  %v7496_v40 = vsel %vm423_vm1, %v1506_v4, %v1525_v20 }
 0x191   : > { %v1524_v22 = vsel %vm423_vm1, %v1523_v61, %v1482_v19  ;;  %v547_v25 = vrot.slane %v6362_v30, 4  ;;  %v550_v37 = vsel %vm423_vm1, %v6362_v30, %v549_v48  ;;  %v726_v9 = vperm.slane %v718_v41, %v6784_v28 }
 0x192   : > { %v1767_v33 = vpack.c.bf16 %v1524_v22, %v1524_v22  ;;  %v1527_v36 = vrot.slane %v7492_v42, 4  ;;  %v558_v2 = vperm.slane %v550_v37, %v6784_v28  ;;  %v716_v27 = vsel %vm423_vm1, %v715_v29, %v6353_v51 }
 0x193   : > { %v548_v21 = vsel %vm423_vm1, %v547_v25, %v6352_v58  ;;  %v722_v35 = vperm.slane %v716_v27, %v6784_v28  ;;  %v739_v38 = vrot.slane %v726_v9, 4  ;;  %v742_v48 = vsel %vm423_vm1, %v726_v9, %v741_v17 }
 0x194   : > { %v1528_v18 = vsel %vm423_vm1, %v1527_v36, %v7481_v52  ;;  %v554_v13 = vperm.slane %v548_v21, %v6784_v28  ;;  %v571_v32 = vrot.slane %v558_v2, 4  ;;  %v574_v51 = vsel %vm423_vm1, %v558_v2, %v573_v1 }
 0x195   : > { %6214 = vmatmul.msk.bf16.vlgmr.msrb.gmra.mxu2 %vm1791_vm2, %v1767_v33  ;;  %v1769_v63 = vpack.c.bf16 %v1528_v18, %v1528_v18  ;;  %v582_v58 = vperm.slane %v574_v51, %v6796_v47  ;;  %v727_v19 = vrot.slane %v722_v35, 4  ;;  %v730_v17 = vsel %vm423_vm1, %v722_v35, %v729_v56 }
 0x196   : > { %v559_v53 = vrot.slane %v554_v13, 4  ;;  %v562_v15 = vsel %vm423_vm1, %v554_v13, %v561_v0  ;;  %v572_v8 = vsel %vm423_vm1, %v571_v32, %v7310_v31  ;;  %v738_v1 = vperm.slane %v730_v17, %v6796_v47 }
 0x197   : > { %6216 = vmatmul.msk.bf16.vlgmr.msra.gmra.mxu0 %vm1791_vm2, %v1769_v63  ;;  %v570_v4 = vperm.slane %v562_v15, %v6796_v47  ;;  %v578_v44 = vperm.slane %v572_v8, %v6796_v47  ;;  %v589_v43 = vrot.slane %v582_v58, 4  ;;  %v728_v56 = vsel %vm423_vm1, %v727_v19, %v7289_v5 }
 0x198   : > { %v560_v20 = vsel %vm423_vm1, %v559_v53, %v7313_v24  ;;  %v7538_v0 = vperm.slane %v728_v56, %v6796_v47  ;;  %v740_v31 = vsel %vm423_vm1, %v739_v38, %v7271_v49  ;;  %v750_v6 = vperm.slane %v742_v48, %v6796_v47 }
 0x199   : > { %v7544_v61 = vperm.slane %v560_v20, %v6796_v47  ;;  %v7546_v57 = vrot.slane %v570_v4, 4  ;;  %v587_v30 = vrot.slane %v578_v44, 4  ;;  %v7549_v29 = vsel %vm423_vm1, 0.0, %v589_v43 }
 0x19a   : > { %v746_v5 = vperm.slane %v740_v31, %v6796_v47  ;;  %v751_v24 = vrot.slane %v7538_v0, 4  ;;  %v7553_v41 = vrot.slane %v738_v1, 4  ;;  %v757_v22 = vrot.slane %v750_v6, 4 }
 0x19b   : > { %v583_v49 = vrot.slane %v7544_v61, 4  ;;  %v7558_v25 = vsel %vm423_vm1, 0.0, %v7546_v57  ;;  %v7561_v37 = vsel %vm423_vm1, 0.0, %v587_v30  ;;  %v1218_v9 = vsel %vm423_vm1, %v589_v43, %v578_v44 }
 0x19c   : > { %v7566_v33 = vsel %vm423_vm1, 0.0, %v7553_v41  ;;  %v755_v36 = vrot.slane %v746_v5, 4  ;;  %v7569_v2 = vsel %vm423_vm1, 0.0, %v757_v22  ;;  %v1212_v27 = vrot.slane %v7558_v25, 4 }
 0x19d   : > { %v7573_v21 = vperm.slane %v1218_v9, %v6784_v28  ;;  %v1223_v35 = vrot.slane %v7549_v29, 4  ;;  %v1378_v38 = vrot.slane %v7566_v33, 4  ;;  %v1384_v48 = vsel %vm423_vm1, %v757_v22, %v746_v5 }
 0x19e   : > { %v7579_v18 = vsel %vm423_vm1, 0.0, %v755_v36  ;;  %v7582_v13 = vperm.slane %v1384_v48, %v6784_v28  ;;  %v1389_v32 = vrot.slane %v7569_v2, 4  ;;  %v1768_v51 = vpack.c.bf16 %v7496_v40, %v7496_v40 }
 0x19f   : > { %v1593_v63 = vrot.slane %v7489_v11, 4  ;;  %v1596_v58 = vsel %vm423_vm1, %v7489_v11, %v1595_v46  ;;  %v1608_v19 = vsel %vm423_vm1, %v7377_v62, %v1607_v54  ;;  %v1620_v17 = vsel %vm423_vm1, %v7392_v55, %v1619_v3 }
 0x1a0   : > { %6215 = vmatmul.msk.bf16.vlgmr.msrb.gmra.mxu3 %vm1791_vm2, %v1768_v51  ;;  %v1604_v40 = vperm.slane %v1596_v58, %v6784_v28  ;;  %v1616_v53 = vperm.slane %v1608_v19, %v6784_v28  ;;  %v1628_v15 = vperm.slane %v1620_v17, %v6784_v28  ;;  %v1677_v46 = vrot.slane %v7395_v45, 4 }
 0x1a1   : > { %v1529_v50 = vrot.slane %v7481_v52, 4  ;;  %v1594_v54 = vsel %vm423_vm1, %v1593_v63, %v7370_v34  ;;  %v1641_v62 = vrot.slane %v7408_v23, 4  ;;  %v1666_v60 = vsel %vm423_vm1, %v1665_v26, %v7422_v7 }
 0x1a2   : > { %v1653_v3 = vrot.slane %v1616_v53, 4  ;;  %v1678_v55 = vsel %vm423_vm1, %v1677_v46, %v1628_v15  ;;  %v1655_v11 = vrot.slane %v1604_v40, 4  ;;  %v1679_v8 = vrot.slane %v1628_v15, 4 }
 0x1a3   : > { %v1684_v1 = vperm.slane %v1678_v55, %v6796_v47  ;;  %v1530_v52 = vsel %vm423_vm1, %v7492_v42, %v1529_v50  ;;  %v1600_v4 = vperm.slane %v1594_v54, %v6784_v28  ;;  %v1672_v34 = vperm.slane %v1666_v60, %v6796_v47 }
 0x1a4   : > { %v1654_v44 = vsel %vm423_vm1, %v1653_v3, %v1604_v40  ;;  %v1770_v43 = vpack.c.bf16 %v1530_v52, %v1530_v52  ;;  %v1656_v56 = vsel %vm423_vm1, %v1616_v53, %v1655_v11  ;;  %v1680_v26 = vsel %vm423_vm1, %v7395_v45, %v1679_v8 }
 0x1a5   : > { %v1660_v20 = vperm.slane %v1654_v44, %v6796_v47  ;;  %v1697_v31 = vrot.slane %v1684_v1, 4  ;;  %v1664_v6 = vperm.slane %v1656_v56, %v6796_v47  ;;  %v1688_v30 = vperm.slane %v1680_v26, %v6796_v47 }
 0x1a6   : > { %6217 = vmatmul.msk.bf16.vlgmr.msrb.gmra.mxu1 %vm1791_vm2, %v1770_v43  ;;  %v1642_v42 = vsel %vm423_vm1, %v1641_v62, %v1600_v4  ;;  %v1689_v5 = vrot.slane %v1672_v34, 4  ;;  %v1643_v22 = vrot.slane %v1600_v4, 4  ;;  %v1668_v9 = vsel %vm423_vm1, %v7411_v59, %v1667_v39 }
 0x1a7   : > { %v1698_v45 = vsel %vm423_vm1, %v1697_v31, %v1660_v20  ;;  %v1699_v36 = vrot.slane %v1660_v20, 4  ;;  %v1701_v48 = vrot.slane %v1688_v30, 4  ;;  %v1703_v51 = vrot.slane %v1664_v6, 4 }
 0x1a8   : > { %v1787_v63 = vpack.c.bf16 %v1698_v45, %v1698_v45  ;;  %v1648_v58 = vperm.slane %v1642_v42, %v6796_v47  ;;  %v1644_v19 = vsel %vm423_vm1, %v7408_v23, %v1643_v22  ;;  %v1676_v17 = vperm.slane %v1668_v9, %v6796_v47 }
 0x1a9   : > { %v1700_v40 = vsel %vm423_vm1, %v1684_v1, %v1699_v36  ;;  %v1702_v7 = vsel %vm423_vm1, %v1701_v48, %v1664_v6  ;;  %v1704_v53 = vsel %vm423_vm1, %v1688_v30, %v1703_v51  ;;  %v1652_v59 = vperm.slane %v1644_v19, %v6796_v47 }
 0x1aa   : > { %v2024_v39 = vsel %vm1791_vm2, %v1787_v63, 0  ;;  %v1788_v15 = vpack.c.bf16 %v1700_v40, %v1700_v40  ;;  %v1789_v46 = vpack.c.bf16 %v1702_v7, %v1702_v7  ;;  %v1790_v50 = vpack.c.bf16 %v1704_v53, %v1704_v53 }
 0x1ab   : > { %2033 = vmatpush.bf16.xpose.msra.mxu2 %v2024_v39  ;;  %v1690_v54 = vsel %vm423_vm1, %v1689_v5, %v1648_v58  ;;  %v1693_v62 = vrot.slane %v1676_v17, 4  ;;  %v1691_v23 = vrot.slane %v1648_v58, 4  ;;  %v1695_v60 = vrot.slane %v1652_v59, 4 }
 0x1ac   : > { %v2043_v3 = vsel %vm1791_vm2, %v1788_v15, 0  ;;  %v2062_v55 = vsel %vm1791_vm2, %v1789_v46, 0  ;;  %v2081_v11 = vsel %vm1791_vm2, %v1790_v50, 0  ;;  %v1771_v8 = vpack.c.bf16 %v1690_v54, %v1690_v54 }
 0x1ad   : > { %2052 = vmatpush.bf16.xpose.msra.mxu3 %v2043_v3  ;;  %2071 = vmatpush.bf16.xpose.msrb.mxu0 %v2062_v55  ;;  %v1694_v1 = vsel %vm423_vm1, %v1693_v62, %v1652_v59  ;;  %v1692_v52 = vsel %vm423_vm1, %v1672_v34, %v1691_v23  ;;  %v1696_v4 = vsel %vm423_vm1, %v1676_v17, %v1695_v60  ;;  %v584_v44 = vsel %vm423_vm1, 0.0, %v583_v49 }
 0x1ae   : > { %2090 = vmatpush.bf16.xpose.msra.mxu1 %v2081_v11  ;;  %v1773_v43 = vpack.c.bf16 %v1694_v1, %v1694_v1  ;;  %v1772_v56 = vpack.c.bf16 %v1692_v52, %v1692_v52  ;;  %v1774_v26 = vpack.c.bf16 %v1696_v4, %v1696_v4  ;;  %v1207_v20 = vsel %vm423_vm1, %v7546_v57, %v7544_v61 }
 0x1af   : > { %v1211_v31 = vperm.slane %v1207_v20, %v6784_v28  ;;  %v1213_v34 = vsel %vm423_vm1, %v1212_v27, %v584_v44  ;;  %v1224_v6 = vsel %vm423_vm1, %v1223_v35, %v7561_v37  ;;  %v1243_v49 = vrot.slane %v7573_v21, 4 }
 0x1b0   : > { %v1217_v30 = vperm.slane %v1213_v34, %v6784_v28  ;;  %v1228_v42 = vperm.slane %v1224_v6, %v6784_v28  ;;  %v752_v61 = vsel %vm423_vm1, 0.0, %v751_v24  ;;  %v1373_v25 = vsel %vm423_vm1, %v7553_v41, %v7538_v0 }
 0x1b1   : > { %v1231_v57 = vrot.slane %v1211_v31, 4  ;;  %v1379_v29 = vsel %vm423_vm1, %v1378_v38, %v752_v61  ;;  %v1390_v37 = vsel %vm423_vm1, %v1389_v32, %v7579_v18  ;;  %v1377_v24 = vperm.slane %v1373_v25, %v6784_v28 }
 0x1b2   : > { %6218 = vmatmul.msk.bf16.vlgmr.msra.gmra.mxu2 %vm1791_vm2, %v1771_v8  ;;  %v1244_v27 = vsel %vm423_vm1, %v1228_v42, %v1243_v49  ;;  %v1383_v35 = vperm.slane %v1379_v29, %v6784_v28  ;;  %v1394_v5 = vperm.slane %v1390_v37, %v6784_v28  ;;  %v1409_v33 = vrot.slane %v7582_v13, 4 }
 0x1b3   : > { %v1232_v0 = vsel %vm423_vm1, %v1217_v30, %v1231_v57  ;;  %v1252_v41 = vperm.slane %v1244_v27, %v6796_v47  ;;  %v1229_v38 = vrot.slane %v1217_v30, 4  ;;  %v1397_v18 = vrot.slane %v1377_v24, 4 }
 0x1b4   : > { %6220 = vmatmul.msk.bf16.vlgmr.msrb.gmra.mxu0 %vm1791_vm2, %v1773_v43  ;;  %6219 = vmatmul.msk.bf16.vlgmr.msra.gmra.mxu3 %vm1791_vm2, %v1772_v56  ;;  %v1240_v2 = vperm.slane %v1232_v0, %v6796_v47  ;;  %v1241_v32 = vrot.slane %v1228_v42, 4  ;;  %v1395_v22 = vrot.slane %v1383_v35, 4  ;;  %v1410_v45 = vsel %vm423_vm1, %v1394_v5, %v1409_v33 }
 0x1b5   : > { %v1257_v9 = vrot.slane %v1252_v41, 4  ;;  %v1230_v36 = vsel %vm423_vm1, %v1229_v38, %v1211_v31  ;;  %v1407_v48 = vrot.slane %v1394_v5, 4  ;;  %v1398_v51 = vsel %vm423_vm1, %v1383_v35, %v1397_v18 }
 0x1b6   : > { %6221 = vmatmul.msk.bf16.vlgmr.msra.gmra.mxu1 %vm1791_vm2, %v1774_v26  ;;  %v1418_v63 = vperm.slane %v1410_v45, %v6796_v47  ;;  %v1236_v58 = vperm.slane %v1230_v36, %v6796_v47  ;;  %v1242_v19 = vsel %vm423_vm1, %v1241_v32, %v7573_v21  ;;  %v1406_v40 = vperm.slane %v1398_v51, %v6796_v47 }
 0x1b7   : > { %v1258_v17 = vsel %vm423_vm1, %v1257_v9, %v1240_v2  ;;  %v1248_v7 = vperm.slane %v1242_v19, %v6796_v47  ;;  %v1259_v53 = vrot.slane %v1240_v2, 4  ;;  %v1396_v15 = vsel %vm423_vm1, %v1395_v22, %v1377_v24 }
 0x1b8   : > { %v2306_v59 = vpack.c.bf16 %v1258_v17, %v1258_v17  ;;  %v1423_v39 = vrot.slane %v1418_v63, 4  ;;  %v1408_v46 = vsel %vm423_vm1, %v1407_v48, %v7582_v13  ;;  %v1402_v62 = vperm.slane %v1396_v15, %v6796_v47 }
 0x1b9   : > { %v1253_v50 = vrot.slane %v1248_v7, 4  ;;  %v1260_v54 = vsel %vm423_vm1, %v1252_v41, %v1259_v53  ;;  %v1414_v21 = vperm.slane %v1408_v46, %v6796_v47  ;;  %v1425_v55 = vrot.slane %v1406_v40, 4 }
 0x1ba   : > { %v2363_v23 = vsel %vm2323_vm3, %v2306_v59, 0  ;;  %v1424_v60 = vsel %vm423_vm1, %v1423_v39, %v1406_v40  ;;  %v2307_v3 = vpack.c.bf16 %v1260_v54, %v1260_v54  ;;  %v1255_v52 = vrot.slane %v1236_v58, 4 }
 0x1bb   : > { %2372 = vmatpush.bf16.msra.mxu0 %v2363_v23  ;;  %v2310_v11 = vpack.c.bf16 %v1424_v60, %v1424_v60  ;;  %v1254_v8 = vsel %vm423_vm1, %v1253_v50, %v1236_v58  ;;  %v1419_v1 = vrot.slane %v1414_v21, 4  ;;  %v1426_v44 = vsel %vm423_vm1, %v1418_v63, %v1425_v55 }
 0x1bc   : > { %v2304_v13 = vpack.c.bf16 %v1254_v8, %v1254_v8  ;;  %v2382_v4 = vsel %vm2323_vm3, %v2307_v3, 0  ;;  %v1421_v43 = vrot.slane %v1402_v62, 4  ;;  %v2311_v20 = vpack.c.bf16 %v1426_v44, %v1426_v44 }
 0x1bd   : > { %v2439_v56 = vsel %vm2323_vm3, %v2310_v11, 0  ;;  %2391 = vmatpush.bf16.msrb.mxu1 %v2382_v4  ;;  %v1420_v26 = vsel %vm423_vm1, %v1419_v1, %v1402_v62  ;;  %v1256_v31 = vsel %vm423_vm1, %v1248_v7, %v1255_v52 }
 0x1be   : > { %v2325_v34 = vsel %vm2323_vm3, %v2304_v13, 0  ;;  %v2308_v6 = vpack.c.bf16 %v1420_v26, %v1420_v26  ;;  %v2305_v49 = vpack.c.bf16 %v1256_v31, %v1256_v31  ;;  %v1422_v30 = vsel %vm423_vm1, %v1414_v21, %v1421_v43 }
 0x1bf   : > { %2448 = vmatpush.bf16.msrb.mxu0 %v2439_v56  ;;  %2334 = vmatpush.bf16.msrb.mxu2 %v2325_v34  ;;  %v2458_v42 = vsel %vm2323_vm3, %v2311_v20, 0  ;;  %v2309_v61 = vpack.c.bf16 %v1422_v30, %v1422_v30 }
 0x1c0   : > { %v2401_v57 = vsel %vm2323_vm3, %v2308_v6, 0  ;;  %v2344_v25 = vsel %vm2323_vm3, %v2305_v49, 0 }
 0x1c1   : > { %2467 = vmatpush.bf16.msra.mxu1 %v2458_v42  ;;  %2353 = vmatpush.bf16.msrb.mxu3 %v2344_v25  ;;  %v2420_v29 = vsel %vm2323_vm3, %v2309_v61, 0 }
 0x1c3   : > { %2410 = vmatpush.bf16.msra.mxu2 %v2401_v57 }
 0x1c5   : > { %2429 = vmatpush.bf16.msra.mxu3 %v2420_v29 }
 0x1cd   : > { %v1807_v37 = vpop.f32.mrf.mxu1 }
 0x1ce   : > { %v7721_v27 = vmul.f32 0.17677669, %v1807_v37 }
 0x1cf   : > { %v1826_v24 = vpop.f32.mrf.mxu3 }
 0x1d0   : > { %v2112_v35 = vsel %vm1791_vm2, %v7721_v27, -inf  ;;  %v7725_v5 = vmul.f32 0.17677669, %v1826_v24 }
 0x1d1   : > { %2113 = vmax.xlane.f32.xlu1 %v2112_v35 }
 0x1d2   : > { %v2115_v0 = vsel %vm1791_vm2, %v7725_v5, -inf }
 0x1d3   : > { %2116 = vmax.xlane.f32.xlu2 %v2115_v0 }
 0x1d5   : > { %v1809_v41 = vpop.f32.mrf.mxu1 }
 0x1d7   : > { %v1828_v33 = vpop.f32.mrf.mxu3 }
 0x1e3   : > { %v1845_v38 = vpop.f32.mrf.mxu3 }
 0x1e4   : > { %v7739_v58 = vmul.f32 0.17677669, %v1845_v38 }
 0x1e5   : > { %v1864_v2 = vpop.f32.mrf.mxu1 }
 0x1e6   : > { %v7729_v18 = vmul.f32 0.17677669, %v1864_v2  ;;  %v2118_v40 = vsel %vm1791_vm2, %v7739_v58, -inf }
 0x1e8   : > { %v2121_v32 = vsel %vm1791_vm2, %v7729_v18, -inf }
 0x1e9   : > { %2122 = vmax.xlane.f32.xlu2 %v2121_v32 }
 0x1eb   : > { %v1847_v22 = vpop.f32.mrf.mxu3 }
 0x1ed   : > { %v1866_v9 = vpop.f32.mrf.mxu1 }
 0x1f2   : > { %v1921_v45 = vpop.f32.mrf.mxu0 }
 0x1f3   : > { %v7733_v36 = vmul.f32 0.17677669, %v1921_v45 }
 0x1f5   : > { %v2130_v48 = vsel %vm1791_vm2, %v7733_v36, -inf }
 0x1f6   : > { %2131 = vmax.xlane.f32.xlu0 %v2130_v48  ;;  %v1883_v51 = vpop.f32.mrf.mxu2 }
 0x1f7   : > { %v7737_v63 = vmul.f32 0.17677669, %v1883_v51 }
 0x1f9   : > { %v2124_v19 = vsel %vm1791_vm2, %v7737_v63, -inf }
 0x1fa   : > { %v1923_v17 = vpop.f32.mrf.mxu0  ;;  %2125 = vmax.xlane.f32.xlu1 %v2124_v19 }
 0x1fe   : > { %v1885_v7 = vpop.f32.mrf.mxu2  ;;  %2119 = vmax.xlane.f32.xlu0 %v2118_v40 }
 0x206   : > { %v1940_v53 = vpop.f32.mrf.mxu1 }
 0x207   : > { %v7745_v59 = vmul.f32 0.17677669, %v1940_v53 }
 0x209   : > { %v1902_v39 = vpop.f32.mrf.mxu3  ;;  %v2133_v15 = vsel %vm1791_vm2, %v7745_v59, -inf }
 0x20a   : > { %2134 = vmax.xlane.f32.xlu1 %v2133_v15  ;;  %v7757_v11 = vmul.f32 0.17677669, %v1902_v39 }
 0x20c   : > { %v2127_v52 = vsel %vm1791_vm2, %v7757_v11, -inf }
 0x20e   : > { %v1942_v46 = vpop.f32.mrf.mxu1 }
 0x211   : > { %v1904_v50 = vpop.f32.mrf.mxu3 }
 0x214   : > { %v1997_v54 = vpop.f32.mrf.mxu0 }
 0x215   : > { %v7749_v62 = vmul.f32 0.17677669, %v1997_v54 }
 0x217   : > { %v2142_v21 = vsel %vm1791_vm2, %v7749_v62, -inf }
 0x218   : > { %v1959_v23 = vpop.f32.mrf.mxu2  ;;  %2143 = vmax.xlane.f32.xlu0 %v2142_v21 }
 0x219   : > { %v7753_v60 = vmul.f32 0.17677669, %v1959_v23 }
 0x21b   : > { %v2136_v3 = vsel %vm1791_vm2, %v7753_v60, -inf }
 0x21c   : > { %v1999_v55 = vpop.f32.mrf.mxu0  ;;  %2137 = vmax.xlane.f32.xlu2 %v2136_v3 }
 0x220   : > { %v1961_v8 = vpop.f32.mrf.mxu2 }
 0x223   : > { %v2016_v1 = vpop.f32.mrf.mxu1  ;;  %v1978_v13 = vpop.f32.mrf.mxu3 }
 0x224   : > { %2128 = vmax.xlane.f32.xlu2 %v2127_v52  ;;  %v7761_v4 = vmul.f32 0.17677669, %v1978_v13  ;;  %v7771_v42 = vmul.f32 0.17677669, %v2016_v1 }
 0x226   : > { %v2139_v44 = vsel %vm1791_vm2, %v7761_v4, -inf  ;;  %v2145_v35 = vsel %vm1791_vm2, %v7771_v42, -inf }
 0x227   : > { %2140 = vmax.xlane.f32.xlu1 %v2139_v44 }
 0x22b   : > { %v2018_v43 = vpop.f32.mrf.mxu1  ;;  %v1980_v56 = vpop.f32.mrf.mxu3 }
 0x231   : > { %v2073_v26 = vpop.f32.mrf.mxu0 }
 0x232   : > { %v7765_v20 = vmul.f32 0.17677669, %v2073_v26 }
 0x233   : > { %v2092_v31 = vpop.f32.mrf.mxu1 }
 0x234   : > { %v2154_v34 = vsel %vm1791_vm2, %v7765_v20, -inf  ;;  %v7779_v24 = vmul.f32 0.17677669, %v2092_v31 }
 0x235   : > { %v2035_v6 = vpop.f32.mrf.mxu2  ;;  %2155 = vmax.xlane.f32.xlu2 %v2154_v34 }
 0x236   : > { %v7769_v49 = vmul.f32 0.17677669, %v2035_v6  ;;  %v2157_v33 = vsel %vm1791_vm2, %v7779_v24, -inf }
 0x237   : > { %v2054_v30 = vpop.f32.mrf.mxu3 }
 0x238   : > { %v2148_v61 = vsel %vm1791_vm2, %v7769_v49, -inf  ;;  %v7775_v57 = vmul.f32 0.17677669, %v2054_v30 }
 0x239   : > { %v2075_v25 = vpop.f32.mrf.mxu0  ;;  %2149 = vmax.xlane.f32.xlu0 %v2148_v61 }
 0x23a   : > { %v2151_v29 = vsel %vm1791_vm2, %v7775_v57, -inf }
 0x23b   : > { %2152 = vmax.xlane.f32.xlu1 %v2151_v29  ;;  %v2094_v37 = vpop.f32.mrf.mxu1 }
 0x23d   : > { %v2037_v0 = vpop.f32.mrf.mxu2  ;;  %2146 = vmax.xlane.f32.xlu2 %v2145_v35 }
 0x23f   : > { %v2056_v41 = vpop.f32.mrf.mxu3 }
 0x241   : > { %2158 = vmax.xlane.f32.xlu0 %v2157_v33 }
 0x244   : > { %v2114_v38 = vpop.xlane.xlu1 %2113 }
 0x245   : > { %v2160_v2 = vsub.f32 %v7721_v27, %v2114_v38 }
 0x246   : > { %v2117_v22 = vpop.xlane.xlu2 %2116 }
 0x247   : > { %v2176_v32 = vmul.f32 1.442695, %v2160_v2  ;;  %v2161_v9 = vsub.f32 %v7725_v5, %v2117_v22 }
 0x249   : > { %6498 = vpow2.f32 %v2176_v32  ;;  %v2178_v45 = vmul.f32 1.442695, %v2161_v9 }
 0x24b   : > { %6500 = vpow2.f32 %v2178_v45 }
 0x24f   : > { %v7787_v48 = vpop.eup %6498 }
 0x250   : > { %v2208_v51 = vsel %vm1791_vm2, %v7787_v48, 0.0 }
 0x251   : > { %2209 = vadd.xlane.f32.xlu1 %v2208_v51  ;;  %v7791_v19 = vpop.eup %6500 }
 0x252   : > { %v2211_v17 = vsel %vm1791_vm2, %v7791_v19, 0.0 }
 0x253   : > { %2212 = vadd.xlane.f32.xlu2 %v2211_v17 }
 0x25c   : > { %v2123_v27 = vpop.xlane.xlu2 %2122 }
 0x25d   : > { %v2163_v40 = vsub.f32 %v7729_v18, %v2123_v27 }
 0x25f   : > { %v2182_v7 = vmul.f32 1.442695, %v2163_v40 }
 0x261   : > { %6502 = vpow2.f32 %v2182_v7 }
 0x267   : > { %v7796_v5 = vpop.eup %6502 }
 0x268   : > { %v2217_v53 = vsel %vm1791_vm2, %v7796_v5, 0.0 }
 0x269   : > { %v2132_v39 = vpop.xlane.xlu0 %2131  ;;  %2218 = vadd.xlane.f32.xlu1 %v2217_v53 }
 0x26a   : > { %v2166_v52 = vsub.f32 %v7733_v36, %v2132_v39 }
 0x26c   : > { %v2188_v13 = vmul.f32 1.442695, %v2166_v52 }
 0x26d   : > { %v2126_v15 = vpop.xlane.xlu1 %2125 }
 0x26e   : > { %v2164_v46 = vsub.f32 %v7737_v63, %v2126_v15  ;;  %v6364_v63 = vpack.i.bf16 %v6755_v16, %v6735_v14 }
 0x270   : > { %v2184_v50 = vmul.f32 1.442695, %v2164_v46 }
 0x271   : > { %v2120_v54 = vpop.xlane.xlu0 %2119 }
 0x272   : > { %6504 = vpow2.f32 %v2184_v50  ;;  %v2162_v21 = vsub.f32 %v7739_v58, %v2120_v54 }
 0x274   : > { %v2180_v23 = vmul.f32 1.442695, %v2162_v21 }
 0x276   : > { %6506 = vpow2.f32 %v2180_v23 }
 0x277   : > { %6508 = vpow2.f32 %v2188_v13 }
 0x278   : > { %v7802_v18 = vpop.eup %6504 }
 0x279   : > { %v2220_v3 = vsel %vm1791_vm2, %v7802_v18, 0.0 }
 0x27a   : > { %2221 = vadd.xlane.f32.xlu2 %v2220_v3 }
 0x27c   : > { %v7806_v55 = vpop.eup %6506 }
 0x27d   : > { %v2214_v8 = vsel %vm1791_vm2, %v7806_v55, 0.0  ;;  %v2135_v1 = vpop.xlane.xlu1 %2134  ;;  %v7818_v34 = vpop.eup %6508 }
 0x27e   : > { %2215 = vadd.xlane.f32.xlu0 %v2214_v8  ;;  %v2226_v30 = vsel %vm1791_vm2, %v7818_v34, 0.0 }
 0x282   : > { %6365 = vrot.lane.b32.xlu1 %v6364_v63, %s6641_s13 }
 0x28b   : > { %v2144_v61 = vpop.xlane.xlu0 %2143 }
 0x28f   : > { %v2138_v58 = vpop.xlane.xlu2 %2137 }
 0x290   : > { %v2168_v35 = vsub.f32 %v7753_v60, %v2138_v58  ;;  %v2170_v60 = vsub.f32 %v7749_v62, %v2144_v61 }
 0x292   : > { %6370 = vrot.lane.b32.xlu2 %v6364_v63, %s6643_s15  ;;  %6375 = vrot.lane.b32.xlu0 %v6364_v63, %s6642_s14  ;;  %v2192_v2 = vmul.f32 1.442695, %v2168_v35  ;;  %v2196_v27 = vmul.f32 1.442695, %v2170_v60 }
 0x297   : > { %v2129_v44 = vpop.xlane.xlu2 %2128 }
 0x298   : > { %v2165_v6 = vsub.f32 %v7757_v11, %v2129_v44 }
 0x29a   : > { %6380 = vrot.lane.b32.xlu2 %v6364_v63, %s6644_s16  ;;  %v2141_v43 = vpop.xlane.xlu1 %2140  ;;  %v2186_v36 = vmul.f32 1.442695, %v2165_v6 }
 0x29b   : > { %v2169_v56 = vsub.f32 %v7761_v4, %v2141_v43  ;;  %v2167_v4 = vsub.f32 %v7745_v59, %v2135_v1 }
 0x29d   : > { %v2194_v26 = vmul.f32 1.442695, %v2169_v56  ;;  %v2190_v33 = vmul.f32 1.442695, %v2167_v4 }
 0x29f   : > { %6510 = vpow2.f32 %v2194_v26 }
 0x2a0   : > { %6512 = vpow2.f32 %v2186_v36 }
 0x2a5   : > { %v7824_v37 = vpop.eup %6510 }
 0x2a6   : > { %v2235_v41 = vsel %vm1791_vm2, %v7824_v37, 0.0 }
 0x2a8   : > { %v2156_v31 = vpop.xlane.xlu2 %2155 }
 0x2a9   : > { %v2174_v11 = vsub.f32 %v7765_v20, %v2156_v31 }
 0x2ab   : > { %v2204_v32 = vmul.f32 1.442695, %v2174_v11 }
 0x2ac   : > { %2227 = vadd.xlane.f32.xlu1 %v2226_v30  ;;  %v2150_v38 = vpop.xlane.xlu0 %2149 }
 0x2ad   : > { %v2172_v59 = vsub.f32 %v7769_v49, %v2150_v38 }
 0x2ae   : > { %v2153_v20 = vpop.xlane.xlu1 %2152 }
 0x2af   : > { %v2200_v51 = vmul.f32 1.442695, %v2172_v59  ;;  %v2173_v53 = vsub.f32 %v7775_v57, %v2153_v20 }
 0x2b0   : > { %v2147_v25 = vpop.xlane.xlu2 %2146 }
 0x2b1   : > { %v2171_v29 = vsub.f32 %v7771_v42, %v2147_v25  ;;  %v7831_v42 = vpop.eup %6512  ;;  %v2202_v21 = vmul.f32 1.442695, %v2173_v53 }
 0x2b2   : > { %v2223_v9 = vsel %vm1791_vm2, %v7831_v42, 0.0 }
 0x2b3   : > { %v2198_v0 = vmul.f32 1.442695, %v2171_v29 }
 0x2b4   : > { %2236 = vadd.xlane.f32.xlu1 %v2235_v41  ;;  %v2159_v40 = vpop.xlane.xlu0 %2158 }
 0x2b5   : > { %6514 = vpow2.f32 %v2198_v0  ;;  %v2175_v62 = vsub.f32 %v7779_v24, %v2159_v40 }
 0x2b6   : > { %6516 = vpow2.f32 %v2190_v33 }
 0x2b7   : > { %6518 = vpow2.f32 %v2192_v2  ;;  %v2206_v54 = vmul.f32 1.442695, %v2175_v62 }
 0x2b8   : > { %6520 = vpow2.f32 %v2204_v32 }
 0x2b9   : > { %6522 = vpow2.f32 %v2200_v51 }
 0x2ba   : > { %6524 = vpow2.f32 %v2196_v27 }
 0x2bb   : > { %v7833_v22 = vpop.eup %6514 }
 0x2bc   : > { %v2241_v45 = vsel %vm1791_vm2, %v7833_v22, 0.0  ;;  %2224 = vadd.xlane.f32.xlu0 %v2223_v9  ;;  %v7841_v17 = vpop.eup %6516 }
 0x2bd   : > { %2242 = vadd.xlane.f32.xlu1 %v2241_v45  ;;  %v7843_v7 = vpop.eup %6518  ;;  %v2229_v15 = vsel %vm1791_vm2, %v7841_v17, 0.0 }
 0x2be   : > { %v7845_v49 = vpop.eup %6520  ;;  %v2232_v39 = vsel %vm1791_vm2, %v7843_v7, 0.0 }
 0x2bf   : > { %v2250_v46 = vsel %vm1791_vm2, %v7845_v49, 0.0  ;;  %v7855_v23 = vpop.eup %6522 }
 0x2c0   : > { %v7857_v57 = vpop.eup %6524  ;;  %v2244_v8 = vsel %vm1791_vm2, %v7855_v23, 0.0 }
 0x2c1   : > { %v2238_v63 = vsel %vm1791_vm2, %v7857_v57, 0.0 }
 0x2c3   : > { %2233 = vadd.xlane.f32.xlu2 %v2232_v39 }
 0x2c4   : > { %v2210_v50 = vpop.xlane.xlu1 %2209  ;;  %2230 = vadd.xlane.f32.xlu0 %v2229_v15 }
 0x2c5   : > { %2251 = vadd.xlane.f32.xlu1 %v2250_v46  ;;  %6526 = vrcp.f32 %v2210_v50 }
 0x2c6   : > { %v2213_v24 = vpop.xlane.xlu2 %2212 }
 0x2c7   : > { %6528 = vrcp.f32 %v2213_v24 }
 0x2c8   : > { %6530 = vpow2.f32 %v2206_v54 }
 0x2c9   : > { %6532 = vpow2.f32 %v2202_v21 }
 0x2cb   : > { %v6527_v3 = vpop.eup %6526  ;;  %2245 = vadd.xlane.f32.xlu2 %v2244_v8 }
 0x2cc   : > { %v2272_v58 = vmul.f32 %v6527_v3, %v7787_v48  ;;  %2239 = vadd.xlane.f32.xlu0 %v2238_v63 }
 0x2cd   : > { %v6529_v1 = vpop.eup %6528 }
 0x2ce   : > { %v2288_v52 = vpack.c.bf16 %v2272_v58, %v2272_v58  ;;  %v2273_v13 = vmul.f32 %v6529_v1, %v7791_v19  ;;  %v7865_v44 = vpop.eup %6530 }
 0x2cf   : > { %v7868_v43 = vpop.eup %6532  ;;  %v2253_v26 = vsel %vm1791_vm2, %v7865_v44, 0.0 }
 0x2d0   : > { %6222 = vmatmul.msk.bf16.vlgmr.msrb.gmra.mxu2 %vm1791_vm2, %v2288_v52  ;;  %v2289_v56 = vpack.c.bf16 %v2273_v13, %v2273_v13  ;;  %v2247_v48 = vsel %vm1791_vm2, %v7868_v43, 0.0 }
 0x2d2   : > { %6223 = vmatmul.msk.bf16.vlgmr.msrb.gmra.mxu3 %vm1791_vm2, %v2289_v56 }
 0x2d3   : > { %2254 = vadd.xlane.f32.xlu2 %v2253_v26 }
 0x2d4   : > { %2248 = vadd.xlane.f32.xlu0 %v2247_v48 }
 0x2dc   : > { %v2219_v31 = vpop.xlane.xlu1 %2218 }
 0x2dd   : > { %6534 = vrcp.f32 %v2219_v31 }
 0x2e3   : > { %v6535_v19 = vpop.eup %6534 }
 0x2e4   : > { %v2275_v6 = vmul.f32 %v6535_v19, %v7796_v5 }
 0x2e6   : > { %v2291_v30 = vpack.c.bf16 %v2275_v6, %v2275_v6 }
 0x2e8   : > { %6225 = vmatmul.msk.bf16.vlgmr.msrb.gmra.mxu1 %vm1791_vm2, %v2291_v30 }
 0x2ed   : > { %v2222_v61 = vpop.xlane.xlu2 %2221 }
 0x2ee   : > { %6536 = vrcp.f32 %v2222_v61 }
 0x2f1   : > { %v2216_v36 = vpop.xlane.xlu0 %2215 }
 0x2f2   : > { %6538 = vrcp.f32 %v2216_v36 }
 0x2f4   : > { %v6537_v25 = vpop.eup %6536  ;;  %v6366_v2 = vpop.permute.xlu1 %6365 }
 0x2f5   : > { %v2276_v29 = vmul.f32 %v6537_v25, %v7802_v18  ;;  %v6371_v4 = vpop.permute.xlu2 %6370  ;;  %v6368_v45 = vunpack.i.h.bf16 %v6366_v2  ;;  %v6367_v51 = vunpack.i.l.bf16 %v6366_v2 }
 0x2f6   : > { %v6373_v33 = vunpack.i.h.bf16 %v6371_v4  ;;  %v6372_v5 = vunpack.i.l.bf16 %v6371_v4 }
 0x2f7   : > { %v2292_v35 = vpack.c.bf16 %v2276_v29, %v2276_v29  ;;  %v1041_v15 = vrot.slane %v6368_v45, 4  ;;  %v873_v46 = vrot.slane %v6367_v51, 4 }
 0x2f8   : > { %v6539_v0 = vpop.eup %6538  ;;  %v1053_v60 = vrot.slane %v6373_v33, 4  ;;  %v885_v20 = vrot.slane %v6372_v5, 4 }
 0x2f9   : > { %v2274_v11 = vmul.f32 %v6539_v0, %v7806_v55  ;;  %6226 = vmatmul.msk.bf16.vlgmr.msra.gmra.mxu2 %vm1791_vm2, %v2292_v35 }
 0x2fb   : > { %v2290_v41 = vpack.c.bf16 %v2274_v11, %v2274_v11 }
 0x2fd   : > { %v6381_v38 = vpop.permute.xlu2 %6380  ;;  %6224 = vmatmul.msk.bf16.vlgmr.msra.gmra.mxu0 %vm1791_vm2, %v2290_v41 }
 0x2fe   : > { %v6383_v32 = vunpack.i.h.bf16 %v6381_v38  ;;  %v6382_v59 = vunpack.i.l.bf16 %v6381_v38 }
 0x300   : > { %v1051_v9 = vrot.slane %v6383_v32, 4  ;;  %v883_v18 = vrot.slane %v6382_v59, 4  ;;  %v886_v27 = vsel %vm423_vm1, %v6382_v59, %v885_v20  ;;  %v1054_v55 = vsel %vm423_vm1, %v6383_v32, %v1053_v60 }
 0x301   : > { %v894_v53 = vperm.slane %v886_v27, %v6784_v28  ;;  %v1062_v39 = vperm.slane %v1054_v55, %v6784_v28 }
 0x302   : > { %v884_v40 = vsel %vm423_vm1, %v883_v18, %v6372_v5  ;;  %v1052_v62 = vsel %vm423_vm1, %v1051_v9, %v6373_v33 }
 0x303   : > { %v890_v54 = vperm.slane %v884_v40, %v6784_v28  ;;  %v1058_v21 = vperm.slane %v1052_v62, %v6784_v28  ;;  %v907_v52 = vrot.slane %v894_v53, 4  ;;  %v1075_v13 = vrot.slane %v1062_v39, 4 }
 0x304   : > { %v6376_v50 = vpop.permute.xlu0 %6375 }
 0x305   : > { %v6378_v24 = vunpack.i.h.bf16 %v6376_v50  ;;  %v6377_v3 = vunpack.i.l.bf16 %v6376_v50  ;;  %v895_v48 = vrot.slane %v890_v54, 4  ;;  %v1063_v31 = vrot.slane %v1058_v21, 4 }
 0x307   : > { %v1039_v8 = vrot.slane %v6378_v24, 4  ;;  %v1042_v63 = vsel %vm423_vm1, %v6378_v24, %v1041_v15  ;;  %v871_v58 = vrot.slane %v6377_v3, 4  ;;  %v874_v1 = vsel %vm423_vm1, %v6377_v3, %v873_v46 }
 0x308   : > { %v1050_v56 = vperm.slane %v1042_v63, %v6784_v28  ;;  %v882_v26 = vperm.slane %v874_v1, %v6784_v28 }
 0x309   : > { %v1040_v19 = vsel %vm423_vm1, %v1039_v8, %v6368_v45  ;;  %v872_v6 = vsel %vm423_vm1, %v871_v58, %v6367_v51 }
 0x30a   : > { %v1046_v30 = vperm.slane %v1040_v19, %v6784_v28  ;;  %v1076_v61 = vsel %vm423_vm1, %v1075_v13, %v1050_v56  ;;  %v1077_v36 = vrot.slane %v1050_v56, 4  ;;  %v878_v25 = vperm.slane %v872_v6, %v6784_v28 }
 0x30b   : > { %v1082_v29 = vperm.slane %v1076_v61, %v6796_v47  ;;  %v908_v4 = vsel %vm423_vm1, %v907_v52, %v882_v26  ;;  %v909_v35 = vrot.slane %v882_v26, 4 }
 0x30c   : > { %v1064_v0 = vsel %vm423_vm1, %v1063_v31, %v1046_v30  ;;  %v1065_v11 = vrot.slane %v1046_v30, 4  ;;  %v1078_v41 = vsel %vm423_vm1, %v1062_v39, %v1077_v36  ;;  %v896_v33 = vsel %vm423_vm1, %v895_v48, %v878_v25 }
 0x30d   : > { %v1070_v5 = vperm.slane %v1064_v0, %v6796_v47  ;;  %v1086_v38 = vperm.slane %v1078_v41, %v6796_v47  ;;  %v1091_v2 = vrot.slane %v1082_v29, 4  ;;  %v897_v32 = vrot.slane %v878_v25, 4 }
 0x30e   : > { %v1066_v59 = vsel %vm423_vm1, %v1058_v21, %v1065_v11  ;;  %v902_v60 = vperm.slane %v896_v33, %v6796_v47  ;;  %v910_v20 = vsel %vm423_vm1, %v894_v53, %v909_v35  ;;  %v914_v9 = vperm.slane %v908_v4, %v6796_v47 }
 0x30f   : > { %v1074_v18 = vperm.slane %v1066_v59, %v6796_v47  ;;  %v1087_v45 = vrot.slane %v1070_v5, 4  ;;  %v1093_v51 = vrot.slane %v1086_v38, 4  ;;  %v898_v27 = vsel %vm423_vm1, %v890_v54, %v897_v32 }
 0x310   : > { %v918_v55 = vperm.slane %v910_v20, %v6796_v47  ;;  %v923_v40 = vrot.slane %v914_v9, 4  ;;  %v1092_v39 = vsel %vm423_vm1, 0.0, %v1091_v2  ;;  %v906_v53 = vperm.slane %v898_v27, %v6796_v47 }
 0x311   : > { %v1089_v62 = vrot.slane %v1074_v18, 4  ;;  %v1094_v15 = vsel %vm423_vm1, 0.0, %v1093_v51  ;;  %v1716_v46 = vsel %vm423_vm1, %v1093_v51, %v1082_v29  ;;  %v919_v21 = vrot.slane %v902_v60, 4 }
 0x312   : > { %v1721_v50 = vrot.slane %v1094_v15, 4  ;;  %v1088_v24 = vsel %vm423_vm1, 0.0, %v1087_v45  ;;  %v924_v54 = vsel %vm423_vm1, 0.0, %v923_v40  ;;  %v925_v8 = vrot.slane %v918_v55, 4 }
 0x313   : > { %v1090_v3 = vsel %vm423_vm1, 0.0, %v1089_v62  ;;  %v921_v1 = vrot.slane %v906_v53, 4  ;;  %v1705_v52 = vsel %vm423_vm1, %v1089_v62, %v1070_v5  ;;  %v1720_v26 = vperm.slane %v1716_v46, %v6784_v28 }
 0x314   : > { %v1710_v63 = vrot.slane %v1090_v3, 4  ;;  %v1722_v58 = vsel %vm423_vm1, %v1721_v50, %v1092_v39  ;;  %v926_v13 = vsel %vm423_vm1, 0.0, %v925_v8  ;;  %v1550_v56 = vsel %vm423_vm1, %v925_v8, %v914_v9 }
 0x315   : > { %v1726_v48 = vperm.slane %v1722_v58, %v6784_v28  ;;  %v922_v31 = vsel %vm423_vm1, 0.0, %v921_v1  ;;  %v1554_v19 = vperm.slane %v1550_v56, %v6784_v28  ;;  %v1555_v6 = vrot.slane %v926_v13, 4 }
 0x316   : > { %v1539_v30 = vsel %vm423_vm1, %v921_v1, %v902_v60  ;;  %v1544_v61 = vrot.slane %v922_v31, 4  ;;  %v1711_v25 = vsel %vm423_vm1, %v1710_v63, %v1088_v24  ;;  %v920_v4 = vsel %vm423_vm1, 0.0, %v919_v21 }
 0x317   : > { %v1543_v36 = vperm.slane %v1539_v30, %v6784_v28  ;;  %v1739_v29 = vrot.slane %v1726_v48, 4  ;;  %v1556_v35 = vsel %vm423_vm1, %v1555_v6, %v924_v54  ;;  %v1575_v0 = vrot.slane %v1554_v19, 4 }
 0x318   : > { %v1715_v11 = vperm.slane %v1711_v25, %v6784_v28  ;;  %v1545_v41 = vsel %vm423_vm1, %v1544_v61, %v920_v4  ;;  %v1560_v33 = vperm.slane %v1556_v35, %v6784_v28  ;;  %v1709_v32 = vperm.slane %v1705_v52, %v6784_v28 }
 0x319   : > { %v1563_v5 = vrot.slane %v1543_v36, 4  ;;  %v1740_v38 = vsel %vm423_vm1, %v1739_v29, %v1720_v26  ;;  %v1549_v2 = vperm.slane %v1545_v41, %v6784_v28  ;;  %v1741_v18 = vrot.slane %v1720_v26, 4 }
 0x31a   : > { %v1727_v59 = vrot.slane %v1715_v11, 4  ;;  %v1746_v60 = vperm.slane %v1740_v38, %v6796_v47  ;;  %v1576_v20 = vsel %vm423_vm1, %v1560_v33, %v1575_v0  ;;  %v1573_v9 = vrot.slane %v1560_v33, 4 }
 0x31b   : > { %v1564_v45 = vsel %vm423_vm1, %v1549_v2, %v1563_v5  ;;  %v1584_v51 = vperm.slane %v1576_v20, %v6796_v47  ;;  %v1561_v27 = vrot.slane %v1549_v2, 4  ;;  %v1729_v21 = vrot.slane %v1709_v32, 4 }
 0x31c   : > { %v1728_v55 = vsel %vm423_vm1, %v1727_v59, %v1709_v32  ;;  %v1572_v40 = vperm.slane %v1564_v45, %v6796_v47  ;;  %v1574_v62 = vsel %vm423_vm1, %v1573_v9, %v1554_v19  ;;  %v1751_v15 = vrot.slane %v1746_v60, 4 }
 0x31d   : > { %v1734_v39 = vperm.slane %v1728_v55, %v6796_v47  ;;  %v1589_v46 = vrot.slane %v1584_v51, 4  ;;  %v1562_v50 = vsel %vm423_vm1, %v1561_v27, %v1543_v36  ;;  %v1580_v53 = vperm.slane %v1574_v62, %v6796_v47 }
 0x31e   : > { %v1568_v24 = vperm.slane %v1562_v50, %v6796_v47  ;;  %v1591_v3 = vrot.slane %v1572_v40, 4  ;;  %v1742_v63 = vsel %vm423_vm1, %v1726_v48, %v1741_v18  ;;  %v1730_v31 = vsel %vm423_vm1, %v1715_v11, %v1729_v21 }
 0x31f   : > { %v1752_v54 = vsel %vm423_vm1, %v1751_v15, %v1734_v39  ;;  %v2228_v8 = vpop.xlane.xlu1 %2227  ;;  %v1590_v58 = vsel %vm423_vm1, %v1589_v46, %v1572_v40  ;;  %v1585_v1 = vrot.slane %v1580_v53, 4  ;;  %v1738_v30 = vperm.slane %v1730_v31, %v6796_v47 }
 0x320   : > { %v2316_v52 = vpack.c.bf16 %v1752_v54, %v1752_v54  ;;  %6540 = vrcp.f32 %v2228_v8  ;;  %v2314_v13 = vpack.c.bf16 %v1590_v58, %v1590_v58  ;;  %v1592_v56 = vsel %vm423_vm1, %v1584_v51, %v1591_v3 }
 0x321   : > { %v1587_v26 = vrot.slane %v1568_v24, 4  ;;  %v1586_v19 = vsel %vm423_vm1, %v1585_v1, %v1568_v24  ;;  %v2315_v6 = vpack.c.bf16 %v1592_v56, %v1592_v56  ;;  %v1750_v25 = vperm.slane %v1742_v63, %v6796_v47 }
 0x322   : > { %v2515_v61 = vsel %vm2323_vm3, %v2314_v13, 0  ;;  %v2312_v36 = vpack.c.bf16 %v1586_v19, %v1586_v19  ;;  %v2553_v4 = vsel %vm2323_vm3, %v2316_v52, 0  ;;  %v1753_v9 = vrot.slane %v1734_v39, 4 }
 0x323   : > { %v1588_v48 = vsel %vm423_vm1, %v1580_v53, %v1587_v26  ;;  %2524 = vmatpush.bf16.msra.mxu0 %v2515_v61  ;;  %v2534_v29 = vsel %vm2323_vm3, %v2315_v6, 0  ;;  %v1755_v11 = vrot.slane %v1750_v25, 4  ;;  %v1757_v62 = vrot.slane %v1738_v30, 4 }
 0x324   : > { %v2313_v35 = vpack.c.bf16 %v1588_v48, %v1588_v48  ;;  %v2477_v0 = vsel %vm2323_vm3, %v2312_v36, 0  ;;  %2543 = vmatpush.bf16.msrb.mxu1 %v2534_v29  ;;  %v1754_v45 = vsel %vm423_vm1, %v1746_v60, %v1753_v9 }
 0x325   : > { %2486 = vmatpush.bf16.msrb.mxu2 %v2477_v0  ;;  %v1756_v38 = vsel %vm423_vm1, %v1755_v11, %v1738_v30  ;;  %v2317_v40 = vpack.c.bf16 %v1754_v45, %v1754_v45  ;;  %v1758_v39 = vsel %vm423_vm1, %v1750_v25, %v1757_v62 }
 0x326   : > { %v6541_v41 = vpop.eup %6540  ;;  %v2496_v33 = vsel %vm2323_vm3, %v2313_v35, 0  ;;  %v2318_v2 = vpack.c.bf16 %v1756_v38, %v1756_v38  ;;  %v2319_v3 = vpack.c.bf16 %v1758_v39, %v1758_v39 }
 0x327   : > { %2505 = vmatpush.bf16.msrb.mxu3 %v2496_v33  ;;  %v2278_v5 = vmul.f32 %v6541_v41, %v7818_v34  ;;  %v2237_v18 = vpop.xlane.xlu1 %2236  ;;  %v2572_v46 = vsel %vm2323_vm3, %v2317_v40, 0 }
 0x328   : > { %v2591_v59 = vsel %vm2323_vm3, %v2318_v2, 0  ;;  %v2610_v1 = vsel %vm2323_vm3, %v2319_v3, 0 }
 0x329   : > { %2562 = vmatpush.bf16.msra.mxu2 %v2553_v4  ;;  %v2294_v32 = vpack.c.bf16 %v2278_v5, %v2278_v5 }
 0x32b   : > { %6228 = vmatmul.msk.bf16.vlgmr.msrb.gmra.mxu0 %vm1791_vm2, %v2294_v32 }
 0x32c   : > { %2600 = vmatpush.bf16.msrb.mxu0 %v2591_v59 }
 0x32f   : > { %v2225_v20 = vpop.xlane.xlu0 %2224 }
 0x330   : > { %6542 = vrcp.f32 %v2225_v20  ;;  %v2243_v21 = vpop.xlane.xlu1 %2242 }
 0x336   : > { %v6543_v51 = vpop.eup %6542  ;;  %v2234_v27 = vpop.xlane.xlu2 %2233 }
 0x337   : > { %v2277_v55 = vmul.f32 %v6543_v51, %v7831_v42  ;;  %6544 = vrcp.f32 %v2234_v27  ;;  %v2231_v34 = vpop.xlane.xlu0 %2230 }
 0x338   : > { %6546 = vrcp.f32 %v2231_v34  ;;  %v2252_v13 = vpop.xlane.xlu1 %2251 }
 0x339   : > { %v2293_v15 = vpack.c.bf16 %v2277_v55, %v2277_v55  ;;  %6548 = vrcp.f32 %v2237_v18 }
 0x33b   : > { %6227 = vmatmul.msk.bf16.vlgmr.msra.gmra.mxu3 %vm1791_vm2, %v2293_v15 }
 0x33c   : > { %2581 = vmatpush.bf16.msra.mxu3 %v2572_v46 }
 0x33d   : > { %v6545_v50 = vpop.eup %6544 }
 0x33e   : > { %v6547_v60 = vpop.eup %6546  ;;  %v2280_v53 = vmul.f32 %v6545_v50, %v7843_v7  ;;  %v2246_v8 = vpop.xlane.xlu2 %2245 }
 0x33f   : > { %v2279_v42 = vmul.f32 %v6547_v60, %v7841_v17  ;;  %v2240_v24 = vpop.xlane.xlu0 %2239  ;;  %v6549_v58 = vpop.eup %6548 }
 0x340   : > { %v2296_v54 = vpack.c.bf16 %v2280_v53, %v2280_v53  ;;  %6550 = vrcp.f32 %v2240_v24  ;;  %v2281_v7 = vmul.f32 %v6549_v58, %v7824_v37 }
 0x341   : > { %v2295_v63 = vpack.c.bf16 %v2279_v42, %v2279_v42  ;;  %6552 = vrcp.f32 %v2246_v8 }
 0x342   : > { %6230 = vmatmul.msk.bf16.vlgmr.msrb.gmra.mxu2 %vm1791_vm2, %v2296_v54  ;;  %6554 = vrcp.f32 %v2243_v21  ;;  %v2297_v26 = vpack.c.bf16 %v2281_v7, %v2281_v7 }
 0x343   : > { %6229 = vmatmul.msk.bf16.vlgmr.msra.gmra.mxu1 %vm1791_vm2, %v2295_v63  ;;  %6556 = vrcp.f32 %v2252_v13 }
 0x344   : > { %2619 = vmatpush.bf16.msra.mxu1 %v2610_v1 }
 0x346   : > { %v6551_v52 = vpop.eup %6550 }
 0x347   : > { %v2282_v17 = vmul.f32 %v6551_v52, %v7857_v57  ;;  %v6553_v56 = vpop.eup %6552  ;;  %v2249_v19 = vpop.xlane.xlu0 %2248 }
 0x348   : > { %v6555_v6 = vpop.eup %6554  ;;  %v2284_v30 = vmul.f32 %v6553_v56, %v7855_v23  ;;  %6558 = vrcp.f32 %v2249_v19  ;;  %v2255_v57 = vpop.xlane.xlu2 %2254 }
 0x349   : > { %v2298_v31 = vpack.c.bf16 %v2282_v17, %v2282_v17  ;;  %v2283_v61 = vmul.f32 %v6555_v6, %v7833_v22  ;;  %v6557_v36 = vpop.eup %6556  ;;  %6560 = vrcp.f32 %v2255_v57 }
 0x34a   : > { %v2300_v37 = vpack.c.bf16 %v2284_v30, %v2284_v30  ;;  %v2286_v4 = vmul.f32 %v6557_v36, %v7845_v49 }
 0x34b   : > { %6231 = vmatmul.msk.bf16.vlgmr.msrb.gmra.mxu3 %vm1791_vm2, %v2297_v26  ;;  %6232 = vmatmul.msk.bf16.vlgmr.msra.gmra.mxu0 %vm1791_vm2, %v2298_v31  ;;  %v2299_v48 = vpack.c.bf16 %v2283_v61, %v2283_v61 }
 0x34c   : > { %v2302_v23 = vpack.c.bf16 %v2286_v4, %v2286_v4 }
 0x34e   : > { %v6559_v25 = vpop.eup %6558 }
 0x34f   : > { %v2285_v35 = vmul.f32 %v6559_v25, %v7868_v43  ;;  %v6561_v41 = vpop.eup %6560 }
 0x350   : > { %v2287_v33 = vmul.f32 %v6561_v41, %v7865_v44 }
 0x351   : > { %v2301_v11 = vpack.c.bf16 %v2285_v35, %v2285_v35 }
 0x352   : > { %6234 = vmatmul.msk.bf16.vlgmr.msra.gmra.mxu2 %vm1791_vm2, %v2300_v37  ;;  %v2303_v38 = vpack.c.bf16 %v2287_v33, %v2287_v33 }
 0x353   : > { %v2336_v29 = vpop.f32.mrf.mxu2  ;;  %6233 = vmatmul.msk.bf16.vlgmr.msrb.gmra.mxu1 %vm1791_vm2, %v2299_v48 }
 0x354   : > { %v2627_v18 = vrot.slane %v2336_v29, 4 }
 0x355   : > { %v2355_v0 = vpop.f32.mrf.mxu3 }
 0x356   : > { %v2639_v49 = vrot.slane %v2355_v0, 4 }
 0x35b   : > { %v2338_v22 = vpop.f32.mrf.mxu2  ;;  %6235 = vmatmul.msk.bf16.vlgmr.msra.gmra.mxu3 %vm1791_vm2, %v2301_v11  ;;  %6236 = vmatmul.msk.bf16.vlgmr.msrb.gmra.mxu0 %vm1791_vm2, %v2302_v23 }
 0x35d   : > { %v2357_v5 = vpop.f32.mrf.mxu3 }
 0x363   : > { %6237 = vmatmul.msk.bf16.vlgmr.msra.gmra.mxu1 %vm1791_vm2, %v2303_v38 }
 0x365   : > { %v2393_v2 = vpop.f32.mrf.mxu1 }
 0x366   : > { %v2637_v59 = vrot.slane %v2393_v2, 4  ;;  %v2640_v43 = vsel %vm423_vm1, %v2393_v2, %v2639_v49 }
 0x367   : > { %v2648_v9 = vperm.slane %v2640_v43, %v6784_v28 }
 0x368   : > { %v2638_v20 = vsel %vm423_vm1, %v2637_v59, %v2355_v0 }
 0x369   : > { %v2644_v45 = vperm.slane %v2638_v20, %v6784_v28  ;;  %v2661_v55 = vrot.slane %v2648_v9, 4 }
 0x36b   : > { %v2649_v15 = vrot.slane %v2644_v45, 4 }
 0x36d   : > { %v2395_v32 = vpop.f32.mrf.mxu1 }
 0x37a   : > { %v2374_v51 = vpop.f32.mrf.mxu0 }
 0x37b   : > { %v2625_v27 = vrot.slane %v2374_v51, 4  ;;  %v2628_v44 = vsel %vm423_vm1, %v2374_v51, %v2627_v18 }
 0x37c   : > { %v2636_v34 = vperm.slane %v2628_v44, %v6784_v28  ;;  %v7997_v40 = vpop.f32.mrf.mxu2 }
 0x37d   : > { %v2626_v62 = vsel %vm423_vm1, %v2625_v27, %v2336_v29 }
 0x37e   : > { %v2632_v46 = vperm.slane %v2626_v62, %v6784_v28  ;;  %v2662_v39 = vsel %vm423_vm1, %v2661_v55, %v2636_v34  ;;  %v2663_v50 = vrot.slane %v2636_v34, 4  ;;  %v2683_v55 = vrot.slane %v7997_v40, 4 }
 0x37f   : > { %v2668_v60 = vperm.slane %v2662_v39, %v6796_v47 }
 0x380   : > { %v2650_v53 = vsel %vm423_vm1, %v2649_v15, %v2632_v46  ;;  %v2651_v21 = vrot.slane %v2632_v46, 4  ;;  %v2664_v42 = vsel %vm423_vm1, %v2648_v9, %v2663_v50 }
 0x381   : > { %v2656_v24 = vperm.slane %v2650_v53, %v6796_v47  ;;  %v2672_v3 = vperm.slane %v2664_v42, %v6796_v47  ;;  %v2677_v58 = vrot.slane %v2668_v60, 4 }
 0x382   : > { %v2652_v54 = vsel %vm423_vm1, %v2644_v45, %v2651_v21  ;;  %v2376_v8 = vpop.f32.mrf.mxu0 }
 0x383   : > { %v2660_v63 = vperm.slane %v2652_v54, %v6796_v47  ;;  %v2679_v1 = vrot.slane %v2672_v3, 4  ;;  %v2673_v52 = vrot.slane %v2656_v24, 4  ;;  %v2678_v6 = vsel %vm423_vm1, 0.0, %v2677_v58 }
 0x384   : > { %v2414_v7 = vpop.f32.mrf.mxu2 }
 0x385   : > { %v2675_v17 = vrot.slane %v2660_v63, 4  ;;  %v2680_v13 = vsel %vm423_vm1, 0.0, %v2679_v1  ;;  %v2860_v56 = vsel %vm423_vm1, %v2679_v1, %v2668_v60  ;;  %v2674_v57 = vsel %vm423_vm1, 0.0, %v2673_v52 }
 0x386   : > { %v2864_v26 = vperm.slane %v2860_v56, %v6784_v28  ;;  %v2865_v31 = vrot.slane %v2680_v13, 4 }
 0x387   : > { %v2676_v19 = vsel %vm423_vm1, 0.0, %v2675_v17  ;;  %v2849_v30 = vsel %vm423_vm1, %v2675_v17, %v2656_v24 }
 0x388   : > { %v2866_v61 = vsel %vm423_vm1, %v2865_v31, %v2678_v6  ;;  %v2853_v37 = vperm.slane %v2849_v30, %v6784_v28  ;;  %v2854_v36 = vrot.slane %v2676_v19, 4  ;;  %v2885_v48 = vrot.slane %v2864_v26, 4 }
 0x389   : > { %v2870_v25 = vperm.slane %v2866_v61, %v6784_v28 }
 0x38a   : > { %v2855_v29 = vsel %vm423_vm1, %v2854_v36, %v2674_v57  ;;  %v2873_v4 = vrot.slane %v2853_v37, 4 }
 0x38b   : > { %v2859_v35 = vperm.slane %v2855_v29, %v6784_v28  ;;  %v2886_v0 = vsel %vm423_vm1, %v2870_v25, %v2885_v48  ;;  %v2883_v23 = vrot.slane %v2870_v25, 4 }
 0x38c   : > { %v2894_v11 = vperm.slane %v2886_v0, %v6796_v47 }
 0x38d   : > { %v2874_v41 = vsel %vm423_vm1, %v2859_v35, %v2873_v4  ;;  %v2871_v22 = vrot.slane %v2859_v35, 4  ;;  %v2884_v38 = vsel %vm423_vm1, %v2883_v23, %v2864_v26 }
 0x38e   : > { %v2882_v33 = vperm.slane %v2874_v41, %v6796_v47  ;;  %v2899_v5 = vrot.slane %v2894_v11, 4  ;;  %v2890_v59 = vperm.slane %v2884_v38, %v6796_v47 }
 0x38f   : > { %v2872_v2 = vsel %vm423_vm1, %v2871_v22, %v2853_v37 }
 0x390   : > { %v2900_v32 = vsel %vm423_vm1, %v2899_v5, %v2882_v33  ;;  %v2878_v49 = vperm.slane %v2872_v2, %v6796_v47  ;;  %v2895_v9 = vrot.slane %v2890_v59, 4  ;;  %v2901_v18 = vrot.slane %v2882_v33, 4 }
 0x391   : > { %3085 = vrot.lane.b32.xlu2 %v2900_v32, %s6647_s17 }
 0x392   : > { %v2897_v43 = vrot.slane %v2878_v49, 4  ;;  %v8034_v45 = vsel %vm423_vm1, %v2894_v11, %v2901_v18  ;;  %v8037_v51 = vsel %vm423_vm1, %v2895_v9, %v2878_v49 }
 0x394   : > { %v2898_v20 = vsel %vm423_vm1, %v2890_v59, %v2897_v43 }
 0x395   : > { %3069 = vrot.lane.b32.xlu0 %v2898_v20, %s6648_s19 }
 0x3a8   : > { %v2450_v27 = vpop.f32.mrf.mxu0 }
 0x3a9   : > { %v2681_v34 = vrot.slane %v2450_v27, 4  ;;  %v2684_v62 = vsel %vm423_vm1, %v2450_v27, %v2683_v55 }
 0x3aa   : > { %v2692_v46 = vperm.slane %v2684_v62, %v6784_v28 }
 0x3ab   : > { %v2682_v15 = vsel %vm423_vm1, %v2681_v34, %v7997_v40 }
 0x3ac   : > { %v2688_v60 = vperm.slane %v2682_v15, %v6784_v28  ;;  %v2719_v24 = vrot.slane %v2692_v46, 4 }
 0x3ae   : > { %v2707_v8 = vrot.slane %v2688_v60, 4 }
 0x3b0   : > { %v2452_v44 = vpop.f32.mrf.mxu0 }
 0x3be   : > { %v2431_v39 = vpop.f32.mrf.mxu3 }
 0x3bf   : > { %v2695_v50 = vrot.slane %v2431_v39, 4 }
 0x3c0   : > { %v2469_v53 = vpop.f32.mrf.mxu1 }
 0x3c1   : > { %v2693_v21 = vrot.slane %v2469_v53, 4  ;;  %v2696_v42 = vsel %vm423_vm1, %v2469_v53, %v2695_v50 }
 0x3c2   : > { %v2704_v3 = vperm.slane %v2696_v42, %v6784_v28 }
 0x3c3   : > { %v2694_v54 = vsel %vm423_vm1, %v2693_v21, %v2431_v39 }
 0x3c4   : > { %v2700_v63 = vperm.slane %v2694_v54, %v6784_v28  ;;  %v2717_v58 = vrot.slane %v2704_v3, 4  ;;  %v2720_v40 = vsel %vm423_vm1, %v2704_v3, %v2719_v24 }
 0x3c5   : > { %v2728_v1 = vperm.slane %v2720_v40, %v6796_v47  ;;  %v2488_v7 = vpop.f32.mrf.mxu2 }
 0x3c6   : > { %v2705_v52 = vrot.slane %v2700_v63, 4  ;;  %v2708_v17 = vsel %vm423_vm1, %v2700_v63, %v2707_v8  ;;  %v2718_v13 = vsel %vm423_vm1, %v2717_v58, %v2692_v46  ;;  %v2739_v56 = vrot.slane %v2488_v7, 4  ;;  %v2433_v26 = vpop.f32.mrf.mxu3 }
 0x3c7   : > { %v2716_v31 = vperm.slane %v2708_v17, %v6796_v47  ;;  %v2724_v19 = vperm.slane %v2718_v13, %v6796_v47  ;;  %v2735_v6 = vrot.slane %v2728_v1, 4 }
 0x3c8   : > { %v2706_v30 = vsel %vm423_vm1, %v2705_v52, %v2688_v60  ;;  %v2471_v61 = vpop.f32.mrf.mxu1  ;;  %v2526_v37 = vpop.f32.mrf.mxu0 }
 0x3c9   : > { %v2712_v36 = vperm.slane %v2706_v30, %v6796_v47  ;;  %v2731_v48 = vrot.slane %v2716_v31, 4  ;;  %v2733_v57 = vrot.slane %v2724_v19, 4  ;;  %v2736_v25 = vsel %vm423_vm1, 0.0, %v2735_v6 }
 0x3ca   : > { %v2914_v29 = vsel %vm423_vm1, %v2735_v6, %v2724_v19  ;;  %v2919_v4 = vrot.slane %v2736_v25, 4  ;;  %v2737_v35 = vrot.slane %v2526_v37, 4  ;;  %v2740_v0 = vsel %vm423_vm1, %v2526_v37, %v2739_v56 }
 0x3cb   : > { %v2729_v23 = vrot.slane %v2712_v36, 4  ;;  %v2732_v11 = vsel %vm423_vm1, 0.0, %v2731_v48  ;;  %v2734_v41 = vsel %vm423_vm1, 0.0, %v2733_v57  ;;  %v2918_v22 = vperm.slane %v2914_v29, %v6784_v28 }
 0x3cc   : > { %v2908_v33 = vrot.slane %v2732_v11, 4  ;;  %v2738_v5 = vsel %vm423_vm1, %v2737_v35, %v2488_v7  ;;  %v2748_v38 = vperm.slane %v2740_v0, %v6784_v28  ;;  %v2903_v2 = vsel %vm423_vm1, %v2731_v48, %v2712_v36 }
 0x3cd   : > { %v2490_v32 = vpop.f32.mrf.mxu2  ;;  %v2730_v49 = vsel %vm423_vm1, 0.0, %v2729_v23  ;;  %v2907_v59 = vperm.slane %v2903_v2, %v6784_v28  ;;  %v2920_v43 = vsel %vm423_vm1, %v2919_v4, %v2734_v41  ;;  %v2939_v27 = vrot.slane %v2918_v22, 4 }
 0x3ce   : > { %v2507_v20 = vpop.f32.mrf.mxu3  ;;  %v2909_v9 = vsel %vm423_vm1, %v2908_v33, %v2730_v49  ;;  %v2924_v18 = vperm.slane %v2920_v43, %v6784_v28  ;;  %v2744_v44 = vperm.slane %v2738_v5, %v6784_v28  ;;  %v2775_v15 = vrot.slane %v2748_v38, 4 }
 0x3cf   : > { %v2751_v55 = vrot.slane %v2507_v20, 4  ;;  %v2913_v34 = vperm.slane %v2909_v9, %v6784_v28  ;;  %v2927_v62 = vrot.slane %v2907_v59, 4 }
 0x3d0   : > { %v2528_v46 = vpop.f32.mrf.mxu0  ;;  %v2545_v39 = vpop.f32.mrf.mxu1  ;;  %v2940_v50 = vsel %vm423_vm1, %v2924_v18, %v2939_v27  ;;  %v2937_v60 = vrot.slane %v2924_v18, 4  ;;  %v2763_v58 = vrot.slane %v2744_v44, 4 }
 0x3d1   : > { %v2749_v53 = vrot.slane %v2545_v39, 4  ;;  %v2752_v21 = vsel %vm423_vm1, %v2545_v39, %v2751_v55  ;;  %v2928_v42 = vsel %vm423_vm1, %v2913_v34, %v2927_v62  ;;  %v2948_v24 = vperm.slane %v2940_v50, %v6796_v47 }
 0x3d2   : > { %v2760_v3 = vperm.slane %v2752_v21, %v6784_v28  ;;  %v2936_v54 = vperm.slane %v2928_v42, %v6796_v47  ;;  %v2925_v8 = vrot.slane %v2913_v34, 4  ;;  %v2938_v63 = vsel %vm423_vm1, %v2937_v60, %v2918_v22 }
 0x3d3   : > { %v2750_v40 = vsel %vm423_vm1, %v2749_v53, %v2507_v20  ;;  %v2953_v1 = vrot.slane %v2948_v24, 4  ;;  %v2944_v7 = vperm.slane %v2938_v63, %v6796_v47 }
 0x3d4   : > { %v2756_v52 = vperm.slane %v2750_v40, %v6784_v28  ;;  %v2773_v17 = vrot.slane %v2760_v3, 4  ;;  %v2776_v13 = vsel %vm423_vm1, %v2760_v3, %v2775_v15  ;;  %v2926_v56 = vsel %vm423_vm1, %v2925_v8, %v2907_v59 }
 0x3d5   : > { %v2784_v26 = vperm.slane %v2776_v13, %v6796_v47  ;;  %v2564_v31 = vpop.f32.mrf.mxu2  ;;  %v2954_v19 = vsel %vm423_vm1, %v2953_v1, %v2936_v54  ;;  %v2932_v6 = vperm.slane %v2926_v56, %v6796_v47  ;;  %v2949_v23 = vrot.slane %v2944_v7, 4 }
 0x3d6   : > { %v2761_v30 = vrot.slane %v2756_v52, 4  ;;  %v2764_v61 = vsel %vm423_vm1, %v2756_v52, %v2763_v58  ;;  %v2774_v37 = vsel %vm423_vm1, %v2773_v17, %v2748_v38  ;;  %v2795_v36 = vrot.slane %v2564_v31, 4  ;;  %3087 = vrot.lane.b32.xlu0 %v2954_v19, %s6647_s17  ;;  %v2509_v48 = vpop.f32.mrf.mxu3 }
 0x3d7   : > { %v2772_v57 = vperm.slane %v2764_v61, %v6796_v47  ;;  %v2780_v25 = vperm.slane %v2774_v37, %v6796_v47  ;;  %v2791_v29 = vrot.slane %v2784_v26, 4  ;;  %v2951_v11 = vrot.slane %v2932_v6, 4 }
 0x3d8   : > { %v2762_v4 = vsel %vm423_vm1, %v2761_v30, %v2744_v44  ;;  %v2547_v35 = vpop.f32.mrf.mxu1  ;;  %v2602_v0 = vpop.f32.mrf.mxu0  ;;  %v2955_v41 = vrot.slane %v2936_v54, 4 }
 0x3d9   : > { %v2768_v22 = vperm.slane %v2762_v4, %v6796_v47  ;;  %v2787_v33 = vrot.slane %v2772_v57, 4  ;;  %v2789_v5 = vrot.slane %v2780_v25, 4  ;;  %v2792_v38 = vsel %vm423_vm1, 0.0, %v2791_v29 }
 0x3da   : > { %v2968_v2 = vsel %vm423_vm1, %v2791_v29, %v2780_v25  ;;  %v2973_v32 = vrot.slane %v2792_v38, 4  ;;  %v2793_v49 = vrot.slane %v2602_v0, 4  ;;  %v2796_v59 = vsel %vm423_vm1, %v2602_v0, %v2795_v36 }
 0x3db   : > { %v2785_v43 = vrot.slane %v2768_v22, 4  ;;  %v2788_v20 = vsel %vm423_vm1, 0.0, %v2787_v33  ;;  %v2790_v9 = vsel %vm423_vm1, 0.0, %v2789_v5  ;;  %v2972_v18 = vperm.slane %v2968_v2, %v6784_v28 }
 0x3dc   : > { %v2962_v27 = vrot.slane %v2788_v20, 4  ;;  %v2794_v44 = vsel %vm423_vm1, %v2793_v49, %v2564_v31  ;;  %v2804_v55 = vperm.slane %v2796_v59, %v6784_v28  ;;  %v2952_v34 = vsel %vm423_vm1, %v2944_v7, %v2951_v11 }
 0x3dd   : > { %3071 = vrot.lane.b32.xlu1 %v2952_v34, %s6648_s19  ;;  %v2566_v62 = vpop.f32.mrf.mxu2  ;;  %v2956_v15 = vsel %vm423_vm1, %v2948_v24, %v2955_v41  ;;  %v2786_v46 = vsel %vm423_vm1, 0.0, %v2785_v43  ;;  %v2957_v39 = vsel %vm423_vm1, %v2787_v33, %v2768_v22  ;;  %v2800_v50 = vperm.slane %v2794_v44, %v6784_v28 }
 0x3de   : > { %3103 = vrot.lane.b32.xlu0 %v2956_v15, %s6649_s20  ;;  %v2583_v60 = vpop.f32.mrf.mxu3  ;;  %v2961_v53 = vperm.slane %v2957_v39, %v6784_v28  ;;  %v2963_v21 = vsel %vm423_vm1, %v2962_v27, %v2786_v46  ;;  %v2974_v42 = vsel %vm423_vm1, %v2973_v32, %v2790_v9  ;;  %v2831_v8 = vrot.slane %v2804_v55, 4 }
 0x3df   : > { %v2807_v3 = vrot.slane %v2583_v60, 4  ;;  %v2967_v54 = vperm.slane %v2963_v21, %v6784_v28  ;;  %v2978_v24 = vperm.slane %v2974_v42, %v6784_v28  ;;  %v2993_v1 = vrot.slane %v2972_v18, 4 }
 0x3e0   : > { %v2604_v63 = vpop.f32.mrf.mxu0  ;;  %v2621_v58 = vpop.f32.mrf.mxu1  ;;  %v2981_v40 = vrot.slane %v2961_v53, 4  ;;  %v8116_v7 = vsel %vm423_vm1, %v2949_v23, %v2932_v6  ;;  %v2819_v26 = vrot.slane %v2800_v50, 4 }
 0x3e1   : > { %v2805_v52 = vrot.slane %v2621_v58, 4  ;;  %v2808_v17 = vsel %vm423_vm1, %v2621_v58, %v2807_v3  ;;  %v2979_v13 = vrot.slane %v2967_v54, 4  ;;  %v2991_v56 = vrot.slane %v2978_v24, 4 }
 0x3e2   : > { %v2816_v31 = vperm.slane %v2808_v17, %v6784_v28  ;;  %v2982_v19 = vsel %vm423_vm1, %v2967_v54, %v2981_v40  ;;  %v2994_v30 = vsel %vm423_vm1, %v2978_v24, %v2993_v1 }
 0x3e3   : > { %v2806_v61 = vsel %vm423_vm1, %v2805_v52, %v2583_v60  ;;  %v8124_v37 = vperm.slane %v2982_v19, %v6796_v47  ;;  %v8127_v6 = vperm.slane %v2994_v30, %v6796_v47  ;;  %v2980_v36 = vsel %vm423_vm1, %v2979_v13, %v2961_v53 }
 0x3e4   : > { %v2812_v48 = vperm.slane %v2806_v61, %v6784_v28  ;;  %v2829_v57 = vrot.slane %v2816_v31, 4  ;;  %v2832_v25 = vsel %vm423_vm1, %v2816_v31, %v2831_v8  ;;  %v2986_v29 = vperm.slane %v2980_v36, %v6796_v47 }
 0x3e5   : > { %v2840_v4 = vperm.slane %v2832_v25, %v6796_v47  ;;  %3101 = vrot.lane.b32.xlu1 %v8034_v45, %s6649_s20  ;;  %v3007_v35 = vrot.slane %v8127_v6, 4  ;;  %v2992_v0 = vsel %vm423_vm1, %v2991_v56, %v2972_v18 }
 0x3e6   : > { %v2817_v23 = vrot.slane %v2812_v48, 4  ;;  %v2820_v11 = vsel %vm423_vm1, %v2812_v48, %v2819_v26  ;;  %v2830_v41 = vsel %vm423_vm1, %v2829_v57, %v2804_v55  ;;  %v2585_v22 = vpop.f32.mrf.mxu3  ;;  %v2998_v33 = vperm.slane %v2992_v0, %v6796_v47 }
 0x3e7   : > { %v2828_v5 = vperm.slane %v2820_v11, %v6796_v47  ;;  %v2836_v38 = vperm.slane %v2830_v41, %v6796_v47  ;;  %v2847_v2 = vrot.slane %v2840_v4, 4  ;;  %v3008_v45 = vsel %vm423_vm1, %v3007_v35, %v8124_v37  ;;  %v6315_v11 = vld [vmem:[%s9793_s3 + $0x8] sm:$0xff]  ;;  %v6314_v41 = vld [vmem:[%s9793_s3] sm:$0xff] }
 0x3e8   : > { %v2818_v32 = vsel %vm423_vm1, %v2817_v23, %v2800_v50  ;;  %3089 = vrot.lane.b32.xlu0 %v3008_v45, %s6647_s17  ;;  %v2623_v49 = vpop.f32.mrf.mxu1  ;;  %v3005_v59 = vrot.slane %v2986_v29, 4  ;;  %v3003_v55 = vrot.slane %v2998_v33, 4  ;;  %v3009_v35 = vrot.slane %v8124_v37, 4  ;;  %3160 = vmatpush.bf16.msrb.mxu2 %v6315_v11 }
 0x3e9   : > { %v2824_v43 = vperm.slane %v2818_v32, %v6796_v47  ;;  %v2843_v20 = vrot.slane %v2828_v5, 4  ;;  %v2845_v9 = vrot.slane %v2836_v38, 4  ;;  %v2848_v18 = vsel %vm423_vm1, 0.0, %v2847_v2 }
 0x3ea   : > { %v3022_v27 = vsel %vm423_vm1, %v2847_v2, %v2836_v38  ;;  %v3027_v44 = vrot.slane %v2848_v18, 4  ;;  %v3006_v34 = vsel %vm423_vm1, %v2998_v33, %v3005_v59  ;;  %v3004_v8 = vsel %vm423_vm1, %v3003_v55, %v2986_v29 }
 0x3eb   : > { %v2841_v62 = vrot.slane %v2824_v43, 4  ;;  %v2844_v15 = vsel %vm423_vm1, 0.0, %v2843_v20  ;;  %v2846_v46 = vsel %vm423_vm1, 0.0, %v2845_v9  ;;  %v3026_v39 = vperm.slane %v3022_v27, %v6784_v28  ;;  %3073 = vrot.lane.b32.xlu2 %v3006_v34, %s6648_s19  ;;  %v3086_v45 = vpop.permute.xlu2 %3085 }
 0x3ec   : > { %v3016_v50 = vrot.slane %v2844_v15, 4  ;;  %v3011_v60 = vsel %vm423_vm1, %v2843_v20, %v2824_v43  ;;  %v3028_v53 = vsel %vm423_vm1, %v3027_v44, %v2846_v46  ;;  %v3010_v23 = vsel %vm423_vm1, %v8127_v6, %v3009_v35  ;;  %3161 = vmatpush.bf16.msrb.mxu2 %v6314_v41 }
 0x3ed   : > { %v2842_v21 = vsel %vm423_vm1, 0.0, %v2841_v62  ;;  %v3015_v42 = vperm.slane %v3011_v60, %v6784_v28  ;;  %v3032_v3 = vperm.slane %v3028_v53, %v6784_v28  ;;  %v3047_v54 = vrot.slane %v3026_v39, 4 }
 0x3ee   : > { %v3017_v24 = vsel %vm423_vm1, %v3016_v50, %v2842_v21  ;;  %v6317_v21 = vld [vmem:[%s9791_s1 + $0x18] sm:$0xff] }
 0x3ef   : > { %v3021_v63 = vperm.slane %v3017_v24, %v6784_v28  ;;  %v3035_v58 = vrot.slane %v3015_v42, 4  ;;  %v3048_v40 = vsel %vm423_vm1, %v3032_v3, %v3047_v54  ;;  %v3045_v1 = vrot.slane %v3032_v3, 4  ;;  %3224 = vmatpush.bf16.msrb.mxu3 %v6317_v21 }
 0x3f0   : > { %v3056_v52 = vperm.slane %v3048_v40, %v6796_v47 }
 0x3f1   : > { %v3036_v17 = vsel %vm423_vm1, %v3021_v63, %v3035_v58  ;;  %v3033_v13 = vrot.slane %v3021_v63, 4  ;;  %v3046_v31 = vsel %vm423_vm1, %v3045_v1, %v3026_v39 }
 0x3f2   : > { %v3044_v56 = vperm.slane %v3036_v17, %v6796_v47  ;;  %v3061_v26 = vrot.slane %v3056_v52, 4  ;;  %v3052_v48 = vperm.slane %v3046_v31, %v6796_v47 }
 0x3f3   : > { %v3034_v19 = vsel %vm423_vm1, %v3033_v13, %v3015_v42  ;;  %v6316_v42 = vld [vmem:[%s9791_s1 + $0x10] sm:$0xff] }
 0x3f4   : > { %v3062_v30 = vsel %vm423_vm1, %v3061_v26, %v3044_v56  ;;  %v3063_v61 = vrot.slane %v3044_v56, 4  ;;  %v3040_v36 = vperm.slane %v3034_v19, %v6796_v47  ;;  %v3057_v4 = vrot.slane %v3052_v48, 4  ;;  %3225 = vmatpush.bf16.msrb.mxu3 %v6316_v42 }
 0x3f5   : > { %3091 = vrot.lane.b32.xlu2 %v3062_v30, %s6647_s17 }
 0x3f6   : > { %v3064_v57 = vsel %vm423_vm1, %v3056_v52, %v3063_v61  ;;  %v3059_v25 = vrot.slane %v3040_v36, 4  ;;  %v3058_v0 = vsel %vm423_vm1, %v3057_v4, %v3040_v36 }
 0x3f7   : > { %3107 = vrot.lane.b32.xlu0 %v3064_v57, %s6649_s20 }
 0x3f8   : > { %v3060_v29 = vsel %vm423_vm1, %v3052_v48, %v3059_v25  ;;  %v6496_v48 = vld [vmem:[%s9792_s2 + $0x1] ss:$0 sm:$0xff] }
 0x3f9   : > { %3075 = vrot.lane.b32.xlu1 %v3060_v29, %s6648_s19 }
 0x401   : > { %3105 = vrot.lane.b32.xlu1 %v3010_v23, %s6649_s20 }
 0x407   : > { %v3070_v22 = vpop.permute.xlu0 %3069 }
 0x408   : > { %v3113_v38 = vsel %vm1791_vm2, %v8037_v51, %v3070_v22 }
 0x409   : > { %v3118_v49 = vsel %vm3117_vm5, %v3113_v38, %v3086_v45 }
 0x445   : > { %v3074_v18 = vpop.permute.xlu2 %3073 }
 0x446   : > { %v3115_v15 = vsel %vm1791_vm2, %v3004_v8, %v3074_v18 }
 0x448   : > { %v3088_v33 = vpop.permute.xlu0 %3087 }
 0x44f   : > { %v3072_v37 = vpop.permute.xlu1 %3071  ;;  %v3092_v55 = vpop.permute.xlu2 %3091 }
 0x450   : > { %v3114_v5 = vsel %vm1791_vm2, %v8116_v7, %v3072_v37  ;;  %v3104_v6 = vpop.permute.xlu0 %3103 }
 0x451   : > { %v3119_v2 = vsel %vm3117_vm5, %v3114_v5, %v3088_v33 }
 0x452   : > { %v3124_v32 = vsel %vm3122_vm4, %v3119_v2, %v3104_v6 }
 0x453   : > { %v3128_v20 = vadd.f32 %v3124_v32, %v6721_v12 }
 0x457   : > { %v3102_v59 = vpop.permute.xlu1 %3101 }
 0x458   : > { %v3123_v43 = vsel %vm3122_vm4, %v3118_v49, %v3102_v59 }
 0x459   : > { %v3127_v7 = vadd.f32 %v3123_v43, %v6707_v10 }
 0x45a   : > { %v3090_v51 = vpop.permute.xlu0 %3089 }
 0x45b   : > { %v3131_v9 = vpack.c.bf16 %v3128_v20, %v3127_v7  ;;  %v3120_v12 = vsel %vm3117_vm5, %v3115_v15, %v3090_v51 }
 0x45d   : > { %6246 = vmatmul.msk.bf16.vlgmr.msrb.gmra.mxu2 %vm260_vm0, %v3131_v9 }
 0x469   : > { %v3108_v62 = vpop.permute.xlu0 %3107 }
 0x46b   : > { %v3076_v27 = vpop.permute.xlu1 %3075 }
 0x46c   : > { %v3116_v44 = vsel %vm1791_vm2, %v3058_v0, %v3076_v27 }
 0x46d   : > { %v3121_v34 = vsel %vm3117_vm5, %v3116_v44, %v3092_v55 }
 0x46e   : > { %v3126_v46 = vsel %vm3122_vm4, %v3121_v34, %v3108_v62 }
 0x46f   : > { %v3130_v60 = vadd.f32 %v3126_v46, %v6755_v16 }
 0x473   : > { %v3106_v39 = vpop.permute.xlu1 %3105 }
 0x474   : > { %v3125_v10 = vsel %vm3122_vm4, %v3120_v12, %v3106_v39 }
 0x475   : > { %v3129_v50 = vadd.f32 %v3125_v10, %v6735_v14  ;;  %v6495_v14 = vld [vmem:[%s9794_s4] ss:$0 sm:$0xff] }
 0x477   : > { %v3132_v53 = vpack.c.bf16 %v3130_v60, %v3129_v50 }
 0x479   : > { %6247 = vmatmul.msk.bf16.gmra.mxu2 %vm260_vm0, %v3132_v53 }
 0x4e0   : > { %v3163_v3 = vpop.f32.mrf.mxu2 }
 0x4e1   : > { %v3164_v54 = vadd.f32 %v6495_v14, %v3163_v3 }
 0x4e3   : > { %v3173_v24 = vmax.f32 %v3164_v54, 0.0 }
 0x4e5   : > { %v3177_v58 = vadd.f32 %v3173_v24, %v3127_v7 }
 0x4e8   : > { %v3165_v16 = vpop.f32.mrf.mxu2 }
 0x4e9   : > { %v3166_v8 = vadd.f32 %v6495_v14, %v3165_v16 }
 0x4eb   : > { %v3174_v63 = vmax.f32 %v3166_v8, 0.0 }
 0x4ed   : > { %v3178_v40 = vadd.f32 %v3174_v63, %v3128_v20 }
 0x4ef   : > { %v3195_v1 = vpack.c.bf16 %v3178_v40, %v3177_v58 }
 0x4f1   : > { %6266 = vmatmul.msk.bf16.vlgmr.msrb.gmra.mxu3 %vm260_vm0, %v3195_v1 }
 0x4fc   : > { %v3168_v52 = vpop.f32.mrf.mxu2 }
 0x4fd   : > { %v3169_v17 = vadd.f32 %v6495_v14, %v3168_v52 }
 0x4ff   : > { %v3175_v56 = vmax.f32 %v3169_v17, 0.0 }
 0x501   : > { %v3179_v19 = vadd.f32 %v3175_v56, %v3129_v50 }
 0x504   : > { %v3170_v13 = vpop.f32.mrf.mxu2 }
 0x505   : > { %v3171_v26 = vadd.f32 %v6495_v14, %v3170_v13 }
 0x507   : > { %v3176_v31 = vmax.f32 %v3171_v26, 0.0 }
 0x509   : > { %v3180_v30 = vadd.f32 %v3176_v31, %v3130_v60 }
 0x50b   : > { %v3196_v61 = vpack.c.bf16 %v3180_v30, %v3179_v19 }
 0x50d   : > { %6267 = vmatmul.msk.bf16.gmra.mxu3 %vm260_vm0, %v3196_v61 }
 0x574   : > { %v3227_v36 = vpop.f32.mrf.mxu3 }
 0x575   : > { %v8222_v25 = vadd.f32 %v6496_v48, %v3227_v36 }
 0x577   : > { %v3375_v6 = vrot.slane %v8222_v25, 4 }
 0x57c   : > { %v3229_v57 = vpop.f32.mrf.mxu3 }
 0x57d   : > { %v8224_v29 = vadd.f32 %v6496_v48, %v3229_v57 }
 0x57f   : > { %v6394_v4 = vpack.i.bf16 %v8224_v29, %v8222_v25  ;;  %v3543_v38 = vrot.slane %v8224_v29, 4 }
 0x581   : > { %6395 = vrot.lane.b32.xlu0 %v6394_v4, %s6634_s6  ;;  %6385 = vrot.lane.b32.xlu2 %v6394_v4, %s6639_s11 }
 0x582   : > { %6390 = vrot.lane.b32.xlu1 %v6394_v4, %s6636_s8 }
 0x589   : > { %6410 = vrot.lane.b32.xlu0 %v6394_v4, %s6638_s10  ;;  %6400 = vrot.lane.b32.xlu2 %v6394_v4, %s6635_s7 }
 0x58a   : > { %6405 = vrot.lane.b32.xlu1 %v6394_v4, %s6640_s12 }
 0x590   : > { %v3232_v35 = vpop.f32.mrf.mxu3 }
 0x591   : > { %6415 = vrot.lane.b32.xlu2 %v6394_v4, %s6637_s9  ;;  %v8235_v23 = vadd.f32 %v6496_v48, %v3232_v35 }
 0x598   : > { %v3234_v0 = vpop.f32.mrf.mxu3 }
 0x599   : > { %v8237_v11 = vadd.f32 %v6496_v48, %v3234_v0 }
 0x59b   : > { %v8241_v41 = vpack.i.bf16 %v8237_v11, %v8235_v23 }
 0x59d   : > { %6430 = vrot.lane.b32.xlu2 %v8241_v41, %s6634_s6  ;;  %6425 = vrot.lane.b32.xlu0 %v8241_v41, %s6636_s8 }
 0x59e   : > { %6420 = vrot.lane.b32.xlu1 %v8241_v41, %s6639_s11 }
 0x5a5   : > { %6445 = vrot.lane.b32.xlu2 %v8241_v41, %s6638_s10  ;;  %6440 = vrot.lane.b32.xlu0 %v8241_v41, %s6640_s12 }
 0x5a6   : > { %6435 = vrot.lane.b32.xlu1 %v8241_v41, %s6635_s7 }
 0x5ad   : > { %6460 = vrot.lane.b32.xlu2 %v6394_v4, %s6643_s15  ;;  %6465 = vrot.lane.b32.xlu0 %v6394_v4, %s6642_s14 }
 0x5ae   : > { %6450 = vrot.lane.b32.xlu1 %v8241_v41, %s6637_s9 }
 0x5b5   : > { %6470 = vrot.lane.b32.xlu2 %v6394_v4, %s6644_s16 }
 0x5b6   : > { %6455 = vrot.lane.b32.xlu1 %v6394_v4, %s6641_s13 }
 0x5bd   : > { %6475 = vrot.lane.b32.xlu2 %v8241_v41, %s6641_s13 }
 0x5db   : > { %v6386_v22 = vpop.permute.xlu2 %6385 }
 0x5dc   : > { %v6388_v59 = vunpack.i.h.bf16 %v6386_v22  ;;  %v6387_v43 = vunpack.i.l.bf16 %v6386_v22 }
 0x5de   : > { %v3555_v44 = vrot.slane %v6388_v59, 4  ;;  %v3387_v46 = vrot.slane %v6387_v43, 4 }
 0x5e3   : > { %v6401_v33 = vpop.permute.xlu2 %6400 }
 0x5e4   : > { %v6403_v37 = vunpack.i.h.bf16 %v6401_v33  ;;  %v6402_v5 = vunpack.i.l.bf16 %v6401_v33 }
 0x5e6   : > { %v3541_v2 = vrot.slane %v6403_v37, 4  ;;  %v3373_v45 = vrot.slane %v6402_v5, 4  ;;  %v3544_v32 = vsel %vm423_vm1, %v6403_v37, %v3543_v38  ;;  %v3376_v49 = vsel %vm423_vm1, %v6402_v5, %v3375_v6 }
 0x5e7   : > { %v3552_v9 = vperm.slane %v3544_v32, %v6784_v28  ;;  %v3384_v18 = vperm.slane %v3376_v49, %v6784_v28 }
 0x5e8   : > { %v3542_v20 = vsel %vm423_vm1, %v3541_v2, %v8224_v29  ;;  %v3374_v7 = vsel %vm423_vm1, %v3373_v45, %v8222_v25 }
 0x5e9   : > { %v3548_v55 = vperm.slane %v3542_v20, %v6784_v28  ;;  %v3380_v34 = vperm.slane %v3374_v7, %v6784_v28  ;;  %v3603_v50 = vrot.slane %v3552_v9, 4  ;;  %v3435_v60 = vrot.slane %v3384_v18, 4 }
 0x5eb   : > { %v8273_v51 = vpop.permute.xlu2 %6415  ;;  %v3591_v16 = vrot.slane %v3548_v55, 4  ;;  %v3423_v24 = vrot.slane %v3380_v34, 4 }
 0x5ec   : > { %v6418_v12 = vunpack.i.h.bf16 %v8273_v51  ;;  %v6417_v53 = vunpack.i.l.bf16 %v8273_v51 }
 0x5ee   : > { %v3565_v58 = vrot.slane %v6418_v12, 4  ;;  %v3397_v19 = vrot.slane %v6417_v53, 4 }
 0x5f3   : > { %v8275_v27 = vpop.permute.xlu0 %6395 }
 0x5f4   : > { %v6391_v62 = vpop.permute.xlu1 %6390  ;;  %v6398_v40 = vunpack.i.h.bf16 %v8275_v27  ;;  %v6397_v30 = vunpack.i.l.bf16 %v8275_v27 }
 0x5f5   : > { %v6393_v39 = vunpack.i.h.bf16 %v6391_v62  ;;  %v6392_v10 = vunpack.i.l.bf16 %v6391_v62 }
 0x5f6   : > { %v3579_v0 = vrot.slane %v6398_v40, 4  ;;  %v3411_v49 = vrot.slane %v6397_v30, 4 }
 0x5f7   : > { %v3553_v42 = vrot.slane %v6393_v39, 4  ;;  %v3556_v3 = vsel %vm423_vm1, %v6393_v39, %v3555_v44  ;;  %v3385_v14 = vrot.slane %v6392_v10, 4  ;;  %v3388_v54 = vsel %vm423_vm1, %v6392_v10, %v3387_v46  ;;  %v8295_v31 = vpop.permute.xlu2 %6430 }
 0x5f8   : > { %v3564_v8 = vperm.slane %v3556_v3, %v6784_v28  ;;  %v3396_v63 = vperm.slane %v3388_v54, %v6784_v28  ;;  %v6433_v20 = vunpack.i.h.bf16 %v8295_v31 }
 0x5f9   : > { %v3554_v1 = vsel %vm423_vm1, %v3553_v42, %v6388_v59  ;;  %v3386_v52 = vsel %vm423_vm1, %v3385_v14, %v6387_v43 }
 0x5fa   : > { %v3560_v17 = vperm.slane %v3554_v1, %v6784_v28  ;;  %v3601_v13 = vrot.slane %v3564_v8, 4  ;;  %v3604_v56 = vsel %vm423_vm1, %v3564_v8, %v3603_v50  ;;  %v3392_v26 = vperm.slane %v3386_v52, %v6784_v28 }
 0x5fb   : > { %v8301_v61 = vperm.slane %v3604_v56, %v6796_v47  ;;  %v3433_v36 = vrot.slane %v3396_v63, 4  ;;  %v6411_v5 = vpop.permute.xlu0 %6410  ;;  %v3436_v43 = vsel %vm423_vm1, %v3396_v63, %v3435_v60 }
 0x5fc   : > { %v3589_v48 = vrot.slane %v3560_v17, 4  ;;  %v3592_v57 = vsel %vm423_vm1, %v3560_v17, %v3591_v16  ;;  %v3602_v4 = vsel %vm423_vm1, %v3601_v13, %v3552_v9  ;;  %v3421_v35 = vrot.slane %v3392_v26, 4  ;;  %v6406_v32 = vpop.permute.xlu1 %6405 }
 0x5fd   : > { %v8306_v22 = vperm.slane %v3592_v57, %v6796_v47  ;;  %v8309_v33 = vperm.slane %v3602_v4, %v6796_v47  ;;  %v3424_v37 = vsel %vm423_vm1, %v3392_v26, %v3423_v24  ;;  %v3434_v45 = vsel %vm423_vm1, %v3433_v36, %v3384_v18 }
 0x5fe   : > { %v3590_v6 = vsel %vm423_vm1, %v3589_v48, %v3548_v55  ;;  %v3422_v38 = vsel %vm423_vm1, %v3421_v35, %v3380_v34  ;;  %v8315_v2 = vperm.slane %v3424_v37, %v6796_v47  ;;  %v3651_v59 = vrot.slane %v8301_v61, 4 }
 0x5ff   : > { %v8322_v7 = vperm.slane %v3590_v6, %v6796_v47  ;;  %v3643_v9 = vrot.slane %v8306_v22, 4  ;;  %v3647_v27 = vrot.slane %v8309_v33, 4  ;;  %v6413_v44 = vunpack.i.h.bf16 %v6411_v5  ;;  %v8343_v63 = vpop.permute.xlu2 %6445 }
 0x600   : > { %v8327_v55 = vperm.slane %v3422_v38, %v6796_v47  ;;  %v8330_v18 = vperm.slane %v3434_v45, %v6796_v47  ;;  %v6412_v34 = vunpack.i.l.bf16 %v6411_v5  ;;  %v6408_v62 = vunpack.i.h.bf16 %v6406_v32 }
 0x601   : > { %v8333_v46 = vperm.slane %v3436_v43, %v6796_v47  ;;  %v3475_v39 = vrot.slane %v8315_v2, 4  ;;  %v3577_v10 = vrot.slane %v6413_v44, 4  ;;  %v3580_v50 = vsel %vm423_vm1, %v6413_v44, %v3579_v0 }
 0x602   : > { %v3409_v60 = vrot.slane %v6412_v34, 4  ;;  %v3412_v42 = vsel %vm423_vm1, %v6412_v34, %v3411_v49  ;;  %v3588_v3 = vperm.slane %v3580_v50, %v6784_v28  ;;  %v3566_v14 = vsel %vm423_vm1, %v3565_v58, %v6408_v62 }
 0x603   : > { %v3420_v54 = vperm.slane %v3412_v42, %v6784_v28  ;;  %v3578_v16 = vsel %vm423_vm1, %v3577_v10, %v6398_v40  ;;  %v3567_v24 = vrot.slane %v6408_v62, 4  ;;  %v3572_v8 = vperm.slane %v3566_v14, %v6784_v28 }
 0x604   : > { %v3410_v1 = vsel %vm423_vm1, %v3409_v60, %v6397_v30  ;;  %v3584_v52 = vperm.slane %v3578_v16, %v6784_v28  ;;  %v3625_v17 = vrot.slane %v3588_v3, 4  ;;  %v6407_v13 = vunpack.i.l.bf16 %v6406_v32 }
 0x605   : > { %v3639_v56 = vrot.slane %v8322_v7, 4  ;;  %v3416_v26 = vperm.slane %v3410_v1, %v6784_v28  ;;  %v3568_v58 = vsel %vm423_vm1, %v6418_v12, %v3567_v24  ;;  %v3615_v40 = vrot.slane %v3572_v8, 4 }
 0x606   : > { %v3613_v36 = vrot.slane %v3584_v52, 4  ;;  %v3576_v48 = vperm.slane %v3568_v58, %v6784_v28  ;;  %v3398_v57 = vsel %vm423_vm1, %v3397_v19, %v6407_v13  ;;  %v3399_v4 = vrot.slane %v6407_v13, 4 }
 0x607   : > { %v3471_v30 = vrot.slane %v8327_v55, 4  ;;  %v3445_v35 = vrot.slane %v3416_v26, 4  ;;  %v3616_v0 = vsel %vm423_vm1, %v3584_v52, %v3615_v40  ;;  %v3404_v37 = vperm.slane %v3398_v57, %v6784_v28  ;;  %v8382_v52 = vpop.permute.xlu2 %6460 }
 0x608   : > { %v3457_v5 = vrot.slane %v3420_v54, 4  ;;  %v3614_v6 = vsel %vm423_vm1, %v3613_v36, %v3572_v8  ;;  %v3626_v38 = vsel %vm423_vm1, %v3625_v17, %v3576_v48  ;;  %v3627_v12 = vrot.slane %v3576_v48, 4 }
 0x609   : > { %v3620_v45 = vperm.slane %v3614_v6, %v6796_v47  ;;  %v3632_v32 = vperm.slane %v3626_v38, %v6796_v47  ;;  %v3400_v19 = vsel %vm423_vm1, %v6417_v53, %v3399_v4  ;;  %v3446_v49 = vsel %vm423_vm1, %v3445_v35, %v3404_v37 }
 0x60a   : > { %v8366_v43 = vperm.slane %v3616_v0, %v6796_v47  ;;  %v3628_v44 = vsel %vm423_vm1, %v3588_v3, %v3627_v12  ;;  %v3408_v34 = vperm.slane %v3400_v19, %v6784_v28  ;;  %v3447_v62 = vrot.slane %v3404_v37, 4 }
 0x60b   : > { %v3479_v10 = vrot.slane %v8330_v18, 4  ;;  %v3483_v50 = vrot.slane %v8333_v46, 4  ;;  %v8373_v60 = vperm.slane %v3628_v44, %v6796_v47  ;;  %v3452_v51 = vperm.slane %v3446_v49, %v6796_v47 }
 0x60c   : > { %v3637_v53 = vrot.slane %v3620_v45, 4  ;;  %v3448_v42 = vsel %vm423_vm1, %v3416_v26, %v3447_v62  ;;  %v3458_v14 = vsel %vm423_vm1, %v3457_v5, %v3408_v34  ;;  %v3459_v16 = vrot.slane %v3408_v34, 4 }
 0x60d   : > { %v3645_v24 = vrot.slane %v3632_v32, 4  ;;  %v8379_v3 = vperm.slane %v3448_v42, %v6796_v47  ;;  %v3464_v8 = vperm.slane %v3458_v14, %v6796_v47  ;;  %v3469_v1 = vrot.slane %v3452_v51, 4 }
 0x60e   : > { %v3641_v17 = vrot.slane %v8366_v43, 4  ;;  %v3460_v13 = vsel %vm423_vm1, %v3420_v54, %v3459_v16  ;;  %v8387_v58 = vsel %vm423_vm1, %v3620_v45, %v3639_v56  ;;  %v3915_v26 = vrot.slane %v6433_v20, 4 }
 0x60f   : > { %v3649_v40 = vrot.slane %v8373_v60, 4  ;;  %v8393_v36 = vperm.slane %v3460_v13, %v6796_v47  ;;  %v8396_v48 = vsel %vm423_vm1, %v3452_v51, %v3471_v30  ;;  %v8400_v57 = vsel %vm423_vm1, %v8379_v3, %v3475_v39  ;;  %v6471_v16 = vpop.permute.xlu2 %6470 }
 0x610   : > { %v8404_v54 = vsel %vm423_vm1, %v3469_v1, %v8327_v55  ;;  %v3477_v56 = vrot.slane %v3464_v8, 4  ;;  %v8408_v4 = vsel %vm423_vm1, %v3637_v53, %v8322_v7  ;;  %v8414_v35 = vsel %vm423_vm1, %v8366_v43, %v3643_v9 }
 0x611   : > { %v3473_v30 = vrot.slane %v8379_v3, 4  ;;  %v8418_v39 = vsel %vm423_vm1, %v3464_v8, %v3479_v10  ;;  %v8422_v55 = vsel %vm423_vm1, %v8393_v36, %v3483_v50  ;;  %v8426_v0 = vsel %vm423_vm1, %v3645_v24, %v8309_v33 }
 0x612   : > { %v8430_v7 = vsel %vm423_vm1, %v3477_v56, %v8330_v18  ;;  %v8436_v9 = vsel %vm423_vm1, %v8373_v60, %v3651_v59  ;;  %v4057_v37 = vrot.slane %v8400_v57, 4  ;;  %v4081_v5 = vrot.slane %v8422_v55, 4 }
 0x613   : > { %v3481_v6 = vrot.slane %v8393_v36, 4  ;;  %v8444_v38 = vsel %vm423_vm1, %v3632_v32, %v3647_v27  ;;  %v4047_v18 = vrot.slane %v8404_v54, 4  ;;  %v4059_v12 = vrot.slane %v8396_v48, 4 }
 0x614   : > { %v4058_v45 = vsel %vm423_vm1, %v4057_v37, %v8396_v48  ;;  %v4071_v59 = vrot.slane %v8430_v7, 4  ;;  %v4082_v19 = vsel %vm423_vm1, %v4081_v5, %v8418_v39  ;;  %v4223_v49 = vrot.slane %v8414_v35, 4 }
 0x615   : > { %v4083_v44 = vrot.slane %v8418_v39, 4  ;;  %v4213_v33 = vrot.slane %v8408_v4, 4  ;;  %v4247_v32 = vrot.slane %v8436_v9, 4  ;;  %v8459_v34 = vperm.slane %v4058_v45, %v6784_v28 }
 0x616   : > { %v6432_v10 = vunpack.i.l.bf16 %v8295_v31  ;;  %v6448_v50 = vunpack.i.h.bf16 %v8343_v63  ;;  %v8465_v51 = vperm.slane %v4082_v19, %v6784_v28  ;;  %v6447_v53 = vunpack.i.l.bf16 %v8343_v63 }
 0x617   : > { %v6463_v42 = vunpack.i.h.bf16 %v8382_v52  ;;  %v6462_v14 = vunpack.i.l.bf16 %v8382_v52  ;;  %v4224_v24 = vsel %vm423_vm1, %v4223_v49, %v8387_v58  ;;  %v4248_v56 = vsel %vm423_vm1, %v4247_v32, %v8444_v38 }
 0x618   : > { %v3747_v8 = vrot.slane %v6432_v10, 4  ;;  %v3913_v1 = vrot.slane %v6448_v50, 4  ;;  %v3916_v13 = vsel %vm423_vm1, %v6448_v50, %v3915_v26  ;;  %v3745_v37 = vrot.slane %v6447_v53, 4 }
 0x619   : > { %v8476_v5 = vperm.slane %v3916_v13, %v6784_v28  ;;  %v3499_v63 = vrot.slane %v6462_v14, 4  ;;  %v6473_v19 = vunpack.i.h.bf16 %v6471_v16  ;;  %v6472_v49 = vunpack.i.l.bf16 %v6471_v16 }
 0x61a   : > { %v3748_v45 = vsel %vm423_vm1, %v6447_v53, %v3747_v8  ;;  %v3914_v52 = vsel %vm423_vm1, %v3913_v1, %v6433_v20  ;;  %v3746_v15 = vsel %vm423_vm1, %v3745_v37, %v6432_v10  ;;  %v3667_v50 = vrot.slane %v6463_v42, 4  ;;  %v6426_v8 = vpop.permute.xlu0 %6425  ;;  %v6421_v37 = vpop.permute.xlu1 %6420 }
 0x61b   : > { %v8484_v26 = vperm.slane %v3748_v45, %v6784_v28  ;;  %v8487_v32 = vperm.slane %v3914_v52, %v6784_v28  ;;  %v8490_v13 = vperm.slane %v3746_v15, %v6784_v28  ;;  %v3665_v21 = vrot.slane %v6473_v19, 4 }
 0x61c   : > { %v3497_v53 = vrot.slane %v6472_v49, 4  ;;  %v3500_v31 = vsel %vm423_vm1, %v6472_v49, %v3499_v63  ;;  %v8494_v20 = vperm.slane %v4224_v24, %v6784_v28  ;;  %v4249_v10 = vrot.slane %v8444_v38, 4 }
 0x61d   : > { %v8498_v16 = vperm.slane %v3500_v31, %v6784_v28  ;;  %v3668_v1 = vsel %vm423_vm1, %v6473_v19, %v3667_v50  ;;  %v8502_v45 = vperm.slane %v4248_v56, %v6784_v28  ;;  %v3666_v63 = vsel %vm423_vm1, %v3665_v21, %v6463_v42 }
 0x61e   : > { %v3498_v52 = vsel %vm423_vm1, %v3497_v53, %v6462_v14  ;;  %v6428_v31 = vunpack.i.h.bf16 %v6426_v8  ;;  %v8511_v62 = vperm.slane %v3668_v1, %v6784_v28  ;;  %v6427_v19 = vunpack.i.l.bf16 %v6426_v8 }
 0x61f   : > { %v6423_v50 = vunpack.i.h.bf16 %v6421_v37  ;;  %v6422_v56 = vunpack.i.l.bf16 %v6421_v37  ;;  %v8514_v27 = vperm.slane %v3498_v52, %v6784_v28  ;;  %v8518_v21 = vperm.slane %v3666_v63, %v6784_v28 }
 0x620   : > { %v3889_v42 = vrot.slane %v6428_v31, 4  ;;  %v3721_v53 = vrot.slane %v6427_v19, 4  ;;  %v8524_v1 = vsel %vm423_vm1, %v3473_v30, %v8315_v2  ;;  %v8531_v37 = vsel %vm423_vm1, %v3481_v6, %v8333_v46 }
 0x621   : > { %v3891_v49 = vrot.slane %v6423_v50, 4  ;;  %v3723_v24 = vrot.slane %v6422_v56, 4  ;;  %v4048_v52 = vsel %vm423_vm1, %v8524_v1, %v4047_v18  ;;  %v4060_v3 = vsel %vm423_vm1, %v8400_v57, %v4059_v12 }
 0x622   : > { %v3890_v8 = vsel %vm423_vm1, %v3889_v42, %v6423_v50  ;;  %v3722_v36 = vsel %vm423_vm1, %v3721_v53, %v6422_v56  ;;  %v4045_v48 = vrot.slane %v8524_v1, 4  ;;  %v4056_v57 = vperm.slane %v4048_v52, %v6784_v28 }
 0x623   : > { %v3892_v2 = vsel %vm423_vm1, %v6428_v31, %v3891_v49  ;;  %v8543_v30 = vperm.slane %v3890_v8, %v6784_v28  ;;  %v3724_v46 = vsel %vm423_vm1, %v6427_v19, %v3723_v24  ;;  %v4068_v12 = vperm.slane %v4060_v3, %v6784_v28 }
 0x624   : > { %v8552_v50 = vperm.slane %v3892_v2, %v6784_v28  ;;  %v4072_v24 = vsel %vm423_vm1, %v8531_v37, %v4071_v59  ;;  %v8562_v31 = vperm.slane %v3722_v36, %v6784_v28  ;;  %v8565_v19 = vperm.slane %v3724_v46, %v6784_v28 }
 0x625   : > { %v4069_v56 = vrot.slane %v8531_v37, 4  ;;  %v4084_v42 = vsel %vm423_vm1, %v8422_v55, %v4083_v44  ;;  %v4105_v53 = vrot.slane %v4068_v12, 4  ;;  %v8576_v59 = vsel %vm423_vm1, %v3641_v17, %v8306_v22 }
 0x626   : > { %v8582_v8 = vsel %vm423_vm1, %v3649_v40, %v8301_v61  ;;  %v4080_v52 = vperm.slane %v4072_v24, %v6784_v28  ;;  %v4092_v39 = vperm.slane %v4084_v42, %v6784_v28  ;;  %v4214_v55 = vsel %vm423_vm1, %v8576_v59, %v4213_v33 }
 0x627   : > { %v9805_v43 = vrot.slane %v8387_v58, 4  ;;  %v3937_v17 = vrot.slane %v8552_v50, 4  ;;  %v4106_v60 = vsel %vm423_vm1, %v4105_v53, %v4056_v57  ;;  %v8597_v61 = vperm.slane %v4214_v55, %v6784_v28 }
 0x628   : > { %v4112_v44 = vperm.slane %v4106_v60, %v6796_v47  ;;  %v4129_v3 = vrot.slane %v4092_v39, 4  ;;  %v9806_v33 = vrot.slane %v8426_v0, 4  ;;  %v4107_v24 = vrot.slane %v4056_v57, 4 }
 0x629   : > { %v4226_v22 = vsel %vm423_vm1, %v8414_v35, %v9805_v43  ;;  %v4250_v35 = vsel %vm423_vm1, %v8436_v9, %v4249_v10  ;;  %v3757_v42 = vrot.slane %v8562_v31, 4  ;;  %v4131_v43 = vrot.slane %v4080_v52, 4 }
 0x62a   : > { %v8600_v40 = vperm.slane %v4226_v22, %v6784_v28  ;;  %v4238_v58 = vsel %vm423_vm1, %v8582_v8, %v9806_v33  ;;  %v8613_v36 = vperm.slane %v4250_v35, %v6784_v28  ;;  %v4130_v53 = vsel %vm423_vm1, %v4129_v3, %v4080_v52  ;;  %v8627_v3 = vpop.permute.xlu0 %6440 }
 0x62b   : > { %v8610_v2 = vperm.slane %v4238_v58, %v6784_v28  ;;  %v4151_v55 = vrot.slane %v4112_v44, 4  ;;  %v4136_v22 = vperm.slane %v4130_v53, %v6796_v47  ;;  %v4108_v60 = vsel %vm423_vm1, %v4068_v12, %v4107_v24 }
 0x62c   : > { %v4271_v46 = vrot.slane %v8600_v40, 4  ;;  %v4295_v10 = vrot.slane %v8613_v36, 4  ;;  %v3769_v33 = vrot.slane %v8565_v19, 4  ;;  %v4116_v57 = vperm.slane %v4108_v60, %v6796_v47 }
 0x62d   : > { %v4132_v35 = vsel %vm423_vm1, %v4092_v39, %v4131_v43  ;;  %v4149_v52 = vrot.slane %v4136_v22, 4  ;;  %v6443_v43 = vunpack.i.h.bf16 %v8627_v3 }
 0x62e   : > { %v4272_v9 = vsel %vm423_vm1, %v4271_v46, %v8597_v61  ;;  %v4296_v53 = vsel %vm423_vm1, %v4295_v10, %v8610_v2  ;;  %v4152_v46 = vsel %vm423_vm1, %v4136_v22, %v4151_v55  ;;  %v4140_v14 = vperm.slane %v4132_v35, %v6796_v47 }
 0x62f   : > { %v4278_v58 = vperm.slane %v4272_v9, %v6796_v47  ;;  %v4302_v12 = vperm.slane %v4296_v53, %v6796_v47  ;;  %v4726_v24 = vpack.c.bf16 %v4152_v46, %v4152_v46  ;;  %v4155_v18 = vrot.slane %v4116_v57, 4 }
 0x630   : > { %v4150_v9 = vsel %vm423_vm1, %v4149_v52, %v4112_v44  ;;  %v4153_v39 = vrot.slane %v4140_v14, 4  ;;  %v4235_v22 = vrot.slane %v8582_v8, 4  ;;  %v6436_v44 = vpop.permute.xlu1 %6435 }
 0x631   : > { %v4317_v6 = vrot.slane %v4278_v58, 4  ;;  %v4725_v63 = vpack.c.bf16 %v4150_v9, %v4150_v9  ;;  %v4315_v38 = vrot.slane %v4302_v12, 4  ;;  %v4764_v10 = vsel %vm1791_vm2, %v4726_v24, 0 }
 0x632   : > { %4773 = vmatpush.bf16.xpose.msrb.mxu1 %v4764_v10  ;;  %v4154_v35 = vsel %vm423_vm1, %v4153_v39, %v4116_v57  ;;  %v4156_v46 = vsel %vm423_vm1, %v4140_v14, %v4155_v18  ;;  %v6442_v57 = vunpack.i.l.bf16 %v8627_v3  ;;  %v6437_v18 = vunpack.i.l.bf16 %v6436_v44 }
 0x633   : > { %v4318_v55 = vsel %vm423_vm1, %v4302_v12, %v4317_v6  ;;  %v4745_v52 = vsel %vm1791_vm2, %v4725_v63, 0  ;;  %v4316_v15 = vsel %vm423_vm1, %v4315_v38, %v4278_v58  ;;  %v4727_v60 = vpack.c.bf16 %v4154_v35, %v4154_v35 }
 0x634   : > { %v4730_v53 = vpack.c.bf16 %v4318_v55, %v4318_v55  ;;  %v4728_v9 = vpack.c.bf16 %v4156_v46, %v4156_v46  ;;  %4754 = vmatpush.bf16.xpose.msra.mxu0 %v4745_v52  ;;  %v4729_v49 = vpack.c.bf16 %v4316_v15, %v4316_v15  ;;  %v8647_v6 = vrot.slane %v6443_v43, 4 }
 0x635   : > { %v4783_v12 = vsel %vm1791_vm2, %v4727_v60, 0  ;;  %v6438_v63 = vunpack.i.h.bf16 %v6436_v44  ;;  %v8655_v15 = vrot.slane %v6442_v57, 4  ;;  %v4046_v58 = vsel %vm423_vm1, %v4045_v48, %v8404_v54 }
 0x636   : > { %v4840_v24 = vsel %vm1791_vm2, %v4730_v53, 0  ;;  %v4802_v14 = vsel %vm1791_vm2, %v4728_v9, 0  ;;  %v4821_v38 = vsel %vm1791_vm2, %v4729_v49, 0  ;;  %v4070_v60 = vsel %vm423_vm1, %v4069_v56, %v8430_v7 }
 0x637   : > { %4849 = vmatpush.bf16.xpose.msra.mxu3 %v4840_v24  ;;  %4830 = vmatpush.bf16.xpose.msra.mxu2 %v4821_v38  ;;  %v3877_v39 = vrot.slane %v6438_v63, 4  ;;  %v9807_v49 = vrot.slane %v8237_v11, 4  ;;  %v3709_v55 = vrot.slane %v6437_v18, 4  ;;  %v9808_v35 = vrot.slane %v8235_v23, 4 }
 0x638   : > { %v8674_v48 = vperm.slane %v4046_v58, %v6784_v28  ;;  %v8677_v7 = vperm.slane %v4070_v60, %v6784_v28  ;;  %v4093_v46 = vrot.slane %v8459_v34, 4  ;;  %v4117_v44 = vrot.slane %v8465_v51, 4 }
 0x639   : > { %v3880_v10 = vsel %vm423_vm1, %v6438_v63, %v9807_v49  ;;  %v3712_v53 = vsel %vm423_vm1, %v6437_v18, %v9808_v35  ;;  %v3878_v37 = vsel %vm423_vm1, %v3877_v39, %v8237_v11  ;;  %v3710_v56 = vsel %vm423_vm1, %v3709_v55, %v8235_v23 }
 0x63a   : > { %4811 = vmatpush.bf16.xpose.msra.mxu1 %v4802_v14  ;;  %v3888_v1 = vperm.slane %v3880_v10, %v6784_v28  ;;  %v3720_v54 = vperm.slane %v3712_v53, %v6784_v28  ;;  %v3884_v52 = vperm.slane %v3878_v37, %v6784_v28  ;;  %v3716_v24 = vperm.slane %v3710_v56, %v6784_v28 }
 0x63b   : > { %v4094_v38 = vsel %vm423_vm1, %v4093_v46, %v8674_v48  ;;  %v9809_v49 = vrot.slane %v8543_v30, 4 }
 0x63c   : > { %4792 = vmatpush.bf16.xpose.msrb.mxu0 %v4783_v12  ;;  %v3939_v9 = vrot.slane %v3888_v1, 4  ;;  %v3770_v12 = vsel %vm423_vm1, %v3769_v33, %v3720_v54  ;;  %v3771_v14 = vrot.slane %v3720_v54, 4  ;;  %v3938_v18 = vsel %vm423_vm1, %v3937_v17, %v3888_v1 }
 0x63d   : > { %v8691_v63 = vperm.slane %v3770_v12, %v6796_v47  ;;  %v3927_v58 = vrot.slane %v3884_v52, 4  ;;  %v3758_v60 = vsel %vm423_vm1, %v3757_v42, %v3716_v24  ;;  %v3759_v39 = vrot.slane %v3716_v24, 4 }
 0x63e   : > { %v3926_v33 = vsel %vm423_vm1, %v9809_v49, %v3884_v52  ;;  %v8705_v10 = vperm.slane %v3758_v60, %v6796_v47  ;;  %v3772_v55 = vsel %vm423_vm1, %v8565_v19, %v3771_v14  ;;  %v3940_v54 = vsel %vm423_vm1, %v8552_v50, %v3939_v9  ;;  %v8738_v9 = vpop.permute.xlu1 %6450 }
 0x63f   : > { %v3815_v17 = vrot.slane %v8691_v63, 4  ;;  %v8711_v35 = vperm.slane %v3926_v33, %v6796_v47  ;;  %v3760_v53 = vsel %vm423_vm1, %v8562_v31, %v3759_v39  ;;  %v8716_v42 = vperm.slane %v3772_v55, %v6796_v47  ;;  %v8755_v33 = vpop.permute.xlu0 %6465 }
 0x640   : > { %v3928_v1 = vsel %vm423_vm1, %v8543_v30, %v3927_v58  ;;  %v8723_v37 = vperm.slane %v3760_v53, %v6796_v47  ;;  %v3807_v19 = vrot.slane %v8705_v10, 4  ;;  %v8730_v46 = vperm.slane %v3938_v18, %v6796_v47 }
 0x641   : > { %v8727_v56 = vperm.slane %v3928_v1, %v6796_v47  ;;  %v8734_v52 = vperm.slane %v3940_v54, %v6796_v47  ;;  %v3975_v30 = vrot.slane %v8711_v35, 4  ;;  %v4100_v50 = vperm.slane %v4094_v38, %v6796_v47 }
 0x642   : > { %v4118_v18 = vsel %vm423_vm1, %v4117_v44, %v8677_v7  ;;  %v9810_v39 = vrot.slane %v8576_v59, 4  ;;  %v4236_v49 = vsel %vm423_vm1, %v4235_v22, %v8426_v0  ;;  %v4259_v53 = vrot.slane %v8494_v20, 4 }
 0x643   : > { %v4124_v60 = vperm.slane %v4118_v18, %v6796_v47  ;;  %v8761_v44 = vperm.slane %v4236_v49, %v6784_v28  ;;  %v4283_v1 = vrot.slane %v8502_v45, 4  ;;  %v4297_v54 = vrot.slane %v8610_v2, 4 }
 0x644   : > { %v4212_v38 = vsel %vm423_vm1, %v9810_v39, %v8408_v4  ;;  %v4273_v4 = vrot.slane %v8597_v61, 4  ;;  %v4143_v8 = vrot.slane %v4100_v50, 4  ;;  %v6468_v18 = vunpack.i.h.bf16 %v8755_v33 }
 0x645   : > { %v8758_v55 = vperm.slane %v4212_v38, %v6784_v28  ;;  %v4141_v59 = vrot.slane %v4124_v60, 4  ;;  %v4284_v22 = vsel %vm423_vm1, %v4283_v1, %v8761_v44  ;;  %v9796_v39 = vunpack.i.l.bf16 %v8755_v33 }
 0x646   : > { %v4290_v12 = vperm.slane %v4284_v22, %v6796_v47  ;;  %v4274_v61 = vsel %vm423_vm1, %v8600_v40, %v4273_v4  ;;  %v4144_v1 = vsel %vm423_vm1, %v4124_v60, %v4143_v8  ;;  %v6452_v8 = vunpack.i.l.bf16 %v8738_v9  ;;  %v8797_v22 = vpop.permute.xlu1 %6455 }
 0x647   : > { %v4260_v0 = vsel %vm423_vm1, %v4259_v53, %v8758_v55  ;;  %v4142_v38 = vsel %vm423_vm1, %v4141_v59, %v4100_v50  ;;  %v4282_v24 = vperm.slane %v4274_v61, %v6796_v47  ;;  %v4298_v53 = vsel %vm423_vm1, %v8613_v36, %v4297_v54 }
 0x648   : > { %v4266_v49 = vperm.slane %v4260_v0, %v6796_v47  ;;  %v4709_v2 = vpack.c.bf16 %v4142_v38, %v4142_v38  ;;  %v4307_v31 = vrot.slane %v4290_v12, 4  ;;  %v4306_v58 = vperm.slane %v4298_v53, %v6796_v47 }
 0x649   : > { %v4710_v14 = vpack.c.bf16 %v4144_v1, %v4144_v1  ;;  %v4321_v59 = vrot.slane %v4282_v24, 4  ;;  %v8786_v0 = vrot.slane %v6468_v18, 4  ;;  %v8790_v40 = vrot.slane %v9796_v39, 4 }
 0x64a   : > { %v4309_v50 = vrot.slane %v4266_v49, 4  ;;  %6268 = vmatmul.msk.bf16.vlgmr.msra.gmra.mxu0 %vm1791_vm2, %v4709_v2  ;;  %v6453_v36 = vunpack.i.h.bf16 %v8738_v9  ;;  %v4308_v60 = vsel %vm423_vm1, %v4307_v31, %v4266_v49  ;;  %v4319_v4 = vrot.slane %v4306_v58, 4 }
 0x64b   : > { %6269 = vmatmul.msk.bf16.vlgmr.msrb.gmra.mxu1 %vm1791_vm2, %v4710_v14  ;;  %v4713_v38 = vpack.c.bf16 %v4308_v60, %v4308_v60  ;;  %v4322_v2 = vsel %vm423_vm1, %v4306_v58, %v4321_v59  ;;  %v3733_v49 = vrot.slane %v6452_v8, 4  ;;  %v6458_v58 = vunpack.i.h.bf16 %v8797_v22 }
 0x64c   : > { %v4310_v54 = vsel %vm423_vm1, %v4290_v12, %v4309_v50  ;;  %v3901_v53 = vrot.slane %v6453_v36, 4  ;;  %v4320_v1 = vsel %vm423_vm1, %v4319_v4, %v4282_v24  ;;  %v4732_v39 = vpack.c.bf16 %v4322_v2, %v4322_v2 }
 0x64d   : > { %v4714_v61 = vpack.c.bf16 %v4310_v54, %v4310_v54  ;;  %v3904_v31 = vsel %vm423_vm1, %v6453_v36, %v8647_v6  ;;  %6272 = vmatmul.msk.bf16.vlgmr.msra.gmra.mxu2 %vm1791_vm2, %v4713_v38  ;;  %v4731_v14 = vpack.c.bf16 %v4320_v1, %v4320_v1  ;;  %v3734_v6 = vsel %vm423_vm1, %v3733_v49, %v6442_v57 }
 0x64e   : > { %v3902_v9 = vsel %vm423_vm1, %v3901_v53, %v6443_v43  ;;  %v3912_v12 = vperm.slane %v3904_v31, %v6784_v28  ;;  %v4878_v24 = vsel %vm1791_vm2, %v4732_v39, 0  ;;  %v3736_v59 = vsel %vm423_vm1, %v6452_v8, %v8655_v15 }
 0x64f   : > { %6273 = vmatmul.msk.bf16.vlgmr.msra.gmra.mxu3 %vm1791_vm2, %v4714_v61  ;;  %v3908_v50 = vperm.slane %v3902_v9, %v6784_v28  ;;  %v4859_v36 = vsel %vm1791_vm2, %v4731_v14, 0  ;;  %4887 = vmatpush.bf16.xpose.msrb.mxu1 %v4878_v24  ;;  %v9811_v43 = vrot.slane %v8476_v5, 4  ;;  %v3740_v54 = vperm.slane %v3734_v6, %v6784_v28 }
 0x650   : > { %v3963_v4 = vrot.slane %v3912_v12, 4  ;;  %4868 = vmatpush.bf16.xpose.msra.mxu0 %v4859_v36  ;;  %v9812_v39 = vrot.slane %v8487_v32, 4  ;;  %v3744_v15 = vperm.slane %v3736_v59, %v6784_v28  ;;  %v9813_v2 = vrot.slane %v8490_v13, 4 }
 0x651   : > { %v3962_v60 = vsel %vm423_vm1, %v9811_v43, %v3912_v12  ;;  %v3951_v38 = vrot.slane %v3908_v50, 4  ;;  %v3783_v1 = vrot.slane %v3740_v54, 4 }
 0x652   : > { %v3950_v3 = vsel %vm423_vm1, %v9812_v39, %v3908_v50  ;;  %v3968_v57 = vperm.slane %v3962_v60, %v6796_v47  ;;  %v3964_v61 = vsel %vm423_vm1, %v8476_v5, %v3963_v4  ;;  %v3782_v53 = vsel %vm423_vm1, %v9813_v2, %v3740_v54 }
 0x653   : > { %v3956_v8 = vperm.slane %v3950_v3, %v6796_v47  ;;  %v3952_v31 = vsel %vm423_vm1, %v8487_v32, %v3951_v38  ;;  %v8836_v49 = vperm.slane %v3964_v61, %v6796_v47  ;;  %v3788_v9 = vperm.slane %v3782_v53, %v6796_v47 }
 0x654   : > { %v3981_v14 = vrot.slane %v3968_v57, 4  ;;  %v8840_v12 = vperm.slane %v3952_v31, %v6796_v47  ;;  %v3784_v5 = vsel %vm423_vm1, %v8490_v13, %v3783_v1  ;;  %v9814_v50 = vrot.slane %v8484_v26, 4 }
 0x655   : > { %v3973_v24 = vrot.slane %v3956_v8, 4  ;;  %v8849_v32 = vperm.slane %v3784_v5, %v6796_v47  ;;  %v3795_v36 = vrot.slane %v3744_v15, 4  ;;  %v3805_v4 = vrot.slane %v3788_v9, 4 }
 0x656   : > { %v3794_v6 = vsel %vm423_vm1, %v9814_v50, %v3744_v15  ;;  %v3977_v60 = vrot.slane %v8840_v12, 4  ;;  %v8856_v54 = vsel %vm423_vm1, %v3788_v9, %v3807_v19  ;;  %v8880_v2 = vsel %vm423_vm1, %v3956_v8, %v3975_v30 }
 0x657   : > { %v3800_v43 = vperm.slane %v3794_v6, %v6796_v47  ;;  %v8860_v13 = vsel %vm423_vm1, %v3973_v24, %v8711_v35  ;;  %v3796_v39 = vsel %vm423_vm1, %v8484_v26, %v3795_v36  ;;  %v3809_v3 = vrot.slane %v8849_v32, 4 }
 0x658   : > { %v8871_v61 = vperm.slane %v3796_v39, %v6796_v47  ;;  %v8875_v19 = vsel %vm423_vm1, %v3805_v4, %v8705_v10  ;;  %v8884_v26 = vsel %vm423_vm1, %v3981_v14, %v8730_v46  ;;  %v9815_v53 = vrot.slane %v8730_v46, 4 }
 0x659   : > { %v3813_v38 = vrot.slane %v3800_v43, 4  ;;  %v8868_v15 = vsel %vm423_vm1, %v3800_v43, %v3815_v17  ;;  %v9816_v10 = vrot.slane %v8734_v52, 4  ;;  %v4391_v30 = vrot.slane %v8856_v54, 4 }
 0x65a   : > { %v8893_v1 = vsel %vm423_vm1, %v3968_v57, %v9815_v53  ;;  %v3817_v8 = vrot.slane %v8871_v61, 4  ;;  %v9817_v31 = vrot.slane %v8716_v42, 4  ;;  %v4415_v57 = vrot.slane %v8868_v15, 4 }
 0x65b   : > { %v8888_v17 = vsel %vm423_vm1, %v3813_v38, %v8691_v63  ;;  %v8899_v35 = vsel %vm423_vm1, %v8836_v49, %v9816_v10  ;;  %v3654_v6 = vsel %vm423_vm1, %v8786_v0, %v6458_v58  ;;  %v3655_v36 = vrot.slane %v6458_v58, 4 }
 0x65c   : > { %v8907_v63 = vsel %vm423_vm1, %v8871_v61, %v9817_v31  ;;  %v4403_v46 = vrot.slane %v8888_v17, 4  ;;  %v4579_v5 = vrot.slane %v8899_v35, 4  ;;  %v6457_v43 = vunpack.i.l.bf16 %v8797_v22 }
 0x65d   : > { %v4413_v14 = vrot.slane %v8907_v63, 4  ;;  %v3660_v38 = vperm.slane %v3654_v6, %v6784_v28  ;;  %v4095_v53 = vrot.slane %v8674_v48, 4  ;;  %v3656_v0 = vsel %vm423_vm1, %v6468_v18, %v3655_v36 }
 0x65e   : > { %v4580_v39 = vsel %vm423_vm1, %v4579_v5, %v8893_v1  ;;  %v3486_v22 = vsel %vm423_vm1, %v8790_v40, %v6457_v43  ;;  %v3664_v58 = vperm.slane %v3656_v0, %v6784_v28  ;;  %v3487_v6 = vrot.slane %v6457_v43, 4 }
 0x65f   : > { %v4414_v4 = vsel %vm423_vm1, %v4413_v14, %v8868_v15  ;;  %v8929_v31 = vperm.slane %v4580_v39, %v6784_v28  ;;  %v9818_v14 = vrot.slane %v8518_v21, 4  ;;  %v3679_v48 = vrot.slane %v3660_v38, 4 }
 0x660   : > { %v8926_v10 = vperm.slane %v4414_v4, %v6784_v28  ;;  %v3492_v18 = vperm.slane %v3486_v22, %v6784_v28  ;;  %v9819_v36 = vrot.slane %v8511_v62, 4  ;;  %v3691_v24 = vrot.slane %v3664_v58, 4 }
 0x661   : > { %v3678_v5 = vsel %vm423_vm1, %v9818_v14, %v3660_v38  ;;  %v3680_v40 = vsel %vm423_vm1, %v8518_v21, %v3679_v48  ;;  %v9820_v38 = vunpack.i.l.bf16 %v8755_v33  ;;  %v9821_v48 = vrot.slane %v8514_v27, 4 }
 0x662   : > { %v8943_v50 = vperm.slane %v3678_v5, %v6796_v47  ;;  %v3690_v0 = vsel %vm423_vm1, %v9819_v36, %v3664_v58  ;;  %v3688_v14 = vperm.slane %v3680_v40, %v6796_v47  ;;  %v3692_v21 = vsel %vm423_vm1, %v8511_v62, %v3691_v24 }
 0x663   : > { %v3488_v43 = vsel %vm423_vm1, %v9820_v38, %v3487_v6  ;;  %v8956_v39 = vperm.slane %v3690_v0, %v6796_v47  ;;  %v3510_v58 = vsel %vm423_vm1, %v9821_v48, %v3492_v18  ;;  %v3511_v36 = vrot.slane %v3492_v18, 4 }
 0x664   : > { %v3701_v5 = vrot.slane %v8943_v50, 4  ;;  %v3496_v22 = vperm.slane %v3488_v43, %v6784_v28  ;;  %v4096_v33 = vsel %vm423_vm1, %v8459_v34, %v4095_v53  ;;  %v3700_v6 = vperm.slane %v3692_v21, %v6796_v47 }
 0x665   : > { %v8971_v0 = vrot.slane %v3688_v14, 4  ;;  %v3705_v38 = vrot.slane %v8956_v39, 4  ;;  %v3512_v62 = vsel %vm423_vm1, %v8514_v27, %v3511_v36  ;;  %v3516_v24 = vperm.slane %v3510_v58, %v6796_v47 }
 0x666   : > { %v8969_v40 = vsel %vm423_vm1, 0.0, %v3701_v5  ;;  %v9822_v43 = vrot.slane %v8498_v16, 4  ;;  %v3523_v48 = vrot.slane %v3496_v22, 4  ;;  %v8987_v14 = vrot.slane %v3700_v6, 4 }
 0x667   : > { %v8982_v34 = vsel %vm423_vm1, 0.0, %v8971_v0  ;;  %v8985_v53 = vsel %vm423_vm1, 0.0, %v3705_v38  ;;  %v3520_v5 = vperm.slane %v3512_v62, %v6796_v47  ;;  %v4104_v6 = vperm.slane %v4096_v33, %v6796_v47 }
 0x668   : > { %v3522_v18 = vsel %vm423_vm1, %v9822_v43, %v3496_v22  ;;  %v3524_v21 = vsel %vm423_vm1, %v8498_v16, %v3523_v48  ;;  %v3533_v22 = vrot.slane %v3516_v24, 4  ;;  %v8998_v36 = vsel %vm423_vm1, 0.0, %v8987_v14 }
 0x669   : > { %v8994_v58 = vperm.slane %v3522_v18, %v6796_v47  ;;  %v3532_v38 = vperm.slane %v3524_v21, %v6796_v47  ;;  %v3535_v43 = vrot.slane %v3520_v5, 4  ;;  %v4119_v16 = vrot.slane %v8677_v7, 4 }
 0x66a   : > { %v3534_v27 = vsel %vm423_vm1, 0.0, %v3533_v22  ;;  %v4147_v59 = vrot.slane %v4104_v6, 4  ;;  %v9021_v7 = vsel %vm423_vm1, %v3809_v3, %v8723_v37  ;;  %v9075_v15 = vsel %vm423_vm1, %v3977_v60, %v8727_v56 }
 0x66b   : > { %v3537_v4 = vrot.slane %v8994_v58, 4  ;;  %v3536_v18 = vsel %vm423_vm1, 0.0, %v3535_v43  ;;  %v9007_v48 = vrot.slane %v3532_v38, 4  ;;  %v9010_v9 = vsel %vm423_vm1, %v3535_v43, %v3516_v24 }
 0x66c   : > { %v4162_v33 = vrot.slane %v3536_v18, 4  ;;  %v4120_v21 = vsel %vm423_vm1, %v8465_v51, %v4119_v16  ;;  %v9823_v38 = vrot.slane %v8723_v37, 4  ;;  %v9038_v51 = vsel %vm423_vm1, %v3817_v8, %v8716_v42 }
 0x66d   : > { %v9013_v5 = vsel %vm423_vm1, 0.0, %v3537_v4  ;;  %v9025_v22 = vsel %vm423_vm1, 0.0, %v9007_v48  ;;  %v4128_v24 = vperm.slane %v4120_v21, %v6796_v47  ;;  %v4379_v18 = vrot.slane %v8875_v19, 4 }
 0x66e   : > { %v9032_v4 = vsel %vm423_vm1, %v8849_v32, %v9823_v38  ;;  %v9041_v3 = vsel %vm423_vm1, %v4162_v33, %v3534_v27 }
 0x66f   : > { %v4145_v37 = vrot.slane %v4128_v24, 4  ;;  %v4148_v21 = vsel %vm423_vm1, %v4128_v24, %v4147_v59  ;;  %v4392_v42 = vsel %vm423_vm1, %v9032_v4, %v4391_v30  ;;  %v4380_v8 = vsel %vm423_vm1, %v9021_v7, %v4379_v18 }
 0x670   : > { %v4712_v61 = vpack.c.bf16 %v4148_v21, %v4148_v21  ;;  %v4400_v27 = vperm.slane %v4392_v42, %v6784_v28  ;;  %v4388_v62 = vperm.slane %v4380_v8, %v6784_v28  ;;  %v4404_v59 = vsel %vm423_vm1, %v9038_v51, %v4403_v46 }
 0x671   : > { %v4146_v38 = vsel %vm423_vm1, %v4145_v37, %v4104_v6  ;;  %v4416_v30 = vsel %vm423_vm1, %v8907_v63, %v4415_v57  ;;  %v4412_v18 = vperm.slane %v4404_v59, %v6784_v28  ;;  %v4261_v37 = vrot.slane %v8758_v55, 4 }
 0x672   : > { %v4711_v24 = vpack.c.bf16 %v4146_v38, %v4146_v38  ;;  %6271 = vmatmul.msk.bf16.vlgmr.msra.gmra.mxu1 %vm1791_vm2, %v4712_v61  ;;  %v4424_v21 = vperm.slane %v4416_v30, %v6784_v28  ;;  %v4437_v6 = vrot.slane %v4400_v27, 4  ;;  %v4285_v42 = vrot.slane %v8761_v44, 4 }
 0x673   : > { %v9824_v63 = vrot.slane %v8727_v56, 4  ;;  %v9825_v55 = vrot.slane %v8836_v49, 4  ;;  %v4262_v56 = vsel %vm423_vm1, %v8494_v20, %v4261_v37  ;;  %v4545_v38 = vrot.slane %v8860_v13, 4 }
 0x674   : > { %6270 = vmatmul.msk.bf16.vlgmr.msrb.gmra.mxu0 %vm1791_vm2, %v4711_v24  ;;  %v4438_v57 = vsel %vm423_vm1, %v4437_v6, %v4388_v62  ;;  %v4461_v61 = vrot.slane %v4424_v21, 4  ;;  %v4270_v30 = vperm.slane %v4262_v56, %v6796_v47  ;;  %v9826_v20 = vrot.slane %v8880_v2, 4 }
 0x675   : > { %v9081_v46 = vsel %vm423_vm1, %v8840_v12, %v9824_v63  ;;  %v9089_v44 = vsel %vm423_vm1, %v9825_v55, %v8734_v52  ;;  %v4444_v8 = vperm.slane %v4438_v57, %v6796_v47  ;;  %v4286_v12 = vsel %vm423_vm1, %v8502_v45, %v4285_v42 }
 0x676   : > { %v4462_v59 = vsel %vm423_vm1, %v4461_v61, %v4412_v18  ;;  %v4294_v49 = vperm.slane %v4286_v12, %v6796_v47  ;;  %v4546_v6 = vsel %vm423_vm1, %v9075_v15, %v4545_v38  ;;  %v4558_v45 = vsel %vm423_vm1, %v9081_v46, %v9826_v20 }
 0x677   : > { %v4468_v24 = vperm.slane %v4462_v59, %v6796_v47  ;;  %v4554_v63 = vperm.slane %v4546_v6, %v6784_v28  ;;  %v4566_v57 = vperm.slane %v4558_v45, %v6784_v28  ;;  %v9827_v61 = vrot.slane %v8884_v26, 4 }
 0x678   : > { %v4311_v42 = vrot.slane %v4294_v49, 4  ;;  %v9828_v38 = vrot.slane %v8893_v1, 4  ;;  %v4483_v20 = vrot.slane %v4444_v8, 4  ;;  %v4439_v45 = vrot.slane %v4388_v62, 4 }
 0x679   : > { %v4570_v55 = vsel %vm423_vm1, %v9089_v44, %v9827_v61  ;;  %v4481_v56 = vrot.slane %v4468_v24, 4  ;;  %v4603_v52 = vrot.slane %v4566_v57, 4  ;;  %v4463_v33 = vrot.slane %v4412_v18, 4 }
 0x67a   : > { %v4578_v12 = vperm.slane %v4570_v55, %v6784_v28  ;;  %v4582_v59 = vsel %vm423_vm1, %v8899_v35, %v9828_v38  ;;  %v4312_v37 = vsel %vm423_vm1, %v4311_v42, %v4270_v30  ;;  %v4484_v61 = vsel %vm423_vm1, %v4468_v24, %v4483_v20 }
 0x67b   : > { %v4590_v6 = vperm.slane %v4582_v59, %v6784_v28  ;;  %v4482_v60 = vsel %vm423_vm1, %v4481_v56, %v4444_v8  ;;  %v4715_v43 = vpack.c.bf16 %v4312_v37, %v4312_v37  ;;  %v4604_v55 = vsel %vm423_vm1, %v4603_v52, %v4554_v63 }
 0x67c   : > { %v4733_v32 = vpack.c.bf16 %v4482_v60, %v4482_v60  ;;  %v4734_v16 = vpack.c.bf16 %v4484_v61, %v4484_v61  ;;  %v4610_v35 = vperm.slane %v4604_v55, %v6796_v47  ;;  %v4440_v38 = vsel %vm423_vm1, %v4400_v27, %v4439_v45 }
 0x67d   : > { %v4627_v1 = vrot.slane %v4590_v6, 4  ;;  %v4464_v42 = vsel %vm423_vm1, %v4424_v21, %v4463_v33  ;;  %v4313_v59 = vrot.slane %v4270_v30, 4  ;;  %v4448_v18 = vperm.slane %v4440_v38, %v6796_v47 }
 0x67e   : > { %v4897_v62 = vsel %vm1791_vm2, %v4733_v32, 0  ;;  %v4916_v37 = vsel %vm1791_vm2, %v4734_v16, 0  ;;  %v4472_v52 = vperm.slane %v4464_v42, %v6796_v47  ;;  %v4649_v27 = vrot.slane %v4610_v35, 4 }
 0x67f   : > { %v4628_v8 = vsel %vm423_vm1, %v4627_v1, %v4578_v12  ;;  %4906 = vmatpush.bf16.xpose.msrb.mxu2 %v4897_v62  ;;  %4925 = vmatpush.bf16.xpose.msrb.mxu3 %v4916_v37  ;;  %v4314_v24 = vsel %vm423_vm1, %v4294_v49, %v4313_v59  ;;  %v4605_v33 = vrot.slane %v4554_v63, 4  ;;  %v4629_v21 = vrot.slane %v4578_v12, 4 }
 0x680   : > { %v4634_v60 = vperm.slane %v4628_v8, %v6796_v47  ;;  %v4716_v56 = vpack.c.bf16 %v4314_v24, %v4314_v24  ;;  %v4487_v30 = vrot.slane %v4448_v18, 4  ;;  %v4485_v20 = vrot.slane %v4472_v52, 4 }
 0x681   : > { %v9829_v16 = vrot.slane %v9021_v7, 4  ;;  %v4606_v1 = vsel %vm423_vm1, %v4566_v57, %v4605_v33  ;;  %v4630_v49 = vsel %vm423_vm1, %v4590_v6, %v4629_v21  ;;  %v9831_v33 = vrot.slane %v9038_v51, 4 }
 0x682   : > { %v4647_v32 = vrot.slane %v4634_v60, 4  ;;  %v4650_v45 = vsel %vm423_vm1, %v4634_v60, %v4649_v27  ;;  %6275 = vmatmul.msk.bf16.vlgmr.msrb.gmra.mxu1 %vm1791_vm2, %v4716_v56  ;;  %v4488_v63 = vsel %vm423_vm1, %v4472_v52, %v4487_v30  ;;  %v4486_v38 = vsel %vm423_vm1, %v4485_v20, %v4448_v18 }
 0x683   : > { %v4378_v61 = vsel %vm423_vm1, %v9829_v16, %v8875_v19  ;;  %v4738_v55 = vpack.c.bf16 %v4650_v45, %v4650_v45  ;;  %v4614_v42 = vperm.slane %v4606_v1, %v6796_v47  ;;  %v4638_v59 = vperm.slane %v4630_v49, %v6796_v47 }
 0x684   : > { %v4648_v12 = vsel %vm423_vm1, %v4647_v32, %v4610_v35  ;;  %6274 = vmatmul.msk.bf16.vlgmr.msra.gmra.mxu0 %vm1791_vm2, %v4715_v43  ;;  %v4735_v7 = vpack.c.bf16 %v4486_v38, %v4486_v38  ;;  %v4736_v8 = vpack.c.bf16 %v4488_v63, %v4488_v63  ;;  %v4384_v37 = vperm.slane %v4378_v61, %v6784_v28 }
 0x685   : > { %v4737_v19 = vpack.c.bf16 %v4648_v12, %v4648_v12  ;;  %v4992_v62 = vsel %vm1791_vm2, %v4738_v55, 0  ;;  %v4651_v57 = vrot.slane %v4638_v59, 4  ;;  %v4653_v6 = vrot.slane %v4614_v42, 4 }
 0x686   : > { %v9830_v35 = vrot.slane %v9032_v4, 4  ;;  %v4935_v52 = vsel %vm1791_vm2, %v4735_v7, 0  ;;  %v4954_v43 = vsel %vm1791_vm2, %v4736_v8, 0  ;;  %v4402_v4 = vsel %vm423_vm1, %v9831_v33, %v8888_v17 }
 0x687   : > { %5001 = vmatpush.bf16.xpose.msra.mxu3 %v4992_v62  ;;  %v4973_v60 = vsel %vm1791_vm2, %v4737_v19, 0  ;;  %4944 = vmatpush.bf16.xpose.msrb.mxu0 %v4935_v52  ;;  %v4652_v27 = vsel %vm423_vm1, %v4651_v57, %v4614_v42  ;;  %v4654_v56 = vsel %vm423_vm1, %v4638_v59, %v4653_v6  ;;  %v4408_v32 = vperm.slane %v4402_v4, %v6784_v28 }
 0x688   : > { %v4390_v18 = vsel %vm423_vm1, %v9830_v35, %v8856_v54  ;;  %4982 = vmatpush.bf16.xpose.msra.mxu2 %v4973_v60  ;;  %v4427_v54 = vrot.slane %v4384_v37, 4  ;;  %v4739_v21 = vpack.c.bf16 %v4652_v27, %v4652_v27  ;;  %4963 = vmatpush.bf16.xpose.msra.mxu1 %v4954_v43  ;;  %v4740_v30 = vpack.c.bf16 %v4654_v56, %v4654_v56 }
 0x689   : > { %v4396_v24 = vperm.slane %v4390_v18, %v6784_v28  ;;  %v4161_v45 = vperm.slane %v9010_v9, %v6784_v28  ;;  %v4167_v16 = vperm.slane %v9041_v3, %v6784_v28  ;;  %v4168_v61 = vsel %vm423_vm1, %v9007_v48, %v8994_v58 }
 0x68a   : > { %v9832_v17 = vrot.slane %v9025_v22, 4  ;;  %v5011_v55 = vsel %vm1791_vm2, %v4739_v21, 0  ;;  %v5030_v1 = vsel %vm1791_vm2, %v4740_v30, 0  ;;  %v9833_v9 = vrot.slane %v8926_v10, 4 }
 0x68b   : > { %v4425_v20 = vrot.slane %v4396_v24, 4  ;;  %v4451_v58 = vrot.slane %v4408_v32, 4  ;;  %v4172_v22 = vperm.slane %v4168_v61, %v6784_v28  ;;  %v4179_v12 = vrot.slane %v4167_v16, 4 }
 0x68c   : > { %v4174_v51 = vsel %vm423_vm1, %v9832_v17, %v9013_v5  ;;  %v4450_v63 = vsel %vm423_vm1, %v9833_v9, %v4408_v32  ;;  %v4428_v38 = vsel %vm423_vm1, %v4396_v24, %v4427_v54  ;;  %v4181_v42 = vrot.slane %v4161_v45, 4 }
 0x68d   : > { %v4426_v49 = vsel %vm423_vm1, %v4425_v20, %v4384_v37  ;;  %v4456_v48 = vperm.slane %v4450_v63, %v6796_v47  ;;  %v4178_v5 = vperm.slane %v4174_v51, %v6784_v28  ;;  %v4436_v7 = vperm.slane %v4428_v38, %v6796_v47 }
 0x68e   : > { %v4432_v3 = vperm.slane %v4426_v49, %v6796_v47  ;;  %v4452_v62 = vsel %vm423_vm1, %v8926_v10, %v4451_v58  ;;  %v4180_v8 = vsel %vm423_vm1, %v4179_v12, %v4161_v45  ;;  %v4182_v37 = vsel %vm423_vm1, %v4167_v16, %v4181_v42 }
 0x68f   : > { %5020 = vmatpush.bf16.xpose.msra.mxu0 %v5011_v55  ;;  %v4473_v59 = vrot.slane %v4456_v48, 4  ;;  %v4191_v57 = vrot.slane %v4178_v5, 4  ;;  %v4460_v6 = vperm.slane %v4452_v62, %v6796_v47  ;;  %v4186_v60 = vperm.slane %v4180_v8, %v6796_v47 }
 0x690   : > { %5039 = vmatpush.bf16.xpose.msrb.mxu1 %v5030_v1  ;;  %v4475_v19 = vrot.slane %v4432_v3, 4  ;;  %v4190_v52 = vperm.slane %v4182_v37, %v6796_v47  ;;  %v4193_v4 = vrot.slane %v4172_v22, 4  ;;  %v4479_v54 = vrot.slane %v4436_v7, 4 }
 0x691   : > { %v4474_v35 = vsel %vm423_vm1, %v4473_v59, %v4432_v3  ;;  %v4192_v27 = vsel %vm423_vm1, %v4191_v57, %v4172_v22  ;;  %v4477_v10 = vrot.slane %v4460_v6, 4  ;;  %v4205_v33 = vrot.slane %v4186_v60, 4 }
 0x692   : > { %v4476_v18 = vsel %vm423_vm1, %v4456_v48, %v4475_v19  ;;  %v4717_v43 = vpack.c.bf16 %v4474_v35, %v4474_v35  ;;  %v4198_v56 = vperm.slane %v4192_v27, %v6796_v47  ;;  %v4209_v30 = vrot.slane %v4190_v52, 4 }
 0x693   : > { %v4718_v24 = vpack.c.bf16 %v4476_v18, %v4476_v18  ;;  %v4478_v21 = vsel %vm423_vm1, %v4477_v10, %v4436_v7  ;;  %v9834_v32 = vrot.slane %v9075_v15, 4  ;;  %v9835_v45 = vrot.slane %v9081_v46, 4 }
 0x694   : > { %6276 = vmatmul.msk.bf16.vlgmr.msrb.gmra.mxu2 %vm1791_vm2, %v4717_v43  ;;  %v4206_v61 = vsel %vm423_vm1, %v4198_v56, %v4205_v33  ;;  %v4203_v17 = vrot.slane %v4198_v56, 4  ;;  %v4719_v51 = vpack.c.bf16 %v4478_v21, %v4478_v21  ;;  %v4194_v55 = vsel %vm423_vm1, %v4178_v5, %v4193_v4 }
 0x695   : > { %6277 = vmatmul.msk.bf16.vlgmr.msrb.gmra.mxu3 %vm1791_vm2, %v4718_v24  ;;  %v4544_v20 = vsel %vm423_vm1, %v9834_v32, %v8860_v13  ;;  %v4556_v16 = vsel %vm423_vm1, %v9835_v45, %v8880_v2  ;;  %v5254_v1 = vpack.c.bf16 %v4206_v61, %v4206_v61  ;;  %v4202_v49 = vperm.slane %v4194_v55, %v6796_v47 }
 0x696   : > { %v4480_v9 = vsel %vm423_vm1, %v4460_v6, %v4479_v54  ;;  %v4550_v15 = vperm.slane %v4544_v20, %v6784_v28  ;;  %v4204_v13 = vsel %vm423_vm1, %v4203_v17, %v4186_v60  ;;  %6278 = vmatmul.msk.bf16.vlgmr.msrb.gmra.mxu0 %vm1791_vm2, %v4719_v51  ;;  %v4562_v2 = vperm.slane %v4556_v16, %v6784_v28 }
 0x697   : > { %v4720_v46 = vpack.c.bf16 %v4480_v9, %v4480_v9  ;;  %v9836_v63 = vrot.slane %v9089_v44, 4  ;;  %v5292_v58 = vsel %vm2323_vm3, %v5254_v1, 0  ;;  %v5253_v48 = vpack.c.bf16 %v4204_v13, %v4204_v13 }
 0x698   : > { %v4207_v22 = vrot.slane %v4202_v49, 4  ;;  %v4210_v5 = vsel %vm423_vm1, %v4202_v49, %v4209_v30  ;;  %5301 = vmatpush.bf16.msrb.mxu3 %v5292_v58  ;;  %v4591_v42 = vrot.slane %v4562_v2, 4  ;;  %v4593_v59 = vrot.slane %v4550_v15, 4 }
 0x699   : > { %v4568_v3 = vsel %vm423_vm1, %v9836_v63, %v8884_v26  ;;  %6279 = vmatmul.msk.bf16.vlgmr.msra.gmra.mxu1 %vm1791_vm2, %v4720_v46  ;;  %v5256_v12 = vpack.c.bf16 %v4210_v5, %v4210_v5  ;;  %v5273_v19 = vsel %vm2323_vm3, %v5253_v48, 0  ;;  %v4323_v26 = vsel %vm423_vm1, %v8971_v0, %v8943_v50 }
 0x69a   : > { %v4574_v38 = vperm.slane %v4568_v3, %v6784_v28  ;;  %v4208_v44 = vsel %vm423_vm1, %v4207_v22, %v4190_v52  ;;  %v9837_v7 = vrot.slane %v8982_v34, 4  ;;  %5282 = vmatpush.bf16.msrb.mxu2 %v5273_v19  ;;  %v4592_v6 = vsel %vm423_vm1, %v4591_v42, %v4550_v15 }
 0x69b   : > { %v5255_v8 = vpack.c.bf16 %v4208_v44, %v4208_v44  ;;  %v5330_v57 = vsel %vm2323_vm3, %v5256_v12, 0  ;;  %v9838_v37 = vrot.slane %v8929_v31, 4  ;;  %v4598_v18 = vperm.slane %v4592_v6, %v6796_v47 }
 0x69c   : > { %v4329_v62 = vsel %vm423_vm1, %v9837_v7, %v8969_v40  ;;  %5339 = vmatpush.bf16.msra.mxu1 %v5330_v57  ;;  %v4617_v60 = vrot.slane %v4574_v38, 4  ;;  %v4327_v0 = vperm.slane %v4323_v26, %v6784_v28  ;;  %v4334_v52 = vsel %vm423_vm1, %v8987_v14, %v8956_v39 }
 0x69d   : > { %v4616_v35 = vsel %vm423_vm1, %v9838_v37, %v4574_v38  ;;  %v5311_v40 = vsel %vm2323_vm3, %v5255_v8, 0  ;;  %v4333_v34 = vperm.slane %v4329_v62, %v6784_v28  ;;  %v9839_v43 = vrot.slane %v8998_v36, 4 }
 0x69e   : > { %v4622_v50 = vperm.slane %v4616_v35, %v6796_v47  ;;  %5320 = vmatpush.bf16.msrb.mxu0 %v5311_v40  ;;  %v4641_v10 = vrot.slane %v4598_v18, 4  ;;  %v4338_v56 = vperm.slane %v4334_v52, %v6784_v28  ;;  %v4594_v54 = vsel %vm423_vm1, %v4562_v2, %v4593_v59 }
 0x69f   : > { %v4340_v24 = vsel %vm423_vm1, %v9839_v43, %v8985_v53  ;;  %v4345_v4 = vrot.slane %v4333_v34, 4  ;;  %v4618_v21 = vsel %vm423_vm1, %v8929_v31, %v4617_v60  ;;  %v4347_v30 = vrot.slane %v4327_v0, 4 }
 0x6a0   : > { %v4639_v27 = vrot.slane %v4622_v50, 4  ;;  %v4344_v33 = vperm.slane %v4340_v24, %v6784_v28  ;;  %v4642_v36 = vsel %vm423_vm1, %v4622_v50, %v4641_v10  ;;  %v4602_v53 = vperm.slane %v4594_v54, %v6796_v47 }
 0x6a1   : > { %v4346_v20 = vsel %vm423_vm1, %v4345_v4, %v4327_v0  ;;  %v4722_v45 = vpack.c.bf16 %v4642_v36, %v4642_v36  ;;  %v4626_v16 = vperm.slane %v4618_v21, %v6796_v47  ;;  %v4348_v31 = vsel %vm423_vm1, %v4333_v34, %v4347_v30 }
 0x6a2   : > { %v4640_v39 = vsel %vm423_vm1, %v4639_v27, %v4598_v18  ;;  %v4357_v14 = vrot.slane %v4344_v33, 4  ;;  %v4352_v61 = vperm.slane %v4346_v20, %v6796_v47  ;;  %v4359_v51 = vrot.slane %v4338_v56, 4 }
 0x6a3   : > { %v4721_v32 = vpack.c.bf16 %v4640_v39, %v4640_v39  ;;  %v4643_v1 = vrot.slane %v4626_v16, 4  ;;  %v4356_v49 = vperm.slane %v4348_v31, %v6796_v47  ;;  %v4645_v9 = vrot.slane %v4602_v53, 4 }
 0x6a4   : > { %v4358_v17 = vsel %vm423_vm1, %v4357_v14, %v4338_v56  ;;  %v4371_v15 = vrot.slane %v4352_v61, 4  ;;  %v4360_v13 = vsel %vm423_vm1, %v4344_v33, %v4359_v51 }
 0x6a5   : > { %v4364_v55 = vperm.slane %v4358_v17, %v6796_v47  ;;  %6280 = vmatmul.msk.bf16.vlgmr.msra.gmra.mxu2 %vm1791_vm2, %v4721_v32  ;;  %6281 = vmatmul.msk.bf16.vlgmr.msra.gmra.mxu3 %vm1791_vm2, %v4722_v45  ;;  %v4644_v2 = vsel %vm423_vm1, %v4643_v1, %v4602_v53  ;;  %v4368_v63 = vperm.slane %v4360_v13, %v6796_v47  ;;  %v4375_v22 = vrot.slane %v4356_v49, 4 }
 0x6a6   : > { %v4646_v3 = vsel %vm423_vm1, %v4626_v16, %v4645_v9  ;;  %v4723_v48 = vpack.c.bf16 %v4644_v2, %v4644_v2 }
 0x6a7   : > { %v4369_v46 = vrot.slane %v4364_v55, 4  ;;  %v4372_v58 = vsel %vm423_vm1, %v4364_v55, %v4371_v15  ;;  %v4373_v38 = vrot.slane %v4368_v63, 4  ;;  %v4724_v42 = vpack.c.bf16 %v4646_v3, %v4646_v3 }
 0x6a8   : > { %v5258_v12 = vpack.c.bf16 %v4372_v58, %v4372_v58  ;;  %6282 = vmatmul.msk.bf16.vlgmr.msra.gmra.mxu0 %vm1791_vm2, %v4723_v48  ;;  %v4376_v19 = vsel %vm423_vm1, %v4368_v63, %v4375_v22 }
 0x6a9   : > { %v4370_v5 = vsel %vm423_vm1, %v4369_v46, %v4352_v61  ;;  %v4374_v26 = vsel %vm423_vm1, %v4373_v38, %v4356_v49  ;;  %6283 = vmatmul.msk.bf16.vlgmr.msrb.gmra.mxu1 %vm1791_vm2, %v4724_v42  ;;  %v5260_v7 = vpack.c.bf16 %v4376_v19, %v4376_v19 }
 0x6aa   : > { %v5257_v59 = vpack.c.bf16 %v4370_v5, %v4370_v5  ;;  %v5368_v44 = vsel %vm2323_vm3, %v5258_v12, 0  ;;  %v5259_v8 = vpack.c.bf16 %v4374_v26, %v4374_v26 }
 0x6ab   : > { %5377 = vmatpush.bf16.msra.mxu3 %v5368_v44  ;;  %v5406_v57 = vsel %vm2323_vm3, %v5260_v7, 0 }
 0x6ac   : > { %v5349_v62 = vsel %vm2323_vm3, %v5257_v59, 0  ;;  %v5387_v6 = vsel %vm2323_vm3, %v5259_v8, 0  ;;  %5415 = vmatpush.bf16.msrb.mxu1 %v5406_v57 }
 0x6ad   : > { %5358 = vmatpush.bf16.msra.mxu2 %v5349_v62  ;;  %5396 = vmatpush.bf16.msra.mxu0 %v5387_v6 }
 0x6c7   : > { %v4756_v37 = vpop.f32.mrf.mxu0 }
 0x6c8   : > { %v9285_v35 = vmul.f32 0.17677669, %v4756_v37  ;;  %v4775_v18 = vpop.f32.mrf.mxu1 }
 0x6c9   : > { %v9287_v60 = vmul.f32 0.17677669, %v4775_v18 }
 0x6ca   : > { %v5061_v50 = vsel %vm1791_vm2, %v9285_v35, -inf }
 0x6cb   : > { %5062 = vmax.xlane.f32.xlu0 %v5061_v50  ;;  %v5064_v0 = vsel %vm1791_vm2, %v9287_v60, -inf }
 0x6cc   : > { %5065 = vmax.xlane.f32.xlu2 %v5064_v0 }
 0x6cf   : > { %v4758_v40 = vpop.f32.mrf.mxu0 }
 0x6d0   : > { %v4777_v34 = vpop.f32.mrf.mxu1  ;;  %v4832_v52 = vpop.f32.mrf.mxu2 }
 0x6d1   : > { %v9293_v24 = vmul.f32 0.17677669, %v4832_v52 }
 0x6d2   : > { %v4851_v43 = vpop.f32.mrf.mxu3 }
 0x6d3   : > { %v9295_v27 = vmul.f32 0.17677669, %v4851_v43  ;;  %v5073_v56 = vsel %vm1791_vm2, %v9293_v24, -inf  ;;  %v9349_v43 = vpop.permute.xlu2 %6475 }
 0x6d4   : > { %5074 = vmax.xlane.f32.xlu2 %v5073_v56 }
 0x6d5   : > { %v5076_v10 = vsel %vm1791_vm2, %v9295_v27, -inf }
 0x6d6   : > { %5077 = vmax.xlane.f32.xlu1 %v5076_v10 }
 0x6d8   : > { %v4834_v33 = vpop.f32.mrf.mxu2 }
 0x6da   : > { %v4853_v4 = vpop.f32.mrf.mxu3 }
 0x6ef   : > { %v4813_v54 = vpop.f32.mrf.mxu1 }
 0x6f0   : > { %v9301_v21 = vmul.f32 0.17677669, %v4813_v54 }
 0x6f1   : > { %v4794_v30 = vpop.f32.mrf.mxu0 }
 0x6f2   : > { %v9303_v39 = vmul.f32 0.17677669, %v4794_v30  ;;  %v5070_v14 = vsel %vm1791_vm2, %v9301_v21, -inf }
 0x6f3   : > { %5071 = vmax.xlane.f32.xlu0 %v5070_v14 }
 0x6f4   : > { %v5067_v36 = vsel %vm1791_vm2, %v9303_v39, -inf }
 0x6f5   : > { %5068 = vmax.xlane.f32.xlu1 %v5067_v36 }
 0x6f7   : > { %v4815_v53 = vpop.f32.mrf.mxu1 }
 0x6f9   : > { %v4796_v32 = vpop.f32.mrf.mxu0 }
 0x6ff   : > { %v4889_v20 = vpop.f32.mrf.mxu1 }
 0x700   : > { %v9309_v45 = vmul.f32 0.17677669, %v4889_v20 }
 0x701   : > { %v4870_v16 = vpop.f32.mrf.mxu0 }
 0x702   : > { %v9311_v61 = vmul.f32 0.17677669, %v4870_v16  ;;  %v5082_v17 = vsel %vm1791_vm2, %v9309_v45, -inf }
 0x703   : > { %5083 = vmax.xlane.f32.xlu2 %v5082_v17 }
 0x704   : > { %v5079_v31 = vsel %vm1791_vm2, %v9311_v61, -inf }
 0x705   : > { %5080 = vmax.xlane.f32.xlu0 %v5079_v31 }
 0x707   : > { %v4891_v51 = vpop.f32.mrf.mxu1 }
 0x709   : > { %v4872_v55 = vpop.f32.mrf.mxu0 }
 0x713   : > { %v4946_v1 = vpop.f32.mrf.mxu0 }
 0x714   : > { %v9329_v22 = vmul.f32 0.17677669, %v4946_v1 }
 0x716   : > { %v4965_v49 = vpop.f32.mrf.mxu1  ;;  %v5091_v42 = vsel %vm1791_vm2, %v9329_v22, -inf }
 0x717   : > { %v4908_v9 = vpop.f32.mrf.mxu2  ;;  %v9317_v13 = vmul.f32 0.17677669, %v4965_v49 }
 0x718   : > { %v4927_v15 = vpop.f32.mrf.mxu3  ;;  %v9319_v46 = vmul.f32 0.17677669, %v4908_v9 }
 0x719   : > { %v9321_v2 = vmul.f32 0.17677669, %v4927_v15  ;;  %v5094_v63 = vsel %vm1791_vm2, %v9317_v13, -inf }
 0x71a   : > { %v5085_v3 = vsel %vm1791_vm2, %v9319_v46, -inf  ;;  %5095 = vmax.xlane.f32.xlu2 %v5094_v63 }
 0x71b   : > { %v5088_v58 = vsel %vm1791_vm2, %v9321_v2, -inf  ;;  %5086 = vmax.xlane.f32.xlu0 %v5085_v3  ;;  %v4948_v48 = vpop.f32.mrf.mxu0 }
 0x71c   : > { %5089 = vmax.xlane.f32.xlu1 %v5088_v58 }
 0x71e   : > { %v4967_v5 = vpop.f32.mrf.mxu1 }
 0x71f   : > { %v4910_v12 = vpop.f32.mrf.mxu2 }
 0x720   : > { %v4929_v38 = vpop.f32.mrf.mxu3 }
 0x723   : > { %5092 = vmax.xlane.f32.xlu0 %v5091_v42 }
 0x725   : > { %v5022_v59 = vpop.f32.mrf.mxu0 }
 0x726   : > { %v9333_v19 = vmul.f32 0.17677669, %v5022_v59  ;;  %v5041_v44 = vpop.f32.mrf.mxu1 }
 0x727   : > { %v9345_v50 = vmul.f32 0.17677669, %v5041_v44 }
 0x728   : > { %v4984_v26 = vpop.f32.mrf.mxu2  ;;  %v5003_v7 = vpop.f32.mrf.mxu3  ;;  %v5103_v57 = vsel %vm1791_vm2, %v9333_v19, -inf }
 0x729   : > { %v9335_v62 = vmul.f32 0.17677669, %v4984_v26  ;;  %v9337_v8 = vmul.f32 0.17677669, %v5003_v7  ;;  %5104 = vmax.xlane.f32.xlu2 %v5103_v57  ;;  %v5106_v52 = vsel %vm1791_vm2, %v9345_v50, -inf }
 0x72b   : > { %v5097_v6 = vsel %vm1791_vm2, %v9335_v62, -inf  ;;  %v5100_v37 = vsel %vm1791_vm2, %v9337_v8, -inf }
 0x72c   : > { %5098 = vmax.xlane.f32.xlu1 %v5097_v6  ;;  %5101 = vmax.xlane.f32.xlu0 %v5100_v37 }
 0x72d   : > { %v5024_v18 = vpop.f32.mrf.mxu0 }
 0x72e   : > { %v5043_v0 = vpop.f32.mrf.mxu1 }
 0x730   : > { %v4986_v40 = vpop.f32.mrf.mxu2  ;;  %v5005_v34 = vpop.f32.mrf.mxu3 }
 0x734   : > { %5107 = vmax.xlane.f32.xlu0 %v5106_v52 }
 0x73e   : > { %v5063_v10 = vpop.xlane.xlu0 %5062 }
 0x73f   : > { %v5109_v56 = vsub.f32 %v9285_v35, %v5063_v10  ;;  %v5066_v33 = vpop.xlane.xlu2 %5065 }
 0x740   : > { %v5110_v4 = vsub.f32 %v9287_v60, %v5066_v33 }
 0x741   : > { %v5125_v54 = vmul.f32 1.442695, %v5109_v56 }
 0x742   : > { %v5127_v30 = vmul.f32 1.442695, %v5110_v4 }
 0x743   : > { %6562 = vpow2.f32 %v5125_v54 }
 0x744   : > { %6564 = vpow2.f32 %v5127_v30 }
 0x747   : > { %v5075_v32 = vpop.xlane.xlu2 %5074 }
 0x748   : > { %6485 = vrot.lane.b32.xlu0 %v8241_v41, %s6642_s14  ;;  %v5113_v31 = vsub.f32 %v9293_v24, %v5075_v32  ;;  %s226_s14 = scalar_lea.vmem %s9795_s5, %s6193_s25 }
 0x749   : > { %v9355_v14 = vpop.eup %6562  ;;  %v9363_v60 = vpop.xlane.xlu1 %5077 }
 0x74a   : > { %v9357_v36 = vpop.eup %6564  ;;  %v5157_v53 = vsel %vm1791_vm2, %v9355_v14, 0.0  ;;  %v5133_v49 = vmul.f32 1.442695, %v5113_v31  ;;  %v5114_v30 = vsub.f32 %v9295_v27, %v9363_v60 }
 0x74b   : > { %5158 = vadd.xlane.f32.xlu1 %v5157_v53  ;;  %v5160_v35 = vsel %vm1791_vm2, %v9357_v36, 0.0 }
 0x74c   : > { %5161 = vadd.xlane.f32.xlu2 %v5160_v35 }
 0x764   : > { %6490 = vrot.lane.b32.xlu2 %v8241_v41, %s6644_s16 }
 0x766   : > { %v5072_v20 = vpop.xlane.xlu0 %5071 }
 0x767   : > { %v5112_v16 = vsub.f32 %v9301_v21, %v5072_v20  ;;  %v5135_v20 = vmul.f32 1.442695, %v5114_v30 }
 0x768   : > { %v5069_v17 = vpop.xlane.xlu1 %5068 }
 0x769   : > { %v5111_v51 = vsub.f32 %v9303_v39, %v5069_v17  ;;  %v5131_v55 = vmul.f32 1.442695, %v5112_v16 }
 0x76b   : > { %v5129_v1 = vmul.f32 1.442695, %v5111_v51  ;;  %6566 = vpow2.f32 %v5131_v55 }
 0x76d   : > { %6568 = vpow2.f32 %v5129_v1 }
 0x76e   : > { %6570 = vpow2.f32 %v5133_v49 }
 0x771   : > { %v9370_v9 = vpop.eup %6566 }
 0x772   : > { %v5166_v15 = vsel %vm1791_vm2, %v9370_v9, 0.0 }
 0x773   : > { %v9374_v63 = vpop.eup %6568  ;;  %5167 = vadd.xlane.f32.xlu0 %v5166_v15 }
 0x774   : > { %v5163_v21 = vsel %vm1791_vm2, %v9374_v63, 0.0  ;;  %v9378_v39 = vpop.eup %6570 }
 0x775   : > { %5164 = vadd.xlane.f32.xlu1 %v5163_v21  ;;  %v5169_v5 = vsel %vm1791_vm2, %v9378_v39, 0.0 }
 0x776   : > { %v5084_v24 = vpop.xlane.xlu2 %5083 }
 0x777   : > { %v5116_v3 = vsub.f32 %v9309_v45, %v5084_v24 }
 0x778   : > { %v5081_v58 = vpop.xlane.xlu0 %5080 }
 0x779   : > { %v5139_v48 = vmul.f32 1.442695, %v5116_v3  ;;  %v5115_v12 = vsub.f32 %v9311_v61, %v5081_v58 }
 0x77b   : > { %6572 = vpow2.f32 %v5139_v48  ;;  %5170 = vadd.xlane.f32.xlu0 %v5169_v5  ;;  %v5137_v38 = vmul.f32 1.442695, %v5115_v12 }
 0x77d   : > { %6574 = vpow2.f32 %v5137_v38 }
 0x781   : > { %v9384_v42 = vpop.eup %6572 }
 0x782   : > { %v5178_v59 = vsel %vm1791_vm2, %v9384_v42, 0.0 }
 0x783   : > { %5179 = vadd.xlane.f32.xlu0 %v5178_v59  ;;  %v9388_v44 = vpop.eup %6574 }
 0x784   : > { %v5175_v57 = vsel %vm1791_vm2, %v9388_v44, 0.0 }
 0x78d   : > { %5176 = vadd.xlane.f32.xlu2 %v5175_v57  ;;  %v5096_v27 = vpop.xlane.xlu2 %5095 }
 0x78e   : > { %v5087_v45 = vpop.xlane.xlu0 %5086  ;;  %6480 = vrot.lane.b32.xlu1 %v8241_v41, %s6643_s15  ;;  %v5120_v51 = vsub.f32 %v9317_v13, %v5096_v27 }
 0x78f   : > { %v5090_v26 = vpop.xlane.xlu1 %5089 }
 0x790   : > { %v5118_v7 = vsub.f32 %v9321_v2, %v5090_v26  ;;  %v5147_v49 = vmul.f32 1.442695, %v5120_v51 }
 0x792   : > { %v5143_v61 = vmul.f32 1.442695, %v5118_v7 }
 0x794   : > { %6576 = vpow2.f32 %v5143_v61 }
 0x796   : > { %v5093_v6 = vpop.xlane.xlu0 %5092 }
 0x797   : > { %v5119_v37 = vsub.f32 %v9329_v22, %v5093_v6 }
 0x799   : > { %v5145_v18 = vmul.f32 1.442695, %v5119_v37 }
 0x79a   : > { %v9396_v0 = vpop.eup %6576 }
 0x79b   : > { %6578 = vpow2.f32 %v5145_v18  ;;  %v5184_v40 = vsel %vm1791_vm2, %v9396_v0, 0.0 }
 0x79c   : > { %5185 = vadd.xlane.f32.xlu2 %v5184_v40  ;;  %v5105_v1 = vpop.xlane.xlu2 %5104 }
 0x79d   : > { %v5123_v15 = vsub.f32 %v9333_v19, %v5105_v1 }
 0x79f   : > { %v5099_v2 = vpop.xlane.xlu1 %5098  ;;  %v5102_v34 = vpop.xlane.xlu0 %5101  ;;  %v5153_v13 = vmul.f32 1.442695, %v5123_v15 }
 0x7a0   : > { %v5121_v52 = vsub.f32 %v9335_v62, %v5099_v2  ;;  %v5122_v41 = vsub.f32 %v9337_v8, %v5102_v34 }
 0x7a1   : > { %v9402_v10 = vpop.eup %6578 }
 0x7a2   : > { %v5149_v56 = vmul.f32 1.442695, %v5121_v52  ;;  %v5151_v33 = vmul.f32 1.442695, %v5122_v41  ;;  %v5187_v22 = vsel %vm1791_vm2, %v9402_v10, 0.0 }
 0x7a3   : > { %5188 = vadd.xlane.f32.xlu0 %v5187_v22 }
 0x7a4   : > { %6580 = vpow2.f32 %v5149_v56 }
 0x7a5   : > { %6582 = vpow2.f32 %v5151_v33  ;;  %v6477_v33 = vunpack.i.l.bf16 %v9349_v43 }
 0x7a7   : > { %v5108_v4 = vpop.xlane.xlu0 %5107 }
 0x7a8   : > { %v5124_v54 = vsub.f32 %v9345_v50, %v5108_v4  ;;  %v5117_v50 = vsub.f32 %v9319_v46, %v5087_v45 }
 0x7aa   : > { %v9409_v53 = vpop.eup %6580  ;;  %v5155_v62 = vmul.f32 1.442695, %v5124_v54  ;;  %v5141_v17 = vmul.f32 1.442695, %v5117_v50 }
 0x7ab   : > { %v9411_v8 = vpop.eup %6582  ;;  %v5193_v35 = vsel %vm1791_vm2, %v9409_v53, 0.0 }
 0x7ac   : > { %6584 = vpow2.f32 %v5155_v62  ;;  %v5196_v32 = vsel %vm1791_vm2, %v9411_v8, 0.0  ;;  %5194 = vadd.xlane.f32.xlu2 %v5193_v35  ;;  %v3823_v62 = vrot.slane %v6477_v33, 4 }
 0x7ad   : > { %5197 = vadd.xlane.f32.xlu0 %v5196_v32  ;;  %6586 = vpow2.f32 %v5135_v20 }
 0x7ae   : > { %6588 = vpow2.f32 %v5141_v17 }
 0x7af   : > { %6590 = vpow2.f32 %v5147_v49 }
 0x7b2   : > { %v9418_v16 = vpop.eup %6584 }
 0x7b3   : > { %v5202_v60 = vsel %vm1791_vm2, %v9418_v16, 0.0  ;;  %v9422_v31 = vpop.eup %6586 }
 0x7b4   : > { %5203 = vadd.xlane.f32.xlu2 %v5202_v60  ;;  %v5172_v55 = vsel %vm1791_vm2, %v9422_v31, 0.0  ;;  %v9427_v46 = vpop.eup %6588 }
 0x7b5   : > { %v5181_v21 = vsel %vm1791_vm2, %v9427_v46, 0.0  ;;  %v9432_v58 = vpop.eup %6590 }
 0x7b6   : > { %v5190_v12 = vsel %vm1791_vm2, %v9432_v58, 0.0 }
 0x7b8   : > { %5173 = vadd.xlane.f32.xlu1 %v5172_v55 }
 0x7ba   : > { %v6486_v57 = vpop.permute.xlu0 %6485 }
 0x7bb   : > { %v6488_v41 = vunpack.i.h.bf16 %v6486_v57  ;;  %v6487_v56 = vunpack.i.l.bf16 %v6486_v57 }
 0x7bd   : > { %v3989_v30 = vrot.slane %v6488_v41, 4  ;;  %v3824_v20 = vsel %vm423_vm1, %v6487_v56, %v3823_v62 }
 0x7be   : > { %v5159_v24 = vpop.xlane.xlu1 %5158  ;;  %v3832_v49 = vperm.slane %v3824_v20, %v6784_v28 }
 0x7bf   : > { %6592 = vrcp.f32 %v5159_v24  ;;  %v5162_v3 = vpop.xlane.xlu2 %5161 }
 0x7c0   : > { %5182 = vadd.xlane.f32.xlu1 %v5181_v21  ;;  %6594 = vrcp.f32 %v5162_v3 }
 0x7c1   : > { %6596 = vpow2.f32 %v5153_v13 }
 0x7c5   : > { %v6593_v48 = vpop.eup %6592 }
 0x7c6   : > { %v6595_v5 = vpop.eup %6594  ;;  %v5221_v38 = vmul.f32 %v6593_v48, %v9355_v14 }
 0x7c7   : > { %v5222_v19 = vmul.f32 %v6595_v5, %v9357_v36  ;;  %v9439_v26 = vpop.eup %6596  ;;  %v6491_v35 = vpop.permute.xlu2 %6490 }
 0x7c8   : > { %5191 = vadd.xlane.f32.xlu1 %v5190_v12  ;;  %v5237_v59 = vpack.c.bf16 %v5221_v38, %v5221_v38  ;;  %v5199_v7 = vsel %vm1791_vm2, %v9439_v26, 0.0  ;;  %v6492_v17 = vunpack.i.l.bf16 %v6491_v35 }
 0x7c9   : > { %v5238_v45 = vpack.c.bf16 %v5222_v19, %v5222_v19 }
 0x7ca   : > { %6284 = vmatmul.msk.bf16.vlgmr.msrb.gmra.mxu2 %vm1791_vm2, %v5237_v59  ;;  %v3833_v3 = vrot.slane %v6492_v17, 4 }
 0x7cb   : > { %6285 = vmatmul.msk.bf16.vlgmr.msrb.gmra.mxu3 %vm1791_vm2, %v5238_v45 }
 0x7d0   : > { %5200 = vadd.xlane.f32.xlu1 %v5199_v7 }
 0x7e6   : > { %v5168_v61 = vpop.xlane.xlu0 %5167 }
 0x7e7   : > { %6598 = vrcp.f32 %v5168_v61  ;;  %v3859_v61 = vrot.slane %v3832_v49, 4 }
 0x7e8   : > { %v5165_v6 = vpop.xlane.xlu1 %5164 }
 0x7e9   : > { %6600 = vrcp.f32 %v5165_v6 }
 0x7ed   : > { %v6599_v14 = vpop.eup %6598 }
 0x7ee   : > { %v5224_v36 = vmul.f32 %v6599_v14, %v9370_v9  ;;  %v5171_v37 = vpop.xlane.xlu0 %5170  ;;  %v6478_v9 = vunpack.i.h.bf16 %v9349_v43 }
 0x7ef   : > { %v6601_v18 = vpop.eup %6600  ;;  %6602 = vrcp.f32 %v5171_v37 }
 0x7f0   : > { %v5223_v40 = vmul.f32 %v6601_v18, %v9374_v63  ;;  %v5240_v2 = vpack.c.bf16 %v5224_v36, %v5224_v36  ;;  %v3821_v63 = vrot.slane %v6487_v56, 4  ;;  %v3991_v32 = vrot.slane %v6478_v9, 4 }
 0x7f1   : > { %v3990_v27 = vsel %vm423_vm1, %v3989_v30, %v6478_v9 }
 0x7f2   : > { %v5239_v34 = vpack.c.bf16 %v5223_v40, %v5223_v40  ;;  %6287 = vmatmul.msk.bf16.vlgmr.msra.gmra.mxu1 %vm1791_vm2, %v5240_v2  ;;  %v3822_v60 = vsel %vm423_vm1, %v3821_v63, %v6477_v33  ;;  %v3992_v43 = vsel %vm423_vm1, %v6488_v41, %v3991_v32  ;;  %v3996_v55 = vperm.slane %v3990_v27, %v6784_v28 }
 0x7f3   : > { %v3828_v1 = vperm.slane %v3822_v60, %v6784_v28  ;;  %v4000_v5 = vperm.slane %v3992_v43, %v6784_v28 }
 0x7f4   : > { %6286 = vmatmul.msk.bf16.vlgmr.msrb.gmra.mxu0 %vm1791_vm2, %v5239_v34  ;;  %v4015_v57 = vrot.slane %v3996_v55, 4 }
 0x7f5   : > { %v6603_v52 = vpop.eup %6602  ;;  %v3847_v59 = vrot.slane %v3828_v1, 4  ;;  %v4027_v2 = vrot.slane %v4000_v5, 4 }
 0x7f6   : > { %v5225_v22 = vmul.f32 %v6603_v52, %v9378_v39  ;;  %v5180_v4 = vpop.xlane.xlu0 %5179  ;;  %v6493_v39 = vunpack.i.h.bf16 %v6491_v35 }
 0x7f7   : > { %6604 = vrcp.f32 %v5180_v4 }
 0x7f8   : > { %v5241_v54 = vpack.c.bf16 %v5225_v22, %v5225_v22  ;;  %v4001_v24 = vrot.slane %v6493_v39, 4 }
 0x7fa   : > { %6288 = vmatmul.msk.bf16.vlgmr.msra.gmra.mxu2 %vm1791_vm2, %v5241_v54 }
 0x7fd   : > { %v6605_v50 = vpop.eup %6604 }
 0x7fe   : > { %v5228_v51 = vmul.f32 %v6605_v50, %v9384_v42 }
 0x800   : > { %v5244_v15 = vpack.c.bf16 %v5228_v51, %v5228_v51  ;;  %v6481_v21 = vpop.permute.xlu1 %6480 }
 0x801   : > { %v6483_v13 = vunpack.i.h.bf16 %v6481_v21  ;;  %v6482_v48 = vunpack.i.l.bf16 %v6481_v21 }
 0x802   : > { %6291 = vmatmul.msk.bf16.vlgmr.msrb.gmra.mxu1 %vm1791_vm2, %v5244_v15 }
 0x803   : > { %v4003_v12 = vrot.slane %v6483_v13, 4  ;;  %v3834_v42 = vsel %vm423_vm1, %v3833_v3, %v6482_v48  ;;  %v3835_v38 = vrot.slane %v6482_v48, 4  ;;  %v4002_v19 = vsel %vm423_vm1, %v4001_v24, %v6483_v13 }
 0x804   : > { %v3840_v45 = vperm.slane %v3834_v42, %v6784_v28  ;;  %v4008_v7 = vperm.slane %v4002_v19, %v6784_v28 }
 0x805   : > { %v3836_v6 = vsel %vm423_vm1, %v6492_v17, %v3835_v38  ;;  %v4004_v14 = vsel %vm423_vm1, %v6493_v39, %v4003_v12 }
 0x806   : > { %v3844_v36 = vperm.slane %v3836_v6, %v6784_v28  ;;  %v3845_v37 = vrot.slane %v3840_v45, 4  ;;  %v3848_v18 = vsel %vm423_vm1, %v3840_v45, %v3847_v59  ;;  %v4012_v40 = vperm.slane %v4004_v14, %v6784_v28 }
 0x807   : > { %v3856_v34 = vperm.slane %v3848_v18, %v6796_v47  ;;  %v4013_v52 = vrot.slane %v4008_v7, 4  ;;  %v4016_v41 = vsel %vm423_vm1, %v4008_v7, %v4015_v57  ;;  %v5177_v57 = vpop.xlane.xlu2 %5176 }
 0x808   : > { %v3846_v56 = vsel %vm423_vm1, %v3845_v37, %v3828_v1  ;;  %v3857_v33 = vrot.slane %v3844_v36, 4  ;;  %v3860_v22 = vsel %vm423_vm1, %v3844_v36, %v3859_v61  ;;  %v4024_v4 = vperm.slane %v4016_v41, %v6796_v47 }
 0x809   : > { %v3852_v9 = vperm.slane %v3846_v56, %v6796_v47  ;;  %v3868_v54 = vperm.slane %v3860_v22, %v6796_v47  ;;  %v3871_v30 = vrot.slane %v3856_v34, 4  ;;  %v4014_v63 = vsel %vm423_vm1, %v4013_v52, %v3996_v55 }
 0x80a   : > { %v3858_v62 = vsel %vm423_vm1, %v3857_v33, %v3832_v49  ;;  %v4020_v35 = vperm.slane %v4014_v63, %v6796_v47  ;;  %v4025_v32 = vrot.slane %v4012_v40, 4  ;;  %v4028_v20 = vsel %vm423_vm1, %v4012_v40, %v4027_v2 }
 0x80b   : > { %v3864_v50 = vperm.slane %v3858_v62, %v6796_v47  ;;  %v3869_v27 = vrot.slane %v3852_v9, 4  ;;  %v3872_v60 = vsel %vm423_vm1, 0.0, %v3871_v30  ;;  %v3875_v39 = vrot.slane %v3868_v54, 4 }
 0x80c   : > { %v4026_v17 = vsel %vm423_vm1, %v4025_v32, %v4000_v5  ;;  %v4036_v51 = vperm.slane %v4028_v20, %v6796_v47  ;;  %v4037_v43 = vrot.slane %v4020_v35, 4  ;;  %v4039_v1 = vrot.slane %v4024_v4, 4 }
 0x80d   : > { %v3870_v55 = vsel %vm423_vm1, 0.0, %v3869_v27  ;;  %v3873_v49 = vrot.slane %v3864_v50, 4  ;;  %v3876_v15 = vsel %vm423_vm1, 0.0, %v3875_v39  ;;  %v4032_v21 = vperm.slane %v4026_v17, %v6796_v47 }
 0x80e   : > { %v4038_v24 = vsel %vm423_vm1, 0.0, %v4037_v43  ;;  %v4040_v3 = vsel %vm423_vm1, 0.0, %v4039_v1  ;;  %v4043_v13 = vrot.slane %v4036_v51, 4  ;;  %v4489_v48 = vsel %vm423_vm1, %v3871_v30, %v3852_v9 }
 0x80f   : > { %v4041_v12 = vrot.slane %v4032_v21, 4  ;;  %v4493_v5 = vperm.slane %v4489_v48, %v6784_v28  ;;  %v4494_v42 = vrot.slane %v3872_v60, 4  ;;  %v4505_v38 = vrot.slane %v3876_v15, 4 }
 0x810   : > { %v4044_v19 = vsel %vm423_vm1, 0.0, %v4043_v13  ;;  %v4655_v59 = vsel %vm423_vm1, %v4039_v1, %v4020_v35  ;;  %v4660_v45 = vrot.slane %v4040_v3, 4  ;;  %v3874_v7 = vsel %vm423_vm1, 0.0, %v3873_v49 }
 0x811   : > { %v4659_v61 = vperm.slane %v4655_v59, %v6784_v28  ;;  %v4671_v6 = vrot.slane %v4044_v19, 4  ;;  %v4495_v14 = vsel %vm423_vm1, %v4494_v42, %v3870_v55  ;;  %v4500_v36 = vsel %vm423_vm1, %v3875_v39, %v3864_v50 }
 0x812   : > { %v4499_v37 = vperm.slane %v4495_v14, %v6784_v28  ;;  %v4504_v18 = vperm.slane %v4500_v36, %v6784_v28  ;;  %v4506_v40 = vsel %vm423_vm1, %v4505_v38, %v3874_v7  ;;  %v4513_v2 = vrot.slane %v4493_v5, 4 }
 0x813   : > { %v4510_v34 = vperm.slane %v4506_v40, %v6784_v28  ;;  %6606 = vrcp.f32 %v5177_v57  ;;  %v4042_v52 = vsel %vm423_vm1, 0.0, %v4041_v12  ;;  %v4661_v41 = vsel %vm423_vm1, %v4660_v45, %v4038_v24 }
 0x814   : > { %v4514_v56 = vsel %vm423_vm1, %v4499_v37, %v4513_v2  ;;  %v4525_v33 = vrot.slane %v4504_v18, 4  ;;  %v4665_v22 = vperm.slane %v4661_v41, %v6784_v28  ;;  %v4666_v4 = vsel %vm423_vm1, %v4043_v13, %v4032_v21 }
 0x815   : > { %v4522_v9 = vperm.slane %v4514_v56, %v6796_v47  ;;  %v4670_v54 = vperm.slane %v4666_v4, %v6784_v28  ;;  %v4672_v30 = vsel %vm423_vm1, %v4671_v6, %v4042_v52  ;;  %v4679_v35 = vrot.slane %v4659_v61, 4 }
 0x816   : > { %v4526_v63 = vsel %vm423_vm1, %v4510_v34, %v4525_v33  ;;  %v4676_v62 = vperm.slane %v4672_v30, %v6784_v28  ;;  %v4511_v32 = vrot.slane %v4499_v37, 4  ;;  %v4523_v60 = vrot.slane %v4510_v34, 4  ;;  %v5189_v12 = vpop.xlane.xlu0 %5188 }
 0x817   : > { %v4534_v20 = vperm.slane %v4526_v63, %v6796_v47  ;;  %v4541_v50 = vrot.slane %v4522_v9, 4  ;;  %v4691_v27 = vrot.slane %v4670_v54, 4  ;;  %v4680_v39 = vsel %vm423_vm1, %v4665_v22, %v4679_v35 }
 0x818   : > { %v4512_v17 = vsel %vm423_vm1, %v4511_v32, %v4493_v5  ;;  %v4677_v51 = vrot.slane %v4665_v22, 4  ;;  %v4689_v43 = vrot.slane %v4676_v62, 4  ;;  %v4688_v49 = vperm.slane %v4680_v39, %v6796_v47 }
 0x819   : > { %v6607_v1 = vpop.eup %6606  ;;  %v4542_v55 = vsel %vm423_vm1, %v4534_v20, %v4541_v50  ;;  %v4692_v15 = vsel %vm423_vm1, %v4676_v62, %v4691_v27  ;;  %v4518_v21 = vperm.slane %v4512_v17, %v6796_v47  ;;  %v4524_v48 = vsel %vm423_vm1, %v4523_v60, %v4504_v18 }
 0x81a   : > { %v5264_v24 = vpack.c.bf16 %v4542_v55, %v4542_v55  ;;  %v5227_v3 = vmul.f32 %v6607_v1, %v9388_v44  ;;  %v4700_v13 = vperm.slane %v4692_v15, %v6796_v47  ;;  %v4707_v5 = vrot.slane %v4688_v49, 4 }
 0x81b   : > { %v4530_v42 = vperm.slane %v4524_v48, %v6796_v47  ;;  %v4537_v38 = vrot.slane %v4518_v21, 4  ;;  %v4539_v19 = vrot.slane %v4534_v20, 4  ;;  %6608 = vrcp.f32 %v5189_v12 }
 0x81c   : > { %v5482_v59 = vsel %vm2323_vm3, %v5264_v24, 0  ;;  %v5243_v45 = vpack.c.bf16 %v5227_v3, %v5227_v3  ;;  %v4708_v7 = vsel %vm423_vm1, %v4700_v13, %v4707_v5  ;;  %v4678_v40 = vsel %vm423_vm1, %v4677_v51, %v4659_v61  ;;  %v5186_v51 = vpop.xlane.xlu2 %5185 }
 0x81d   : > { %5491 = vmatpush.bf16.msra.mxu1 %v5482_v59  ;;  %v4538_v57 = vsel %vm423_vm1, %v4530_v42, %v4537_v38  ;;  %v4540_v44 = vsel %vm423_vm1, %v4539_v19, %v4522_v9  ;;  %v4535_v6 = vrot.slane %v4530_v42, 4  ;;  %v5268_v14 = vpack.c.bf16 %v4708_v7, %v4708_v7 }
 0x81e   : > { %v5262_v36 = vpack.c.bf16 %v4538_v57, %v4538_v57  ;;  %6290 = vmatmul.msk.bf16.vlgmr.msra.gmra.mxu0 %vm1791_vm2, %v5243_v45  ;;  %v5263_v37 = vpack.c.bf16 %v4540_v44, %v4540_v44  ;;  %v4690_v2 = vsel %vm423_vm1, %v4689_v43, %v4670_v54  ;;  %v4705_v22 = vrot.slane %v4700_v13, 4 }
 0x81f   : > { %v4536_v18 = vsel %vm423_vm1, %v4535_v6, %v4518_v21  ;;  %v5558_v34 = vsel %vm2323_vm3, %v5268_v14, 0  ;;  %v4696_v56 = vperm.slane %v4690_v2, %v6796_v47  ;;  %v4684_v9 = vperm.slane %v4678_v40, %v6796_v47 }
 0x820   : > { %v5444_v52 = vsel %vm2323_vm3, %v5262_v36, 0  ;;  %v5261_v41 = vpack.c.bf16 %v4536_v18, %v4536_v18  ;;  %v5463_v33 = vsel %vm2323_vm3, %v5263_v37, 0  ;;  %v4706_v54 = vsel %vm423_vm1, %v4705_v22, %v4688_v49  ;;  %v5198_v19 = vpop.xlane.xlu0 %5197 }
 0x821   : > { %5567 = vmatpush.bf16.msrb.mxu1 %v5558_v34  ;;  %5453 = vmatpush.bf16.msrb.mxu3 %v5444_v52  ;;  %v4701_v61 = vrot.slane %v4696_v56, 4  ;;  %v6609_v30 = vpop.eup %6608  ;;  %v5267_v62 = vpack.c.bf16 %v4706_v54, %v4706_v54  ;;  %v4703_v39 = vrot.slane %v4684_v9, 4 }
 0x822   : > { %5472 = vmatpush.bf16.msrb.mxu0 %v5463_v33  ;;  %v5425_v4 = vsel %vm2323_vm3, %v5261_v41, 0  ;;  %v5231_v50 = vmul.f32 %v6609_v30, %v9402_v10 }
 0x823   : > { %5434 = vmatpush.bf16.msrb.mxu2 %v5425_v4  ;;  %v4702_v63 = vsel %vm423_vm1, %v4701_v61, %v4684_v9  ;;  %v5539_v32 = vsel %vm2323_vm3, %v5267_v62, 0  ;;  %v4704_v17 = vsel %vm423_vm1, %v4696_v56, %v4703_v39 }
 0x824   : > { %v5265_v35 = vpack.c.bf16 %v4702_v63, %v4702_v63  ;;  %v5247_v60 = vpack.c.bf16 %v5231_v50, %v5231_v50  ;;  %v5266_v49 = vpack.c.bf16 %v4704_v17, %v4704_v17  ;;  %v5195_v24 = vpop.xlane.xlu2 %5194 }
 0x826   : > { %v5501_v20 = vsel %vm2323_vm3, %v5265_v35, 0  ;;  %5548 = vmatpush.bf16.msra.mxu0 %v5539_v32  ;;  %v5520_v10 = vsel %vm2323_vm3, %v5266_v49, 0 }
 0x827   : > { %5510 = vmatpush.bf16.msra.mxu2 %v5501_v20 }
 0x82b   : > { %v5174_v27 = vpop.xlane.xlu1 %5173 }
 0x82c   : > { %6610 = vrcp.f32 %v5174_v27  ;;  %v5204_v45 = vpop.xlane.xlu2 %5203 }
 0x82e   : > { %6294 = vmatmul.msk.bf16.vlgmr.msrb.gmra.mxu0 %vm1791_vm2, %v5247_v60 }
 0x832   : > { %v6611_v43 = vpop.eup %6610 }
 0x833   : > { %v5226_v1 = vmul.f32 %v6611_v43, %v9422_v31  ;;  %v5183_v55 = vpop.xlane.xlu1 %5182 }
 0x834   : > { %6612 = vrcp.f32 %v5183_v55 }
 0x835   : > { %v5242_v15 = vpack.c.bf16 %v5226_v1, %v5226_v1  ;;  %6614 = vrcp.f32 %v5186_v51 }
 0x837   : > { %6289 = vmatmul.msk.bf16.vlgmr.msra.gmra.mxu3 %vm1791_vm2, %v5242_v15 }
 0x838   : > { %5529 = vmatpush.bf16.msra.mxu3 %v5520_v10 }
 0x83a   : > { %v6613_v21 = vpop.eup %6612 }
 0x83b   : > { %v5229_v3 = vmul.f32 %v6613_v21, %v9427_v46  ;;  %v5192_v13 = vpop.xlane.xlu1 %5191  ;;  %v6615_v12 = vpop.eup %6614 }
 0x83c   : > { %6616 = vrcp.f32 %v5192_v13  ;;  %v5230_v31 = vmul.f32 %v6615_v12, %v9396_v0 }
 0x83d   : > { %v5245_v48 = vpack.c.bf16 %v5229_v3, %v5229_v3  ;;  %6618 = vrcp.f32 %v5195_v24 }
 0x83e   : > { %v5246_v59 = vpack.c.bf16 %v5230_v31, %v5230_v31 }
 0x83f   : > { %6292 = vmatmul.msk.bf16.vlgmr.msrb.gmra.mxu2 %vm1791_vm2, %v5245_v48 }
 0x842   : > { %v6617_v5 = vpop.eup %6616 }
 0x843   : > { %v5232_v42 = vmul.f32 %v6617_v5, %v9432_v58  ;;  %v5201_v38 = vpop.xlane.xlu1 %5200  ;;  %v6619_v57 = vpop.eup %6618 }
 0x844   : > { %6620 = vrcp.f32 %v5201_v38  ;;  %v5233_v46 = vmul.f32 %v6619_v57, %v9409_v53 }
 0x845   : > { %v5248_v7 = vpack.c.bf16 %v5232_v42, %v5232_v42  ;;  %6622 = vrcp.f32 %v5198_v19 }
 0x846   : > { %6624 = vrcp.f32 %v5204_v45  ;;  %v5249_v58 = vpack.c.bf16 %v5233_v46, %v5233_v46 }
 0x847   : > { %6293 = vmatmul.msk.bf16.vlgmr.msrb.gmra.mxu3 %vm1791_vm2, %v5246_v59  ;;  %6295 = vmatmul.msk.bf16.vlgmr.msra.gmra.mxu1 %vm1791_vm2, %v5248_v7 }
 0x84a   : > { %v6621_v44 = vpop.eup %6620 }
 0x84b   : > { %v5235_v0 = vmul.f32 %v6621_v44, %v9439_v26  ;;  %v6623_v6 = vpop.eup %6622 }
 0x84c   : > { %v6625_v36 = vpop.eup %6624  ;;  %v5234_v40 = vmul.f32 %v6623_v6, %v9411_v8 }
 0x84d   : > { %v5251_v14 = vpack.c.bf16 %v5235_v0, %v5235_v0  ;;  %v5284_v37 = vpop.f32.mrf.mxu2  ;;  %v5236_v2 = vmul.f32 %v6625_v36, %v9418_v16 }
 0x84e   : > { %v5303_v18 = vpop.f32.mrf.mxu3  ;;  %v5250_v34 = vpack.c.bf16 %v5234_v40, %v5234_v40  ;;  %v5575_v33 = vrot.slane %v5284_v37, 4 }
 0x84f   : > { %6296 = vmatmul.msk.bf16.vlgmr.msra.gmra.mxu2 %vm1791_vm2, %v5249_v58  ;;  %6298 = vmatmul.msk.bf16.vlgmr.msra.gmra.mxu0 %vm1791_vm2, %v5251_v14  ;;  %v5252_v52 = vpack.c.bf16 %v5236_v2, %v5236_v2  ;;  %v5587_v41 = vrot.slane %v5303_v18, 4 }
 0x855   : > { %v5286_v53 = vpop.f32.mrf.mxu2 }
 0x856   : > { %v5305_v26 = vpop.f32.mrf.mxu3 }
 0x857   : > { %6297 = vmatmul.msk.bf16.vlgmr.msra.gmra.mxu3 %vm1791_vm2, %v5250_v34  ;;  %6299 = vmatmul.msk.bf16.vlgmr.msrb.gmra.mxu1 %vm1791_vm2, %v5252_v52 }
 0x86f   : > { %v5341_v56 = vpop.f32.mrf.mxu1 }
 0x870   : > { %v5585_v22 = vrot.slane %v5341_v56, 4  ;;  %v5588_v4 = vsel %vm423_vm1, %v5341_v56, %v5587_v41 }
 0x871   : > { %v5322_v9 = vpop.f32.mrf.mxu0  ;;  %v5596_v61 = vperm.slane %v5588_v4, %v6784_v28 }
 0x872   : > { %v5573_v8 = vrot.slane %v5322_v9, 4  ;;  %v5576_v16 = vsel %vm423_vm1, %v5322_v9, %v5575_v33  ;;  %v5586_v54 = vsel %vm423_vm1, %v5585_v22, %v5303_v18 }
 0x873   : > { %v5584_v30 = vperm.slane %v5576_v16, %v6784_v28  ;;  %v5592_v63 = vperm.slane %v5586_v54, %v6784_v28  ;;  %v5609_v62 = vrot.slane %v5596_v61, 4 }
 0x874   : > { %v5574_v35 = vsel %vm423_vm1, %v5573_v8, %v5284_v37 }
 0x875   : > { %v5580_v32 = vperm.slane %v5574_v35, %v6784_v28  ;;  %v5611_v20 = vrot.slane %v5584_v30, 4  ;;  %v5597_v50 = vrot.slane %v5592_v63, 4  ;;  %v5610_v27 = vsel %vm423_vm1, %v5609_v62, %v5584_v30 }
 0x876   : > { %v5616_v60 = vperm.slane %v5610_v27, %v6796_v47 }
 0x877   : > { %v5599_v39 = vrot.slane %v5580_v32, 4  ;;  %v5598_v17 = vsel %vm423_vm1, %v5597_v50, %v5580_v32  ;;  %v5612_v51 = vsel %vm423_vm1, %v5596_v61, %v5611_v20  ;;  %v5343_v43 = vpop.f32.mrf.mxu1 }
 0x878   : > { %v5604_v1 = vperm.slane %v5598_v17, %v6796_v47  ;;  %v5620_v55 = vperm.slane %v5612_v51, %v6796_v47  ;;  %v5625_v49 = vrot.slane %v5616_v60, 4 }
 0x879   : > { %v5600_v15 = vsel %vm423_vm1, %v5592_v63, %v5599_v39  ;;  %v5324_v10 = vpop.f32.mrf.mxu0 }
 0x87a   : > { %v5608_v21 = vperm.slane %v5600_v15, %v6796_v47  ;;  %v5621_v24 = vrot.slane %v5604_v1, 4  ;;  %v5627_v3 = vrot.slane %v5620_v55, 4  ;;  %v5626_v48 = vsel %vm423_vm1, 0.0, %v5625_v49 }
 0x87c   : > { %v5623_v13 = vrot.slane %v5608_v21, 4  ;;  %v5628_v12 = vsel %vm423_vm1, 0.0, %v5627_v3  ;;  %v5808_v31 = vsel %vm423_vm1, %v5627_v3, %v5616_v60  ;;  %v5622_v59 = vsel %vm423_vm1, 0.0, %v5621_v24 }
 0x87d   : > { %v5812_v5 = vperm.slane %v5808_v31, %v6784_v28  ;;  %v5813_v42 = vrot.slane %v5628_v12, 4  ;;  %v5360_v38 = vpop.f32.mrf.mxu2 }
 0x87e   : > { %v5624_v19 = vsel %vm423_vm1, 0.0, %v5623_v13  ;;  %v5797_v45 = vsel %vm423_vm1, %v5623_v13, %v5604_v1  ;;  %v5631_v27 = vrot.slane %v5360_v38, 4 }
 0x87f   : > { %v5802_v7 = vrot.slane %v5624_v19, 4  ;;  %v5417_v57 = vpop.f32.mrf.mxu1  ;;  %v5801_v46 = vperm.slane %v5797_v45, %v6784_v28  ;;  %v5814_v44 = vsel %vm423_vm1, %v5813_v42, %v5626_v48  ;;  %v5833_v0 = vrot.slane %v5812_v5, 4 }
 0x880   : > { %v5818_v6 = vperm.slane %v5814_v44, %v6784_v28  ;;  %v5641_v51 = vrot.slane %v5417_v57, 4 }
 0x881   : > { %v5803_v58 = vsel %vm423_vm1, %v5802_v7, %v5622_v59  ;;  %v5821_v14 = vrot.slane %v5801_v46, 4 }
 0x882   : > { %v5807_v36 = vperm.slane %v5803_v58, %v6784_v28  ;;  %v5834_v37 = vsel %vm423_vm1, %v5818_v6, %v5833_v0  ;;  %v5831_v18 = vrot.slane %v5818_v6, 4 }
 0x883   : > { %v5842_v40 = vperm.slane %v5834_v37, %v6796_v47 }
 0x884   : > { %v5822_v2 = vsel %vm423_vm1, %v5807_v36, %v5821_v14  ;;  %v5819_v34 = vrot.slane %v5807_v36, 4  ;;  %v5832_v52 = vsel %vm423_vm1, %v5831_v18, %v5812_v5 }
 0x885   : > { %v5830_v53 = vperm.slane %v5822_v2, %v6796_v47  ;;  %v5847_v26 = vrot.slane %v5842_v40, 4  ;;  %v5362_v41 = vpop.f32.mrf.mxu2  ;;  %v5838_v56 = vperm.slane %v5832_v52, %v6796_v47 }
 0x886   : > { %v5820_v33 = vsel %vm423_vm1, %v5819_v34, %v5801_v46 }
 0x887   : > { %v5848_v22 = vsel %vm423_vm1, %v5847_v26, %v5830_v53  ;;  %v5419_v4 = vpop.f32.mrf.mxu1  ;;  %v5826_v9 = vperm.slane %v5820_v33, %v6796_v47  ;;  %v5843_v61 = vrot.slane %v5838_v56, 4  ;;  %v5849_v54 = vrot.slane %v5830_v53, 4 }
 0x888   : > { %6033 = vrot.lane.b32.xlu2 %v5848_v22, %s6647_s17 }
 0x889   : > { %v5845_v8 = vrot.slane %v5826_v9, 4  ;;  %v9603_v30 = vsel %vm423_vm1, %v5842_v40, %v5849_v54  ;;  %v9606_v63 = vsel %vm423_vm1, %v5843_v61, %v5826_v9 }
 0x88b   : > { %v5846_v16 = vsel %vm423_vm1, %v5838_v56, %v5845_v8 }
 0x88c   : > { %6017 = vrot.lane.b32.xlu0 %v5846_v16, %s6648_s19 }
 0x89b   : > { %v5398_v62 = vpop.f32.mrf.mxu0 }
 0x89c   : > { %v5629_v20 = vrot.slane %v5398_v62, 4  ;;  %v5632_v39 = vsel %vm423_vm1, %v5398_v62, %v5631_v27 }
 0x89d   : > { %v5640_v43 = vperm.slane %v5632_v39, %v6784_v28 }
 0x89e   : > { %v5630_v60 = vsel %vm423_vm1, %v5629_v20, %v5360_v38 }
 0x89f   : > { %v5636_v17 = vperm.slane %v5630_v60, %v6784_v28  ;;  %v5667_v24 = vrot.slane %v5640_v43, 4 }
 0x8a1   : > { %v5655_v15 = vrot.slane %v5636_v17, 4 }
 0x8a3   : > { %v5400_v35 = vpop.f32.mrf.mxu0 }
 0x8ab   : > { %v5474_v32 = vpop.f32.mrf.mxu0 }
 0x8ac   : > { %v5685_v45 = vrot.slane %v5474_v32, 4 }
 0x8b3   : > { %v5476_v50 = vpop.f32.mrf.mxu0 }
 0x8ba   : > { %v5379_v1 = vpop.f32.mrf.mxu3 }
 0x8bb   : > { %v5642_v55 = vsel %vm423_vm1, %v5641_v51, %v5379_v1  ;;  %v5643_v49 = vrot.slane %v5379_v1, 4 }
 0x8bc   : > { %v5648_v10 = vperm.slane %v5642_v55, %v6784_v28 }
 0x8bd   : > { %v5644_v21 = vsel %vm423_vm1, %v5417_v57, %v5643_v49 }
 0x8be   : > { %v5652_v3 = vperm.slane %v5644_v21, %v6784_v28  ;;  %v5653_v13 = vrot.slane %v5648_v10, 4  ;;  %v5656_v48 = vsel %vm423_vm1, %v5648_v10, %v5655_v15 }
 0x8bf   : > { %v5664_v12 = vperm.slane %v5656_v48, %v6796_v47 }
 0x8c0   : > { %v5654_v31 = vsel %vm423_vm1, %v5653_v13, %v5636_v17  ;;  %v5665_v5 = vrot.slane %v5652_v3, 4  ;;  %v5668_v42 = vsel %vm423_vm1, %v5652_v3, %v5667_v24 }
 0x8c1   : > { %v5660_v38 = vperm.slane %v5654_v31, %v6796_v47  ;;  %v5676_v19 = vperm.slane %v5668_v42, %v6796_v47  ;;  %v5679_v59 = vrot.slane %v5664_v12, 4 }
 0x8c2   : > { %v5666_v7 = vsel %vm423_vm1, %v5665_v5, %v5640_v43  ;;  %v5381_v57 = vpop.f32.mrf.mxu3  ;;  %v5436_v46 = vpop.f32.mrf.mxu2 }
 0x8c3   : > { %v5672_v44 = vperm.slane %v5666_v7, %v6796_v47  ;;  %v5677_v0 = vrot.slane %v5660_v38, 4  ;;  %v5680_v6 = vsel %vm423_vm1, 0.0, %v5679_v59  ;;  %v5683_v58 = vrot.slane %v5676_v19, 4 }
 0x8c4   : > { %v5851_v14 = vsel %vm423_vm1, %v5679_v59, %v5660_v38  ;;  %v5856_v36 = vrot.slane %v5680_v6, 4  ;;  %v5686_v37 = vsel %vm423_vm1, %v5685_v45, %v5436_v46  ;;  %v5687_v18 = vrot.slane %v5436_v46, 4  ;;  %v5493_v40 = vpop.f32.mrf.mxu1 }
 0x8c5   : > { %v5678_v2 = vsel %vm423_vm1, 0.0, %v5677_v0  ;;  %v5681_v34 = vrot.slane %v5672_v44, 4  ;;  %v5684_v52 = vsel %vm423_vm1, 0.0, %v5683_v58  ;;  %v5855_v41 = vperm.slane %v5851_v14, %v6784_v28 }
 0x8c6   : > { %v5867_v53 = vrot.slane %v5684_v52, 4  ;;  %v5688_v26 = vsel %vm423_vm1, %v5474_v32, %v5687_v18  ;;  %v5692_v56 = vperm.slane %v5686_v37, %v6784_v28  ;;  %v5857_v4 = vsel %vm423_vm1, %v5856_v36, %v5678_v2 }
 0x8c7   : > { %v5696_v33 = vperm.slane %v5688_v26, %v6784_v28  ;;  %v5682_v22 = vsel %vm423_vm1, 0.0, %v5681_v34  ;;  %v5861_v9 = vperm.slane %v5857_v4, %v6784_v28  ;;  %v5862_v61 = vsel %vm423_vm1, %v5683_v58, %v5672_v44 }
 0x8c8   : > { %v5868_v8 = vsel %vm423_vm1, %v5867_v53, %v5682_v22  ;;  %v5875_v16 = vrot.slane %v5855_v41, 4  ;;  %v5697_v54 = vrot.slane %v5493_v40, 4  ;;  %v5866_v62 = vperm.slane %v5862_v61, %v6784_v28 }
 0x8c9   : > { %v5872_v35 = vperm.slane %v5868_v8, %v6784_v28  ;;  %v5873_v27 = vrot.slane %v5861_v9, 4  ;;  %v5711_v60 = vrot.slane %v5692_v56, 4  ;;  %v5723_v43 = vrot.slane %v5696_v33, 4 }
 0x8ca   : > { %v5438_v32 = vpop.f32.mrf.mxu2  ;;  %v5455_v20 = vpop.f32.mrf.mxu3  ;;  %v5876_v50 = vsel %vm423_vm1, %v5861_v9, %v5875_v16  ;;  %v5887_v51 = vrot.slane %v5866_v62, 4 }
 0x8cb   : > { %v5698_v39 = vsel %vm423_vm1, %v5697_v54, %v5455_v20  ;;  %v5699_v17 = vrot.slane %v5455_v20, 4  ;;  %v5874_v15 = vsel %vm423_vm1, %v5873_v27, %v5855_v41  ;;  %v5885_v10 = vrot.slane %v5872_v35, 4 }
 0x8cc   : > { %v5704_v1 = vperm.slane %v5698_v39, %v6784_v28  ;;  %v5495_v55 = vpop.f32.mrf.mxu1  ;;  %v5550_v49 = vpop.f32.mrf.mxu0  ;;  %v5884_v24 = vperm.slane %v5876_v50, %v6796_v47  ;;  %v5888_v3 = vsel %vm423_vm1, %v5872_v35, %v5887_v51  ;;  %v5880_v13 = vperm.slane %v5874_v15, %v6796_v47 }
 0x8cd   : > { %v5700_v21 = vsel %vm423_vm1, %v5493_v40, %v5699_v17  ;;  %v5896_v5 = vperm.slane %v5888_v3, %v6796_v47  ;;  %v5886_v38 = vsel %vm423_vm1, %v5885_v10, %v5866_v62  ;;  %v5741_v14 = vrot.slane %v5550_v49, 4 }
 0x8ce   : > { %v5708_v48 = vperm.slane %v5700_v21, %v6784_v28  ;;  %v5709_v12 = vrot.slane %v5704_v1, 4  ;;  %v5712_v31 = vsel %vm423_vm1, %v5704_v1, %v5711_v60  ;;  %v5899_v19 = vrot.slane %v5880_v13, 4 }
 0x8cf   : > { %v5720_v42 = vperm.slane %v5712_v31, %v6796_v47  ;;  %v5901_v57 = vrot.slane %v5896_v5, 4  ;;  %v5892_v6 = vperm.slane %v5886_v38, %v6796_v47  ;;  %v5903_v40 = vrot.slane %v5884_v24, 4 }
 0x8d0   : > { %v5710_v59 = vsel %vm423_vm1, %v5709_v12, %v5692_v56  ;;  %v5721_v45 = vrot.slane %v5708_v48, 4  ;;  %v5724_v7 = vsel %vm423_vm1, %v5708_v48, %v5723_v43 }
 0x8d1   : > { %v5716_v46 = vperm.slane %v5710_v59, %v6796_v47  ;;  %v5732_v44 = vperm.slane %v5724_v7, %v6796_v47  ;;  %v5735_v0 = vrot.slane %v5720_v42, 4  ;;  %v5902_v36 = vsel %vm423_vm1, %v5901_v57, %v5884_v24 }
 0x8d2   : > { %v5722_v58 = vsel %vm423_vm1, %v5721_v45, %v5696_v33  ;;  %v5457_v37 = vpop.f32.mrf.mxu3  ;;  %v5512_v18 = vpop.f32.mrf.mxu2  ;;  %6035 = vrot.lane.b32.xlu0 %v5902_v36, %s6647_s17  ;;  %v5897_v56 = vrot.slane %v5892_v6, 4  ;;  %v5900_v33 = vsel %vm423_vm1, %v5892_v6, %v5899_v19  ;;  %v5904_v10 = vsel %vm423_vm1, %v5896_v5, %v5903_v40 }
 0x8d3   : > { %v5728_v2 = vperm.slane %v5722_v58, %v6796_v47  ;;  %v5733_v34 = vrot.slane %v5716_v46, 4  ;;  %v5736_v52 = vsel %vm423_vm1, 0.0, %v5735_v0  ;;  %v5739_v53 = vrot.slane %v5732_v44, 4  ;;  %6019 = vrot.lane.b32.xlu1 %v5900_v33, %s6648_s19 }
 0x8d4   : > { %v5905_v26 = vsel %vm423_vm1, %v5735_v0, %v5716_v46  ;;  %v5910_v41 = vrot.slane %v5736_v52, 4  ;;  %v5552_v22 = vpop.f32.mrf.mxu0  ;;  %v5569_v4 = vpop.f32.mrf.mxu1  ;;  %v5742_v35 = vsel %vm423_vm1, %v5741_v14, %v5512_v18  ;;  %v5743_v32 = vrot.slane %v5512_v18, 4 }
 0x8d5   : > { %v5734_v9 = vsel %vm423_vm1, 0.0, %v5733_v34  ;;  %v5737_v61 = vrot.slane %v5728_v2, 4  ;;  %v5740_v8 = vsel %vm423_vm1, 0.0, %v5739_v53  ;;  %v5909_v16 = vperm.slane %v5905_v26, %v6784_v28 }
 0x8d6   : > { %v5916_v54 = vsel %vm423_vm1, %v5739_v53, %v5728_v2  ;;  %v5921_v62 = vrot.slane %v5740_v8, 4  ;;  %v5748_v20 = vperm.slane %v5742_v35, %v6784_v28  ;;  %v5911_v27 = vsel %vm423_vm1, %v5910_v41, %v5734_v9 }
 0x8d7   : > { %v5738_v50 = vsel %vm423_vm1, 0.0, %v5737_v61  ;;  %v5744_v60 = vsel %vm423_vm1, %v5550_v49, %v5743_v32  ;;  %v5915_v39 = vperm.slane %v5911_v27, %v6784_v28  ;;  %v5920_v17 = vperm.slane %v5916_v54, %v6784_v28 }
 0x8d8   : > { %v5922_v51 = vsel %vm423_vm1, %v5921_v62, %v5738_v50  ;;  %v5752_v43 = vperm.slane %v5744_v60, %v6784_v28  ;;  %v5753_v1 = vrot.slane %v5569_v4, 4  ;;  %v5929_v15 = vrot.slane %v5909_v16, 4 }
 0x8d9   : > { %v5926_v55 = vperm.slane %v5922_v51, %v6784_v28  ;;  %v5941_v3 = vrot.slane %v5920_v17, 4  ;;  %v5927_v48 = vrot.slane %v5915_v39, 4  ;;  %v9682_v49 = vsel %vm423_vm1, %v5897_v56, %v5880_v13 }
 0x8da   : > { %v5514_v21 = vpop.f32.mrf.mxu2  ;;  %v5531_v24 = vpop.f32.mrf.mxu3  ;;  %v5767_v12 = vrot.slane %v5748_v20, 4  ;;  %6051 = vrot.lane.b32.xlu0 %v5904_v10, %s6649_s20  ;;  %v5930_v38 = vsel %vm423_vm1, %v5915_v39, %v5929_v15  ;;  %v5779_v19 = vrot.slane %v5752_v43, 4 }
 0x8db   : > { %v5754_v31 = vsel %vm423_vm1, %v5753_v1, %v5531_v24  ;;  %v5755_v42 = vrot.slane %v5531_v24, 4  ;;  %v5942_v5 = vsel %vm423_vm1, %v5926_v55, %v5941_v3  ;;  %v5928_v7 = vsel %vm423_vm1, %v5927_v48, %v5909_v16  ;;  %6049 = vrot.lane.b32.xlu1 %v9603_v30, %s6649_s20 }
 0x8dc   : > { %v5760_v59 = vperm.slane %v5754_v31, %v6784_v28  ;;  %v5571_v45 = vpop.f32.mrf.mxu1  ;;  %v9694_v57 = vperm.slane %v5942_v5, %v6796_v47  ;;  %v5934_v46 = vperm.slane %v5928_v7, %v6796_v47  ;;  %v5939_v44 = vrot.slane %v5926_v55, 4 }
 0x8dd   : > { %v5756_v13 = vsel %vm423_vm1, %v5569_v4, %v5755_v42  ;;  %v9700_v14 = vperm.slane %v5930_v38, %v6796_v47 }
 0x8de   : > { %v5764_v0 = vperm.slane %v5756_v13, %v6784_v28  ;;  %v5765_v6 = vrot.slane %v5760_v59, 4  ;;  %v5768_v58 = vsel %vm423_vm1, %v5760_v59, %v5767_v12  ;;  %v5955_v30 = vrot.slane %v9694_v57, 4 }
 0x8df   : > { %v5776_v36 = vperm.slane %v5768_v58, %v6796_v47  ;;  %v5940_v37 = vsel %vm423_vm1, %v5939_v44, %v5920_v17  ;;  %v5953_v18 = vrot.slane %v5934_v46, 4  ;;  %v5957_v58 = vrot.slane %v9700_v14, 4 }
 0x8e0   : > { %v5766_v40 = vsel %vm423_vm1, %v5765_v6, %v5748_v20  ;;  %v5777_v2 = vrot.slane %v5764_v0, 4  ;;  %v5780_v34 = vsel %vm423_vm1, %v5764_v0, %v5779_v19  ;;  %v5946_v52 = vperm.slane %v5940_v37, %v6796_v47  ;;  %v6318_v37 = vld [vmem:[%s9793_s3 + $0x10] sm:$0xff] }
 0x8e1   : > { %v5772_v53 = vperm.slane %v5766_v40, %v6796_v47  ;;  %v5788_v26 = vperm.slane %v5780_v34, %v6796_v47  ;;  %v5791_v41 = vrot.slane %v5776_v36, 4  ;;  %v5956_v56 = vsel %vm423_vm1, %v5955_v30, %v9700_v14 }
 0x8e2   : > { %v5778_v33 = vsel %vm423_vm1, %v5777_v2, %v5752_v43  ;;  %v5951_v22 = vrot.slane %v5946_v52, 4  ;;  %v5954_v4 = vsel %vm423_vm1, %v5946_v52, %v5953_v18  ;;  %v5533_v9 = vpop.f32.mrf.mxu3  ;;  %6037 = vrot.lane.b32.xlu0 %v5956_v56, %s6647_s17  ;;  %v5958_v30 = vsel %vm423_vm1, %v9694_v57, %v5957_v58 }
 0x8e3   : > { %v5784_v61 = vperm.slane %v5778_v33, %v6796_v47  ;;  %v5789_v8 = vrot.slane %v5772_v53, 4  ;;  %v5792_v16 = vsel %vm423_vm1, 0.0, %v5791_v41  ;;  %v5795_v54 = vrot.slane %v5788_v26, 4  ;;  %6021 = vrot.lane.b32.xlu2 %v5954_v4, %s6648_s19 }
 0x8e4   : > { %v5959_v62 = vsel %vm423_vm1, %v5791_v41, %v5772_v53  ;;  %v5964_v35 = vrot.slane %v5792_v16, 4  ;;  %v5952_v51 = vsel %vm423_vm1, %v5951_v22, %v5934_v46  ;;  %v6034_v53 = vpop.permute.xlu2 %6033 }
 0x8e5   : > { %v5790_v32 = vsel %vm423_vm1, 0.0, %v5789_v8  ;;  %v5793_v20 = vrot.slane %v5784_v61, 4  ;;  %v5796_v50 = vsel %vm423_vm1, 0.0, %v5795_v54  ;;  %v5963_v27 = vperm.slane %v5959_v62, %v6784_v28 }
 0x8e6   : > { %v5965_v60 = vsel %vm423_vm1, %v5964_v35, %v5790_v32  ;;  %v5975_v39 = vrot.slane %v5796_v50, 4  ;;  %v5970_v17 = vsel %vm423_vm1, %v5795_v54, %v5784_v61 }
 0x8e7   : > { %v5794_v43 = vsel %vm423_vm1, 0.0, %v5793_v20  ;;  %v5969_v1 = vperm.slane %v5965_v60, %v6784_v28  ;;  %v5974_v55 = vperm.slane %v5970_v17, %v6784_v28  ;;  %v5983_v15 = vrot.slane %v5963_v27, 4 }
 0x8e8   : > { %v5976_v10 = vsel %vm423_vm1, %v5975_v39, %v5794_v43  ;;  %v6497_v39 = vld [vmem:[%s9794_s4 + $0x1] ss:$0 sm:$0xff] }
 0x8e9   : > { %v5980_v21 = vperm.slane %v5976_v10, %v6784_v28  ;;  %v5984_v24 = vsel %vm423_vm1, %v5969_v1, %v5983_v15  ;;  %v5995_v3 = vrot.slane %v5974_v55, 4  ;;  %v5981_v48 = vrot.slane %v5969_v1, 4 }
 0x8ea   : > { %v5992_v12 = vperm.slane %v5984_v24, %v6796_v47 }
 0x8eb   : > { %v5996_v31 = vsel %vm423_vm1, %v5980_v21, %v5995_v3  ;;  %v5982_v42 = vsel %vm423_vm1, %v5981_v48, %v5963_v27  ;;  %v5993_v38 = vrot.slane %v5980_v21, 4 }
 0x8ec   : > { %v6004_v19 = vperm.slane %v5996_v31, %v6796_v47  ;;  %v6011_v59 = vrot.slane %v5992_v12, 4  ;;  %v5988_v45 = vperm.slane %v5982_v42, %v6796_v47 }
 0x8ed   : > { %v5994_v5 = vsel %vm423_vm1, %v5993_v38, %v5974_v55 }
 0x8ee   : > { %v6012_v28 = vsel %vm423_vm1, %v6004_v19, %v6011_v59  ;;  %v6009_v7 = vrot.slane %v6004_v19, 4  ;;  %v6000_v13 = vperm.slane %v5994_v5, %v6796_v47  ;;  %v6007_v46 = vrot.slane %v5988_v45, 4  ;;  %v6319_v47 = vld [vmem:[%s9793_s3 + $0x18] sm:$0xff] }
 0x8ef   : > { %6055 = vrot.lane.b32.xlu0 %v6012_v28, %s6649_s20  ;;  %6106 = vmatpush.bf16.msrb.mxu2 %v6319_v47 }
 0x8f0   : > { %v6010_v44 = vsel %vm423_vm1, %v6009_v7, %v5992_v12  ;;  %v6008_v0 = vsel %vm423_vm1, %v6000_v13, %v6007_v46  ;;  %v6005_v6 = vrot.slane %v6000_v13, 4 }
 0x8f1   : > { %6039 = vrot.lane.b32.xlu2 %v6010_v44, %s6647_s17  ;;  %6023 = vrot.lane.b32.xlu1 %v6008_v0, %s6648_s19 }
 0x8f2   : > { %v6006_v36 = vsel %vm423_vm1, %v6005_v6, %v5988_v45 }
 0x8f3   : > { %6107 = vmatpush.bf16.msrb.mxu2 %v6318_v37 }
 0x8f9   : > { %6053 = vrot.lane.b32.xlu1 %v5958_v30, %s6649_s20 }
 0x8fe   : > { %v6018_v18 = vpop.permute.xlu0 %6017 }
 0x8ff   : > { %v6061_v57 = vsel %vm1791_vm2, %v9606_v63, %v6018_v18 }
 0x900   : > { %v6065_v56 = vsel %vm3117_vm5, %v6061_v57, %v6034_v53 }
 0x944   : > { %v6036_v40 = vpop.permute.xlu0 %6035 }
 0x945   : > { %v6020_v14 = vpop.permute.xlu1 %6019 }
 0x946   : > { %v6062_v2 = vsel %vm1791_vm2, %v9682_v49, %v6020_v14  ;;  %v6022_v49 = vpop.permute.xlu2 %6021 }
 0x947   : > { %v6066_v52 = vsel %vm3117_vm5, %v6062_v2, %v6036_v40  ;;  %v6063_v62 = vsel %vm1791_vm2, %v5952_v51, %v6022_v49 }
 0x94c   : > { %v6052_v34 = vpop.permute.xlu0 %6051 }
 0x94d   : > { %v6070_v26 = vsel %vm3122_vm4, %v6066_v52, %v6052_v34  ;;  %v6050_v33 = vpop.permute.xlu1 %6049 }
 0x94e   : > { %v6074_v41 = vadd.f32 %v6070_v26, %v8224_v29  ;;  %v6069_v22 = vsel %vm3122_vm4, %v6065_v56, %v6050_v33  ;;  %v6040_v16 = vpop.permute.xlu2 %6039 }
 0x94f   : > { %v6073_v4 = vadd.f32 %v6069_v22, %v8222_v25 }
 0x951   : > { %v6077_v9 = vpack.c.bf16 %v6074_v41, %v6073_v4 }
 0x953   : > { %6308 = vmatmul.msk.bf16.vlgmr.msrb.gmra.mxu2 %vm260_vm0, %v6077_v9 }
 0x954   : > { %v6038_v63 = vpop.permute.xlu0 %6037 }
 0x955   : > { %v6067_v32 = vsel %vm3117_vm5, %v6063_v62, %v6038_v63 }
 0x961   : > { %v6056_v29 = vpop.permute.xlu0 %6055 }
 0x963   : > { %v6024_v61 = vpop.permute.xlu1 %6023 }
 0x964   : > { %v6064_v8 = vsel %vm1791_vm2, %v6006_v36, %v6024_v61 }
 0x965   : > { %v6068_v54 = vsel %vm3117_vm5, %v6064_v8, %v6040_v16 }
 0x966   : > { %v6072_v35 = vsel %vm3122_vm4, %v6068_v54, %v6056_v29 }
 0x967   : > { %v6076_v27 = vadd.f32 %v6072_v35, %v8237_v11 }
 0x96b   : > { %v6054_v25 = vpop.permute.xlu1 %6053 }
 0x96c   : > { %v6071_v20 = vsel %vm3122_vm4, %v6067_v32, %v6054_v25 }
 0x96d   : > { %v6075_v50 = vadd.f32 %v6071_v20, %v8235_v23 }
 0x96f   : > { %v6078_v60 = vpack.c.bf16 %v6076_v27, %v6075_v50 }
 0x971   : > { %6309 = vmatmul.msk.bf16.gmra.mxu2 %vm260_vm0, %v6078_v60 }
 0x9d6   : > { %v6109_v17 = vpop.f32.mrf.mxu2 }
 0x9d7   : > { %v6110_v51 = vadd.f32 %v6497_v39, %v6109_v17 }
 0x9d9   : > { %v6119_v43 = vmax.f32 %v6110_v51, 0.0 }
 0x9db   : > { %v6123_v1 = vadd.f32 %v6119_v43, %v6073_v4 }
 0x9dd   : > { %6127 = vst.msk [vmem:[%s226_s14] sm:$0xff] %vm260_vm0, %v6123_v1 }
 0x9de   : > { %v6111_v23 = vpop.f32.mrf.mxu2 }
 0x9df   : > { %v6112_v11 = vadd.f32 %v6497_v39, %v6111_v23 }
 0x9e1   : > { %v6120_v55 = vmax.f32 %v6112_v11, 0.0 }
 0x9e3   : > { %v6124_v15 = vadd.f32 %v6120_v55, %v6074_v41 }
 0x9e5   : > { %6128 = vst.msk [vmem:[%s226_s14 + $0x8] sm:$0xff] %vm260_vm0, %v6124_v15 }
 0x9f4   : > { %v6114_v10 = vpop.f32.mrf.mxu2 }
 0x9f5   : > { %v6115_v21 = vadd.f32 %v6497_v39, %v6114_v10 }
 0x9f7   : > { %v6121_v24 = vmax.f32 %v6115_v21, 0.0 }
 0x9f9   : > { %v6125_v3 = vadd.f32 %v6121_v24, %v6075_v50 }
 0x9fb   : > { %6129 = vst.msk [vmem:[%s226_s14 + $0x10] sm:$0xff] %vm260_vm0, %v6125_v3 }
 0x9fc   : > { %v6116_v48 = vpop.f32.mrf.mxu2 }
 0x9fd   : > { %v6117_v12 = vadd.f32 %v6497_v39, %v6116_v48 }
 0x9ff   : > { %v6122_v31 = vmax.f32 %v6117_v12, 0.0 }
 0xa01   : > { %v6126_v42 = vadd.f32 %v6122_v31, %v6076_v27 }
 0xa03   : > { %6130 = vst.msk [vmem:[%s226_s14 + $0x18] sm:$0xff] %vm260_vm0, %v6126_v42 }
 0xa04 PF: > { %s15_s18 = sadd.s32 1, %s6632_s18  }
 0xa05   : > { %p12_p4 = scmp.ge.s32.totalorder %s15_s18, 6  }
 0xa07   :  { %14 = sbr.rel (!%p12_p4) target bundleno = 1 (0x1), region = 74 }

// kernel: tpu_custom_call.1
= control target key start
LH: loop header
LB: loop body
LE: loop exit
PB: predicated region body
PF: predicated region fallthrough
CT: control target
= control target key end

     0   :  { %s2813_s18 = smov 0   ;;  %s3420_s0 = inlined_call_operand.vmem [shape: f32[128,32], index: 0, kind: input, shape index: {}]   ;;  %s3421_s1 = inlined_call_operand.vmem [shape: bf16[2,32,96], index: 1, kind: input, shape index: {}]   ;;  %s3422_s2 = inlined_call_operand.vmem [shape: f32[2,1,96], index: 2, kind: input, shape index: {}]   ;;  %s3423_s3 = inlined_call_operand.vmem [shape: bf16[2,32,32], index: 3, kind: input, shape index: {}]   ;;  %s3424_s4 = inlined_call_operand.vmem [shape: f32[2,1,32], index: 4, kind: input, shape index: {}]   ;;  %s3425_s5 = inlined_call_operand.vmem [shape: f32[128,32], index: 5, kind: output, shape index: {}]  }
   0x1 LB: > { %s2474_s19 = sadd.s32 4294967295, %s2767_s18   ;;  %p2478_p0 = scmp.ge.s32.totalorder %s2767_s18, 1  ;;  %s2767_s18 = sphi %s2813_s18, %s15_s18  }
   0x2   : > { %p188_p1 = scmp.lt.s32.totalorder %s2767_s18, 5 }
   0x4   : > { %p189_p2 = pnand %p2478_p0, %p188_p1 }
   0x5   : > { %s2479_s22 = sshll.u32 (!%p189_p2), %s2474_s19, 2  ;;  %s2769_s6 = smov (!%p189_p2), 64  }
   0x6   : > { %192 = sbr.rel (%p189_p2) target bundleno = 4699 (0x125b), region = 40  ;;  %p217_p3 = scmp.lt.s32.totalorder (!%p189_p2), %s2479_s22, 15 }
   0x7   : > { %s2770_s7 = smov (!%p189_p2), 96   ;;  %s2771_s8 = smov (!%p189_p2), 88  }
   0x8   : > { %s2772_s9 = smov (!%p189_p2), 120   ;;  %s2773_s10 = smov (!%p189_p2), 56  }
   0x9   : > { %s2774_s11 = smov (!%p189_p2), 80   ;;  %s2775_s12 = smov (!%p189_p2), 112  }
   0xa   : > { %s2776_s13 = smov (!%p189_p2), 48   ;;  %s2777_s14 = smov (!%p189_p2), 104  }
   0xb   : > { %v2600_v0 = vld [vmem:[%s3421_s1 + $0x8] sm:$0xff]  ;;  %v2599_v1 = vld [vmem:[%s3421_s1] sm:$0xff]  ;;  %s3427_s22 = smov (!%p217_p3, %s2479_s22), 15  ;;  %vm260_vm0 = vcmask 261120   ;;  %vm444_vm1 = vcmask 1043456   ;;  %vm295_vm2 = vcmask 64512  }
   0xc   : > { %273 = vmatpush.bf16.msra.mxu0 %v2600_v0  ;;  %s2480_s25 = sshll.u32 %s3427_s22, 3  ;;  %v2629_v8 = vld [vmem:[%s3422_s2] ss:$0 sm:$0xff]  ;;  %s2778_s15 = smov 72   ;;  %vm1265_vm3 = vcmask 195584   ;;  %vm1260_vm4 = vcmask 130048  }
   0xd   : > { %s220_s28 = scalar_lea.vmem %s3420_s0, %s2480_s25  ;;  %s2779_s16 = smov 40  }
   0xe   : > { %v229_v2 = vld [vmem:[%s220_s28] sm:$0xff]  ;;  %v230_v3 = vld [vmem:[%s220_s28 + $0x8] sm:$0xff]  ;;  %v231_v5 = vld [vmem:[%s220_s28 + $0x10] sm:$0xff]  ;;  %s2780_s17 = smov 8   ;;  %s2781_s19 = smov 16  }
   0xf   : > { %v243_v4 = vpack.c.bf16 %v230_v3, %v229_v2  ;;  %v232_v6 = vld [vmem:[%s220_s28 + $0x18] sm:$0xff]  ;;  %s2782_s20 = smov 24  }
  0x10   : > { %274 = vmatpush.bf16.msra.mxu0 %v2599_v1  ;;  %v244_v7 = vpack.c.bf16 %v232_v6, %v231_v5 }
  0x13   : > { %2491 = vmatmul.msk.bf16.vlgmr.msra.gmra.mxu0 %vm260_vm0, %v243_v4 }
  0x23   : > { %2492 = vmatmul.msk.bf16.gmra.mxu0 %vm260_vm0, %v244_v7 }
  0x90   : > { %v276_v9 = vpop.f32.mrf.mxu0 }
  0x91   : > { %v2840_v10 = vadd.f32 %v2629_v8, %v276_v9 }
  0x93   : > { %v286_v11 = vpack.c.bf16 %v2840_v10, %v2840_v10 }
  0x95   : > { %v291_v12 = vunpack.c.l.b16 %v286_v11 }
  0x97   : > { %v2844_v13 = vpack.c.b16 %v291_v12, %v291_v12 }
  0x98   : > { %v278_v14 = vpop.f32.mrf.mxu0 }
  0x99   : > { %v2846_v15 = vadd.f32 %v2629_v8, %v278_v14  ;;  %439 = vrot.lane.b32.xlu2 %v2844_v13, %s2769_s6 }
  0x9b   : > { %v287_v16 = vpack.c.bf16 %v2846_v15, %v2846_v15 }
  0x9d   : > { %v316_v17 = vunpack.c.l.b16 %v287_v16 }
  0x9f   : > { %v2852_v18 = vpack.c.b16 %v316_v17, %v316_v17 }
  0xa0   : > { %v281_v19 = vpop.f32.mrf.mxu0 }
  0xa1   : > { %v2854_v20 = vadd.f32 %v2629_v8, %v281_v19  ;;  %318 = vrot.lane.b32.xlu0 %v2852_v18, %s2770_s7 }
  0xa3   : > { %v288_v21 = vpack.c.bf16 %v2854_v20, %v2854_v20 }
  0xa5   : > { %v340_v22 = vunpack.c.l.b16 %v288_v21 }
  0xa7   : > { %v2860_v23 = vpack.c.b16 %v340_v22, %v340_v22 }
  0xa8   : > { %v283_v24 = vpop.f32.mrf.mxu0 }
  0xa9   : > { %v2862_v25 = vadd.f32 %v2629_v8, %v283_v24  ;;  %342 = vrot.lane.b32.xlu1 %v2860_v23, %s2770_s7  ;;  %293 = vrot.lane.b32.xlu0 %v2844_v13, %s2770_s7 }
  0xab   : > { %v289_v26 = vpack.c.bf16 %v2862_v25, %v2862_v25 }
  0xad   : > { %v364_v27 = vunpack.c.l.b16 %v289_v26 }
  0xaf   : > { %v2870_v28 = vpack.c.b16 %v364_v27, %v364_v27 }
  0xb1   : > { %366 = vrot.lane.b32.xlu1 %v2870_v28, %s2770_s7  ;;  %549 = vrot.lane.b32.xlu0 %v2852_v18, %s2771_s8 }
  0xb9   : > { %526 = vrot.lane.b32.xlu1 %v2844_v13, %s2771_s8 }
  0xf3   : > { %v440_v29 = vpop.permute.xlu2 %439 }
  0xf4   : > { %v446_v30 = vsel %vm444_vm1, %v440_v29, 0 }
  0xf5   : > { %455 = vmatpush.bf16.msra.mxu2 %v446_v30 }
 0x113   : > { %v319_v31 = vpop.permute.xlu0 %318 }
 0x114   : > { %v324_v32 = vsel %vm295_vm2, %v319_v31, 0 }
 0x115   : > { %333 = vmatpush.bf16.xpose.msra.mxu3 %v324_v32 }
 0x11b   : > { %v343_v33 = vpop.permute.xlu1 %342  ;;  %v294_v34 = vpop.permute.xlu0 %293 }
 0x11c   : > { %2494 = vmatmul.msk.bf16.vlgmr.msra.gmra.mxu3 %vm295_vm2, %v287_v16  ;;  %v300_v35 = vsel %vm295_vm2, %v294_v34, 0  ;;  %v348_v36 = vsel %vm295_vm2, %v343_v33, 0 }
 0x11d   : > { %309 = vmatpush.bf16.xpose.msra.mxu1 %v300_v35  ;;  %357 = vmatpush.bf16.xpose.msrb.mxu3 %v348_v36 }
 0x123   : > { %v367_v37 = vpop.permute.xlu1 %366  ;;  %v550_v1 = vpop.permute.xlu0 %549 }
 0x124   : > { %2493 = vmatmul.msk.bf16.vlgmr.msra.gmra.mxu1 %vm295_vm2, %v286_v11  ;;  %v372_v38 = vsel %vm295_vm2, %v367_v37, 0  ;;  %v555_v4 = vsel %vm295_vm2, %v550_v1, 0 }
 0x125   : > { %381 = vmatpush.bf16.xpose.msrb.mxu1 %v372_v38 }
 0x12b   : > { %v527_v39 = vpop.permute.xlu1 %526 }
 0x12c   : > { %2495 = vmatmul.msk.bf16.vlgmr.msrb.gmra.mxu3 %vm295_vm2, %v288_v21  ;;  %v532_v40 = vsel %vm295_vm2, %v527_v39, 0 }
 0x12d   : > { %541 = vmatpush.bf16.xpose.msrb.mxu2 %v532_v40 }
 0x134   : > { %2496 = vmatmul.msk.bf16.vlgmr.msrb.gmra.mxu1 %vm295_vm2, %v289_v26 }
 0x19f   : > { %v335_v41 = vpop.f32.mrf.mxu3 }
 0x1a0   : > { %v388_v46 = vmul.f32 0.17677669, %v335_v41 }
 0x1a1   : > { %v311_v42 = vpop.f32.mrf.mxu1 }
 0x1a2   : > { %v387_v43 = vmul.f32 0.17677669, %v311_v42  ;;  %v394_v48 = vsel %vm295_vm2, %v388_v46, -inf }
 0x1a4   : > { %v391_v44 = vsel %vm295_vm2, %v387_v43, -inf }
 0x1a5   : > { %392 = vmax.xlane.f32.xlu2 %v391_v44 }
 0x1a7   : > { %v337_v45 = vpop.f32.mrf.mxu3 }
 0x1a9   : > { %v313_v47 = vpop.f32.mrf.mxu1 }
 0x1ad   : > { %395 = vmax.xlane.f32.xlu2 %v394_v48 }
 0x1af   : > { %v359_v49 = vpop.f32.mrf.mxu3 }
 0x1b0   : > { %v389_v55 = vmul.f32 0.17677669, %v359_v49 }
 0x1b1   : > { %v383_v50 = vpop.f32.mrf.mxu1 }
 0x1b2   : > { %v390_v51 = vmul.f32 0.17677669, %v383_v50  ;;  %v397_v56 = vsel %vm295_vm2, %v389_v55, -inf }
 0x1b4   : > { %v400_v52 = vsel %vm295_vm2, %v390_v51, -inf }
 0x1b5   : > { %401 = vmax.xlane.f32.xlu0 %v400_v52 }
 0x1b7   : > { %v361_v53 = vpop.f32.mrf.mxu3 }
 0x1b9   : > { %v385_v54 = vpop.f32.mrf.mxu1 }
 0x1c5   : > { %461 = vrot.lane.b32.xlu2 %v2852_v18, %s2769_s6 }
 0x1ee   : > { %398 = vmax.xlane.f32.xlu2 %v397_v56 }
 0x206   : > { %503 = vrot.lane.b32.xlu2 %v2870_v28, %s2769_s6 }
 0x218   : > { %v393_v57 = vpop.xlane.xlu2 %392 }
 0x219   : > { %v403_v58 = vsub.f32 %v387_v43, %v393_v57 }
 0x21b   : > { %v407_v59 = vmul.f32 1.442695, %v403_v58 }
 0x21d   : > { %2633 = vpow2.f32 %v407_v59 }
 0x220   : > { %v396_v60 = vpop.xlane.xlu2 %395 }
 0x221   : > { %v404_v61 = vsub.f32 %v388_v46, %v396_v60 }
 0x223   : > { %v2634_v62 = vpop.eup %2633  ;;  %v409_v63 = vmul.f32 1.442695, %v404_v61 }
 0x224   : > { %v415_v0 = vsel %vm295_vm2, %v2634_v62, 0.0 }
 0x225   : > { %2635 = vpow2.f32 %v409_v63  ;;  %416 = vadd.xlane.f32.xlu0 %v415_v0 }
 0x228   : > { %v462_v2 = vpop.permute.xlu2 %461  ;;  %v402_v7 = vpop.xlane.xlu0 %401 }
 0x229   : > { %v467_v3 = vsel %vm444_vm1, %v462_v2, 0  ;;  %v406_v8 = vsub.f32 %v390_v51, %v402_v7 }
 0x22a   : > { %476 = vmatpush.bf16.msra.mxu3 %v467_v3 }
 0x22b   : > { %v2636_v5 = vpop.eup %2635  ;;  %v413_v9 = vmul.f32 1.442695, %v406_v8 }
 0x22c   : > { %v418_v6 = vsel %vm295_vm2, %v2636_v5, 0.0 }
 0x22d   : > { %419 = vadd.xlane.f32.xlu1 %v418_v6  ;;  %2637 = vpow2.f32 %v413_v9 }
 0x22e   : > { %564 = vmatpush.bf16.xpose.msrb.mxu3 %v555_v4 }
 0x233   : > { %v2638_v19 = vpop.eup %2637 }
 0x234   : > { %v424_v24 = vsel %vm295_vm2, %v2638_v19, 0.0 }
 0x239   : > { %547 = vrot.lane.b32.xlu0 %v2852_v18, %s2772_s9 }
 0x241   : > { %482 = vrot.lane.b32.xlu0 %v2860_v23, %s2769_s6 }
 0x246   : > { %524 = vrot.lane.b32.xlu1 %v2844_v13, %s2772_s9 }
 0x249   : > { %572 = vrot.lane.b32.xlu0 %v2860_v23, %s2771_s8 }
 0x251   : > { %595 = vrot.lane.b32.xlu0 %v2870_v28, %s2771_s8 }
 0x259   : > { %570 = vrot.lane.b32.xlu0 %v2860_v23, %s2772_s9 }
 0x261   : > { %v399_v11 = vpop.xlane.xlu2 %398 }
 0x262   : > { %v405_v12 = vsub.f32 %v389_v55, %v399_v11 }
 0x264   : > { %v411_v14 = vmul.f32 1.442695, %v405_v12 }
 0x266   : > { %2639 = vpow2.f32 %v411_v14 }
 0x269   : > { %v504_v16 = vpop.permute.xlu2 %503 }
 0x26a   : > { %v509_v17 = vsel %vm444_vm1, %v504_v16, 0 }
 0x26b   : > { %518 = vmatpush.bf16.msra.mxu1 %v509_v17 }
 0x26c   : > { %v2640_v21 = vpop.eup %2639 }
 0x26d   : > { %v421_v22 = vsel %vm295_vm2, %v2640_v21, 0.0 }
 0x26e   : > { %422 = vadd.xlane.f32.xlu2 %v421_v22 }
 0x270   : > { %425 = vadd.xlane.f32.xlu1 %v424_v24 }
 0x286   : > { %593 = vrot.lane.b32.xlu2 %v2870_v28, %s2772_s9 }
 0x289   : > { %668 = vrot.lane.b32.xlu1 %v2844_v13, %s2773_s10 }
 0x298   : > { %v417_v26 = vpop.xlane.xlu0 %416 }
 0x299   : > { %2641 = vrcp.f32 %v417_v26 }
 0x29f   : > { %v2642_v27 = vpop.eup %2641 }
 0x2a0   : > { %v420_v29 = vpop.xlane.xlu1 %419  ;;  %v431_v30 = vmul.f32 %v2642_v27, %v2634_v62 }
 0x2a1   : > { %2643 = vrcp.f32 %v420_v29 }
 0x2a2   : > { %v435_v31 = vpack.c.bf16 %v431_v30, %v431_v30 }
 0x2a4   : > { %2497 = vmatmul.msk.bf16.vlgmr.msra.gmra.mxu2 %vm295_vm2, %v435_v31 }
 0x2a7   : > { %v2644_v32 = vpop.eup %2643 }
 0x2a8   : > { %v432_v33 = vmul.f32 %v2644_v32, %v2636_v5 }
 0x2aa   : > { %v436_v34 = vpack.c.bf16 %v432_v33, %v432_v33 }
 0x2ab   : > { %v548_v35 = vpop.permute.xlu0 %547 }
 0x2ac   : > { %2498 = vmatmul.msk.bf16.vlgmr.msra.gmra.mxu3 %vm295_vm2, %v436_v34 }
 0x2b3   : > { %v483_v36 = vpop.permute.xlu0 %482 }
 0x2b4   : > { %v488_v37 = vsel %vm444_vm1, %v483_v36, 0 }
 0x2b5   : > { %497 = vmatpush.bf16.msrb.mxu0 %v488_v37 }
 0x2b8   : > { %v525_v38 = vpop.permute.xlu1 %524 }
 0x2b9   : > { %2501 = vmatmul.msk.bf16.vlgmr.msrb.gmra.mxu2 %vm295_vm2, %v525_v38 }
 0x2bb   : > { %v573_v39 = vpop.permute.xlu0 %572 }
 0x2bc   : > { %v578_v40 = vsel %vm295_vm2, %v573_v39, 0  ;;  %2502 = vmatmul.msk.bf16.vlgmr.msrb.gmra.mxu3 %vm295_vm2, %v548_v35 }
 0x2bd   : > { %587 = vmatpush.bf16.xpose.msra.mxu0 %v578_v40 }
 0x2c3   : > { %v596_v41 = vpop.permute.xlu0 %595 }
 0x2c4   : > { %v601_v42 = vsel %vm295_vm2, %v596_v41, 0 }
 0x2c5   : > { %610 = vmatpush.bf16.xpose.msrb.mxu1 %v601_v42 }
 0x2cb   : > { %v571_v52 = vpop.permute.xlu0 %570 }
 0x2e1   : > { %v423_v43 = vpop.xlane.xlu2 %422 }
 0x2e2   : > { %2645 = vrcp.f32 %v423_v43 }
 0x2e3   : > { %v426_v44 = vpop.xlane.xlu1 %425 }
 0x2e4   : > { %2647 = vrcp.f32 %v426_v44 }
 0x2e8   : > { %v2646_v45 = vpop.eup %2645 }
 0x2e9   : > { %v433_v46 = vmul.f32 %v2646_v45, %v2640_v21  ;;  %v594_v54 = vpop.permute.xlu2 %593 }
 0x2ea   : > { %v2648_v47 = vpop.eup %2647 }
 0x2eb   : > { %v434_v48 = vmul.f32 %v2648_v47, %v2638_v19  ;;  %v437_v49 = vpack.c.bf16 %v433_v46, %v433_v46 }
 0x2ed   : > { %v438_v50 = vpack.c.bf16 %v434_v48, %v434_v48  ;;  %2499 = vmatmul.msk.bf16.vlgmr.msrb.gmra.mxu0 %vm295_vm2, %v437_v49 }
 0x2ef   : > { %2500 = vmatmul.msk.bf16.vlgmr.msra.gmra.mxu1 %vm295_vm2, %v438_v50 }
 0x2fb   : > { %v669_v51 = vpop.permute.xlu1 %668 }
 0x2fc   : > { %v674_v53 = vsel %vm444_vm1, %v669_v51, 0 }
 0x2fd   : > { %2503 = vmatmul.msk.bf16.vlgmr.msra.gmra.mxu0 %vm295_vm2, %v571_v52  ;;  %683 = vmatpush.bf16.msra.mxu2 %v674_v53 }
 0x2ff   : > { %2504 = vmatmul.msk.bf16.vlgmr.msrb.gmra.mxu1 %vm295_vm2, %v594_v54 }
 0x327   : > { %v2931_v55 = vpop.f32.mrf.mxu2 }
 0x32f   : > { %v459_v56 = vpop.f32.mrf.mxu2  ;;  %v2933_v57 = vpop.f32.mrf.mxu3 }
 0x337   : > { %v480_v58 = vpop.f32.mrf.mxu3 }
 0x33c   : > { %v543_v59 = vpop.f32.mrf.mxu2 }
 0x33d   : > { %v616_v60 = vmul.f32 0.17677669, %v543_v59 }
 0x33f   : > { %v566_v61 = vpop.f32.mrf.mxu3  ;;  %v620_v62 = vsel %vm295_vm2, %v616_v60, -inf }
 0x340   : > { %v617_v63 = vmul.f32 0.17677669, %v566_v61  ;;  %621 = vmax.xlane.f32.xlu0 %v620_v62 }
 0x342   : > { %v623_v0 = vsel %vm295_vm2, %v617_v63, -inf }
 0x343   : > { %624 = vmax.xlane.f32.xlu2 %v623_v0 }
 0x344   : > { %v545_v1 = vpop.f32.mrf.mxu2 }
 0x347   : > { %v568_v2 = vpop.f32.mrf.mxu3 }
 0x354   : > { %689 = vrot.lane.b32.xlu0 %v2852_v18, %s2773_s10 }
 0x35b   : > { %754 = vrot.lane.b32.xlu2 %v2844_v13, %s2774_s11 }
 0x35c   : > { %777 = vrot.lane.b32.xlu0 %v2852_v18, %s2774_s11 }
 0x363   : > { %775 = vrot.lane.b32.xlu2 %v2852_v18, %s2775_s12 }
 0x36a   : > { %v2945_v3 = vpop.f32.mrf.mxu0 }
 0x36b   : > { %710 = vrot.lane.b32.xlu2 %v2860_v23, %s2773_s10 }
 0x36c   : > { %v2949_v4 = vpop.f32.mrf.mxu1 }
 0x372   : > { %v501_v5 = vpop.f32.mrf.mxu0 }
 0x373   : > { %731 = vrot.lane.b32.xlu2 %v2870_v28, %s2773_s10 }
 0x374   : > { %v522_v6 = vpop.f32.mrf.mxu1 }
 0x37a   : > { %v589_v7 = vpop.f32.mrf.mxu0 }
 0x37b   : > { %800 = vrot.lane.b32.xlu2 %v2860_v23, %s2774_s11  ;;  %v618_v14 = vmul.f32 0.17677669, %v589_v7 }
 0x37c   : > { %v612_v8 = vpop.f32.mrf.mxu1 }
 0x37d   : > { %v619_v9 = vmul.f32 0.17677669, %v612_v8  ;;  %v626_v17 = vsel %vm295_vm2, %v618_v14, -inf }
 0x37f   : > { %v629_v11 = vsel %vm295_vm2, %v619_v9, -inf }
 0x380   : > { %630 = vmax.xlane.f32.xlu1 %v629_v11 }
 0x382   : > { %v591_v12 = vpop.f32.mrf.mxu0 }
 0x383   : > { %823 = vrot.lane.b32.xlu2 %v2870_v28, %s2774_s11 }
 0x384   : > { %v614_v16 = vpop.f32.mrf.mxu1 }
 0x388   : > { %627 = vmax.xlane.f32.xlu1 %v626_v17 }
 0x38b   : > { %798 = vrot.lane.b32.xlu2 %v2860_v23, %s2775_s12 }
 0x3b3   : > { %v622_v19 = vpop.xlane.xlu0 %621 }
 0x3b4   : > { %v632_v21 = vsub.f32 %v616_v60, %v622_v19 }
 0x3b6   : > { %v636_v22 = vmul.f32 1.442695, %v632_v21  ;;  %v625_v24 = vpop.xlane.xlu2 %624 }
 0x3b7   : > { %v633_v26 = vsub.f32 %v617_v63, %v625_v24 }
 0x3b8   : > { %2649 = vpow2.f32 %v636_v22 }
 0x3b9   : > { %v638_v27 = vmul.f32 1.442695, %v633_v26 }
 0x3bb   : > { %2651 = vpow2.f32 %v638_v27 }
 0x3be   : > { %v2650_v29 = vpop.eup %2649  ;;  %v755_v30 = vpop.permute.xlu2 %754 }
 0x3bf   : > { %v760_v31 = vsel %vm295_vm2, %v755_v30, 0  ;;  %v644_v32 = vsel %vm295_vm2, %v2650_v29, 0.0 }
 0x3c0   : > { %769 = vmatpush.bf16.xpose.msrb.mxu2 %v760_v31  ;;  %645 = vadd.xlane.f32.xlu1 %v644_v32 }
 0x3c1   : > { %v2652_v33 = vpop.eup %2651 }
 0x3c2   : > { %v647_v37 = vsel %vm295_vm2, %v2652_v33, 0.0 }
 0x3c6   : > { %v776_v34 = vpop.permute.xlu2 %775  ;;  %v690_v35 = vpop.permute.xlu0 %689 }
 0x3c7   : > { %v695_v36 = vsel %vm444_vm1, %v690_v35, 0 }
 0x3c8   : > { %648 = vadd.xlane.f32.xlu1 %v647_v37  ;;  %704 = vmatpush.bf16.msra.mxu3 %v695_v36 }
 0x3ce   : > { %v711_v38 = vpop.permute.xlu2 %710  ;;  %v778_v39 = vpop.permute.xlu0 %777 }
 0x3cf   : > { %v716_v40 = vsel %vm444_vm1, %v711_v38, 0  ;;  %v783_v41 = vsel %vm295_vm2, %v778_v39, 0 }
 0x3d0   : > { %725 = vmatpush.bf16.msrb.mxu0 %v716_v40  ;;  %792 = vmatpush.bf16.xpose.msrb.mxu3 %v783_v41 }
 0x3d6   : > { %v732_v42 = vpop.permute.xlu2 %731 }
 0x3d7   : > { %v737_v43 = vsel %vm444_vm1, %v732_v42, 0 }
 0x3d8   : > { %746 = vmatpush.bf16.msra.mxu1 %v737_v43 }
 0x3de   : > { %v801_v44 = vpop.permute.xlu2 %800 }
 0x3df   : > { %v806_v45 = vsel %vm295_vm2, %v801_v44, 0 }
 0x3e0   : > { %815 = vmatpush.bf16.xpose.msra.mxu0 %v806_v45 }
 0x3e1   : > { %752 = vrot.lane.b32.xlu1 %v2844_v13, %s2775_s12 }
 0x3e6   : > { %v824_v46 = vpop.permute.xlu2 %823 }
 0x3e7   : > { %v829_v47 = vsel %vm295_vm2, %v824_v46, 0 }
 0x3e8   : > { %838 = vmatpush.bf16.xpose.msrb.mxu1 %v829_v47 }
 0x3ee   : > { %v799_v19 = vpop.permute.xlu2 %798 }
 0x3f3   : > { %v631_v48 = vpop.xlane.xlu1 %630 }
 0x3f4   : > { %v635_v49 = vsub.f32 %v619_v9, %v631_v48 }
 0x3f6   : > { %v642_v52 = vmul.f32 1.442695, %v635_v49 }
 0x3fb   : > { %v628_v50 = vpop.xlane.xlu1 %627 }
 0x3fc   : > { %v634_v51 = vsub.f32 %v618_v14, %v628_v50 }
 0x3fe   : > { %v640_v53 = vmul.f32 1.442695, %v634_v51 }
 0x400   : > { %2653 = vpow2.f32 %v640_v53 }
 0x401   : > { %2655 = vpow2.f32 %v642_v52 }
 0x406   : > { %v2654_v54 = vpop.eup %2653 }
 0x407   : > { %v2656_v56 = vpop.eup %2655  ;;  %v650_v58 = vsel %vm295_vm2, %v2654_v54, 0.0 }
 0x408   : > { %651 = vadd.xlane.f32.xlu0 %v650_v58  ;;  %v653_v59 = vsel %vm295_vm2, %v2656_v56, 0.0 }
 0x40b   : > { %654 = vadd.xlane.f32.xlu1 %v653_v59 }
 0x41c   : > { %821 = vrot.lane.b32.xlu0 %v2870_v28, %s2775_s12 }
 0x433   : > { %v646_v60 = vpop.xlane.xlu1 %645 }
 0x434   : > { %2657 = vrcp.f32 %v646_v60 }
 0x43a   : > { %v2658_v61 = vpop.eup %2657 }
 0x43b   : > { %v660_v62 = vmul.f32 %v2658_v61, %v2650_v29  ;;  %v649_v63 = vpop.xlane.xlu1 %648 }
 0x43c   : > { %2659 = vrcp.f32 %v649_v63 }
 0x43d   : > { %v664_v0 = vpack.c.bf16 %v660_v62, %v660_v62 }
 0x43f   : > { %2505 = vmatmul.msk.bf16.vlgmr.msra.gmra.mxu2 %vm295_vm2, %v664_v0 }
 0x442   : > { %v2660_v1 = vpop.eup %2659 }
 0x443   : > { %v661_v2 = vmul.f32 %v2660_v1, %v2652_v33 }
 0x445   : > { %v665_v5 = vpack.c.bf16 %v661_v2, %v661_v2 }
 0x447   : > { %2506 = vmatmul.msk.bf16.vlgmr.msra.gmra.mxu3 %vm295_vm2, %v665_v5 }
 0x453   : > { %v753_v6 = vpop.permute.xlu1 %752 }
 0x454   : > { %2509 = vmatmul.msk.bf16.vlgmr.msrb.gmra.mxu2 %vm295_vm2, %v753_v6 }
 0x457   : > { %2510 = vmatmul.msk.bf16.vlgmr.msrb.gmra.mxu3 %vm295_vm2, %v776_v34 }
 0x47b   : > { %v652_v7 = vpop.xlane.xlu0 %651 }
 0x47c   : > { %2661 = vrcp.f32 %v652_v7 }
 0x47e   : > { %v655_v8 = vpop.xlane.xlu1 %654 }
 0x47f   : > { %2663 = vrcp.f32 %v655_v8 }
 0x482   : > { %v2662_v9 = vpop.eup %2661 }
 0x483   : > { %v662_v11 = vmul.f32 %v2662_v9, %v2654_v54 }
 0x485   : > { %v2664_v12 = vpop.eup %2663  ;;  %v666_v14 = vpack.c.bf16 %v662_v11, %v662_v11 }
 0x486   : > { %v663_v16 = vmul.f32 %v2664_v12, %v2656_v56 }
 0x487   : > { %2507 = vmatmul.msk.bf16.vlgmr.msrb.gmra.mxu0 %vm295_vm2, %v666_v14 }
 0x488   : > { %v667_v17 = vpack.c.bf16 %v663_v16, %v663_v16 }
 0x48a   : > { %2508 = vmatmul.msk.bf16.vlgmr.msra.gmra.mxu1 %vm295_vm2, %v667_v17 }
 0x48e   : > { %v822_v21 = vpop.permute.xlu0 %821 }
 0x497   : > { %2511 = vmatmul.msk.bf16.vlgmr.msra.gmra.mxu0 %vm295_vm2, %v799_v19 }
 0x49a   : > { %2512 = vmatmul.msk.bf16.vlgmr.msrb.gmra.mxu1 %vm295_vm2, %v822_v21 }
 0x4c2   : > { %v2984_v22 = vpop.f32.mrf.mxu2 }
 0x4ca   : > { %v687_v24 = vpop.f32.mrf.mxu2  ;;  %v2986_v26 = vpop.f32.mrf.mxu3 }
 0x4d2   : > { %v708_v27 = vpop.f32.mrf.mxu3 }
 0x4d7   : > { %v771_v29 = vpop.f32.mrf.mxu2 }
 0x4d8   : > { %v844_v30 = vmul.f32 0.17677669, %v771_v29 }
 0x4da   : > { %v794_v31 = vpop.f32.mrf.mxu3  ;;  %v848_v32 = vsel %vm295_vm2, %v844_v30, -inf }
 0x4db   : > { %v845_v33 = vmul.f32 0.17677669, %v794_v31  ;;  %849 = vmax.xlane.f32.xlu1 %v848_v32 }
 0x4dd   : > { %v851_v34 = vsel %vm295_vm2, %v845_v33, -inf }
 0x4de   : > { %852 = vmax.xlane.f32.xlu2 %v851_v34 }
 0x4df   : > { %v773_v35 = vpop.f32.mrf.mxu2 }
 0x4e2   : > { %v796_v36 = vpop.f32.mrf.mxu3 }
 0x4f6   : > { %917 = vrot.lane.b32.xlu2 %v2852_v18, %s2776_s13 }
 0x4fe   : > { %1003 = vrot.lane.b32.xlu2 %v2852_v18, %s2777_s14 }
 0x504   : > { %v2994_v37 = vpop.f32.mrf.mxu0 }
 0x507   : > { %v2996_v38 = vpop.f32.mrf.mxu1 }
 0x50c   : > { %v729_v39 = vpop.f32.mrf.mxu0 }
 0x50f   : > { %v750_v40 = vpop.f32.mrf.mxu1 }
 0x514   : > { %v817_v41 = vpop.f32.mrf.mxu0 }
 0x515   : > { %v846_v59 = vmul.f32 0.17677669, %v817_v41 }
 0x517   : > { %v840_v42 = vpop.f32.mrf.mxu1  ;;  %v854_v60 = vsel %vm295_vm2, %v846_v59, -inf }
 0x518   : > { %v847_v43 = vmul.f32 0.17677669, %v840_v42 }
 0x51a   : > { %v857_v44 = vsel %vm295_vm2, %v847_v43, -inf }
 0x51b   : > { %858 = vmax.xlane.f32.xlu1 %v857_v44 }
 0x51c   : > { %v819_v45 = vpop.f32.mrf.mxu0 }
 0x51f   : > { %v842_v46 = vpop.f32.mrf.mxu1 }
 0x534   : > { %896 = vrot.lane.b32.xlu1 %v2844_v13, %s2776_s13 }
 0x53c   : > { %982 = vrot.lane.b32.xlu1 %v2844_v13, %s2778_s15 }
 0x54e   : > { %v850_v47 = vpop.xlane.xlu1 %849 }
 0x54f   : > { %v860_v48 = vsub.f32 %v844_v30, %v850_v47 }
 0x551   : > { %v864_v49 = vmul.f32 1.442695, %v860_v48  ;;  %v853_v50 = vpop.xlane.xlu2 %852 }
 0x552   : > { %v861_v56 = vsub.f32 %v845_v33, %v853_v50 }
 0x553   : > { %2665 = vpow2.f32 %v864_v49 }
 0x554   : > { %v866_v58 = vmul.f32 1.442695, %v861_v56 }
 0x556   : > { %2667 = vpow2.f32 %v866_v58 }
 0x559   : > { %v2666_v51 = vpop.eup %2665  ;;  %v918_v52 = vpop.permute.xlu2 %917 }
 0x55a   : > { %v923_v53 = vsel %vm444_vm1, %v918_v52, 0  ;;  %v872_v54 = vsel %vm295_vm2, %v2666_v51, 0.0 }
 0x55b   : > { %873 = vadd.xlane.f32.xlu0 %v872_v54  ;;  %932 = vmatpush.bf16.msra.mxu3 %v923_v53 }
 0x55c   : > { %v2668_v61 = vpop.eup %2667 }
 0x55d   : > { %v875_v62 = vsel %vm295_vm2, %v2668_v61, 0.0 }
 0x561   : > { %v1004_v44 = vpop.permute.xlu2 %1003 }
 0x566   : > { %855 = vmax.xlane.f32.xlu1 %v854_v60 }
 0x56e   : > { %876 = vadd.xlane.f32.xlu1 %v875_v62 }
 0x56f   : > { %1005 = vrot.lane.b32.xlu0 %v2852_v18, %s2778_s15 }
 0x577   : > { %938 = vrot.lane.b32.xlu0 %v2860_v23, %s2776_s13 }
 0x57f   : > { %959 = vrot.lane.b32.xlu0 %v2870_v28, %s2776_s13 }
 0x587   : > { %1028 = vrot.lane.b32.xlu0 %v2860_v23, %s2778_s15  ;;  %980 = vrot.lane.b32.xlu1 %v2844_v13, %s2777_s14 }
 0x58e   : > { %v859_v63 = vpop.xlane.xlu1 %858 }
 0x58f   : > { %v863_v0 = vsub.f32 %v847_v43, %v859_v63  ;;  %1051 = vrot.lane.b32.xlu0 %v2870_v28, %s2778_s15 }
 0x591   : > { %v870_v1 = vmul.f32 1.442695, %v863_v0 }
 0x593   : > { %2669 = vpow2.f32 %v870_v1 }
 0x597   : > { %1026 = vrot.lane.b32.xlu0 %v2860_v23, %s2777_s14 }
 0x599   : > { %v2670_v2 = vpop.eup %2669 }
 0x59a   : > { %v881_v5 = vsel %vm295_vm2, %v2670_v2, 0.0 }
 0x59b   : > { %882 = vadd.xlane.f32.xlu2 %v881_v5 }
 0x5a6   : > { %v897_v6 = vpop.permute.xlu1 %896 }
 0x5a7   : > { %v902_v7 = vsel %vm444_vm1, %v897_v6, 0 }
 0x5a8   : > { %911 = vmatpush.bf16.msra.mxu2 %v902_v7 }
 0x5ae   : > { %v983_v8 = vpop.permute.xlu1 %982 }
 0x5af   : > { %v988_v9 = vsel %vm295_vm2, %v983_v8, 0 }
 0x5b0   : > { %997 = vmatpush.bf16.xpose.msrb.mxu2 %v988_v9 }
 0x5ce   : > { %v874_v11 = vpop.xlane.xlu0 %873 }
 0x5cf   : > { %2671 = vrcp.f32 %v874_v11 }
 0x5d5   : > { %v2672_v12 = vpop.eup %2671 }
 0x5d6   : > { %v888_v14 = vmul.f32 %v2672_v12, %v2666_v51 }
 0x5d8   : > { %v892_v16 = vpack.c.bf16 %v888_v14, %v888_v14 }
 0x5d9   : > { %v856_v17 = vpop.xlane.xlu1 %855 }
 0x5da   : > { %v862_v19 = vsub.f32 %v846_v59, %v856_v17  ;;  %2513 = vmatmul.msk.bf16.vlgmr.msra.gmra.mxu2 %vm295_vm2, %v892_v16 }
 0x5dc   : > { %v868_v21 = vmul.f32 1.442695, %v862_v19 }
 0x5de   : > { %2673 = vpow2.f32 %v868_v21 }
 0x5e1   : > { %v877_v24 = vpop.xlane.xlu1 %876  ;;  %v1006_v27 = vpop.permute.xlu0 %1005 }
 0x5e2   : > { %2675 = vrcp.f32 %v877_v24  ;;  %v1011_v29 = vsel %vm295_vm2, %v1006_v27, 0 }
 0x5e3   : > { %1020 = vmatpush.bf16.xpose.msrb.mxu3 %v1011_v29 }
 0x5e4   : > { %v2674_v30 = vpop.eup %2673 }
 0x5e5   : > { %v878_v31 = vsel %vm295_vm2, %v2674_v30, 0.0 }
 0x5e6   : > { %879 = vadd.xlane.f32.xlu1 %v878_v31 }
 0x5e8   : > { %v2676_v32 = vpop.eup %2675 }
 0x5e9   : > { %v889_v33 = vmul.f32 %v2676_v32, %v2668_v61  ;;  %v939_v34 = vpop.permute.xlu0 %938 }
 0x5ea   : > { %v944_v35 = vsel %vm444_vm1, %v939_v34, 0 }
 0x5eb   : > { %v893_v36 = vpack.c.bf16 %v889_v33, %v889_v33  ;;  %953 = vmatpush.bf16.msrb.mxu0 %v944_v35 }
 0x5ed   : > { %2514 = vmatmul.msk.bf16.vlgmr.msra.gmra.mxu3 %vm295_vm2, %v893_v36 }
 0x5f1   : > { %v960_v39 = vpop.permute.xlu0 %959 }
 0x5f2   : > { %v965_v40 = vsel %vm444_vm1, %v960_v39, 0 }
 0x5f3   : > { %974 = vmatpush.bf16.msra.mxu1 %v965_v40 }
 0x5f9   : > { %v981_v41 = vpop.permute.xlu1 %980  ;;  %v1029_v42 = vpop.permute.xlu0 %1028 }
 0x5fa   : > { %v1034_v43 = vsel %vm295_vm2, %v1029_v42, 0  ;;  %2517 = vmatmul.msk.bf16.vlgmr.msrb.gmra.mxu2 %vm295_vm2, %v981_v41 }
 0x5fb   : > { %1043 = vmatpush.bf16.xpose.msra.mxu0 %v1034_v43 }
 0x5fd   : > { %2518 = vmatmul.msk.bf16.vlgmr.msrb.gmra.mxu3 %vm295_vm2, %v1004_v44 }
 0x5ff   : > { %1049 = vrot.lane.b32.xlu1 %v2870_v28, %s2777_s14 }
 0x601   : > { %v1052_v45 = vpop.permute.xlu0 %1051 }
 0x602   : > { %v1057_v46 = vsel %vm295_vm2, %v1052_v45, 0 }
 0x603   : > { %1066 = vmatpush.bf16.xpose.msrb.mxu1 %v1057_v46 }
 0x609   : > { %v1027_v61 = vpop.permute.xlu0 %1026 }
 0x60e   : > { %v883_v47 = vpop.xlane.xlu2 %882 }
 0x60f   : > { %2677 = vrcp.f32 %v883_v47 }
 0x615   : > { %v2678_v48 = vpop.eup %2677 }
 0x616   : > { %v891_v49 = vmul.f32 %v2678_v48, %v2670_v2 }
 0x618   : > { %v895_v50 = vpack.c.bf16 %v891_v49, %v891_v49 }
 0x61a   : > { %2516 = vmatmul.msk.bf16.vlgmr.msra.gmra.mxu1 %vm295_vm2, %v895_v50 }
 0x659   : > { %v880_v51 = vpop.xlane.xlu1 %879 }
 0x65a   : > { %2679 = vrcp.f32 %v880_v51 }
 0x65d   : > { %v913_v52 = vpop.f32.mrf.mxu2 }
 0x660   : > { %v2680_v53 = vpop.eup %2679 }
 0x661   : > { %v890_v54 = vmul.f32 %v2680_v53, %v2674_v30 }
 0x663   : > { %v894_v56 = vpack.c.bf16 %v890_v54, %v890_v54 }
 0x665   : > { %v915_v58 = vpop.f32.mrf.mxu2  ;;  %2515 = vmatmul.msk.bf16.vlgmr.msrb.gmra.mxu0 %vm295_vm2, %v894_v56 }
 0x670   : > { %v3038_v59 = vpop.f32.mrf.mxu3 }
 0x671   : > { %v1050_v60 = vpop.permute.xlu1 %1049 }
 0x672   : > { %2520 = vmatmul.msk.bf16.vlgmr.msrb.gmra.mxu1 %vm295_vm2, %v1050_v60 }
 0x675   : > { %2519 = vmatmul.msk.bf16.vlgmr.msra.gmra.mxu0 %vm295_vm2, %v1027_v61 }
 0x678   : > { %v936_v62 = vpop.f32.mrf.mxu3 }
 0x67d   : > { %v999_v63 = vpop.f32.mrf.mxu2 }
 0x67e   : > { %v1072_v0 = vmul.f32 0.17677669, %v999_v63 }
 0x680   : > { %v1022_v1 = vpop.f32.mrf.mxu3  ;;  %v1076_v2 = vsel %vm295_vm2, %v1072_v0, -inf }
 0x681   : > { %v1073_v5 = vmul.f32 0.17677669, %v1022_v1  ;;  %1077 = vmax.xlane.f32.xlu2 %v1076_v2 }
 0x683   : > { %v1079_v6 = vsel %vm295_vm2, %v1073_v5, -inf }
 0x684   : > { %1080 = vmax.xlane.f32.xlu0 %v1079_v6 }
 0x685   : > { %v1001_v7 = vpop.f32.mrf.mxu2 }
 0x688   : > { %v1024_v8 = vpop.f32.mrf.mxu3 }
 0x697   : > { %v3044_v9 = vpop.f32.mrf.mxu1 }
 0x698   : > { %1145 = vrot.lane.b32.xlu0 %v2852_v18, %s2779_s16 }
 0x69f   : > { %v978_v11 = vpop.f32.mrf.mxu1 }
 0x6e2   : > { %v3048_v12 = vpop.f32.mrf.mxu0 }
 0x6ea   : > { %v957_v14 = vpop.f32.mrf.mxu0 }
 0x6ef   : > { %v1068_v16 = vpop.f32.mrf.mxu1 }
 0x6f0   : > { %v1075_v33 = vmul.f32 0.17677669, %v1068_v16 }
 0x6f2   : > { %v1045_v17 = vpop.f32.mrf.mxu0  ;;  %v1085_v35 = vsel %vm295_vm2, %v1075_v33, -inf }
 0x6f3   : > { %v1074_v19 = vmul.f32 0.17677669, %v1045_v17 }
 0x6f4   : > { %v1078_v21 = vpop.xlane.xlu2 %1077 }
 0x6f5   : > { %v1088_v24 = vsub.f32 %v1072_v0, %v1078_v21  ;;  %v1082_v27 = vsel %vm295_vm2, %v1074_v19, -inf  ;;  %v2602_v21 = vld [vmem:[%s3423_s3 + $0x8] sm:$0xff] }
 0x6f6   : > { %1083 = vmax.xlane.f32.xlu2 %v1082_v27 }
 0x6f7   : > { %v1092_v29 = vmul.f32 1.442695, %v1088_v24  ;;  %v1070_v30 = vpop.f32.mrf.mxu1  ;;  %v1081_v31 = vpop.xlane.xlu0 %1080  ;;  %v2601_v24 = vld [vmem:[%s3423_s3] sm:$0xff] }
 0x6f8   : > { %v1089_v32 = vsub.f32 %v1073_v5, %v1081_v31 }
 0x6f9   : > { %2681 = vpow2.f32 %v1092_v29 }
 0x6fa   : > { %v1094_v34 = vmul.f32 1.442695, %v1089_v32  ;;  %v1047_v18 = vpop.f32.mrf.mxu0 }
 0x6fc   : > { %2683 = vpow2.f32 %v1094_v34 }
 0x6fe   : > { %1086 = vmax.xlane.f32.xlu2 %v1085_v35 }
 0x6ff   : > { %v2682_v36 = vpop.eup %2681 }
 0x700   : > { %v1100_v39 = vsel %vm295_vm2, %v2682_v36, 0.0 }
 0x701   : > { %1101 = vadd.xlane.f32.xlu1 %v1100_v39 }
 0x702   : > { %v2684_v40 = vpop.eup %2683 }
 0x703   : > { %v1103_v41 = vsel %vm295_vm2, %v2684_v40, 0.0 }
 0x706   : > { %1104 = vadd.xlane.f32.xlu2 %v1103_v41 }
 0x70a   : > { %v1146_v42 = vpop.permute.xlu0 %1145 }
 0x70b   : > { %v1151_v43 = vsel %vm444_vm1, %v1146_v42, 0 }
 0x70c   : > { %1160 = vmatpush.bf16.msra.mxu3 %v1151_v43 }
 0x71a   : > { %1166 = vrot.lane.b32.xlu1 %v2860_v23, %s2779_s16 }
 0x71e   : > { %1124 = vrot.lane.b32.xlu2 %v2844_v13, %s2779_s16 }
 0x722   : > { %1187 = vrot.lane.b32.xlu1 %v2870_v28, %s2779_s16 }
 0x72a   : > { %1214 = vrot.lane.b32.xlu1 %v2986_v26, %s2780_s17 }
 0x732   : > { %1228 = vrot.lane.b32.xlu1 %v913_v52, %s2781_s19 }
 0x769   : > { %v1084_v44 = vpop.xlane.xlu2 %1083 }
 0x76a   : > { %v1090_v45 = vsub.f32 %v1074_v19, %v1084_v44 }
 0x76c   : > { %v1096_v46 = vmul.f32 1.442695, %v1090_v45 }
 0x76e   : > { %2685 = vpow2.f32 %v1096_v46 }
 0x771   : > { %v1087_v47 = vpop.xlane.xlu2 %1086 }
 0x772   : > { %v1091_v48 = vsub.f32 %v1075_v33, %v1087_v47 }
 0x774   : > { %v2686_v23 = vpop.eup %2685  ;;  %v1098_v49 = vmul.f32 1.442695, %v1091_v48  ;;  %v1102_v50 = vpop.xlane.xlu1 %1101 }
 0x775   : > { %v1106_v13 = vsel %vm295_vm2, %v2686_v23, 0.0 }
 0x776   : > { %2687 = vpow2.f32 %v1098_v49  ;;  %1107 = vadd.xlane.f32.xlu2 %v1106_v13 }
 0x777   : > { %2689 = vrcp.f32 %v1102_v50 }
 0x779   : > { %v1105_v28 = vpop.xlane.xlu2 %1104 }
 0x77a   : > { %2691 = vrcp.f32 %v1105_v28 }
 0x77c   : > { %v2688_v26 = vpop.eup %2687 }
 0x77d   : > { %v2690_v51 = vpop.eup %2689  ;;  %v1109_v52 = vsel %vm295_vm2, %v2688_v26, 0.0 }
 0x77e   : > { %1110 = vadd.xlane.f32.xlu0 %v1109_v52  ;;  %v1116_v54 = vmul.f32 %v2690_v51, %v2682_v36 }
 0x780   : > { %v2692_v53 = vpop.eup %2691  ;;  %v1120_v62 = vpack.c.bf16 %v1116_v54, %v1116_v54 }
 0x781   : > { %v1117_v56 = vmul.f32 %v2692_v53, %v2684_v40  ;;  %v1125_v58 = vpop.permute.xlu2 %1124 }
 0x782   : > { %v1130_v60 = vsel %vm444_vm1, %v1125_v58, 0 }
 0x783   : > { %v1121_v61 = vpack.c.bf16 %v1117_v56, %v1117_v56  ;;  %1139 = vmatpush.bf16.msra.mxu2 %v1130_v60 }
 0x785   : > { %2522 = vmatmul.msk.bf16.vlgmr.msra.gmra.mxu3 %vm295_vm2, %v1121_v61 }
 0x786   : > { %2521 = vmatmul.msk.bf16.vlgmr.msra.gmra.mxu2 %vm295_vm2, %v1120_v62 }
 0x787   : > { %1303 = vmatpush.bf16.msrb.mxu2 %v2602_v21 }
 0x78b   : > { %1304 = vmatpush.bf16.msrb.mxu2 %v2601_v24 }
 0x78c   : > { %v1167_v63 = vpop.permute.xlu1 %1166 }
 0x78d   : > { %v1172_v0 = vsel %vm444_vm1, %v1167_v63, 0 }
 0x78e   : > { %1181 = vmatpush.bf16.msrb.mxu0 %v1172_v0  ;;  %1212 = vrot.lane.b32.xlu2 %v2984_v22, %s2780_s17 }
 0x792   : > { %1230 = vrot.lane.b32.xlu0 %v3038_v59, %s2781_s19 }
 0x794   : > { %v1188_v1 = vpop.permute.xlu1 %1187 }
 0x795   : > { %v1193_v2 = vsel %vm444_vm1, %v1188_v1, 0 }
 0x796   : > { %1202 = vmatpush.bf16.msra.mxu1 %v1193_v2 }
 0x79a   : > { %1218 = vrot.lane.b32.xlu0 %v2996_v38, %s2780_s17 }
 0x79c   : > { %v1215_v27 = vpop.permute.xlu1 %1214 }
 0x7e9   : > { %v1108_v5 = vpop.xlane.xlu2 %1107 }
 0x7ea   : > { %2693 = vrcp.f32 %v1108_v5 }
 0x7f0   : > { %v2694_v6 = vpop.eup %2693 }
 0x7f1   : > { %v1118_v7 = vmul.f32 %v2694_v6, %v2686_v23  ;;  %v1111_v8 = vpop.xlane.xlu0 %1110  ;;  %v1213_v29 = vpop.permute.xlu2 %1212 }
 0x7f2   : > { %2695 = vrcp.f32 %v1111_v8  ;;  %v1256_v32 = vsel %vm295_vm2, %v2931_v55, %v1213_v29 }
 0x7f3   : > { %v1122_v11 = vpack.c.bf16 %v1118_v7, %v1118_v7 }
 0x7f5   : > { %2523 = vmatmul.msk.bf16.vlgmr.msrb.gmra.mxu0 %vm295_vm2, %v1122_v11 }
 0x7f8   : > { %v2696_v22 = vpop.eup %2695 }
 0x7f9   : > { %v1119_v14 = vmul.f32 %v2696_v22, %v2688_v26  ;;  %v2631_v22 = vld [vmem:[%s3422_s2 + $0x1] ss:$0 sm:$0xff] }
 0x7fb   : > { %v1123_v16 = vpack.c.bf16 %v1119_v14, %v1119_v14 }
 0x7fd   : > { %2524 = vmatmul.msk.bf16.vlgmr.msra.gmra.mxu1 %vm295_vm2, %v1123_v16 }
 0x808   : > { %v1162_v59 = vpop.f32.mrf.mxu3 }
 0x809   : > { %v1141_v17 = vpop.f32.mrf.mxu2  ;;  %1246 = vrot.lane.b32.xlu2 %v1162_v59, %s2782_s20 }
 0x80a   : > { %1244 = vrot.lane.b32.xlu1 %v1141_v17, %s2782_s20 }
 0x810   : > { %v1164_v38 = vpop.f32.mrf.mxu3 }
 0x811   : > { %v1143_v19 = vpop.f32.mrf.mxu2  ;;  %1232 = vrot.lane.b32.xlu2 %v3048_v12, %s2781_s19  ;;  %v1229_v12 = vpop.permute.xlu1 %1228 }
 0x812   : > { %1216 = vrot.lane.b32.xlu1 %v2994_v37, %s2780_s17  ;;  %v1231_v37 = vpop.permute.xlu0 %1230  ;;  %v1261_v39 = vsel %vm1260_vm4, %v1256_v32, %v1229_v12 }
 0x81a   : > { %1234 = vrot.lane.b32.xlu1 %v3044_v9, %s2781_s19  ;;  %v1257_v9 = vsel %vm295_vm2, %v2933_v57, %v1215_v27  ;;  %v1219_v45 = vpop.permute.xlu0 %1218 }
 0x81b   : > { %v1262_v33 = vsel %vm1260_vm4, %v1257_v9, %v1231_v37  ;;  %v1259_v48 = vsel %vm295_vm2, %v2949_v4, %v1219_v45  ;;  %v2603_v4 = vld [vmem:[%s3421_s1 + $0x10] sm:$0xff] }
 0x863   : > { %v1247_v31 = vpop.permute.xlu2 %1246 }
 0x864   : > { %v1267_v35 = vsel %vm1265_vm3, %v1262_v33, %v1247_v31 }
 0x865   : > { %v1271_v41 = vadd.f32 %v1267_v35, %v2846_v15 }
 0x86b   : > { %v1233_v44 = vpop.permute.xlu2 %1232 }
 0x872   : > { %v1183_v30 = vpop.f32.mrf.mxu0 }
 0x873   : > { %1248 = vrot.lane.b32.xlu0 %v1183_v30, %s2782_s20 }
 0x87a   : > { %v1185_v34 = vpop.f32.mrf.mxu0  ;;  %v1204_v18 = vpop.f32.mrf.mxu1 }
 0x87b   : > { %1250 = vrot.lane.b32.xlu2 %v1204_v18, %s2782_s20 }
 0x87c   : > { %v1245_v36 = vpop.permute.xlu1 %1244 }
 0x87d   : > { %v1266_v40 = vsel %vm1265_vm3, %v1261_v39, %v1245_v36 }
 0x87e   : > { %v1270_v57 = vadd.f32 %v1266_v40, %v2840_v10 }
 0x880   : > { %v1274_v42 = vpack.c.bf16 %v1271_v41, %v1270_v57 }
 0x882   : > { %v1206_v55 = vpop.f32.mrf.mxu1  ;;  %2533 = vmatmul.msk.bf16.vlgmr.msrb.gmra.mxu2 %vm260_vm0, %v1274_v42 }
 0x884   : > { %v1217_v43 = vpop.permute.xlu1 %1216 }
 0x885   : > { %v1258_v23 = vsel %vm295_vm2, %v2945_v3, %v1217_v43  ;;  %v2604_v3 = vld [vmem:[%s3421_s1 + $0x18] sm:$0xff] }
 0x886   : > { %v1263_v10 = vsel %vm1260_vm4, %v1258_v23, %v1233_v44  ;;  %1367 = vmatpush.bf16.msrb.mxu3 %v2604_v3 }
 0x88a   : > { %1368 = vmatpush.bf16.msrb.mxu3 %v2603_v4 }
 0x88c   : > { %v1235_v46 = vpop.permute.xlu1 %1234 }
 0x88d   : > { %v1264_v49 = vsel %vm1260_vm4, %v1259_v48, %v1235_v46 }
 0x8d5   : > { %v1251_v47 = vpop.permute.xlu2 %1250 }
 0x8d6   : > { %v1269_v15 = vsel %vm1265_vm3, %v1264_v49, %v1251_v47 }
 0x8d7   : > { %v1273_v28 = vadd.f32 %v1269_v15, %v2862_v25  ;;  %v2630_v25 = vld [vmem:[%s3424_s4] ss:$0 sm:$0xff] }
 0x8e5   : > { %v1249_v50 = vpop.permute.xlu0 %1248 }
 0x8e6   : > { %v1268_v13 = vsel %vm1265_vm3, %v1263_v10, %v1249_v50 }
 0x8e7   : > { %v1272_v26 = vadd.f32 %v1268_v13, %v2854_v20 }
 0x8e9   : > { %v1275_v51 = vpack.c.bf16 %v1273_v28, %v1272_v26 }
 0x8eb   : > { %2534 = vmatmul.msk.bf16.gmra.mxu2 %vm260_vm0, %v1275_v51 }
 0x905   : > { %v1306_v52 = vpop.f32.mrf.mxu2 }
 0x906   : > { %v1307_v53 = vadd.f32 %v2630_v25, %v1306_v52 }
 0x908   : > { %v1316_v54 = vmax.f32 %v1307_v53, 0.0 }
 0x90a   : > { %v1320_v60 = vadd.f32 %v1316_v54, %v1270_v57 }
 0x90d   : > { %v1308_v20 = vpop.f32.mrf.mxu2 }
 0x90e   : > { %v1309_v56 = vadd.f32 %v2630_v25, %v1308_v20 }
 0x910   : > { %v1317_v58 = vmax.f32 %v1309_v56, 0.0 }
 0x912   : > { %v1321_v61 = vadd.f32 %v1317_v58, %v1271_v41 }
 0x914   : > { %v1338_v62 = vpack.c.bf16 %v1321_v61, %v1320_v60 }
 0x916   : > { %2553 = vmatmul.msk.bf16.vlgmr.msrb.gmra.mxu3 %vm260_vm0, %v1338_v62 }
 0x96e   : > { %v1311_v63 = vpop.f32.mrf.mxu2 }
 0x96f   : > { %v1312_v0 = vadd.f32 %v2630_v25, %v1311_v63 }
 0x971   : > { %v1318_v2 = vmax.f32 %v1312_v0, 0.0 }
 0x973   : > { %v1322_v7 = vadd.f32 %v1318_v2, %v1272_v26 }
 0x976   : > { %v1313_v1 = vpop.f32.mrf.mxu2 }
 0x977   : > { %v1314_v5 = vadd.f32 %v2630_v25, %v1313_v1 }
 0x979   : > { %v1319_v6 = vmax.f32 %v1314_v5, 0.0 }
 0x97b   : > { %v1323_v8 = vadd.f32 %v1319_v6, %v1273_v28 }
 0x97d   : > { %v1339_v11 = vpack.c.bf16 %v1323_v8, %v1322_v7 }
 0x97f   : > { %2554 = vmatmul.msk.bf16.gmra.mxu3 %vm260_vm0, %v1339_v11 }
 0x999   : > { %v1370_v14 = vpop.f32.mrf.mxu3 }
 0x99a   : > { %v3131_v16 = vadd.f32 %v2631_v22, %v1370_v14 }
 0x99c   : > { %v1380_v59 = vpack.c.bf16 %v3131_v16, %v3131_v16 }
 0x99e   : > { %v1385_v17 = vunpack.c.l.b16 %v1380_v59 }
 0x9a0   : > { %v3135_v38 = vpack.c.b16 %v1385_v17, %v1385_v17 }
 0x9a1   : > { %v1372_v19 = vpop.f32.mrf.mxu3 }
 0x9a2   : > { %v3137_v21 = vadd.f32 %v2631_v22, %v1372_v19  ;;  %1387 = vrot.lane.b32.xlu1 %v3135_v38, %s2770_s7 }
 0x9a4   : > { %v1381_v24 = vpack.c.bf16 %v3137_v21, %v3137_v21 }
 0x9a6   : > { %v1409_v27 = vunpack.c.l.b16 %v1381_v24 }
 0x9a8   : > { %v3143_v29 = vpack.c.b16 %v1409_v27, %v1409_v27 }
 0x9aa   : > { %1411 = vrot.lane.b32.xlu0 %v3143_v29, %s2770_s7 }
 0xa02   : > { %v1375_v30 = vpop.f32.mrf.mxu3 }
 0xa03   : > { %v3147_v12 = vadd.f32 %v2631_v22, %v1375_v30 }
 0xa05   : > { %v1382_v37 = vpack.c.bf16 %v3147_v12, %v3147_v12 }
 0xa07   : > { %v1433_v31 = vunpack.c.l.b16 %v1382_v37 }
 0xa09   : > { %v3151_v9 = vpack.c.b16 %v1433_v31, %v1433_v31 }
 0xa0a   : > { %v1377_v32 = vpop.f32.mrf.mxu3 }
 0xa0b   : > { %v3153_v33 = vadd.f32 %v2631_v22, %v1377_v32  ;;  %1435 = vrot.lane.b32.xlu2 %v3151_v9, %s2770_s7 }
 0xa0d   : > { %v1383_v34 = vpack.c.bf16 %v3153_v33, %v3153_v33 }
 0xa0f   : > { %v1457_v18 = vunpack.c.l.b16 %v1383_v34 }
 0xa11   : > { %v3159_v35 = vpack.c.b16 %v1457_v18, %v1457_v18 }
 0xa13   : > { %1459 = vrot.lane.b32.xlu1 %v3159_v35, %s2770_s7 }
 0xa14   : > { %v1388_v36 = vpop.permute.xlu1 %1387 }
 0xa15   : > { %v1393_v39 = vsel %vm295_vm2, %v1388_v36, 0 }
 0xa16   : > { %1402 = vmatpush.bf16.xpose.msra.mxu0 %v1393_v39 }
 0xa1c   : > { %v1412_v40 = vpop.permute.xlu0 %1411 }
 0xa1d   : > { %v1417_v41 = vsel %vm295_vm2, %v1412_v40, 0  ;;  %2555 = vmatmul.msk.bf16.vlgmr.msra.gmra.mxu0 %vm295_vm2, %v1380_v59 }
 0xa1e   : > { %1426 = vmatpush.bf16.xpose.msrb.mxu1 %v1417_v41 }
 0xa25   : > { %2556 = vmatmul.msk.bf16.vlgmr.msrb.gmra.mxu1 %vm295_vm2, %v1381_v24 }
 0xa65   : > { %v1436_v57 = vpop.permute.xlu2 %1435 }
 0xa66   : > { %v1441_v42 = vsel %vm295_vm2, %v1436_v57, 0 }
 0xa67   : > { %1450 = vmatpush.bf16.xpose.msrb.mxu0 %v1441_v42 }
 0xa6e   : > { %2557 = vmatmul.msk.bf16.vlgmr.msrb.gmra.mxu0 %vm295_vm2, %v1382_v37 }
 0xa85   : > { %v1460_v55 = vpop.permute.xlu1 %1459 }
 0xa86   : > { %v1465_v43 = vsel %vm295_vm2, %v1460_v55, 0 }
 0xa87   : > { %1474 = vmatpush.bf16.xpose.msra.mxu1 %v1465_v43 }
 0xa8e   : > { %2558 = vmatmul.msk.bf16.vlgmr.msra.gmra.mxu1 %vm295_vm2, %v1383_v34 }
 0xa9a   : > { %v1404_v44 = vpop.f32.mrf.mxu0 }
 0xa9b   : > { %v1480_v45 = vmul.f32 0.17677669, %v1404_v44 }
 0xa9d   : > { %v1484_v46 = vsel %vm295_vm2, %v1480_v45, -inf }
 0xa9e   : > { %1485 = vmax.xlane.f32.xlu0 %v1484_v46 }
 0xaa2   : > { %v1406_v47 = vpop.f32.mrf.mxu0  ;;  %v1428_v48 = vpop.f32.mrf.mxu1 }
 0xaa3   : > { %v1481_v23 = vmul.f32 0.17677669, %v1428_v48 }
 0xaa5   : > { %v1487_v49 = vsel %vm295_vm2, %v1481_v23, -inf }
 0xaa6   : > { %1488 = vmax.xlane.f32.xlu2 %v1487_v49 }
 0xaaa   : > { %v1430_v15 = vpop.f32.mrf.mxu1 }
 0xab2   : > { %1532 = vrot.lane.b32.xlu0 %v3135_v38, %s2769_s6 }
 0xabe   : > { %1553 = vrot.lane.b32.xlu2 %v3143_v29, %s2769_s6 }
 0xaeb   : > { %v1452_v10 = vpop.f32.mrf.mxu0 }
 0xaec   : > { %v1482_v50 = vmul.f32 0.17677669, %v1452_v10 }
 0xaee   : > { %v1490_v13 = vsel %vm295_vm2, %v1482_v50, -inf }
 0xaef   : > { %1491 = vmax.xlane.f32.xlu1 %v1490_v13 }
 0xaf3   : > { %v1454_v28 = vpop.f32.mrf.mxu0 }
 0xb0b   : > { %v1476_v26 = vpop.f32.mrf.mxu1 }
 0xb0c   : > { %v1483_v51 = vmul.f32 0.17677669, %v1476_v26 }
 0xb0e   : > { %v1493_v3 = vsel %vm295_vm2, %v1483_v51, -inf }
 0xb0f   : > { %1494 = vmax.xlane.f32.xlu0 %v1493_v3 }
 0xb11   : > { %v1486_v4 = vpop.xlane.xlu0 %1485 }
 0xb12   : > { %v1496_v52 = vsub.f32 %v1480_v45, %v1486_v4 }
 0xb13   : > { %v1478_v25 = vpop.f32.mrf.mxu1 }
 0xb14   : > { %v1500_v53 = vmul.f32 1.442695, %v1496_v52 }
 0xb16   : > { %2697 = vpow2.f32 %v1500_v53 }
 0xb19   : > { %v1489_v20 = vpop.xlane.xlu2 %1488 }
 0xb1a   : > { %v1497_v54 = vsub.f32 %v1481_v23, %v1489_v20 }
 0xb1c   : > { %v2698_v56 = vpop.eup %2697  ;;  %v1502_v58 = vmul.f32 1.442695, %v1497_v54 }
 0xb1d   : > { %v1508_v60 = vsel %vm295_vm2, %v2698_v56, 0.0 }
 0xb1e   : > { %2699 = vpow2.f32 %v1502_v58  ;;  %1509 = vadd.xlane.f32.xlu2 %v1508_v60 }
 0xb21   : > { %v1554_v61 = vpop.permute.xlu2 %1553 }
 0xb22   : > { %v1559_v62 = vsel %vm444_vm1, %v1554_v61, 0 }
 0xb23   : > { %1568 = vmatpush.bf16.msra.mxu3 %v1559_v62  ;;  %1641 = vrot.lane.b32.xlu0 %v3143_v29, %s2771_s8 }
 0xb24   : > { %v2700_v63 = vpop.eup %2699  ;;  %v1533_v0 = vpop.permute.xlu0 %1532 }
 0xb25   : > { %v1538_v1 = vsel %vm444_vm1, %v1533_v0, 0  ;;  %v1511_v2 = vsel %vm295_vm2, %v2700_v63, 0.0 }
 0xb26   : > { %1512 = vadd.xlane.f32.xlu1 %v1511_v2  ;;  %1547 = vmatpush.bf16.msra.mxu2 %v1538_v1 }
 0xb2b   : > { %1639 = vrot.lane.b32.xlu0 %v3143_v29, %s2772_s9 }
 0xb33   : > { %1574 = vrot.lane.b32.xlu0 %v3151_v9, %s2769_s6 }
 0xb36   : > { %1616 = vrot.lane.b32.xlu2 %v3135_v38, %s2772_s9 }
 0xb3b   : > { %1595 = vrot.lane.b32.xlu0 %v3159_v35, %s2769_s6 }
 0xb3f   : > { %1618 = vrot.lane.b32.xlu1 %v3135_v38, %s2771_s8 }
 0xb43   : > { %1664 = vrot.lane.b32.xlu0 %v3151_v9, %s2771_s8 }
 0xb4b   : > { %1687 = vrot.lane.b32.xlu0 %v3159_v35, %s2771_s8 }
 0xb53   : > { %1662 = vrot.lane.b32.xlu0 %v3151_v9, %s2772_s9 }
 0xb62   : > { %v1492_v5 = vpop.xlane.xlu1 %1491 }
 0xb63   : > { %v1498_v6 = vsub.f32 %v1482_v50, %v1492_v5 }
 0xb65   : > { %v1504_v7 = vmul.f32 1.442695, %v1498_v6 }
 0xb67   : > { %2701 = vpow2.f32 %v1504_v7 }
 0xb6d   : > { %v2702_v8 = vpop.eup %2701 }
 0xb6e   : > { %v1514_v11 = vsel %vm295_vm2, %v2702_v8, 0.0 }
 0xb6f   : > { %1515 = vadd.xlane.f32.xlu1 %v1514_v11 }
 0xb82   : > { %v1495_v22 = vpop.xlane.xlu0 %1494 }
 0xb83   : > { %v1499_v14 = vsub.f32 %v1483_v51, %v1495_v22 }
 0xb85   : > { %v1506_v59 = vmul.f32 1.442695, %v1499_v14 }
 0xb87   : > { %2703 = vpow2.f32 %v1506_v59 }
 0xb88   : > { %1685 = vrot.lane.b32.xlu1 %v3159_v35, %s2772_s9 }
 0xb8d   : > { %v2704_v17 = vpop.eup %2703 }
 0xb8e   : > { %v1517_v19 = vsel %vm295_vm2, %v2704_v17, 0.0 }
 0xb8f   : > { %1518 = vadd.xlane.f32.xlu2 %v1517_v19 }
 0xb90   : > { %1869 = vrot.lane.b32.xlu1 %v3143_v29, %s2774_s11 }
 0xb91   : > { %v1510_v24 = vpop.xlane.xlu2 %1509 }
 0xb92   : > { %2705 = vrcp.f32 %v1510_v24 }
 0xb95   : > { %v1642_v27 = vpop.permute.xlu0 %1641 }
 0xb96   : > { %v1647_v30 = vsel %vm295_vm2, %v1642_v27, 0 }
 0xb97   : > { %1656 = vmatpush.bf16.xpose.msrb.mxu3 %v1647_v30 }
 0xb98   : > { %v2706_v37 = vpop.eup %2705 }
 0xb99   : > { %v1524_v31 = vmul.f32 %v2706_v37, %v2698_v56  ;;  %v1513_v32 = vpop.xlane.xlu1 %1512  ;;  %v1617_v47 = vpop.permute.xlu2 %1616 }
 0xb9a   : > { %2707 = vrcp.f32 %v1513_v32 }
 0xb9b   : > { %v1528_v34 = vpack.c.bf16 %v1524_v31, %v1524_v31 }
 0xb9d   : > { %2559 = vmatmul.msk.bf16.vlgmr.msra.gmra.mxu2 %vm295_vm2, %v1528_v34  ;;  %v1640_v18 = vpop.permute.xlu0 %1639 }
 0xba0   : > { %v2708_v36 = vpop.eup %2707 }
 0xba1   : > { %v1525_v39 = vmul.f32 %v2708_v36, %v2700_v63 }
 0xba3   : > { %v1529_v40 = vpack.c.bf16 %v1525_v39, %v1525_v39 }
 0xba5   : > { %2560 = vmatmul.msk.bf16.vlgmr.msra.gmra.mxu3 %vm295_vm2, %v1529_v40  ;;  %v1575_v41 = vpop.permute.xlu0 %1574 }
 0xba6   : > { %v1580_v57 = vsel %vm444_vm1, %v1575_v41, 0 }
 0xba7   : > { %1589 = vmatpush.bf16.msra.mxu0 %v1580_v57 }
 0xbad   : > { %v1596_v42 = vpop.permute.xlu0 %1595 }
 0xbae   : > { %v1601_v55 = vsel %vm444_vm1, %v1596_v42, 0 }
 0xbaf   : > { %1610 = vmatpush.bf16.msrb.mxu1 %v1601_v55 }
 0xbb1   : > { %v1619_v43 = vpop.permute.xlu1 %1618 }
 0xbb2   : > { %v1624_v44 = vsel %vm295_vm2, %v1619_v43, 0 }
 0xbb3   : > { %1633 = vmatpush.bf16.xpose.msrb.mxu2 %v1624_v44 }
 0xbb5   : > { %2564 = vmatmul.msk.bf16.vlgmr.msrb.gmra.mxu3 %vm295_vm2, %v1640_v18  ;;  %v1665_v45 = vpop.permute.xlu0 %1664 }
 0xbb6   : > { %v1670_v46 = vsel %vm295_vm2, %v1665_v45, 0 }
 0xbb7   : > { %1679 = vmatpush.bf16.xpose.msrb.mxu0 %v1670_v46 }
 0xbba   : > { %2563 = vmatmul.msk.bf16.vlgmr.msrb.gmra.mxu2 %vm295_vm2, %v1617_v47 }
 0xbbd   : > { %v1688_v48 = vpop.permute.xlu0 %1687 }
 0xbbe   : > { %v1693_v23 = vsel %vm295_vm2, %v1688_v48, 0 }
 0xbbf   : > { %1702 = vmatpush.bf16.xpose.msra.mxu1 %v1693_v23 }
 0xbc5   : > { %v1663_v13 = vpop.permute.xlu0 %1662 }
 0xbe2   : > { %v1516_v49 = vpop.xlane.xlu1 %1515 }
 0xbe3   : > { %2709 = vrcp.f32 %v1516_v49 }
 0xbe9   : > { %v2710_v15 = vpop.eup %2709 }
 0xbea   : > { %v1526_v10 = vmul.f32 %v2710_v15, %v2702_v8 }
 0xbec   : > { %v1530_v50 = vpack.c.bf16 %v1526_v10, %v1526_v10 }
 0xbee   : > { %2561 = vmatmul.msk.bf16.vlgmr.msra.gmra.mxu0 %vm295_vm2, %v1530_v50 }
 0xbfa   : > { %v1686_v4 = vpop.permute.xlu1 %1685 }
 0xbfe   : > { %2565 = vmatmul.msk.bf16.vlgmr.msrb.gmra.mxu0 %vm295_vm2, %v1663_v13 }
 0xc02   : > { %v1519_v28 = vpop.xlane.xlu2 %1518  ;;  %v1870_v57 = vpop.permute.xlu1 %1869 }
 0xc03   : > { %2711 = vrcp.f32 %v1519_v28  ;;  %v1875_v43 = vsel %vm295_vm2, %v1870_v57, 0 }
 0xc09   : > { %v2712_v26 = vpop.eup %2711 }
 0xc0a   : > { %v1527_v51 = vmul.f32 %v2712_v26, %v2704_v17 }
 0xc0c   : > { %v1531_v3 = vpack.c.bf16 %v1527_v51, %v1527_v51 }
 0xc0e   : > { %2562 = vmatmul.msk.bf16.vlgmr.msrb.gmra.mxu1 %vm295_vm2, %v1531_v3 }
 0xc1e   : > { %2566 = vmatmul.msk.bf16.vlgmr.msra.gmra.mxu1 %vm295_vm2, %v1686_v4 }
 0xc20   : > { %v3221_v52 = vpop.f32.mrf.mxu2 }
 0xc28   : > { %v1551_v25 = vpop.f32.mrf.mxu2  ;;  %v3223_v53 = vpop.f32.mrf.mxu3 }
 0xc30   : > { %v1572_v20 = vpop.f32.mrf.mxu3 }
 0xc38   : > { %v1658_v54 = vpop.f32.mrf.mxu3 }
 0xc39   : > { %v1709_v56 = vmul.f32 0.17677669, %v1658_v54 }
 0xc3b   : > { %v1715_v58 = vsel %vm295_vm2, %v1709_v56, -inf }
 0xc3c   : > { %1716 = vmax.xlane.f32.xlu0 %v1715_v58 }
 0xc3d   : > { %v1635_v60 = vpop.f32.mrf.mxu2 }
 0xc3e   : > { %v1708_v61 = vmul.f32 0.17677669, %v1635_v60 }
 0xc40   : > { %v1660_v62 = vpop.f32.mrf.mxu3  ;;  %v1712_v63 = vsel %vm295_vm2, %v1708_v61, -inf }
 0xc41   : > { %1713 = vmax.xlane.f32.xlu2 %v1712_v63 }
 0xc45   : > { %v1637_v0 = vpop.f32.mrf.mxu2 }
 0xc50   : > { %1781 = vrot.lane.b32.xlu0 %v3143_v29, %s2773_s10 }
 0xc58   : > { %1867 = vrot.lane.b32.xlu0 %v3143_v29, %s2775_s12 }
 0xc59   : > { %1760 = vrot.lane.b32.xlu2 %v3135_v38, %s2773_s10 }
 0xc61   : > { %1846 = vrot.lane.b32.xlu2 %v3135_v38, %s2774_s11 }
 0xc6b   : > { %v3235_v1 = vpop.f32.mrf.mxu0 }
 0xc73   : > { %v1593_v2 = vpop.f32.mrf.mxu0 }
 0xc7b   : > { %v1681_v5 = vpop.f32.mrf.mxu0 }
 0xc7c   : > { %v1710_v7 = vmul.f32 0.17677669, %v1681_v5 }
 0xc7e   : > { %v1718_v8 = vsel %vm295_vm2, %v1710_v7, -inf }
 0xc83   : > { %v1683_v6 = vpop.f32.mrf.mxu0 }
 0xc8a   : > { %1719 = vmax.xlane.f32.xlu2 %v1718_v8 }
 0xc8b   : > { %v3238_v11 = vpop.f32.mrf.mxu1 }
 0xc93   : > { %v1614_v22 = vpop.f32.mrf.mxu1 }
 0xc9b   : > { %v1704_v14 = vpop.f32.mrf.mxu1 }
 0xc9c   : > { %v1711_v59 = vmul.f32 0.17677669, %v1704_v14 }
 0xc9e   : > { %v1721_v17 = vsel %vm295_vm2, %v1711_v59, -inf }
 0xc9f   : > { %1722 = vmax.xlane.f32.xlu2 %v1721_v17 }
 0xca3   : > { %v1706_v19 = vpop.f32.mrf.mxu1 }
 0xcaf   : > { %v1717_v24 = vpop.xlane.xlu0 %1716 }
 0xcb0   : > { %v1725_v27 = vsub.f32 %v1709_v56, %v1717_v24 }
 0xcb2   : > { %v1730_v30 = vmul.f32 1.442695, %v1725_v27 }
 0xcb4   : > { %2713 = vpow2.f32 %v1730_v30  ;;  %v1714_v37 = vpop.xlane.xlu2 %1713 }
 0xcb5   : > { %v1724_v31 = vsub.f32 %v1708_v61, %v1714_v37 }
 0xcb7   : > { %v1728_v32 = vmul.f32 1.442695, %v1724_v31 }
 0xcb9   : > { %2715 = vpow2.f32 %v1728_v32 }
 0xcba   : > { %v2714_v34 = vpop.eup %2713 }
 0xcbb   : > { %v1739_v18 = vsel %vm295_vm2, %v2714_v34, 0.0 }
 0xcbc   : > { %v1761_v36 = vpop.permute.xlu2 %1760  ;;  %1740 = vadd.xlane.f32.xlu2 %v1739_v18 }
 0xcbd   : > { %v1766_v39 = vsel %vm444_vm1, %v1761_v36, 0 }
 0xcbe   : > { %1775 = vmatpush.bf16.msra.mxu2 %v1766_v39 }
 0xcbf   : > { %v2716_v40 = vpop.eup %2715 }
 0xcc0   : > { %v1736_v41 = vsel %vm295_vm2, %v2716_v40, 0.0 }
 0xcc1   : > { %1737 = vadd.xlane.f32.xlu1 %v1736_v41 }
 0xcc2   : > { %v1782_v42 = vpop.permute.xlu0 %1781 }
 0xcc3   : > { %v1787_v55 = vsel %vm444_vm1, %v1782_v42, 0 }
 0xcc4   : > { %v1847_v44 = vpop.permute.xlu2 %1846  ;;  %1796 = vmatpush.bf16.msra.mxu3 %v1787_v55 }
 0xcc5   : > { %v1852_v45 = vsel %vm295_vm2, %v1847_v44, 0 }
 0xcc6   : > { %1861 = vmatpush.bf16.xpose.msrb.mxu2 %v1852_v45 }
 0xcc8   : > { %1884 = vmatpush.bf16.xpose.msrb.mxu3 %v1875_v43 }
 0xcca   : > { %v1868_v58 = vpop.permute.xlu0 %1867 }
 0xcd4   : > { %1844 = vrot.lane.b32.xlu2 %v3135_v38, %s2775_s12 }
 0xcda   : > { %1802 = vrot.lane.b32.xlu1 %v3151_v9, %s2773_s10 }
 0xce2   : > { %1823 = vrot.lane.b32.xlu1 %v3159_v35, %s2773_s10 }
 0xcea   : > { %1892 = vrot.lane.b32.xlu1 %v3151_v9, %s2774_s11 }
 0xcf2   : > { %1915 = vrot.lane.b32.xlu1 %v3159_v35, %s2774_s11 }
 0xcfd   : > { %v1720_v46 = vpop.xlane.xlu2 %1719 }
 0xcfe   : > { %v1726_v47 = vsub.f32 %v1710_v7, %v1720_v46 }
 0xd00   : > { %v1732_v48 = vmul.f32 1.442695, %v1726_v47 }
 0xd02   : > { %2717 = vpow2.f32 %v1732_v48 }
 0xd08   : > { %v2718_v23 = vpop.eup %2717 }
 0xd09   : > { %v1742_v49 = vsel %vm295_vm2, %v2718_v23, 0.0 }
 0xd0a   : > { %1743 = vadd.xlane.f32.xlu2 %v1742_v49 }
 0xd12   : > { %v1723_v15 = vpop.xlane.xlu2 %1722 }
 0xd13   : > { %v1727_v10 = vsub.f32 %v1711_v59, %v1723_v15 }
 0xd15   : > { %v1734_v50 = vmul.f32 1.442695, %v1727_v10 }
 0xd17   : > { %2719 = vpow2.f32 %v1734_v50 }
 0xd1d   : > { %v2720_v13 = vpop.eup %2719 }
 0xd1e   : > { %v1745_v28 = vsel %vm295_vm2, %v2720_v13, 0.0 }
 0xd1f   : > { %1746 = vadd.xlane.f32.xlu0 %v1745_v28 }
 0xd22   : > { %1890 = vrot.lane.b32.xlu2 %v3151_v9, %s2775_s12 }
 0xd2a   : > { %1988 = vrot.lane.b32.xlu2 %v3135_v38, %s2776_s13 }
 0xd2f   : > { %v1741_v26 = vpop.xlane.xlu2 %1740 }
 0xd30   : > { %2721 = vrcp.f32 %v1741_v26 }
 0xd33   : > { %1913 = vrot.lane.b32.xlu0 %v3159_v35, %s2775_s12 }
 0xd34   : > { %v1738_v51 = vpop.xlane.xlu1 %1737 }
 0xd35   : > { %2723 = vrcp.f32 %v1738_v51 }
 0xd36   : > { %v2722_v3 = vpop.eup %2721 }
 0xd37   : > { %v1753_v4 = vmul.f32 %v2722_v3, %v2714_v34  ;;  %v1845_v62 = vpop.permute.xlu2 %1844 }
 0xd39   : > { %v1757_v25 = vpack.c.bf16 %v1753_v4, %v1753_v4 }
 0xd3b   : > { %v2724_v20 = vpop.eup %2723  ;;  %2568 = vmatmul.msk.bf16.vlgmr.msra.gmra.mxu3 %vm295_vm2, %v1757_v25 }
 0xd3c   : > { %v1752_v54 = vmul.f32 %v2724_v20, %v2716_v40 }
 0xd3e   : > { %v1756_v56 = vpack.c.bf16 %v1752_v54, %v1752_v54 }
 0xd40   : > { %2567 = vmatmul.msk.bf16.vlgmr.msra.gmra.mxu2 %vm295_vm2, %v1756_v56 }
 0xd4b   : > { %2572 = vmatmul.msk.bf16.vlgmr.msrb.gmra.mxu3 %vm295_vm2, %v1868_v58 }
 0xd4c   : > { %v1803_v60 = vpop.permute.xlu1 %1802 }
 0xd4d   : > { %v1808_v61 = vsel %vm444_vm1, %v1803_v60, 0 }
 0xd4e   : > { %1817 = vmatpush.bf16.msra.mxu0 %v1808_v61 }
 0xd50   : > { %2571 = vmatmul.msk.bf16.vlgmr.msrb.gmra.mxu2 %vm295_vm2, %v1845_v62 }
 0xd54   : > { %v1824_v63 = vpop.permute.xlu1 %1823 }
 0xd55   : > { %v1829_v0 = vsel %vm444_vm1, %v1824_v63, 0 }
 0xd56   : > { %1838 = vmatpush.bf16.msrb.mxu1 %v1829_v0 }
 0xd5c   : > { %v1893_v2 = vpop.permute.xlu1 %1892 }
 0xd5d   : > { %v1898_v5 = vsel %vm295_vm2, %v1893_v2, 0 }
 0xd5e   : > { %1907 = vmatpush.bf16.xpose.msrb.mxu0 %v1898_v5 }
 0xd64   : > { %v1916_v6 = vpop.permute.xlu1 %1915 }
 0xd65   : > { %v1921_v7 = vsel %vm295_vm2, %v1916_v6, 0 }
 0xd66   : > { %1930 = vmatpush.bf16.xpose.msra.mxu1 %v1921_v7 }
 0xd7d   : > { %v1744_v8 = vpop.xlane.xlu2 %1743 }
 0xd7e   : > { %2725 = vrcp.f32 %v1744_v8 }
 0xd84   : > { %v2726_v22 = vpop.eup %2725 }
 0xd85   : > { %v1754_v14 = vmul.f32 %v2726_v22, %v2718_v23  ;;  %v1891_v59 = vpop.permute.xlu2 %1890 }
 0xd87   : > { %v1758_v17 = vpack.c.bf16 %v1754_v14, %v1754_v14 }
 0xd89   : > { %2569 = vmatmul.msk.bf16.vlgmr.msra.gmra.mxu0 %vm295_vm2, %v1758_v17 }
 0xd8d   : > { %v1989_v19 = vpop.permute.xlu2 %1988 }
 0xd8e   : > { %v1994_v24 = vsel %vm444_vm1, %v1989_v19, 0 }
 0xd8f   : > { %2003 = vmatpush.bf16.msra.mxu2 %v1994_v24 }
 0xd92   : > { %v1747_v27 = vpop.xlane.xlu0 %1746 }
 0xd93   : > { %2727 = vrcp.f32 %v1747_v27 }
 0xd99   : > { %v2728_v30 = vpop.eup %2727  ;;  %2573 = vmatmul.msk.bf16.vlgmr.msrb.gmra.mxu0 %vm295_vm2, %v1891_v59 }
 0xd9a   : > { %v1755_v37 = vmul.f32 %v2728_v30, %v2720_v13 }
 0xd9c   : > { %v1759_v31 = vpack.c.bf16 %v1755_v37, %v1755_v37 }
 0xd9e   : > { %2570 = vmatmul.msk.bf16.vlgmr.msrb.gmra.mxu1 %vm295_vm2, %v1759_v31 }
 0xda5   : > { %v1914_v32 = vpop.permute.xlu0 %1913 }
 0xdae   : > { %2574 = vmatmul.msk.bf16.vlgmr.msra.gmra.mxu1 %vm295_vm2, %v1914_v32 }
 0xdbe   : > { %v3278_v34 = vpop.f32.mrf.mxu3 }
 0xdc3   : > { %v3280_v18 = vpop.f32.mrf.mxu2 }
 0xdc6   : > { %v1800_v36 = vpop.f32.mrf.mxu3 }
 0xdcb   : > { %v1779_v39 = vpop.f32.mrf.mxu2 }
 0xdce   : > { %v1886_v40 = vpop.f32.mrf.mxu3 }
 0xdcf   : > { %v1937_v41 = vmul.f32 0.17677669, %v1886_v40 }
 0xdd1   : > { %v1943_v57 = vsel %vm295_vm2, %v1937_v41, -inf }
 0xdd2   : > { %1944 = vmax.xlane.f32.xlu0 %v1943_v57 }
 0xdd3   : > { %v1863_v42 = vpop.f32.mrf.mxu2 }
 0xdd4   : > { %v1936_v55 = vmul.f32 0.17677669, %v1863_v42 }
 0xdd6   : > { %v1888_v43 = vpop.f32.mrf.mxu3  ;;  %v1940_v44 = vsel %vm295_vm2, %v1936_v55, -inf }
 0xdd7   : > { %1941 = vmax.xlane.f32.xlu1 %v1940_v44 }
 0xddb   : > { %v1865_v45 = vpop.f32.mrf.mxu2 }
 0xe06   : > { %v3284_v46 = vpop.f32.mrf.mxu0 }
 0xe0e   : > { %v1821_v47 = vpop.f32.mrf.mxu0 }
 0xe16   : > { %v1909_v48 = vpop.f32.mrf.mxu0 }
 0xe17   : > { %v1938_v23 = vmul.f32 0.17677669, %v1909_v48 }
 0xe19   : > { %v1946_v49 = vsel %vm295_vm2, %v1938_v23, -inf }
 0xe1a   : > { %1947 = vmax.xlane.f32.xlu2 %v1946_v49 }
 0xe1b   : > { %v3287_v15 = vpop.f32.mrf.mxu1 }
 0xe1e   : > { %v1911_v10 = vpop.f32.mrf.mxu0 }
 0xe23   : > { %v1842_v50 = vpop.f32.mrf.mxu1 }
 0xe2b   : > { %v1932_v13 = vpop.f32.mrf.mxu1 }
 0xe2c   : > { %v1939_v28 = vmul.f32 0.17677669, %v1932_v13 }
 0xe2e   : > { %v1949_v26 = vsel %vm295_vm2, %v1939_v28, -inf }
 0xe2f   : > { %1950 = vmax.xlane.f32.xlu1 %v1949_v26 }
 0xe32   : > { %2097 = vrot.lane.b32.xlu2 %v3143_v29, %s2778_s15 }
 0xe33   : > { %v1934_v51 = vpop.f32.mrf.mxu1 }
 0xe3a   : > { %2072 = vrot.lane.b32.xlu2 %v3135_v38, %s2777_s14 }
 0xe42   : > { %2095 = vrot.lane.b32.xlu2 %v3143_v29, %s2777_s14 }
 0xe45   : > { %v1945_v3 = vpop.xlane.xlu0 %1944 }
 0xe46   : > { %v1953_v4 = vsub.f32 %v1937_v41, %v1945_v3 }
 0xe48   : > { %v1958_v25 = vmul.f32 1.442695, %v1953_v4  ;;  %2009 = vrot.lane.b32.xlu1 %v3143_v29, %s2776_s13 }
 0xe4a   : > { %2729 = vpow2.f32 %v1958_v25  ;;  %2030 = vrot.lane.b32.xlu2 %v3151_v9, %s2776_s13  ;;  %v1942_v56 = vpop.xlane.xlu1 %1941 }
 0xe4b   : > { %v1952_v58 = vsub.f32 %v1936_v55, %v1942_v56 }
 0xe4d   : > { %v1956_v60 = vmul.f32 1.442695, %v1952_v58 }
 0xe4f   : > { %2731 = vpow2.f32 %v1956_v60 }
 0xe50   : > { %v2730_v20 = vpop.eup %2729 }
 0xe51   : > { %v1967_v54 = vsel %vm295_vm2, %v2730_v20, 0.0 }
 0xe52   : > { %2051 = vrot.lane.b32.xlu2 %v3159_v35, %s2776_s13  ;;  %1968 = vadd.xlane.f32.xlu0 %v1967_v54 }
 0xe55   : > { %v2732_v61 = vpop.eup %2731 }
 0xe56   : > { %v1964_v62 = vsel %vm295_vm2, %v2732_v61, 0.0 }
 0xe5a   : > { %2120 = vrot.lane.b32.xlu2 %v3151_v9, %s2778_s15 }
 0xe62   : > { %2141 = vrot.lane.b32.xlu2 %v3159_v35, %s2777_s14 }
 0xe66   : > { %2074 = vrot.lane.b32.xlu0 %v3135_v38, %s2778_s15 }
 0xe72   : > { %1965 = vadd.xlane.f32.xlu1 %v1964_v62 }
 0xe8d   : > { %v1948_v63 = vpop.xlane.xlu2 %1947 }
 0xe8e   : > { %v1954_v0 = vsub.f32 %v1938_v23, %v1948_v63 }
 0xe90   : > { %v1960_v2 = vmul.f32 1.442695, %v1954_v0 }
 0xe92   : > { %2733 = vpow2.f32 %v1960_v2 }
 0xe95   : > { %v2098_v5 = vpop.permute.xlu2 %2097 }
 0xe96   : > { %v2103_v39 = vsel %vm295_vm2, %v2098_v5, 0 }
 0xe98   : > { %v2734_v6 = vpop.eup %2733 }
 0xe99   : > { %v1970_v7 = vsel %vm295_vm2, %v2734_v6, 0.0 }
 0xe9a   : > { %1971 = vadd.xlane.f32.xlu1 %v1970_v7 }
 0xe9d   : > { %v2073_v8 = vpop.permute.xlu2 %2072 }
 0xea2   : > { %v1951_v22 = vpop.xlane.xlu1 %1950 }
 0xea3   : > { %v1955_v14 = vsub.f32 %v1939_v28, %v1951_v22 }
 0xea5   : > { %v1962_v59 = vmul.f32 1.442695, %v1955_v14  ;;  %v2096_v17 = vpop.permute.xlu2 %2095 }
 0xea7   : > { %2735 = vpow2.f32 %v1962_v59 }
 0xead   : > { %v2736_v19 = vpop.eup %2735  ;;  %v2031_v24 = vpop.permute.xlu2 %2030 }
 0xeae   : > { %v2036_v27 = vsel %vm444_vm1, %v2031_v24, 0  ;;  %v1973_v30 = vsel %vm295_vm2, %v2736_v19, 0.0 }
 0xeaf   : > { %2045 = vmatpush.bf16.msra.mxu0 %v2036_v27  ;;  %1974 = vadd.xlane.f32.xlu0 %v1973_v30 }
 0xeb3   : > { %2143 = vrot.lane.b32.xlu1 %v3159_v35, %s2778_s15 }
 0xeb5   : > { %v2052_v37 = vpop.permute.xlu2 %2051 }
 0xeb6   : > { %v2057_v31 = vsel %vm444_vm1, %v2052_v37, 0 }
 0xeb7   : > { %2066 = vmatpush.bf16.msrb.mxu1 %v2057_v31 }
 0xeba   : > { %v2010_v32 = vpop.permute.xlu1 %2009 }
 0xebb   : > { %v2015_v36 = vsel %vm444_vm1, %v2010_v32, 0 }
 0xebc   : > { %2024 = vmatpush.bf16.msra.mxu3 %v2015_v36 }
 0xebd   : > { %v2121_v40 = vpop.permute.xlu2 %2120 }
 0xebe   : > { %v2126_v41 = vsel %vm295_vm2, %v2121_v40, 0 }
 0xebf   : > { %2135 = vmatpush.bf16.xpose.msrb.mxu0 %v2126_v41 }
 0xec0   : > { %2112 = vmatpush.bf16.xpose.msrb.mxu3 %v2103_v39 }
 0xec3   : > { %2118 = vrot.lane.b32.xlu0 %v3151_v9, %s2777_s14  ;;  %s226_s14 = scalar_lea.vmem %s3425_s5, %s2480_s25 }
 0xec5   : > { %v1969_v57 = vpop.xlane.xlu0 %1968  ;;  %v2142_v56 = vpop.permute.xlu2 %2141 }
 0xec6   : > { %2737 = vrcp.f32 %v1969_v57 }
 0xecc   : > { %v2738_v42 = vpop.eup %2737 }
 0xecd   : > { %v1981_v55 = vmul.f32 %v2738_v42, %v2730_v20 }
 0xecf   : > { %v1985_v43 = vpack.c.bf16 %v1981_v55, %v1981_v55 }
 0xed1   : > { %2576 = vmatmul.msk.bf16.vlgmr.msra.gmra.mxu3 %vm295_vm2, %v1985_v43 }
 0xed8   : > { %v2075_v44 = vpop.permute.xlu0 %2074 }
 0xed9   : > { %v2080_v45 = vsel %vm295_vm2, %v2075_v44, 0 }
 0xeda   : > { %2089 = vmatpush.bf16.xpose.msrb.mxu2 %v2080_v45 }
 0xee1   : > { %2580 = vmatmul.msk.bf16.vlgmr.msrb.gmra.mxu3 %vm295_vm2, %v2096_v17 }
 0xee5   : > { %v1966_v47 = vpop.xlane.xlu1 %1965 }
 0xee6   : > { %2739 = vrcp.f32 %v1966_v47 }
 0xeec   : > { %v2740_v48 = vpop.eup %2739 }
 0xeed   : > { %v1980_v23 = vmul.f32 %v2740_v48, %v2732_v61 }
 0xeef   : > { %v1984_v49 = vpack.c.bf16 %v1980_v23, %v1980_v23 }
 0xef1   : > { %2575 = vmatmul.msk.bf16.vlgmr.msra.gmra.mxu2 %vm295_vm2, %v1984_v49 }
 0xf01   : > { %2579 = vmatmul.msk.bf16.vlgmr.msrb.gmra.mxu2 %vm295_vm2, %v2073_v8 }
 0xf0d   : > { %v1972_v10 = vpop.xlane.xlu1 %1971 }
 0xf0e   : > { %2741 = vrcp.f32 %v1972_v10 }
 0xf14   : > { %v2742_v50 = vpop.eup %2741 }
 0xf15   : > { %v1982_v13 = vmul.f32 %v2742_v50, %v2734_v6 }
 0xf17   : > { %v1986_v28 = vpack.c.bf16 %v1982_v13, %v1982_v13 }
 0xf19   : > { %2577 = vmatmul.msk.bf16.vlgmr.msra.gmra.mxu0 %vm295_vm2, %v1986_v28 }
 0xf22   : > { %v1975_v26 = vpop.xlane.xlu0 %1974 }
 0xf23   : > { %2743 = vrcp.f32 %v1975_v26 }
 0xf25   : > { %v2144_v51 = vpop.permute.xlu1 %2143 }
 0xf26   : > { %v2149_v3 = vsel %vm295_vm2, %v2144_v51, 0 }
 0xf27   : > { %2158 = vmatpush.bf16.xpose.msra.mxu1 %v2149_v3 }
 0xf29   : > { %v2744_v4 = vpop.eup %2743 }
 0xf2a   : > { %v1983_v25 = vmul.f32 %v2744_v4, %v2736_v19 }
 0xf2c   : > { %v1987_v20 = vpack.c.bf16 %v1983_v25, %v1983_v25 }
 0xf2e   : > { %2578 = vmatmul.msk.bf16.vlgmr.msrb.gmra.mxu1 %vm295_vm2, %v1987_v20 }
 0xf35   : > { %v2119_v54 = vpop.permute.xlu0 %2118 }
 0xf36   : > { %2581 = vmatmul.msk.bf16.vlgmr.msrb.gmra.mxu0 %vm295_vm2, %v2119_v54 }
 0xf3e   : > { %2582 = vmatmul.msk.bf16.vlgmr.msra.gmra.mxu1 %vm295_vm2, %v2142_v56 }
 0xf54   : > { %v3331_v58 = vpop.f32.mrf.mxu3 }
 0xf5c   : > { %v2028_v60 = vpop.f32.mrf.mxu3 }
 0xf64   : > { %v2114_v61 = vpop.f32.mrf.mxu3 }
 0xf65   : > { %v2165_v62 = vmul.f32 0.17677669, %v2114_v61 }
 0xf67   : > { %v2171_v63 = vsel %vm295_vm2, %v2165_v62, -inf }
 0xf68   : > { %2172 = vmax.xlane.f32.xlu0 %v2171_v63 }
 0xf6c   : > { %v2116_v0 = vpop.f32.mrf.mxu3 }
 0xf74   : > { %v2005_v2 = vpop.f32.mrf.mxu2 }
 0xf7c   : > { %v2007_v5 = vpop.f32.mrf.mxu2 }
 0xf84   : > { %v2091_v6 = vpop.f32.mrf.mxu2 }
 0xf85   : > { %v2164_v7 = vmul.f32 0.17677669, %v2091_v6 }
 0xf87   : > { %v2168_v8 = vsel %vm295_vm2, %v2164_v7, -inf }
 0xf88   : > { %2169 = vmax.xlane.f32.xlu2 %v2168_v8 }
 0xf8c   : > { %v2093_v22 = vpop.f32.mrf.mxu2 }
 0xf96   : > { %v3335_v14 = vpop.f32.mrf.mxu0 }
 0xf9e   : > { %v2049_v59 = vpop.f32.mrf.mxu0 }
 0xfab   : > { %v2068_v17 = vpop.f32.mrf.mxu1 }
 0xfb3   : > { %v2070_v19 = vpop.f32.mrf.mxu1  ;;  %v2137_v24 = vpop.f32.mrf.mxu0 }
 0xfb4   : > { %v2166_v27 = vmul.f32 0.17677669, %v2137_v24 }
 0xfb6   : > { %v2174_v30 = vsel %vm295_vm2, %v2166_v27, -inf }
 0xfb7   : > { %2175 = vmax.xlane.f32.xlu1 %v2174_v30 }
 0xfbb   : > { %v2139_v37 = vpop.f32.mrf.mxu0  ;;  %v2160_v31 = vpop.f32.mrf.mxu1 }
 0xfbc   : > { %v2167_v32 = vmul.f32 0.17677669, %v2160_v31 }
 0xfbe   : > { %v2177_v36 = vsel %vm295_vm2, %v2167_v32, -inf }
 0xfbf   : > { %2178 = vmax.xlane.f32.xlu2 %v2177_v36  ;;  %v2606_v36 = vld [vmem:[%s3423_s3 + $0x18] sm:$0xff] }
 0xfc3   : > { %v2162_v39 = vpop.f32.mrf.mxu1 }
 0xfd0   : > { %2216 = vrot.lane.b32.xlu1 %v3135_v38, %s2779_s16 }
 0xfd8   : > { %2279 = vrot.lane.b32.xlu1 %v3159_v35, %s2779_s16 }
 0xfe0   : > { %2306 = vrot.lane.b32.xlu1 %v3278_v34, %s2780_s17  ;;  %v2173_v34 = vpop.xlane.xlu0 %2172 }
 0xfe1   : > { %v2181_v48 = vsub.f32 %v2165_v62, %v2173_v34 }
 0xffb   : > { %v2170_v40 = vpop.xlane.xlu2 %2169 }
 0xffc   : > { %v2180_v41 = vsub.f32 %v2164_v7, %v2170_v40 }
 0xffe   : > { %v2184_v57 = vmul.f32 1.442695, %v2180_v41 }
0x1000   : > { %2745 = vpow2.f32 %v2184_v57 }
0x1006   : > { %v2746_v42 = vpop.eup %2745 }
0x1007   : > { %v2192_v55 = vsel %vm295_vm2, %v2746_v42, 0.0 }
0x1008   : > { %2193 = vadd.xlane.f32.xlu2 %v2192_v55 }
0x1020   : > { %2237 = vrot.lane.b32.xlu2 %v3143_v29, %s2779_s16  ;;  %v2186_v29 = vmul.f32 1.442695, %v2181_v48 }
0x1028   : > { %2304 = vrot.lane.b32.xlu2 %v3280_v18, %s2780_s17 }
0x102a   : > { %v2176_v38 = vpop.xlane.xlu1 %2175 }
0x102b   : > { %v2182_v43 = vsub.f32 %v2166_v27, %v2176_v38 }
0x102d   : > { %v2188_v35 = vmul.f32 1.442695, %v2182_v43 }
0x102f   : > { %2747 = vpow2.f32 %v2188_v35 }
0x1030   : > { %2320 = vrot.lane.b32.xlu2 %v2005_v2, %s2781_s19 }
0x1032   : > { %v2179_v44 = vpop.xlane.xlu2 %2178 }
0x1033   : > { %v2183_v45 = vsub.f32 %v2167_v32, %v2179_v44 }
0x1035   : > { %v2748_v47 = vpop.eup %2747  ;;  %v2190_v23 = vmul.f32 1.442695, %v2183_v45 }
0x1036   : > { %v2198_v49 = vsel %vm295_vm2, %v2748_v47, 0.0 }
0x1037   : > { %2749 = vpow2.f32 %v2190_v23  ;;  %2199 = vadd.xlane.f32.xlu0 %v2198_v49 }
0x1038   : > { %2751 = vpow2.f32 %v2186_v29 }
0x103d   : > { %v2750_v10 = vpop.eup %2749 }
0x103e   : > { %v2201_v18 = vsel %vm295_vm2, %v2750_v10, 0.0  ;;  %v2752_v13 = vpop.eup %2751 }
0x103f   : > { %2202 = vadd.xlane.f32.xlu0 %v2201_v18  ;;  %v2195_v26 = vsel %vm295_vm2, %v2752_v13, 0.0 }
0x1042   : > { %v2217_v50 = vpop.permute.xlu1 %2216 }
0x1043   : > { %v2222_v28 = vsel %vm444_vm1, %v2217_v50, 0 }
0x1044   : > { %2231 = vmatpush.bf16.msra.mxu2 %v2222_v28 }
0x1047   : > { %2196 = vadd.xlane.f32.xlu0 %v2195_v26 }
0x1048   : > { %2393 = vmatpush.bf16.msrb.mxu2 %v2606_v36 }
0x104a   : > { %v2280_v51 = vpop.permute.xlu1 %2279 }
0x104b   : > { %v2285_v3 = vsel %vm444_vm1, %v2280_v51, 0 }
0x104c   : > { %2294 = vmatpush.bf16.msrb.mxu1 %v2285_v3  ;;  %v2632_v3 = vld [vmem:[%s3424_s4 + $0x1] ss:$0 sm:$0xff] }
0x1052   : > { %v2307_v40 = vpop.permute.xlu1 %2306 }
0x1053   : > { %v2349_v38 = vsel %vm295_vm2, %v3223_v53, %v2307_v40 }
0x105b   : > { %2258 = vrot.lane.b32.xlu0 %v3151_v9, %s2779_s16 }
0x1063   : > { %2322 = vrot.lane.b32.xlu0 %v3331_v58, %s2781_s19 }
0x106b   : > { %2308 = vrot.lane.b32.xlu0 %v3284_v46, %s2780_s17 }
0x1073   : > { %2326 = vrot.lane.b32.xlu0 %v2068_v17, %s2781_s19 }
0x107b   : > { %v2194_v4 = vpop.xlane.xlu2 %2193 }
0x107c   : > { %2753 = vrcp.f32 %v2194_v4 }
0x1082   : > { %v2754_v25 = vpop.eup %2753 }
0x1083   : > { %v2208_v20 = vmul.f32 %v2754_v25, %v2746_v42  ;;  %v2238_v54 = vpop.permute.xlu2 %2237 }
0x1084   : > { %v2243_v56 = vsel %vm444_vm1, %v2238_v54, 0 }
0x1085   : > { %v2212_v60 = vpack.c.bf16 %v2208_v20, %v2208_v20  ;;  %2252 = vmatpush.bf16.msra.mxu3 %v2243_v56 }
0x1087   : > { %2583 = vmatmul.msk.bf16.vlgmr.msra.gmra.mxu2 %vm295_vm2, %v2212_v60 }
0x108b   : > { %v2305_v39 = vpop.permute.xlu2 %2304 }
0x1093   : > { %v2321_v41 = vpop.permute.xlu2 %2320 }
0x10aa   : > { %v2200_v9 = vpop.xlane.xlu0 %2199 }
0x10b2   : > { %v2203_v61 = vpop.xlane.xlu0 %2202 }
0x10b3   : > { %2755 = vrcp.f32 %v2203_v61 }
0x10b9   : > { %v2756_v58 = vpop.eup %2755 }
0x10ba   : > { %v2211_v62 = vmul.f32 %v2756_v58, %v2750_v10  ;;  %v2197_v63 = vpop.xlane.xlu0 %2196 }
0x10bb   : > { %2757 = vrcp.f32 %v2197_v63 }
0x10bc   : > { %v2215_v46 = vpack.c.bf16 %v2211_v62, %v2211_v62  ;;  %2759 = vrcp.f32 %v2200_v9 }
0x10be   : > { %2586 = vmatmul.msk.bf16.vlgmr.msrb.gmra.mxu1 %vm295_vm2, %v2215_v46 }
0x10c1   : > { %v2758_v0 = vpop.eup %2757 }
0x10c2   : > { %v2209_v2 = vmul.f32 %v2758_v0, %v2752_v13  ;;  %v2760_v6 = vpop.eup %2759 }
0x10c3   : > { %v2210_v7 = vmul.f32 %v2760_v6, %v2748_v47 }
0x10c4   : > { %v2213_v5 = vpack.c.bf16 %v2209_v2, %v2209_v2 }
0x10c5   : > { %v2214_v59 = vpack.c.bf16 %v2210_v7, %v2210_v7 }
0x10c6   : > { %2584 = vmatmul.msk.bf16.vlgmr.msra.gmra.mxu3 %vm295_vm2, %v2213_v5 }
0x10cd   : > { %v2259_v8 = vpop.permute.xlu0 %2258 }
0x10ce   : > { %v2264_v22 = vsel %vm444_vm1, %v2259_v8, 0 }
0x10cf   : > { %2273 = vmatpush.bf16.msra.mxu0 %v2264_v22 }
0x10d2   : > { %2585 = vmatmul.msk.bf16.vlgmr.msra.gmra.mxu0 %vm295_vm2, %v2214_v59 }
0x10d5   : > { %v2323_v42 = vpop.permute.xlu0 %2322 }
0x10d6   : > { %v2353_v35 = vsel %vm1260_vm4, %v2349_v38, %v2323_v42 }
0x10dd   : > { %v2309_v23 = vpop.permute.xlu0 %2308 }
0x10de   : > { %v2350_v50 = vsel %vm295_vm2, %v3235_v1, %v2309_v23 }
0x10e5   : > { %v2327_v10 = vpop.permute.xlu0 %2326 }
0x110a   : > { %v2233_v17 = vpop.f32.mrf.mxu2 }
0x110b   : > { %2336 = vrot.lane.b32.xlu1 %v2233_v17, %s2782_s20 }
0x1112   : > { %v2235_v19 = vpop.f32.mrf.mxu2 }
0x1113   : > { %2310 = vrot.lane.b32.xlu1 %v3287_v15, %s2780_s17  ;;  %v2605_v15 = vld [vmem:[%s3423_s3 + $0x10] sm:$0xff] }
0x1114   : > { %2394 = vmatpush.bf16.msrb.mxu2 %v2605_v15 }
0x113b   : > { %v2296_v24 = vpop.f32.mrf.mxu1 }
0x1143   : > { %v2298_v27 = vpop.f32.mrf.mxu1 }
0x1149   : > { %v2254_v30 = vpop.f32.mrf.mxu3 }
0x114a   : > { %2338 = vrot.lane.b32.xlu2 %v2254_v30, %s2782_s20 }
0x114f   : > { %v2275_v37 = vpop.f32.mrf.mxu0 }
0x1150   : > { %2340 = vrot.lane.b32.xlu1 %v2275_v37, %s2782_s20 }
0x1151   : > { %v2256_v31 = vpop.f32.mrf.mxu3 }
0x1152   : > { %2324 = vrot.lane.b32.xlu2 %v3335_v14, %s2781_s19  ;;  %v2348_v14 = vsel %vm295_vm2, %v3221_v52, %v2305_v39 }
0x1153   : > { %v2352_v55 = vsel %vm1260_vm4, %v2348_v14, %v2321_v41 }
0x1157   : > { %v2277_v32 = vpop.f32.mrf.mxu0 }
0x115a   : > { %2342 = vrot.lane.b32.xlu2 %v2296_v24, %s2782_s20 }
0x117d   : > { %v2337_v57 = vpop.permute.xlu1 %2336 }
0x117e   : > { %v2356_v43 = vsel %vm1265_vm3, %v2352_v55, %v2337_v57 }
0x117f   : > { %v2360_v45 = vadd.f32 %v2356_v43, %v3131_v16 }
0x1185   : > { %v2311_v49 = vpop.permute.xlu1 %2310 }
0x1186   : > { %v2351_v53 = vsel %vm295_vm2, %v3238_v11, %v2311_v49 }
0x1187   : > { %v2355_v18 = vsel %vm1260_vm4, %v2351_v53, %v2327_v10 }
0x11a4   : > { %v2339_v34 = vpop.permute.xlu2 %2338 }
0x11a5   : > { %v2357_v44 = vsel %vm1265_vm3, %v2353_v35, %v2339_v34 }
0x11a6   : > { %v2361_v47 = vadd.f32 %v2357_v44, %v3137_v21 }
0x11a8   : > { %v2364_v48 = vpack.c.bf16 %v2361_v47, %v2360_v45 }
0x11aa   : > { %2595 = vmatmul.msk.bf16.vlgmr.msrb.gmra.mxu2 %vm260_vm0, %v2364_v48 }
0x11ac   : > { %v2325_v52 = vpop.permute.xlu2 %2324 }
0x11ad   : > { %v2354_v21 = vsel %vm1260_vm4, %v2350_v50, %v2325_v52 }
0x11b4   : > { %v2343_v29 = vpop.permute.xlu2 %2342 }
0x11b5   : > { %v2359_v16 = vsel %vm1265_vm3, %v2355_v18, %v2343_v29 }
0x11b6   : > { %v2363_v26 = vadd.f32 %v2359_v16, %v3153_v33 }
0x11c2   : > { %v2341_v13 = vpop.permute.xlu1 %2340 }
0x11c3   : > { %v2358_v28 = vsel %vm1265_vm3, %v2354_v21, %v2341_v13 }
0x11c4   : > { %v2362_v51 = vadd.f32 %v2358_v28, %v3147_v12 }
0x11c6   : > { %v2365_v11 = vpack.c.bf16 %v2363_v26, %v2362_v51 }
0x11c8   : > { %2596 = vmatmul.msk.bf16.gmra.mxu2 %vm260_vm0, %v2365_v11 }
0x122d   : > { %v2396_v4 = vpop.f32.mrf.mxu2 }
0x122e   : > { %v2397_v1 = vadd.f32 %v2632_v3, %v2396_v4 }
0x1230   : > { %v2406_v25 = vmax.f32 %v2397_v1, 0.0 }
0x1232   : > { %v2410_v20 = vadd.f32 %v2406_v25, %v2360_v45 }
0x1234   : > { %2414 = vst.msk [vmem:[%s226_s14] sm:$0xff] %vm260_vm0, %v2410_v20 }
0x1235   : > { %v2398_v33 = vpop.f32.mrf.mxu2 }
0x1236   : > { %v2399_v12 = vadd.f32 %v2632_v3, %v2398_v33 }
0x1238   : > { %v2407_v54 = vmax.f32 %v2399_v12, 0.0 }
0x123a   : > { %v2411_v56 = vadd.f32 %v2407_v54, %v2361_v47 }
0x123c   : > { %2415 = vst.msk [vmem:[%s226_s14 + $0x8] sm:$0xff] %vm260_vm0, %v2411_v56 }
0x124b   : > { %v2401_v60 = vpop.f32.mrf.mxu2 }
0x124c   : > { %v2402_v9 = vadd.f32 %v2632_v3, %v2401_v60 }
0x124e   : > { %v2408_v61 = vmax.f32 %v2402_v9, 0.0 }
0x1250   : > { %v2412_v58 = vadd.f32 %v2408_v61, %v2362_v51 }
0x1252   : > { %2416 = vst.msk [vmem:[%s226_s14 + $0x10] sm:$0xff] %vm260_vm0, %v2412_v58 }
0x1253   : > { %v2403_v62 = vpop.f32.mrf.mxu2 }
0x1254   : > { %v2404_v63 = vadd.f32 %v2632_v3, %v2403_v62 }
0x1256   : > { %v2409_v46 = vmax.f32 %v2404_v63, 0.0 }
0x1258   : > { %v2413_v0 = vadd.f32 %v2409_v46, %v2363_v26 }
0x125a   : > { %2417 = vst.msk [vmem:[%s226_s14 + $0x18] sm:$0xff] %vm260_vm0, %v2413_v0 }
0x125b PF: > { %s15_s18 = sadd.s32 1, %s2767_s18  }
0x125c   : > { %p12_p4 = scmp.ge.s32.totalorder %s15_s18, 6  }
0x125e   :  { %14 = sbr.rel (!%p12_p4) target bundleno = 1 (0x1), region = 74 }

</bundles_post_ra>
